<compile_context>
chip_gen: v7x
topology: tpu7x:2x2x1
jax: 0.10.0
libtpu: 0.0.40
codegen_flags: <defaults>
</compile_context>

<pallas_src>
import functools

import numpy as np
import jax
import jax.numpy as jnp
from jax.experimental import pallas as pl
from jax.experimental.pallas import tpu as pltpu

EPS = 1e-30
BN_EPS = 1e-5


# ------------------------- generic single-block launcher ---------------------


def _run_fused(kernel, inputs, out_shape, scratch_shapes=()):
    """Run `kernel` once with every operand as a full-array VMEM block."""
    in_specs = [pl.BlockSpec(a.shape, lambda i, nd=a.ndim: (0,) * nd)
                for a in inputs]
    out_specs = pl.BlockSpec(out_shape.shape,
                             lambda i, nd=len(out_shape.shape): (0,) * nd)
    return pl.pallas_call(
        kernel,
        grid=(1,),
        in_specs=in_specs,
        out_specs=out_specs,
        out_shape=out_shape,
        scratch_shapes=list(scratch_shapes),
        compiler_params=pltpu.CompilerParams(
            dimension_semantics=("arbitrary",)),
    )(*inputs)


# ------------------------------- Pallas kernels ------------------------------


def _temporal_fused_kernel(x_ref, k1_ref, b1_ref, p1_ref,
                           k2_ref, b2_ref, p2_ref,
                           k3_ref, b3_ref, p3_ref,
                           p2c_ref, w11_ref, b11_ref,
                           o_ref, ybuf, *, C, Tcat, Tf):
    """Fused temporal chain:
       Tception x3 (conv+bias -> ^2 -> avgpool -> log)  [per-branch chunked]
       -> BN_t (training batch stats, gamma=1, beta=0)
       -> 1x1 conv (per-channel broadcast-FMA, BN folded in) -> LeakyReLU
       -> AvgPool(1,2) -> BN_t_ .
    """
    x = x_ref[...]                                           # (M, T) f32

    # per-branch chunked: z_b = x @ Toeplitz_b + bias, square, pool -> accumulate
    y = None
    for k_ref, b_ref, p_ref in ((k1_ref, b1_ref, p1_ref),
                                (k2_ref, b2_ref, p2_ref),
                                (k3_ref, b3_ref, p3_ref)):
        z = jnp.dot(x, k_ref[...], preferred_element_type=jnp.float32)
        z = z + b_ref[...]
        z = z * z
        part = jnp.dot(z, p_ref[...], preferred_element_type=jnp.float32)
        y = part if y is None else y + part
    # PowerLayer: log(avgpool(conv^2));  branches write disjoint columns.
    ybuf[...] = jnp.log(y)                                   # (M, C*Tcat)

    M = ybuf.shape[0]
    inv_n1 = 1.0 / float(M * Tcat)
    means, scales = [], []
    for c in range(C):
        yc = ybuf[:, c * Tcat:(c + 1) * Tcat]
        s1 = jnp.sum(jnp.sum(yc, axis=1, keepdims=True), axis=0, keepdims=True)
        s2 = jnp.sum(jnp.sum(yc * yc, axis=1, keepdims=True), axis=0,
                     keepdims=True)
        m = s1 * inv_n1
        v = s2 * inv_n1 - m * m                              # biased var (torch BN)
        means.append(m)
        scales.append(jax.lax.rsqrt(v + BN_EPS))

    # 1x1 channel mix with BN_t folded in:  out_d = sum_c (w[d,c]*s_c) * y_c
    #                                              + (b[d] - sum_c w[d,c]*s_c*m_c)
    p2c = p2c_ref[...]                                       # (Tcat, Tf) const pool
    inv_n2 = 1.0 / float(M * Tf)
    for d in range(C):
        acc = None
        off = b11_ref[:, d:d + 1]                            # (1,1) conv bias
        for c in range(C):
            coef = w11_ref[d:d + 1, c:c + 1] * scales[c]     # (1,1)
            term = coef * ybuf[:, c * Tcat:(c + 1) * Tcat]
            acc = term if acc is None else acc + term
            off = off - coef * means[c]
        acc = acc + off
        acc = jnp.where(acc >= 0.0, acc, 0.01 * acc)         # LeakyReLU(0.01)
        pooled = jnp.dot(acc, p2c, preferred_element_type=jnp.float32)  # (M, Tf)
        # BN_t_ per output channel (training batch stats)
        s1 = jnp.sum(jnp.sum(pooled, axis=1, keepdims=True), axis=0,
                     keepdims=True)
        s2 = jnp.sum(jnp.sum(pooled * pooled, axis=1, keepdims=True), axis=0,
                     keepdims=True)
        pm = s1 * inv_n2
        pv = s2 * inv_n2 - pm * pm
        o_ref[:, d * Tf:(d + 1) * Tf] = (pooled - pm) * jax.lax.rsqrt(pv + BN_EPS)


def _graph2_kernel(adj_ref, x_ref, w1_ref, b1_ref, w2_ref, b2_ref, o_ref, *, n1):
    """Two chained GraphConvolution layers, single concatenated output slab:
       H1 = (A @ X) @ W1 - b1 ;  H2 = (A @ H1) @ W2 - b2."""
    adj = adj_ref[...]
    ax = jnp.dot(adj, x_ref[...], preferred_element_type=jnp.float32)
    h1 = jnp.dot(ax, w1_ref[...], preferred_element_type=jnp.float32) - b1_ref[...]
    ah1 = jnp.dot(adj, h1, preferred_element_type=jnp.float32)
    h2 = jnp.dot(ah1, w2_ref[...], preferred_element_type=jnp.float32) - b2_ref[...]
    o_ref[:, :n1] = h1
    o_ref[:, n1:] = h2


# --------------------------- fused building blocks ---------------------------


def temporal_features(x, params, pool, pool_step):
    """Entire Tception->BN_t->1x1->BN_t_ chain in ONE pallas_call.

    Structure matrices are NumPy constants (no runtime scatters); the Toeplitz
    conv matrices are built from the conv weights via a tiny constant-placement
    matmul (fused by XLA)."""
    B, Cin, H, T = x.shape
    assert Cin == 1  # reference configuration uses a single input channel
    C = params["t1_w"].shape[0]
    Ws = [params["t1_w"].reshape(C, -1), params["t2_w"].reshape(C, -1),
          params["t3_w"].reshape(C, -1)]
    bs = [params["t1_b"], params["t2_b"], params["t3_b"]]
    ks = [int(w.shape[-1]) for w in Ws]
    Tcs = [T - k + 1 for k in ks]
    Touts = [(Tc - pool) // pool_step + 1 for Tc in Tcs]
    Tcat = sum(Touts)
    Tf = Tcat // 2

    inputs = [x.reshape(B * H, T).astype(jnp.float32)]
    t_off = 0
    for W2, b, k, Tc, Tout in zip(Ws, bs, ks, Tcs, Touts):
        # constant placement tensor: place[j, tc + j, tc] = 1
        place = np.zeros((k, T, Tc), np.float32)
        for j in range(k):
            place[j, j:j + Tc, :] += np.eye(Tc, dtype=np.float32)
        kb = jnp.tensordot(W2.astype(jnp.float32), jnp.asarray(place),
                           axes=([1], [0]))                   # (C, T, Tc)
        kb = jnp.transpose(kb, (1, 0, 2)).reshape(T, C * Tc)  # Toeplitz conv matrix
        bvec = jnp.repeat(b.astype(jnp.float32), Tc)[None, :]
        # constant block avg-pool matrix (conv cols -> (c, t_cat) cols)
        pall = np.zeros((C * Tc, C * Tcat), np.float32)
        for c in range(C):
            for to in range(Tout):
                r0 = c * Tc + to * pool_step
                pall[r0:r0 + pool, c * Tcat + t_off + to] = 1.0 / pool
        inputs += [kb, bvec, jnp.asarray(pall)]
        t_off += Tout

    # constant AvgPool(1,2) matrix (per channel)
    p2c = np.zeros((Tcat, Tf), np.float32)
    for tf in range(Tf):
        p2c[2 * tf, tf] = 0.5
        p2c[2 * tf + 1, tf] = 0.5
    # TODO(synk): nn.Dropout in training mode is stochastic; applied as identity.
    inputs += [jnp.asarray(p2c),
               params["oxo_w"].reshape(C, C).astype(jnp.float32),
               params["oxo_b"].reshape(1, C).astype(jnp.float32)]

    kernel = functools.partial(_temporal_fused_kernel, C=C, Tcat=Tcat, Tf=Tf)
    out = _run_fused(
        kernel, inputs,
        jax.ShapeDtypeStruct((B * H, C * Tf), jnp.float32),
        scratch_shapes=[pltpu.VMEM((B * H, C * Tcat), jnp.float32)])
    return out, Tf      # rows (b, h), columns (c, t) == permute(0,2,1,3)+reshape


def graph_conv2(adj_bd, x_flat, w1, b1, w2, b2):
    """Two chained graph convolutions on a block-diagonal batched adjacency."""
    M = x_flat.shape[0]
    n1, n2 = w1.shape[1], w2.shape[1]
    out = _run_fused(
        functools.partial(_graph2_kernel, n1=n1),
        [adj_bd.astype(jnp.float32), x_flat.astype(jnp.float32),
         w1.astype(jnp.float32), b1.reshape(1, -1).astype(jnp.float32),
         w2.astype(jnp.float32), b2.reshape(1, -1).astype(jnp.float32)],
        jax.ShapeDtypeStruct((M, n1 + n2), jnp.float32))
    return out[:, :n1], out[:, n1:]


# ------------------------------ plain-JAX glue --------------------------------


def bn1d(x):
    """Training-mode BatchNorm1d (gamma=1, beta=0, batch statistics)."""
    if x.ndim == 3:
        mean = x.mean(axis=(0, 2), keepdims=True)
        var = x.var(axis=(0, 2), keepdims=True)
    else:
        mean = x.mean(axis=0, keepdims=True)
        var = x.var(axis=0, keepdims=True)
    return (x - mean) / jnp.sqrt(var + BN_EPS)


def linear(x, W, b):
    return jnp.matmul(x, W.T) + b


def get_adj(x, global_adj):
    s = jnp.einsum('bnf,bmf->bnm', x, x)           # self-similarity
    g = global_adj + global_adj.T
    adj = jax.nn.relu(s * g[None])
    n = adj.shape[-1]
    adj = adj + jnp.eye(n, dtype=adj.dtype)[None]
    rowsum = adj.sum(-1)
    rowsum = rowsum + jnp.where(rowsum == 0, 1.0, 0.0)
    d = rowsum ** -0.5
    return d[:, :, None] * adj * d[:, None, :]


def dense_diff_pool(x, adj, s):
    st = jnp.swapaxes(s, 1, 2)
    out = jnp.matmul(st, x)
    out_adj = jnp.matmul(jnp.matmul(st, adj), s)
    link = adj - jnp.matmul(s, st) + EPS
    link_loss = jnp.sqrt(jnp.sum(link * link)) / adj.size
    ent_loss = jnp.mean(jnp.sum(-s * jnp.log(s + EPS), axis=-1))
    return out, out_adj, link_loss, ent_loss


def attention_readout(out_all):
    out_mean = out_all.mean(axis=1)
    tg = jnp.tanh(out_mean)
    scores = jax.nn.softmax(jnp.einsum('bnf,bf->bn', out_all, tg), axis=-1)
    rep = jnp.einsum('bnf,bn->bf', out_all, scores)
    return jnp.concatenate([rep, out_all.sum(axis=1)], axis=1)


def block_diag_batch(a):
    """(B, n, n) -> (B*n, B*n) block-diagonal matrix via broadcast-mask (no scatter)."""
    B, n, _ = a.shape
    eye = jnp.eye(B, dtype=a.dtype)
    out = a[:, :, None, :] * eye[:, None, :, None]        # (B, n, B, n)
    return out.reshape(B * n, B * n)


def two_block_diag(a, b):
    """block_diag(a, b) built with pads/concats (no scatter)."""
    top = jnp.concatenate([a, jnp.zeros((a.shape[0], b.shape[1]), a.dtype)], axis=1)
    bot = jnp.concatenate([jnp.zeros((b.shape[0], a.shape[1]), a.dtype), b], axis=1)
    return jnp.concatenate([top, bot], axis=0)


# ------------------------------- full forward ---------------------------------


def mcgp_forward(params, x, *, pool, pool_step):
    B, _, H, _ = x.shape
    num_T = params["t1_w"].shape[0]

    # fully fused temporal chain (one pallas_call)
    z, Tf = temporal_features(x, params, pool, pool_step)
    out = z.reshape(B, H, num_T * Tf)               # (B, channel, size_last)

    # local filter + BN
    out = jax.nn.relu(out * params["local_w"][None] - params["local_b"])
    out = bn1d(out)
    adj = get_adj(out, params["global_adj"])        # (B, H, H)

    # entry + pool graph branches: 4 graph convs in ONE fused kernel
    n_e = params["entry1_w"].shape[1]
    n_p = params["pool1_w"].shape[1]
    adj_bd = block_diag_batch(adj)
    x_flat = out.reshape(B * H, -1)
    w1_cat = jnp.concatenate([params["entry1_w"], params["pool1_w"]], axis=1)
    b1_cat = jnp.concatenate([params["entry1_b"].reshape(-1),
                              params["pool1_b"].reshape(-1)])
    w2_blk = two_block_diag(params["entry2_w"], params["pool2_w"])
    b2_cat = jnp.concatenate([params["entry2_b"].reshape(-1),
                              params["pool2_b"].reshape(-1)])
    h1, h2 = graph_conv2(adj_bd, x_flat, w1_cat, b1_cat, w2_blk, b2_cat)

    lo1 = bn1d(h1[:, :n_e].reshape(B, H, n_e))
    lo2 = bn1d(h2[:, :n_e].reshape(B, H, n_e))
    po1 = bn1d(h1[:, n_e:].reshape(B, H, n_p))
    po2 = bn1d(h2[:, n_e:].reshape(B, H, n_p))

    out_all_entry = jnp.concatenate([lo1, lo2], axis=2)
    representation_1 = attention_readout(out_all_entry)

    out_all_pool = jnp.concatenate([po1, po2], axis=2)
    pooling_tensor = jax.nn.softmax(
        linear(out_all_pool, params["pl_w"], params["pl_b"]), axis=-1)
    x_pool, adj_pool, link_loss, ent_loss = dense_diff_pool(
        out_all_entry, adj, pooling_tensor)

    # embed branch: same fused two-layer graph kernel on the pooled graph
    n_c = adj_pool.shape[1]
    adjp_bd = block_diag_batch(adj_pool)
    xp_flat = x_pool.reshape(B * n_c, -1)
    e1, e2 = graph_conv2(adjp_bd, xp_flat,
                         params["embed1_w"], params["embed1_b"].reshape(-1),
                         params["embed2_w"], params["embed2_b"].reshape(-1))
    eo1 = bn1d(e1.reshape(B, n_c, -1))
    eo2 = bn1d(e2.reshape(B, n_c, -1))
    out_all = jnp.concatenate([eo1, eo2], axis=2)
    representation_2 = attention_readout(out_all)

    output = jnp.concatenate([representation_1, representation_2], axis=1)
    pseudo = jax.nn.relu(linear(output, params["fc1_w"], params["fc1_b"]))
    mid_out = linear(pseudo, params["fc2_w"], params["fc2_b"])
    pseudo = jax.nn.relu(mid_out)
    pseudo = linear(pseudo, params["fc3_w"], params["fc3_b"])
    pseudo = bn1d(pseudo)
    return pseudo, link_loss, ent_loss


# ------------------------------- parameter init -------------------------------


def init_params(key, *, in_chan, channel, num_T, k1, k2, k3, size_last,
                out_graph, out_graph_, num_class):
    keys = jax.random.split(key, 16)

    def w(k, shape, scale=0.1):
        return jax.random.normal(k, shape, jnp.float32) * scale

    z = lambda shape: jnp.zeros(shape, jnp.float32)
    p = {
        "t1_w": w(keys[0], (num_T, in_chan, 1, k1)), "t1_b": z((num_T,)),
        "t2_w": w(keys[1], (num_T, in_chan, 1, k2)), "t2_b": z((num_T,)),
        "t3_w": w(keys[2], (num_T, in_chan, 1, k3)), "t3_b": z((num_T,)),
        "oxo_w": w(keys[3], (num_T, num_T, 1, 1)), "oxo_b": z((num_T,)),
        "local_w": w(keys[4], (channel, size_last)),
        "local_b": z((1, channel, 1)),
        "global_adj": w(keys[5], (channel, channel)),
        "entry1_w": w(keys[6], (size_last, out_graph)), "entry1_b": z((1, 1, out_graph)),
        "entry2_w": w(keys[7], (out_graph, out_graph)), "entry2_b": z((1, 1, out_graph)),
        "pool1_w": w(keys[8], (size_last, out_graph_)), "pool1_b": z((1, 1, out_graph_)),
        "pool2_w": w(keys[9], (out_graph_, out_graph_)), "pool2_b": z((1, 1, out_graph_)),
        "pl_w": w(keys[10], (out_graph_, out_graph_ * 2)), "pl_b": z((out_graph_,)),
        "embed1_w": w(keys[11], (out_graph * 2, out_graph)), "embed1_b": z((1, 1, out_graph)),
        "embed2_w": w(keys[12], (out_graph, out_graph)), "embed2_b": z((1, 1, out_graph)),
        "fc1_w": w(keys[13], (out_graph * 2, 2 * 4 * out_graph)), "fc1_b": z((out_graph * 2,)),
        "fc2_w": w(keys[14], (out_graph, 2 * out_graph)), "fc2_b": z((out_graph,)),
        "fc3_w": w(keys[15], (num_class, out_graph)), "fc3_b": z((num_class,)),
    }
    return p


# ----------------------------------- main --------------------------------------

if __name__ == "__main__":
    # small configuration consistent with the module's __init__
    num_class = 3
    in_chan, channel, time = 1, 8, 64          # input_size = (1, 8, 64)
    sampling_rate = 40
    num_T = 8
    out_graph, out_graph_ = 16, 8
    pool, pool_step_rate = 8, 0.5
    pool_step = int(pool_step_rate * pool)

    k1 = int(0.1 * sampling_rate)
    k2 = int(0.2 * sampling_rate)
    k3 = int(0.5 * sampling_rate)

    # temporal feature size (mirrors get_size_temporal)
    def _tlen(T, k):
        return ((T - k + 1) - pool) // pool_step + 1
    t_cat = _tlen(time, k1) + _tlen(time, k2) + _tlen(time, k3)
    t_final = t_cat // 2                       # AvgPool (1, 2) inside OneXOneConv
    size_last = num_T * t_final

    key = jax.random.PRNGKey(0)
    kx, kp = jax.random.split(key)
    B = 4
    x = jax.random.normal(kx, (B, in_chan, channel, time), jnp.float32)

    params = init_params(kp, in_chan=in_chan, channel=channel, num_T=num_T,
                         k1=k1, k2=k2, k3=k3, size_last=size_last,
                         out_graph=out_graph, out_graph_=out_graph_,
                         num_class=num_class)

    fwd = jax.jit(functools.partial(mcgp_forward, pool=pool, pool_step=pool_step))
    pseudo_label, link_loss, ent_loss = fwd(params, x)
    jax.block_until_ready((pseudo_label, link_loss, ent_loss))
    assert pseudo_label.shape == (B, num_class)
    assert link_loss.shape == () and ent_loss.shape == ()
    print("KERNEL_OK")
</pallas_src>

<mosaic_0001>
module attributes {stable_mosaic.version = 11 : i64} {
  func.func @_temporal_fused_kernel(%arg0: i32, %arg1: memref<32x64xf32, #tpu.memory_space<vmem>>, %arg2: memref<64x488xf32, #tpu.memory_space<vmem>>, %arg3: memref<1x488xf32, #tpu.memory_space<vmem>>, %arg4: memref<488x296xf32, #tpu.memory_space<vmem>>, %arg5: memref<64x456xf32, #tpu.memory_space<vmem>>, %arg6: memref<1x456xf32, #tpu.memory_space<vmem>>, %arg7: memref<456x296xf32, #tpu.memory_space<vmem>>, %arg8: memref<64x360xf32, #tpu.memory_space<vmem>>, %arg9: memref<1x360xf32, #tpu.memory_space<vmem>>, %arg10: memref<360x296xf32, #tpu.memory_space<vmem>>, %arg11: memref<37x18xf32, #tpu.memory_space<vmem>>, %arg12: memref<8x8xf32, #tpu.memory_space<vmem>>, %arg13: memref<1x8xf32, #tpu.memory_space<vmem>>, %arg14: memref<32x144xf32, #tpu.memory_space<vmem>>, %arg15: memref<32x296xf32, #tpu.memory_space<vmem>>) attributes {dimension_semantics = [#tpu.dimension_semantics<arbitrary>], iteration_bounds = array<i64: 1>, scalar_prefetch = 0 : i64, scratch_operands = 1 : i64, tpu.core_type = #tpu.core_type<tc>, window_params = [{pipeline_mode = #tpu.pipeline_mode<synchronous>, transform_indices = @transform_0, window_bounds = array<i64: 32, 64>}, {pipeline_mode = #tpu.pipeline_mode<synchronous>, transform_indices = @transform_1, window_bounds = array<i64: 64, 488>}, {pipeline_mode = #tpu.pipeline_mode<synchronous>, transform_indices = @transform_2, window_bounds = array<i64: 1, 488>}, {pipeline_mode = #tpu.pipeline_mode<synchronous>, transform_indices = @transform_3, window_bounds = array<i64: 488, 296>}, {pipeline_mode = #tpu.pipeline_mode<synchronous>, transform_indices = @transform_4, window_bounds = array<i64: 64, 456>}, {pipeline_mode = #tpu.pipeline_mode<synchronous>, transform_indices = @transform_5, window_bounds = array<i64: 1, 456>}, {pipeline_mode = #tpu.pipeline_mode<synchronous>, transform_indices = @transform_6, window_bounds = array<i64: 456, 296>}, {pipeline_mode = #tpu.pipeline_mode<synchronous>, transform_indices = @transform_7, window_bounds = array<i64: 64, 360>}, {pipeline_mode = #tpu.pipeline_mode<synchronous>, transform_indices = @transform_8, window_bounds = array<i64: 1, 360>}, {pipeline_mode = #tpu.pipeline_mode<synchronous>, transform_indices = @transform_9, window_bounds = array<i64: 360, 296>}, {pipeline_mode = #tpu.pipeline_mode<synchronous>, transform_indices = @transform_10, window_bounds = array<i64: 37, 18>}, {pipeline_mode = #tpu.pipeline_mode<synchronous>, transform_indices = @transform_11, window_bounds = array<i64: 8, 8>}, {pipeline_mode = #tpu.pipeline_mode<synchronous>, transform_indices = @transform_12, window_bounds = array<i64: 1, 8>}, {pipeline_mode = #tpu.pipeline_mode<synchronous>, transform_indices = @transform_13, window_bounds = array<i64: 32, 144>}]} {
    %c0 = arith.constant 0 : index
    %c0_0 = arith.constant 0 : index
    %0 = vector.load %arg1[%c0, %c0_0] : memref<32x64xf32, #tpu.memory_space<vmem>>, vector<32x64xf32>
    %c0_1 = arith.constant 0 : index
    %c0_2 = arith.constant 0 : index
    %1 = vector.load %arg2[%c0_1, %c0_2] : memref<64x488xf32, #tpu.memory_space<vmem>>, vector<64x488xf32>
    %cst = arith.constant dense<0.000000e+00> : vector<32x488xf32>
    %2 = tpu.matmul %0, %1, %cst {dimension_numbers = #tpu.dot_dimension_numbers<[1], [0], [0], [1], [0, 0, 1, 1], [], []>} : vector<32x64xf32>, vector<64x488xf32>, vector<32x488xf32> -> vector<32x488xf32>
    %c0_3 = arith.constant 0 : index
    %c0_4 = arith.constant 0 : index
    %3 = vector.load %arg3[%c0_3, %c0_4] : memref<1x488xf32, #tpu.memory_space<vmem>>, vector<1x488xf32>
    %4 = vector.broadcast %3 : vector<1x488xf32> to vector<32x488xf32>
    %5 = arith.addf %2, %4 : vector<32x488xf32>
    %6 = arith.mulf %5, %5 : vector<32x488xf32>
    %c0_5 = arith.constant 0 : index
    %c0_6 = arith.constant 0 : index
    %7 = vector.load %arg4[%c0_5, %c0_6] : memref<488x296xf32, #tpu.memory_space<vmem>>, vector<488x296xf32>
    %cst_7 = arith.constant dense<0.000000e+00> : vector<32x296xf32>
    %8 = tpu.matmul %6, %7, %cst_7 {dimension_numbers = #tpu.dot_dimension_numbers<[1], [0], [0], [1], [0, 0, 1, 1], [], []>} : vector<32x488xf32>, vector<488x296xf32>, vector<32x296xf32> -> vector<32x296xf32>
    %c0_8 = arith.constant 0 : index
    %c0_9 = arith.constant 0 : index
    %9 = vector.load %arg5[%c0_8, %c0_9] : memref<64x456xf32, #tpu.memory_space<vmem>>, vector<64x456xf32>
    %cst_10 = arith.constant dense<0.000000e+00> : vector<32x456xf32>
    %10 = tpu.matmul %0, %9, %cst_10 {dimension_numbers = #tpu.dot_dimension_numbers<[1], [0], [0], [1], [0, 0, 1, 1], [], []>} : vector<32x64xf32>, vector<64x456xf32>, vector<32x456xf32> -> vector<32x456xf32>
    %c0_11 = arith.constant 0 : index
    %c0_12 = arith.constant 0 : index
    %11 = vector.load %arg6[%c0_11, %c0_12] : memref<1x456xf32, #tpu.memory_space<vmem>>, vector<1x456xf32>
    %12 = vector.broadcast %11 : vector<1x456xf32> to vector<32x456xf32>
    %13 = arith.addf %10, %12 : vector<32x456xf32>
    %14 = arith.mulf %13, %13 : vector<32x456xf32>
    %c0_13 = arith.constant 0 : index
    %c0_14 = arith.constant 0 : index
    %15 = vector.load %arg7[%c0_13, %c0_14] : memref<456x296xf32, #tpu.memory_space<vmem>>, vector<456x296xf32>
    %cst_15 = arith.constant dense<0.000000e+00> : vector<32x296xf32>
    %16 = tpu.matmul %14, %15, %cst_15 {dimension_numbers = #tpu.dot_dimension_numbers<[1], [0], [0], [1], [0, 0, 1, 1], [], []>} : vector<32x456xf32>, vector<456x296xf32>, vector<32x296xf32> -> vector<32x296xf32>
    %17 = arith.addf %8, %16 : vector<32x296xf32>
    %c0_16 = arith.constant 0 : index
    %c0_17 = arith.constant 0 : index
    %18 = vector.load %arg8[%c0_16, %c0_17] : memref<64x360xf32, #tpu.memory_space<vmem>>, vector<64x360xf32>
    %cst_18 = arith.constant dense<0.000000e+00> : vector<32x360xf32>
    %19 = tpu.matmul %0, %18, %cst_18 {dimension_numbers = #tpu.dot_dimension_numbers<[1], [0], [0], [1], [0, 0, 1, 1], [], []>} : vector<32x64xf32>, vector<64x360xf32>, vector<32x360xf32> -> vector<32x360xf32>
    %c0_19 = arith.constant 0 : index
    %c0_20 = arith.constant 0 : index
    %20 = vector.load %arg9[%c0_19, %c0_20] : memref<1x360xf32, #tpu.memory_space<vmem>>, vector<1x360xf32>
    %21 = vector.broadcast %20 : vector<1x360xf32> to vector<32x360xf32>
    %22 = arith.addf %19, %21 : vector<32x360xf32>
    %23 = arith.mulf %22, %22 : vector<32x360xf32>
    %c0_21 = arith.constant 0 : index
    %c0_22 = arith.constant 0 : index
    %24 = vector.load %arg10[%c0_21, %c0_22] : memref<360x296xf32, #tpu.memory_space<vmem>>, vector<360x296xf32>
    %cst_23 = arith.constant dense<0.000000e+00> : vector<32x296xf32>
    %25 = tpu.matmul %23, %24, %cst_23 {dimension_numbers = #tpu.dot_dimension_numbers<[1], [0], [0], [1], [0, 0, 1, 1], [], []>} : vector<32x360xf32>, vector<360x296xf32>, vector<32x296xf32> -> vector<32x296xf32>
    %26 = arith.addf %17, %25 : vector<32x296xf32>
    %27 = math.log %26 : vector<32x296xf32>
    %c0_24 = arith.constant 0 : index
    %c0_25 = arith.constant 0 : index
    %28 = vector.load %arg15[%c0_24, %c0_25] : memref<32x296xf32, #tpu.memory_space<vmem>>, vector<32x296xf32>
    tpu.vector_store %arg15[%c0_24, %c0_25], %27 {strides = array<i32>} : memref<32x296xf32, #tpu.memory_space<vmem>>, vector<32x296xf32>,
    %c0_26 = arith.constant 0 : index
    %c0_27 = arith.constant 0 : index
    %29 = vector.load %arg15[%c0_26, %c0_27] : memref<32x296xf32, #tpu.memory_space<vmem>>, vector<32x37xf32>
    %cst_28 = arith.constant dense<0.000000e+00> : vector<32xf32>
    %30 = vector.multi_reduction <add>, %29, %cst_28 [1] : vector<32x37xf32> to vector<32xf32>
    %31 = vector.shape_cast %30 : vector<32xf32> to vector<32x1xf32>
    %cst_29 = arith.constant dense<0.000000e+00> : vector<1xf32>
    %32 = vector.multi_reduction <add>, %31, %cst_29 [0] : vector<32x1xf32> to vector<1xf32>
    %33 = vector.shape_cast %32 : vector<1xf32> to vector<1x1xf32>
    %34 = arith.mulf %29, %29 : vector<32x37xf32>
    %cst_30 = arith.constant dense<0.000000e+00> : vector<32xf32>
    %35 = vector.multi_reduction <add>, %34, %cst_30 [1] : vector<32x37xf32> to vector<32xf32>
    %36 = vector.shape_cast %35 : vector<32xf32> to vector<32x1xf32>
    %cst_31 = arith.constant dense<0.000000e+00> : vector<1xf32>
    %37 = vector.multi_reduction <add>, %36, %cst_31 [0] : vector<32x1xf32> to vector<1xf32>
    %38 = vector.shape_cast %37 : vector<1xf32> to vector<1x1xf32>
    %cst_32 = arith.constant 8.44594615E-4 : f32
    %39 = vector.broadcast %cst_32 : f32 to vector<1x1xf32>
    %40 = arith.mulf %33, %39 : vector<1x1xf32>
    %cst_33 = arith.constant 8.44594615E-4 : f32
    %41 = vector.broadcast %cst_33 : f32 to vector<1x1xf32>
    %42 = arith.mulf %38, %41 : vector<1x1xf32>
    %43 = arith.mulf %40, %40 : vector<1x1xf32>
    %44 = arith.subf %42, %43 : vector<1x1xf32>
    %cst_34 = arith.constant 9.99999974E-6 : f32
    %45 = vector.broadcast %cst_34 : f32 to vector<1x1xf32>
    %46 = arith.addf %44, %45 : vector<1x1xf32>
    %47 = math.rsqrt %46 : vector<1x1xf32>
    %c0_35 = arith.constant 0 : index
    %c37 = arith.constant 37 : index
    %48 = vector.load %arg15[%c0_35, %c37] : memref<32x296xf32, #tpu.memory_space<vmem>>, vector<32x37xf32>
    %cst_36 = arith.constant dense<0.000000e+00> : vector<32xf32>
    %49 = vector.multi_reduction <add>, %48, %cst_36 [1] : vector<32x37xf32> to vector<32xf32>
    %50 = vector.shape_cast %49 : vector<32xf32> to vector<32x1xf32>
    %cst_37 = arith.constant dense<0.000000e+00> : vector<1xf32>
    %51 = vector.multi_reduction <add>, %50, %cst_37 [0] : vector<32x1xf32> to vector<1xf32>
    %52 = vector.shape_cast %51 : vector<1xf32> to vector<1x1xf32>
    %53 = arith.mulf %48, %48 : vector<32x37xf32>
    %cst_38 = arith.constant dense<0.000000e+00> : vector<32xf32>
    %54 = vector.multi_reduction <add>, %53, %cst_38 [1] : vector<32x37xf32> to vector<32xf32>
    %55 = vector.shape_cast %54 : vector<32xf32> to vector<32x1xf32>
    %cst_39 = arith.constant dense<0.000000e+00> : vector<1xf32>
    %56 = vector.multi_reduction <add>, %55, %cst_39 [0] : vector<32x1xf32> to vector<1xf32>
    %57 = vector.shape_cast %56 : vector<1xf32> to vector<1x1xf32>
    %cst_40 = arith.constant 8.44594615E-4 : f32
    %58 = vector.broadcast %cst_40 : f32 to vector<1x1xf32>
    %59 = arith.mulf %52, %58 : vector<1x1xf32>
    %cst_41 = arith.constant 8.44594615E-4 : f32
    %60 = vector.broadcast %cst_41 : f32 to vector<1x1xf32>
    %61 = arith.mulf %57, %60 : vector<1x1xf32>
    %62 = arith.mulf %59, %59 : vector<1x1xf32>
    %63 = arith.subf %61, %62 : vector<1x1xf32>
    %cst_42 = arith.constant 9.99999974E-6 : f32
    %64 = vector.broadcast %cst_42 : f32 to vector<1x1xf32>
    %65 = arith.addf %63, %64 : vector<1x1xf32>
    %66 = math.rsqrt %65 : vector<1x1xf32>
    %c0_43 = arith.constant 0 : index
    %c74 = arith.constant 74 : index
    %67 = vector.load %arg15[%c0_43, %c74] : memref<32x296xf32, #tpu.memory_space<vmem>>, vector<32x37xf32>
    %cst_44 = arith.constant dense<0.000000e+00> : vector<32xf32>
    %68 = vector.multi_reduction <add>, %67, %cst_44 [1] : vector<32x37xf32> to vector<32xf32>
    %69 = vector.shape_cast %68 : vector<32xf32> to vector<32x1xf32>
    %cst_45 = arith.constant dense<0.000000e+00> : vector<1xf32>
    %70 = vector.multi_reduction <add>, %69, %cst_45 [0] : vector<32x1xf32> to vector<1xf32>
    %71 = vector.shape_cast %70 : vector<1xf32> to vector<1x1xf32>
    %72 = arith.mulf %67, %67 : vector<32x37xf32>
    %cst_46 = arith.constant dense<0.000000e+00> : vector<32xf32>
    %73 = vector.multi_reduction <add>, %72, %cst_46 [1] : vector<32x37xf32> to vector<32xf32>
    %74 = vector.shape_cast %73 : vector<32xf32> to vector<32x1xf32>
    %cst_47 = arith.constant dense<0.000000e+00> : vector<1xf32>
    %75 = vector.multi_reduction <add>, %74, %cst_47 [0] : vector<32x1xf32> to vector<1xf32>
    %76 = vector.shape_cast %75 : vector<1xf32> to vector<1x1xf32>
    %cst_48 = arith.constant 8.44594615E-4 : f32
    %77 = vector.broadcast %cst_48 : f32 to vector<1x1xf32>
    %78 = arith.mulf %71, %77 : vector<1x1xf32>
    %cst_49 = arith.constant 8.44594615E-4 : f32
    %79 = vector.broadcast %cst_49 : f32 to vector<1x1xf32>
    %80 = arith.mulf %76, %79 : vector<1x1xf32>
    %81 = arith.mulf %78, %78 : vector<1x1xf32>
    %82 = arith.subf %80, %81 : vector<1x1xf32>
    %cst_50 = arith.constant 9.99999974E-6 : f32
    %83 = vector.broadcast %cst_50 : f32 to vector<1x1xf32>
    %84 = arith.addf %82, %83 : vector<1x1xf32>
    %85 = math.rsqrt %84 : vector<1x1xf32>
    %c0_51 = arith.constant 0 : index
    %c111 = arith.constant 111 : index
    %86 = vector.load %arg15[%c0_51, %c111] : memref<32x296xf32, #tpu.memory_space<vmem>>, vector<32x37xf32>
    %cst_52 = arith.constant dense<0.000000e+00> : vector<32xf32>
    %87 = vector.multi_reduction <add>, %86, %cst_52 [1] : vector<32x37xf32> to vector<32xf32>
    %88 = vector.shape_cast %87 : vector<32xf32> to vector<32x1xf32>
    %cst_53 = arith.constant dense<0.000000e+00> : vector<1xf32>
    %89 = vector.multi_reduction <add>, %88, %cst_53 [0] : vector<32x1xf32> to vector<1xf32>
    %90 = vector.shape_cast %89 : vector<1xf32> to vector<1x1xf32>
    %91 = arith.mulf %86, %86 : vector<32x37xf32>
    %cst_54 = arith.constant dense<0.000000e+00> : vector<32xf32>
    %92 = vector.multi_reduction <add>, %91, %cst_54 [1] : vector<32x37xf32> to vector<32xf32>
    %93 = vector.shape_cast %92 : vector<32xf32> to vector<32x1xf32>
    %cst_55 = arith.constant dense<0.000000e+00> : vector<1xf32>
    %94 = vector.multi_reduction <add>, %93, %cst_55 [0] : vector<32x1xf32> to vector<1xf32>
    %95 = vector.shape_cast %94 : vector<1xf32> to vector<1x1xf32>
    %cst_56 = arith.constant 8.44594615E-4 : f32
    %96 = vector.broadcast %cst_56 : f32 to vector<1x1xf32>
    %97 = arith.mulf %90, %96 : vector<1x1xf32>
    %cst_57 = arith.constant 8.44594615E-4 : f32
    %98 = vector.broadcast %cst_57 : f32 to vector<1x1xf32>
    %99 = arith.mulf %95, %98 : vector<1x1xf32>
    %100 = arith.mulf %97, %97 : vector<1x1xf32>
    %101 = arith.subf %99, %100 : vector<1x1xf32>
    %cst_58 = arith.constant 9.99999974E-6 : f32
    %102 = vector.broadcast %cst_58 : f32 to vector<1x1xf32>
    %103 = arith.addf %101, %102 : vector<1x1xf32>
    %104 = math.rsqrt %103 : vector<1x1xf32>
    %c0_59 = arith.constant 0 : index
    %c148 = arith.constant 148 : index
    %105 = vector.load %arg15[%c0_59, %c148] : memref<32x296xf32, #tpu.memory_space<vmem>>, vector<32x37xf32>
    %cst_60 = arith.constant dense<0.000000e+00> : vector<32xf32>
    %106 = vector.multi_reduction <add>, %105, %cst_60 [1] : vector<32x37xf32> to vector<32xf32>
    %107 = vector.shape_cast %106 : vector<32xf32> to vector<32x1xf32>
    %cst_61 = arith.constant dense<0.000000e+00> : vector<1xf32>
    %108 = vector.multi_reduction <add>, %107, %cst_61 [0] : vector<32x1xf32> to vector<1xf32>
    %109 = vector.shape_cast %108 : vector<1xf32> to vector<1x1xf32>
    %110 = arith.mulf %105, %105 : vector<32x37xf32>
    %cst_62 = arith.constant dense<0.000000e+00> : vector<32xf32>
    %111 = vector.multi_reduction <add>, %110, %cst_62 [1] : vector<32x37xf32> to vector<32xf32>
    %112 = vector.shape_cast %111 : vector<32xf32> to vector<32x1xf32>
    %cst_63 = arith.constant dense<0.000000e+00> : vector<1xf32>
    %113 = vector.multi_reduction <add>, %112, %cst_63 [0] : vector<32x1xf32> to vector<1xf32>
    %114 = vector.shape_cast %113 : vector<1xf32> to vector<1x1xf32>
    %cst_64 = arith.constant 8.44594615E-4 : f32
    %115 = vector.broadcast %cst_64 : f32 to vector<1x1xf32>
    %116 = arith.mulf %109, %115 : vector<1x1xf32>
    %cst_65 = arith.constant 8.44594615E-4 : f32
    %117 = vector.broadcast %cst_65 : f32 to vector<1x1xf32>
    %118 = arith.mulf %114, %117 : vector<1x1xf32>
    %119 = arith.mulf %116, %116 : vector<1x1xf32>
    %120 = arith.subf %118, %119 : vector<1x1xf32>
    %cst_66 = arith.constant 9.99999974E-6 : f32
    %121 = vector.broadcast %cst_66 : f32 to vector<1x1xf32>
    %122 = arith.addf %120, %121 : vector<1x1xf32>
    %123 = math.rsqrt %122 : vector<1x1xf32>
    %c0_67 = arith.constant 0 : index
    %c185 = arith.constant 185 : index
    %124 = vector.load %arg15[%c0_67, %c185] : memref<32x296xf32, #tpu.memory_space<vmem>>, vector<32x37xf32>
    %cst_68 = arith.constant dense<0.000000e+00> : vector<32xf32>
    %125 = vector.multi_reduction <add>, %124, %cst_68 [1] : vector<32x37xf32> to vector<32xf32>
    %126 = vector.shape_cast %125 : vector<32xf32> to vector<32x1xf32>
    %cst_69 = arith.constant dense<0.000000e+00> : vector<1xf32>
    %127 = vector.multi_reduction <add>, %126, %cst_69 [0] : vector<32x1xf32> to vector<1xf32>
    %128 = vector.shape_cast %127 : vector<1xf32> to vector<1x1xf32>
    %129 = arith.mulf %124, %124 : vector<32x37xf32>
    %cst_70 = arith.constant dense<0.000000e+00> : vector<32xf32>
    %130 = vector.multi_reduction <add>, %129, %cst_70 [1] : vector<32x37xf32> to vector<32xf32>
    %131 = vector.shape_cast %130 : vector<32xf32> to vector<32x1xf32>
    %cst_71 = arith.constant dense<0.000000e+00> : vector<1xf32>
    %132 = vector.multi_reduction <add>, %131, %cst_71 [0] : vector<32x1xf32> to vector<1xf32>
    %133 = vector.shape_cast %132 : vector<1xf32> to vector<1x1xf32>
    %cst_72 = arith.constant 8.44594615E-4 : f32
    %134 = vector.broadcast %cst_72 : f32 to vector<1x1xf32>
    %135 = arith.mulf %128, %134 : vector<1x1xf32>
    %cst_73 = arith.constant 8.44594615E-4 : f32
    %136 = vector.broadcast %cst_73 : f32 to vector<1x1xf32>
    %137 = arith.mulf %133, %136 : vector<1x1xf32>
    %138 = arith.mulf %135, %135 : vector<1x1xf32>
    %139 = arith.subf %137, %138 : vector<1x1xf32>
    %cst_74 = arith.constant 9.99999974E-6 : f32
    %140 = vector.broadcast %cst_74 : f32 to vector<1x1xf32>
    %141 = arith.addf %139, %140 : vector<1x1xf32>
    %142 = math.rsqrt %141 : vector<1x1xf32>
    %c0_75 = arith.constant 0 : index
    %c222 = arith.constant 222 : index
    %143 = vector.load %arg15[%c0_75, %c222] : memref<32x296xf32, #tpu.memory_space<vmem>>, vector<32x37xf32>
    %cst_76 = arith.constant dense<0.000000e+00> : vector<32xf32>
    %144 = vector.multi_reduction <add>, %143, %cst_76 [1] : vector<32x37xf32> to vector<32xf32>
    %145 = vector.shape_cast %144 : vector<32xf32> to vector<32x1xf32>
    %cst_77 = arith.constant dense<0.000000e+00> : vector<1xf32>
    %146 = vector.multi_reduction <add>, %145, %cst_77 [0] : vector<32x1xf32> to vector<1xf32>
    %147 = vector.shape_cast %146 : vector<1xf32> to vector<1x1xf32>
    %148 = arith.mulf %143, %143 : vector<32x37xf32>
    %cst_78 = arith.constant dense<0.000000e+00> : vector<32xf32>
    %149 = vector.multi_reduction <add>, %148, %cst_78 [1] : vector<32x37xf32> to vector<32xf32>
    %150 = vector.shape_cast %149 : vector<32xf32> to vector<32x1xf32>
    %cst_79 = arith.constant dense<0.000000e+00> : vector<1xf32>
    %151 = vector.multi_reduction <add>, %150, %cst_79 [0] : vector<32x1xf32> to vector<1xf32>
    %152 = vector.shape_cast %151 : vector<1xf32> to vector<1x1xf32>
    %cst_80 = arith.constant 8.44594615E-4 : f32
    %153 = vector.broadcast %cst_80 : f32 to vector<1x1xf32>
    %154 = arith.mulf %147, %153 : vector<1x1xf32>
    %cst_81 = arith.constant 8.44594615E-4 : f32
    %155 = vector.broadcast %cst_81 : f32 to vector<1x1xf32>
    %156 = arith.mulf %152, %155 : vector<1x1xf32>
    %157 = arith.mulf %154, %154 : vector<1x1xf32>
    %158 = arith.subf %156, %157 : vector<1x1xf32>
    %cst_82 = arith.constant 9.99999974E-6 : f32
    %159 = vector.broadcast %cst_82 : f32 to vector<1x1xf32>
    %160 = arith.addf %158, %159 : vector<1x1xf32>
    %161 = math.rsqrt %160 : vector<1x1xf32>
    %c0_83 = arith.constant 0 : index
    %c259 = arith.constant 259 : index
    %162 = vector.load %arg15[%c0_83, %c259] : memref<32x296xf32, #tpu.memory_space<vmem>>, vector<32x37xf32>
    %cst_84 = arith.constant dense<0.000000e+00> : vector<32xf32>
    %163 = vector.multi_reduction <add>, %162, %cst_84 [1] : vector<32x37xf32> to vector<32xf32>
    %164 = vector.shape_cast %163 : vector<32xf32> to vector<32x1xf32>
    %cst_85 = arith.constant dense<0.000000e+00> : vector<1xf32>
    %165 = vector.multi_reduction <add>, %164, %cst_85 [0] : vector<32x1xf32> to vector<1xf32>
    %166 = vector.shape_cast %165 : vector<1xf32> to vector<1x1xf32>
    %167 = arith.mulf %162, %162 : vector<32x37xf32>
    %cst_86 = arith.constant dense<0.000000e+00> : vector<32xf32>
    %168 = vector.multi_reduction <add>, %167, %cst_86 [1] : vector<32x37xf32> to vector<32xf32>
    %169 = vector.shape_cast %168 : vector<32xf32> to vector<32x1xf32>
    %cst_87 = arith.constant dense<0.000000e+00> : vector<1xf32>
    %170 = vector.multi_reduction <add>, %169, %cst_87 [0] : vector<32x1xf32> to vector<1xf32>
    %171 = vector.shape_cast %170 : vector<1xf32> to vector<1x1xf32>
    %cst_88 = arith.constant 8.44594615E-4 : f32
    %172 = vector.broadcast %cst_88 : f32 to vector<1x1xf32>
    %173 = arith.mulf %166, %172 : vector<1x1xf32>
    %cst_89 = arith.constant 8.44594615E-4 : f32
    %174 = vector.broadcast %cst_89 : f32 to vector<1x1xf32>
    %175 = arith.mulf %171, %174 : vector<1x1xf32>
    %176 = arith.mulf %173, %173 : vector<1x1xf32>
    %177 = arith.subf %175, %176 : vector<1x1xf32>
    %cst_90 = arith.constant 9.99999974E-6 : f32
    %178 = vector.broadcast %cst_90 : f32 to vector<1x1xf32>
    %179 = arith.addf %177, %178 : vector<1x1xf32>
    %180 = math.rsqrt %179 : vector<1x1xf32>
    %c0_91 = arith.constant 0 : index
    %c0_92 = arith.constant 0 : index
    %181 = vector.load %arg11[%c0_91, %c0_92] : memref<37x18xf32, #tpu.memory_space<vmem>>, vector<37x18xf32>
    %c0_93 = arith.constant 0 : index
    %c0_94 = arith.constant 0 : index
    %182 = vector.load %arg13[%c0_93, %c0_94] : memref<1x8xf32, #tpu.memory_space<vmem>>, vector<1x1xf32>
    %c0_95 = arith.constant 0 : index
    %c0_96 = arith.constant 0 : index
    %183 = vector.load %arg12[%c0_95, %c0_96] : memref<8x8xf32, #tpu.memory_space<vmem>>, vector<1x1xf32>
    %184 = arith.mulf %183, %47 : vector<1x1xf32>
    %c0_97 = arith.constant 0 : index
    %c0_98 = arith.constant 0 : index
    %185 = vector.load %arg15[%c0_97, %c0_98] : memref<32x296xf32, #tpu.memory_space<vmem>>, vector<32x37xf32>
    %186 = vector.broadcast %184 : vector<1x1xf32> to vector<32x37xf32>
    %187 = arith.mulf %186, %185 : vector<32x37xf32>
    %188 = arith.mulf %184, %40 : vector<1x1xf32>
    %189 = arith.subf %182, %188 : vector<1x1xf32>
    %c0_99 = arith.constant 0 : index
    %c1 = arith.constant 1 : index
    %190 = vector.load %arg12[%c0_99, %c1] : memref<8x8xf32, #tpu.memory_space<vmem>>, vector<1x1xf32>
    %191 = arith.mulf %190, %66 : vector<1x1xf32>
    %c0_100 = arith.constant 0 : index
    %c37_101 = arith.constant 37 : index
    %192 = vector.load %arg15[%c0_100, %c37_101] : memref<32x296xf32, #tpu.memory_space<vmem>>, vector<32x37xf32>
    %193 = vector.broadcast %191 : vector<1x1xf32> to vector<32x37xf32>
    %194 = arith.mulf %193, %192 : vector<32x37xf32>
    %195 = arith.addf %187, %194 : vector<32x37xf32>
    %196 = arith.mulf %191, %59 : vector<1x1xf32>
    %197 = arith.subf %189, %196 : vector<1x1xf32>
    %c0_102 = arith.constant 0 : index
    %c2 = arith.constant 2 : index
    %198 = vector.load %arg12[%c0_102, %c2] : memref<8x8xf32, #tpu.memory_space<vmem>>, vector<1x1xf32>
    %199 = arith.mulf %198, %85 : vector<1x1xf32>
    %c0_103 = arith.constant 0 : index
    %c74_104 = arith.constant 74 : index
    %200 = vector.load %arg15[%c0_103, %c74_104] : memref<32x296xf32, #tpu.memory_space<vmem>>, vector<32x37xf32>
    %201 = vector.broadcast %199 : vector<1x1xf32> to vector<32x37xf32>
    %202 = arith.mulf %201, %200 : vector<32x37xf32>
    %203 = arith.addf %195, %202 : vector<32x37xf32>
    %204 = arith.mulf %199, %78 : vector<1x1xf32>
    %205 = arith.subf %197, %204 : vector<1x1xf32>
    %c0_105 = arith.constant 0 : index
    %c3 = arith.constant 3 : index
    %206 = vector.load %arg12[%c0_105, %c3] : memref<8x8xf32, #tpu.memory_space<vmem>>, vector<1x1xf32>
    %207 = arith.mulf %206, %104 : vector<1x1xf32>
    %c0_106 = arith.constant 0 : index
    %c111_107 = arith.constant 111 : index
    %208 = vector.load %arg15[%c0_106, %c111_107] : memref<32x296xf32, #tpu.memory_space<vmem>>, vector<32x37xf32>
    %209 = vector.broadcast %207 : vector<1x1xf32> to vector<32x37xf32>
    %210 = arith.mulf %209, %208 : vector<32x37xf32>
    %211 = arith.addf %203, %210 : vector<32x37xf32>
    %212 = arith.mulf %207, %97 : vector<1x1xf32>
    %213 = arith.subf %205, %212 : vector<1x1xf32>
    %c0_108 = arith.constant 0 : index
    %c4 = arith.constant 4 : index
    %214 = vector.load %arg12[%c0_108, %c4] : memref<8x8xf32, #tpu.memory_space<vmem>>, vector<1x1xf32>
    %215 = arith.mulf %214, %123 : vector<1x1xf32>
    %c0_109 = arith.constant 0 : index
    %c148_110 = arith.constant 148 : index
    %216 = vector.load %arg15[%c0_109, %c148_110] : memref<32x296xf32, #tpu.memory_space<vmem>>, vector<32x37xf32>
    %217 = vector.broadcast %215 : vector<1x1xf32> to vector<32x37xf32>
    %218 = arith.mulf %217, %216 : vector<32x37xf32>
    %219 = arith.addf %211, %218 : vector<32x37xf32>
    %220 = arith.mulf %215, %116 : vector<1x1xf32>
    %221 = arith.subf %213, %220 : vector<1x1xf32>
    %c0_111 = arith.constant 0 : index
    %c5 = arith.constant 5 : index
    %222 = vector.load %arg12[%c0_111, %c5] : memref<8x8xf32, #tpu.memory_space<vmem>>, vector<1x1xf32>
    %223 = arith.mulf %222, %142 : vector<1x1xf32>
    %c0_112 = arith.constant 0 : index
    %c185_113 = arith.constant 185 : index
    %224 = vector.load %arg15[%c0_112, %c185_113] : memref<32x296xf32, #tpu.memory_space<vmem>>, vector<32x37xf32>
    %225 = vector.broadcast %223 : vector<1x1xf32> to vector<32x37xf32>
    %226 = arith.mulf %225, %224 : vector<32x37xf32>
    %227 = arith.addf %219, %226 : vector<32x37xf32>
    %228 = arith.mulf %223, %135 : vector<1x1xf32>
    %229 = arith.subf %221, %228 : vector<1x1xf32>
    %c0_114 = arith.constant 0 : index
    %c6 = arith.constant 6 : index
    %230 = vector.load %arg12[%c0_114, %c6] : memref<8x8xf32, #tpu.memory_space<vmem>>, vector<1x1xf32>
    %231 = arith.mulf %230, %161 : vector<1x1xf32>
    %c0_115 = arith.constant 0 : index
    %c222_116 = arith.constant 222 : index
    %232 = vector.load %arg15[%c0_115, %c222_116] : memref<32x296xf32, #tpu.memory_space<vmem>>, vector<32x37xf32>
    %233 = vector.broadcast %231 : vector<1x1xf32> to vector<32x37xf32>
    %234 = arith.mulf %233, %232 : vector<32x37xf32>
    %235 = arith.addf %227, %234 : vector<32x37xf32>
    %236 = arith.mulf %231, %154 : vector<1x1xf32>
    %237 = arith.subf %229, %236 : vector<1x1xf32>
    %c0_117 = arith.constant 0 : index
    %c7 = arith.constant 7 : index
    %238 = vector.load %arg12[%c0_117, %c7] : memref<8x8xf32, #tpu.memory_space<vmem>>, vector<1x1xf32>
    %239 = arith.mulf %238, %180 : vector<1x1xf32>
    %c0_118 = arith.constant 0 : index
    %c259_119 = arith.constant 259 : index
    %240 = vector.load %arg15[%c0_118, %c259_119] : memref<32x296xf32, #tpu.memory_space<vmem>>, vector<32x37xf32>
    %241 = vector.broadcast %239 : vector<1x1xf32> to vector<32x37xf32>
    %242 = arith.mulf %241, %240 : vector<32x37xf32>
    %243 = arith.addf %235, %242 : vector<32x37xf32>
    %244 = arith.mulf %239, %173 : vector<1x1xf32>
    %245 = arith.subf %237, %244 : vector<1x1xf32>
    %246 = vector.broadcast %245 : vector<1x1xf32> to vector<32x37xf32>
    %247 = arith.addf %243, %246 : vector<32x37xf32>
    %cst_120 = arith.constant 0.000000e+00 : f32
    %248 = vector.broadcast %cst_120 : f32 to vector<32x37xf32>
    %249 = arith.cmpf oge, %247, %248 : vector<32x37xf32>
    %cst_121 = arith.constant 0.00999999977 : f32
    %250 = vector.broadcast %cst_121 : f32 to vector<32x37xf32>
    %251 = arith.mulf %250, %247 : vector<32x37xf32>
    %252 = arith.select %249, %247, %251 : vector<32x37xi1>, vector<32x37xf32>
    %cst_122 = arith.constant dense<0.000000e+00> : vector<32x18xf32>
    %253 = tpu.matmul %252, %181, %cst_122 {dimension_numbers = #tpu.dot_dimension_numbers<[1], [0], [0], [1], [0, 0, 1, 1], [], []>} : vector<32x37xf32>, vector<37x18xf32>, vector<32x18xf32> -> vector<32x18xf32>
    %cst_123 = arith.constant dense<0.000000e+00> : vector<32xf32>
    %254 = vector.multi_reduction <add>, %253, %cst_123 [1] : vector<32x18xf32> to vector<32xf32>
    %255 = vector.shape_cast %254 : vector<32xf32> to vector<32x1xf32>
    %cst_124 = arith.constant dense<0.000000e+00> : vector<1xf32>
    %256 = vector.multi_reduction <add>, %255, %cst_124 [0] : vector<32x1xf32> to vector<1xf32>
    %257 = vector.shape_cast %256 : vector<1xf32> to vector<1x1xf32>
    %258 = arith.mulf %253, %253 : vector<32x18xf32>
    %cst_125 = arith.constant dense<0.000000e+00> : vector<32xf32>
    %259 = vector.multi_reduction <add>, %258, %cst_125 [1] : vector<32x18xf32> to vector<32xf32>
    %260 = vector.shape_cast %259 : vector<32xf32> to vector<32x1xf32>
    %cst_126 = arith.constant dense<0.000000e+00> : vector<1xf32>
    %261 = vector.multi_reduction <add>, %260, %cst_126 [0] : vector<32x1xf32> to vector<1xf32>
    %262 = vector.shape_cast %261 : vector<1xf32> to vector<1x1xf32>
    %cst_127 = arith.constant 0.00173611112 : f32
    %263 = vector.broadcast %cst_127 : f32 to vector<1x1xf32>
    %264 = arith.mulf %257, %263 : vector<1x1xf32>
    %cst_128 = arith.constant 0.00173611112 : f32
    %265 = vector.broadcast %cst_128 : f32 to vector<1x1xf32>
    %266 = arith.mulf %262, %265 : vector<1x1xf32>
    %267 = arith.mulf %264, %264 : vector<1x1xf32>
    %268 = arith.subf %266, %267 : vector<1x1xf32>
    %269 = vector.broadcast %264 : vector<1x1xf32> to vector<32x18xf32>
    %270 = arith.subf %253, %269 : vector<32x18xf32>
    %cst_129 = arith.constant 9.99999974E-6 : f32
    %271 = vector.broadcast %cst_129 : f32 to vector<1x1xf32>
    %272 = arith.addf %268, %271 : vector<1x1xf32>
    %273 = math.rsqrt %272 : vector<1x1xf32>
    %274 = vector.broadcast %273 : vector<1x1xf32> to vector<32x18xf32>
    %275 = arith.mulf %270, %274 : vector<32x18xf32>
    %c0_130 = arith.constant 0 : index
    %c0_131 = arith.constant 0 : index
    %276 = vector.load %arg14[%c0_130, %c0_131] : memref<32x144xf32, #tpu.memory_space<vmem>>, vector<32x18xf32>
    tpu.vector_store %arg14[%c0_130, %c0_131], %275 {strides = array<i32>} : memref<32x144xf32, #tpu.memory_space<vmem>>, vector<32x18xf32>,
    %c0_132 = arith.constant 0 : index
    %c1_133 = arith.constant 1 : index
    %277 = vector.load %arg13[%c0_132, %c1_133] : memref<1x8xf32, #tpu.memory_space<vmem>>, vector<1x1xf32>
    %c1_134 = arith.constant 1 : index
    %c0_135 = arith.constant 0 : index
    %278 = vector.load %arg12[%c1_134, %c0_135] : memref<8x8xf32, #tpu.memory_space<vmem>>, vector<1x1xf32>
    %279 = arith.mulf %278, %47 : vector<1x1xf32>
    %c0_136 = arith.constant 0 : index
    %c0_137 = arith.constant 0 : index
    %280 = vector.load %arg15[%c0_136, %c0_137] : memref<32x296xf32, #tpu.memory_space<vmem>>, vector<32x37xf32>
    %281 = vector.broadcast %279 : vector<1x1xf32> to vector<32x37xf32>
    %282 = arith.mulf %281, %280 : vector<32x37xf32>
    %283 = arith.mulf %279, %40 : vector<1x1xf32>
    %284 = arith.subf %277, %283 : vector<1x1xf32>
    %c1_138 = arith.constant 1 : index
    %c1_139 = arith.constant 1 : index
    %285 = vector.load %arg12[%c1_138, %c1_139] : memref<8x8xf32, #tpu.memory_space<vmem>>, vector<1x1xf32>
    %286 = arith.mulf %285, %66 : vector<1x1xf32>
    %c0_140 = arith.constant 0 : index
    %c37_141 = arith.constant 37 : index
    %287 = vector.load %arg15[%c0_140, %c37_141] : memref<32x296xf32, #tpu.memory_space<vmem>>, vector<32x37xf32>
    %288 = vector.broadcast %286 : vector<1x1xf32> to vector<32x37xf32>
    %289 = arith.mulf %288, %287 : vector<32x37xf32>
    %290 = arith.addf %282, %289 : vector<32x37xf32>
    %291 = arith.mulf %286, %59 : vector<1x1xf32>
    %292 = arith.subf %284, %291 : vector<1x1xf32>
    %c1_142 = arith.constant 1 : index
    %c2_143 = arith.constant 2 : index
    %293 = vector.load %arg12[%c1_142, %c2_143] : memref<8x8xf32, #tpu.memory_space<vmem>>, vector<1x1xf32>
    %294 = arith.mulf %293, %85 : vector<1x1xf32>
    %c0_144 = arith.constant 0 : index
    %c74_145 = arith.constant 74 : index
    %295 = vector.load %arg15[%c0_144, %c74_145] : memref<32x296xf32, #tpu.memory_space<vmem>>, vector<32x37xf32>
    %296 = vector.broadcast %294 : vector<1x1xf32> to vector<32x37xf32>
    %297 = arith.mulf %296, %295 : vector<32x37xf32>
    %298 = arith.addf %290, %297 : vector<32x37xf32>
    %299 = arith.mulf %294, %78 : vector<1x1xf32>
    %300 = arith.subf %292, %299 : vector<1x1xf32>
    %c1_146 = arith.constant 1 : index
    %c3_147 = arith.constant 3 : index
    %301 = vector.load %arg12[%c1_146, %c3_147] : memref<8x8xf32, #tpu.memory_space<vmem>>, vector<1x1xf32>
    %302 = arith.mulf %301, %104 : vector<1x1xf32>
    %c0_148 = arith.constant 0 : index
    %c111_149 = arith.constant 111 : index
    %303 = vector.load %arg15[%c0_148, %c111_149] : memref<32x296xf32, #tpu.memory_space<vmem>>, vector<32x37xf32>
    %304 = vector.broadcast %302 : vector<1x1xf32> to vector<32x37xf32>
    %305 = arith.mulf %304, %303 : vector<32x37xf32>
    %306 = arith.addf %298, %305 : vector<32x37xf32>
    %307 = arith.mulf %302, %97 : vector<1x1xf32>
    %308 = arith.subf %300, %307 : vector<1x1xf32>
    %c1_150 = arith.constant 1 : index
    %c4_151 = arith.constant 4 : index
    %309 = vector.load %arg12[%c1_150, %c4_151] : memref<8x8xf32, #tpu.memory_space<vmem>>, vector<1x1xf32>
    %310 = arith.mulf %309, %123 : vector<1x1xf32>
    %c0_152 = arith.constant 0 : index
    %c148_153 = arith.constant 148 : index
    %311 = vector.load %arg15[%c0_152, %c148_153] : memref<32x296xf32, #tpu.memory_space<vmem>>, vector<32x37xf32>
    %312 = vector.broadcast %310 : vector<1x1xf32> to vector<32x37xf32>
    %313 = arith.mulf %312, %311 : vector<32x37xf32>
    %314 = arith.addf %306, %313 : vector<32x37xf32>
    %315 = arith.mulf %310, %116 : vector<1x1xf32>
    %316 = arith.subf %308, %315 : vector<1x1xf32>
    %c1_154 = arith.constant 1 : index
    %c5_155 = arith.constant 5 : index
    %317 = vector.load %arg12[%c1_154, %c5_155] : memref<8x8xf32, #tpu.memory_space<vmem>>, vector<1x1xf32>
    %318 = arith.mulf %317, %142 : vector<1x1xf32>
    %c0_156 = arith.constant 0 : index
    %c185_157 = arith.constant 185 : index
    %319 = vector.load %arg15[%c0_156, %c185_157] : memref<32x296xf32, #tpu.memory_space<vmem>>, vector<32x37xf32>
    %320 = vector.broadcast %318 : vector<1x1xf32> to vector<32x37xf32>
    %321 = arith.mulf %320, %319 : vector<32x37xf32>
    %322 = arith.addf %314, %321 : vector<32x37xf32>
    %323 = arith.mulf %318, %135 : vector<1x1xf32>
    %324 = arith.subf %316, %323 : vector<1x1xf32>
    %c1_158 = arith.constant 1 : index
    %c6_159 = arith.constant 6 : index
    %325 = vector.load %arg12[%c1_158, %c6_159] : memref<8x8xf32, #tpu.memory_space<vmem>>, vector<1x1xf32>
    %326 = arith.mulf %325, %161 : vector<1x1xf32>
    %c0_160 = arith.constant 0 : index
    %c222_161 = arith.constant 222 : index
    %327 = vector.load %arg15[%c0_160, %c222_161] : memref<32x296xf32, #tpu.memory_space<vmem>>, vector<32x37xf32>
    %328 = vector.broadcast %326 : vector<1x1xf32> to vector<32x37xf32>
    %329 = arith.mulf %328, %327 : vector<32x37xf32>
    %330 = arith.addf %322, %329 : vector<32x37xf32>
    %331 = arith.mulf %326, %154 : vector<1x1xf32>
    %332 = arith.subf %324, %331 : vector<1x1xf32>
    %c1_162 = arith.constant 1 : index
    %c7_163 = arith.constant 7 : index
    %333 = vector.load %arg12[%c1_162, %c7_163] : memref<8x8xf32, #tpu.memory_space<vmem>>, vector<1x1xf32>
    %334 = arith.mulf %333, %180 : vector<1x1xf32>
    %c0_164 = arith.constant 0 : index
    %c259_165 = arith.constant 259 : index
    %335 = vector.load %arg15[%c0_164, %c259_165] : memref<32x296xf32, #tpu.memory_space<vmem>>, vector<32x37xf32>
    %336 = vector.broadcast %334 : vector<1x1xf32> to vector<32x37xf32>
    %337 = arith.mulf %336, %335 : vector<32x37xf32>
    %338 = arith.addf %330, %337 : vector<32x37xf32>
    %339 = arith.mulf %334, %173 : vector<1x1xf32>
    %340 = arith.subf %332, %339 : vector<1x1xf32>
    %341 = vector.broadcast %340 : vector<1x1xf32> to vector<32x37xf32>
    %342 = arith.addf %338, %341 : vector<32x37xf32>
    %cst_166 = arith.constant 0.000000e+00 : f32
    %343 = vector.broadcast %cst_166 : f32 to vector<32x37xf32>
    %344 = arith.cmpf oge, %342, %343 : vector<32x37xf32>
    %cst_167 = arith.constant 0.00999999977 : f32
    %345 = vector.broadcast %cst_167 : f32 to vector<32x37xf32>
    %346 = arith.mulf %345, %342 : vector<32x37xf32>
    %347 = arith.select %344, %342, %346 : vector<32x37xi1>, vector<32x37xf32>
    %cst_168 = arith.constant dense<0.000000e+00> : vector<32x18xf32>
    %348 = tpu.matmul %347, %181, %cst_168 {dimension_numbers = #tpu.dot_dimension_numbers<[1], [0], [0], [1], [0, 0, 1, 1], [], []>} : vector<32x37xf32>, vector<37x18xf32>, vector<32x18xf32> -> vector<32x18xf32>
    %cst_169 = arith.constant dense<0.000000e+00> : vector<32xf32>
    %349 = vector.multi_reduction <add>, %348, %cst_169 [1] : vector<32x18xf32> to vector<32xf32>
    %350 = vector.shape_cast %349 : vector<32xf32> to vector<32x1xf32>
    %cst_170 = arith.constant dense<0.000000e+00> : vector<1xf32>
    %351 = vector.multi_reduction <add>, %350, %cst_170 [0] : vector<32x1xf32> to vector<1xf32>
    %352 = vector.shape_cast %351 : vector<1xf32> to vector<1x1xf32>
    %353 = arith.mulf %348, %348 : vector<32x18xf32>
    %cst_171 = arith.constant dense<0.000000e+00> : vector<32xf32>
    %354 = vector.multi_reduction <add>, %353, %cst_171 [1] : vector<32x18xf32> to vector<32xf32>
    %355 = vector.shape_cast %354 : vector<32xf32> to vector<32x1xf32>
    %cst_172 = arith.constant dense<0.000000e+00> : vector<1xf32>
    %356 = vector.multi_reduction <add>, %355, %cst_172 [0] : vector<32x1xf32> to vector<1xf32>
    %357 = vector.shape_cast %356 : vector<1xf32> to vector<1x1xf32>
    %cst_173 = arith.constant 0.00173611112 : f32
    %358 = vector.broadcast %cst_173 : f32 to vector<1x1xf32>
    %359 = arith.mulf %352, %358 : vector<1x1xf32>
    %cst_174 = arith.constant 0.00173611112 : f32
    %360 = vector.broadcast %cst_174 : f32 to vector<1x1xf32>
    %361 = arith.mulf %357, %360 : vector<1x1xf32>
    %362 = arith.mulf %359, %359 : vector<1x1xf32>
    %363 = arith.subf %361, %362 : vector<1x1xf32>
    %364 = vector.broadcast %359 : vector<1x1xf32> to vector<32x18xf32>
    %365 = arith.subf %348, %364 : vector<32x18xf32>
    %cst_175 = arith.constant 9.99999974E-6 : f32
    %366 = vector.broadcast %cst_175 : f32 to vector<1x1xf32>
    %367 = arith.addf %363, %366 : vector<1x1xf32>
    %368 = math.rsqrt %367 : vector<1x1xf32>
    %369 = vector.broadcast %368 : vector<1x1xf32> to vector<32x18xf32>
    %370 = arith.mulf %365, %369 : vector<32x18xf32>
    %c0_176 = arith.constant 0 : index
    %c18 = arith.constant 18 : index
    %371 = vector.load %arg14[%c0_176, %c18] : memref<32x144xf32, #tpu.memory_space<vmem>>, vector<32x18xf32>
    tpu.vector_store %arg14[%c0_176, %c18], %370 {strides = array<i32>} : memref<32x144xf32, #tpu.memory_space<vmem>>, vector<32x18xf32>,
    %c0_177 = arith.constant 0 : index
    %c2_178 = arith.constant 2 : index
    %372 = vector.load %arg13[%c0_177, %c2_178] : memref<1x8xf32, #tpu.memory_space<vmem>>, vector<1x1xf32>
    %c2_179 = arith.constant 2 : index
    %c0_180 = arith.constant 0 : index
    %373 = vector.load %arg12[%c2_179, %c0_180] : memref<8x8xf32, #tpu.memory_space<vmem>>, vector<1x1xf32>
    %374 = arith.mulf %373, %47 : vector<1x1xf32>
    %c0_181 = arith.constant 0 : index
    %c0_182 = arith.constant 0 : index
    %375 = vector.load %arg15[%c0_181, %c0_182] : memref<32x296xf32, #tpu.memory_space<vmem>>, vector<32x37xf32>
    %376 = vector.broadcast %374 : vector<1x1xf32> to vector<32x37xf32>
    %377 = arith.mulf %376, %375 : vector<32x37xf32>
    %378 = arith.mulf %374, %40 : vector<1x1xf32>
    %379 = arith.subf %372, %378 : vector<1x1xf32>
    %c2_183 = arith.constant 2 : index
    %c1_184 = arith.constant 1 : index
    %380 = vector.load %arg12[%c2_183, %c1_184] : memref<8x8xf32, #tpu.memory_space<vmem>>, vector<1x1xf32>
    %381 = arith.mulf %380, %66 : vector<1x1xf32>
    %c0_185 = arith.constant 0 : index
    %c37_186 = arith.constant 37 : index
    %382 = vector.load %arg15[%c0_185, %c37_186] : memref<32x296xf32, #tpu.memory_space<vmem>>, vector<32x37xf32>
    %383 = vector.broadcast %381 : vector<1x1xf32> to vector<32x37xf32>
    %384 = arith.mulf %383, %382 : vector<32x37xf32>
    %385 = arith.addf %377, %384 : vector<32x37xf32>
    %386 = arith.mulf %381, %59 : vector<1x1xf32>
    %387 = arith.subf %379, %386 : vector<1x1xf32>
    %c2_187 = arith.constant 2 : index
    %c2_188 = arith.constant 2 : index
    %388 = vector.load %arg12[%c2_187, %c2_188] : memref<8x8xf32, #tpu.memory_space<vmem>>, vector<1x1xf32>
    %389 = arith.mulf %388, %85 : vector<1x1xf32>
    %c0_189 = arith.constant 0 : index
    %c74_190 = arith.constant 74 : index
    %390 = vector.load %arg15[%c0_189, %c74_190] : memref<32x296xf32, #tpu.memory_space<vmem>>, vector<32x37xf32>
    %391 = vector.broadcast %389 : vector<1x1xf32> to vector<32x37xf32>
    %392 = arith.mulf %391, %390 : vector<32x37xf32>
    %393 = arith.addf %385, %392 : vector<32x37xf32>
    %394 = arith.mulf %389, %78 : vector<1x1xf32>
    %395 = arith.subf %387, %394 : vector<1x1xf32>
    %c2_191 = arith.constant 2 : index
    %c3_192 = arith.constant 3 : index
    %396 = vector.load %arg12[%c2_191, %c3_192] : memref<8x8xf32, #tpu.memory_space<vmem>>, vector<1x1xf32>
    %397 = arith.mulf %396, %104 : vector<1x1xf32>
    %c0_193 = arith.constant 0 : index
    %c111_194 = arith.constant 111 : index
    %398 = vector.load %arg15[%c0_193, %c111_194] : memref<32x296xf32, #tpu.memory_space<vmem>>, vector<32x37xf32>
    %399 = vector.broadcast %397 : vector<1x1xf32> to vector<32x37xf32>
    %400 = arith.mulf %399, %398 : vector<32x37xf32>
    %401 = arith.addf %393, %400 : vector<32x37xf32>
    %402 = arith.mulf %397, %97 : vector<1x1xf32>
    %403 = arith.subf %395, %402 : vector<1x1xf32>
    %c2_195 = arith.constant 2 : index
    %c4_196 = arith.constant 4 : index
    %404 = vector.load %arg12[%c2_195, %c4_196] : memref<8x8xf32, #tpu.memory_space<vmem>>, vector<1x1xf32>
    %405 = arith.mulf %404, %123 : vector<1x1xf32>
    %c0_197 = arith.constant 0 : index
    %c148_198 = arith.constant 148 : index
    %406 = vector.load %arg15[%c0_197, %c148_198] : memref<32x296xf32, #tpu.memory_space<vmem>>, vector<32x37xf32>
    %407 = vector.broadcast %405 : vector<1x1xf32> to vector<32x37xf32>
    %408 = arith.mulf %407, %406 : vector<32x37xf32>
    %409 = arith.addf %401, %408 : vector<32x37xf32>
    %410 = arith.mulf %405, %116 : vector<1x1xf32>
    %411 = arith.subf %403, %410 : vector<1x1xf32>
    %c2_199 = arith.constant 2 : index
    %c5_200 = arith.constant 5 : index
    %412 = vector.load %arg12[%c2_199, %c5_200] : memref<8x8xf32, #tpu.memory_space<vmem>>, vector<1x1xf32>
    %413 = arith.mulf %412, %142 : vector<1x1xf32>
    %c0_201 = arith.constant 0 : index
    %c185_202 = arith.constant 185 : index
    %414 = vector.load %arg15[%c0_201, %c185_202] : memref<32x296xf32, #tpu.memory_space<vmem>>, vector<32x37xf32>
    %415 = vector.broadcast %413 : vector<1x1xf32> to vector<32x37xf32>
    %416 = arith.mulf %415, %414 : vector<32x37xf32>
    %417 = arith.addf %409, %416 : vector<32x37xf32>
    %418 = arith.mulf %413, %135 : vector<1x1xf32>
    %419 = arith.subf %411, %418 : vector<1x1xf32>
    %c2_203 = arith.constant 2 : index
    %c6_204 = arith.constant 6 : index
    %420 = vector.load %arg12[%c2_203, %c6_204] : memref<8x8xf32, #tpu.memory_space<vmem>>, vector<1x1xf32>
    %421 = arith.mulf %420, %161 : vector<1x1xf32>
    %c0_205 = arith.constant 0 : index
    %c222_206 = arith.constant 222 : index
    %422 = vector.load %arg15[%c0_205, %c222_206] : memref<32x296xf32, #tpu.memory_space<vmem>>, vector<32x37xf32>
    %423 = vector.broadcast %421 : vector<1x1xf32> to vector<32x37xf32>
    %424 = arith.mulf %423, %422 : vector<32x37xf32>
    %425 = arith.addf %417, %424 : vector<32x37xf32>
    %426 = arith.mulf %421, %154 : vector<1x1xf32>
    %427 = arith.subf %419, %426 : vector<1x1xf32>
    %c2_207 = arith.constant 2 : index
    %c7_208 = arith.constant 7 : index
    %428 = vector.load %arg12[%c2_207, %c7_208] : memref<8x8xf32, #tpu.memory_space<vmem>>, vector<1x1xf32>
    %429 = arith.mulf %428, %180 : vector<1x1xf32>
    %c0_209 = arith.constant 0 : index
    %c259_210 = arith.constant 259 : index
    %430 = vector.load %arg15[%c0_209, %c259_210] : memref<32x296xf32, #tpu.memory_space<vmem>>, vector<32x37xf32>
    %431 = vector.broadcast %429 : vector<1x1xf32> to vector<32x37xf32>
    %432 = arith.mulf %431, %430 : vector<32x37xf32>
    %433 = arith.addf %425, %432 : vector<32x37xf32>
    %434 = arith.mulf %429, %173 : vector<1x1xf32>
    %435 = arith.subf %427, %434 : vector<1x1xf32>
    %436 = vector.broadcast %435 : vector<1x1xf32> to vector<32x37xf32>
    %437 = arith.addf %433, %436 : vector<32x37xf32>
    %cst_211 = arith.constant 0.000000e+00 : f32
    %438 = vector.broadcast %cst_211 : f32 to vector<32x37xf32>
    %439 = arith.cmpf oge, %437, %438 : vector<32x37xf32>
    %cst_212 = arith.constant 0.00999999977 : f32
    %440 = vector.broadcast %cst_212 : f32 to vector<32x37xf32>
    %441 = arith.mulf %440, %437 : vector<32x37xf32>
    %442 = arith.select %439, %437, %441 : vector<32x37xi1>, vector<32x37xf32>
    %cst_213 = arith.constant dense<0.000000e+00> : vector<32x18xf32>
    %443 = tpu.matmul %442, %181, %cst_213 {dimension_numbers = #tpu.dot_dimension_numbers<[1], [0], [0], [1], [0, 0, 1, 1], [], []>} : vector<32x37xf32>, vector<37x18xf32>, vector<32x18xf32> -> vector<32x18xf32>
    %cst_214 = arith.constant dense<0.000000e+00> : vector<32xf32>
    %444 = vector.multi_reduction <add>, %443, %cst_214 [1] : vector<32x18xf32> to vector<32xf32>
    %445 = vector.shape_cast %444 : vector<32xf32> to vector<32x1xf32>
    %cst_215 = arith.constant dense<0.000000e+00> : vector<1xf32>
    %446 = vector.multi_reduction <add>, %445, %cst_215 [0] : vector<32x1xf32> to vector<1xf32>
    %447 = vector.shape_cast %446 : vector<1xf32> to vector<1x1xf32>
    %448 = arith.mulf %443, %443 : vector<32x18xf32>
    %cst_216 = arith.constant dense<0.000000e+00> : vector<32xf32>
    %449 = vector.multi_reduction <add>, %448, %cst_216 [1] : vector<32x18xf32> to vector<32xf32>
    %450 = vector.shape_cast %449 : vector<32xf32> to vector<32x1xf32>
    %cst_217 = arith.constant dense<0.000000e+00> : vector<1xf32>
    %451 = vector.multi_reduction <add>, %450, %cst_217 [0] : vector<32x1xf32> to vector<1xf32>
    %452 = vector.shape_cast %451 : vector<1xf32> to vector<1x1xf32>
    %cst_218 = arith.constant 0.00173611112 : f32
    %453 = vector.broadcast %cst_218 : f32 to vector<1x1xf32>
    %454 = arith.mulf %447, %453 : vector<1x1xf32>
    %cst_219 = arith.constant 0.00173611112 : f32
    %455 = vector.broadcast %cst_219 : f32 to vector<1x1xf32>
    %456 = arith.mulf %452, %455 : vector<1x1xf32>
    %457 = arith.mulf %454, %454 : vector<1x1xf32>
    %458 = arith.subf %456, %457 : vector<1x1xf32>
    %459 = vector.broadcast %454 : vector<1x1xf32> to vector<32x18xf32>
    %460 = arith.subf %443, %459 : vector<32x18xf32>
    %cst_220 = arith.constant 9.99999974E-6 : f32
    %461 = vector.broadcast %cst_220 : f32 to vector<1x1xf32>
    %462 = arith.addf %458, %461 : vector<1x1xf32>
    %463 = math.rsqrt %462 : vector<1x1xf32>
    %464 = vector.broadcast %463 : vector<1x1xf32> to vector<32x18xf32>
    %465 = arith.mulf %460, %464 : vector<32x18xf32>
    %c0_221 = arith.constant 0 : index
    %c36 = arith.constant 36 : index
    %466 = vector.load %arg14[%c0_221, %c36] : memref<32x144xf32, #tpu.memory_space<vmem>>, vector<32x18xf32>
    tpu.vector_store %arg14[%c0_221, %c36], %465 {strides = array<i32>} : memref<32x144xf32, #tpu.memory_space<vmem>>, vector<32x18xf32>,
    %c0_222 = arith.constant 0 : index
    %c3_223 = arith.constant 3 : index
    %467 = vector.load %arg13[%c0_222, %c3_223] : memref<1x8xf32, #tpu.memory_space<vmem>>, vector<1x1xf32>
    %c3_224 = arith.constant 3 : index
    %c0_225 = arith.constant 0 : index
    %468 = vector.load %arg12[%c3_224, %c0_225] : memref<8x8xf32, #tpu.memory_space<vmem>>, vector<1x1xf32>
    %469 = arith.mulf %468, %47 : vector<1x1xf32>
    %c0_226 = arith.constant 0 : index
    %c0_227 = arith.constant 0 : index
    %470 = vector.load %arg15[%c0_226, %c0_227] : memref<32x296xf32, #tpu.memory_space<vmem>>, vector<32x37xf32>
    %471 = vector.broadcast %469 : vector<1x1xf32> to vector<32x37xf32>
    %472 = arith.mulf %471, %470 : vector<32x37xf32>
    %473 = arith.mulf %469, %40 : vector<1x1xf32>
    %474 = arith.subf %467, %473 : vector<1x1xf32>
    %c3_228 = arith.constant 3 : index
    %c1_229 = arith.constant 1 : index
    %475 = vector.load %arg12[%c3_228, %c1_229] : memref<8x8xf32, #tpu.memory_space<vmem>>, vector<1x1xf32>
    %476 = arith.mulf %475, %66 : vector<1x1xf32>
    %c0_230 = arith.constant 0 : index
    %c37_231 = arith.constant 37 : index
    %477 = vector.load %arg15[%c0_230, %c37_231] : memref<32x296xf32, #tpu.memory_space<vmem>>, vector<32x37xf32>
    %478 = vector.broadcast %476 : vector<1x1xf32> to vector<32x37xf32>
    %479 = arith.mulf %478, %477 : vector<32x37xf32>
    %480 = arith.addf %472, %479 : vector<32x37xf32>
    %481 = arith.mulf %476, %59 : vector<1x1xf32>
    %482 = arith.subf %474, %481 : vector<1x1xf32>
    %c3_232 = arith.constant 3 : index
    %c2_233 = arith.constant 2 : index
    %483 = vector.load %arg12[%c3_232, %c2_233] : memref<8x8xf32, #tpu.memory_space<vmem>>, vector<1x1xf32>
    %484 = arith.mulf %483, %85 : vector<1x1xf32>
    %c0_234 = arith.constant 0 : index
    %c74_235 = arith.constant 74 : index
    %485 = vector.load %arg15[%c0_234, %c74_235] : memref<32x296xf32, #tpu.memory_space<vmem>>, vector<32x37xf32>
    %486 = vector.broadcast %484 : vector<1x1xf32> to vector<32x37xf32>
    %487 = arith.mulf %486, %485 : vector<32x37xf32>
    %488 = arith.addf %480, %487 : vector<32x37xf32>
    %489 = arith.mulf %484, %78 : vector<1x1xf32>
    %490 = arith.subf %482, %489 : vector<1x1xf32>
    %c3_236 = arith.constant 3 : index
    %c3_237 = arith.constant 3 : index
    %491 = vector.load %arg12[%c3_236, %c3_237] : memref<8x8xf32, #tpu.memory_space<vmem>>, vector<1x1xf32>
    %492 = arith.mulf %491, %104 : vector<1x1xf32>
    %c0_238 = arith.constant 0 : index
    %c111_239 = arith.constant 111 : index
    %493 = vector.load %arg15[%c0_238, %c111_239] : memref<32x296xf32, #tpu.memory_space<vmem>>, vector<32x37xf32>
    %494 = vector.broadcast %492 : vector<1x1xf32> to vector<32x37xf32>
    %495 = arith.mulf %494, %493 : vector<32x37xf32>
    %496 = arith.addf %488, %495 : vector<32x37xf32>
    %497 = arith.mulf %492, %97 : vector<1x1xf32>
    %498 = arith.subf %490, %497 : vector<1x1xf32>
    %c3_240 = arith.constant 3 : index
    %c4_241 = arith.constant 4 : index
    %499 = vector.load %arg12[%c3_240, %c4_241] : memref<8x8xf32, #tpu.memory_space<vmem>>, vector<1x1xf32>
    %500 = arith.mulf %499, %123 : vector<1x1xf32>
    %c0_242 = arith.constant 0 : index
    %c148_243 = arith.constant 148 : index
    %501 = vector.load %arg15[%c0_242, %c148_243] : memref<32x296xf32, #tpu.memory_space<vmem>>, vector<32x37xf32>
    %502 = vector.broadcast %500 : vector<1x1xf32> to vector<32x37xf32>
    %503 = arith.mulf %502, %501 : vector<32x37xf32>
    %504 = arith.addf %496, %503 : vector<32x37xf32>
    %505 = arith.mulf %500, %116 : vector<1x1xf32>
    %506 = arith.subf %498, %505 : vector<1x1xf32>
    %c3_244 = arith.constant 3 : index
    %c5_245 = arith.constant 5 : index
    %507 = vector.load %arg12[%c3_244, %c5_245] : memref<8x8xf32, #tpu.memory_space<vmem>>, vector<1x1xf32>
    %508 = arith.mulf %507, %142 : vector<1x1xf32>
    %c0_246 = arith.constant 0 : index
    %c185_247 = arith.constant 185 : index
    %509 = vector.load %arg15[%c0_246, %c185_247] : memref<32x296xf32, #tpu.memory_space<vmem>>, vector<32x37xf32>
    %510 = vector.broadcast %508 : vector<1x1xf32> to vector<32x37xf32>
    %511 = arith.mulf %510, %509 : vector<32x37xf32>
    %512 = arith.addf %504, %511 : vector<32x37xf32>
    %513 = arith.mulf %508, %135 : vector<1x1xf32>
    %514 = arith.subf %506, %513 : vector<1x1xf32>
    %c3_248 = arith.constant 3 : index
    %c6_249 = arith.constant 6 : index
    %515 = vector.load %arg12[%c3_248, %c6_249] : memref<8x8xf32, #tpu.memory_space<vmem>>, vector<1x1xf32>
    %516 = arith.mulf %515, %161 : vector<1x1xf32>
    %c0_250 = arith.constant 0 : index
    %c222_251 = arith.constant 222 : index
    %517 = vector.load %arg15[%c0_250, %c222_251] : memref<32x296xf32, #tpu.memory_space<vmem>>, vector<32x37xf32>
    %518 = vector.broadcast %516 : vector<1x1xf32> to vector<32x37xf32>
    %519 = arith.mulf %518, %517 : vector<32x37xf32>
    %520 = arith.addf %512, %519 : vector<32x37xf32>
    %521 = arith.mulf %516, %154 : vector<1x1xf32>
    %522 = arith.subf %514, %521 : vector<1x1xf32>
    %c3_252 = arith.constant 3 : index
    %c7_253 = arith.constant 7 : index
    %523 = vector.load %arg12[%c3_252, %c7_253] : memref<8x8xf32, #tpu.memory_space<vmem>>, vector<1x1xf32>
    %524 = arith.mulf %523, %180 : vector<1x1xf32>
    %c0_254 = arith.constant 0 : index
    %c259_255 = arith.constant 259 : index
    %525 = vector.load %arg15[%c0_254, %c259_255] : memref<32x296xf32, #tpu.memory_space<vmem>>, vector<32x37xf32>
    %526 = vector.broadcast %524 : vector<1x1xf32> to vector<32x37xf32>
    %527 = arith.mulf %526, %525 : vector<32x37xf32>
    %528 = arith.addf %520, %527 : vector<32x37xf32>
    %529 = arith.mulf %524, %173 : vector<1x1xf32>
    %530 = arith.subf %522, %529 : vector<1x1xf32>
    %531 = vector.broadcast %530 : vector<1x1xf32> to vector<32x37xf32>
    %532 = arith.addf %528, %531 : vector<32x37xf32>
    %cst_256 = arith.constant 0.000000e+00 : f32
    %533 = vector.broadcast %cst_256 : f32 to vector<32x37xf32>
    %534 = arith.cmpf oge, %532, %533 : vector<32x37xf32>
    %cst_257 = arith.constant 0.00999999977 : f32
    %535 = vector.broadcast %cst_257 : f32 to vector<32x37xf32>
    %536 = arith.mulf %535, %532 : vector<32x37xf32>
    %537 = arith.select %534, %532, %536 : vector<32x37xi1>, vector<32x37xf32>
    %cst_258 = arith.constant dense<0.000000e+00> : vector<32x18xf32>
    %538 = tpu.matmul %537, %181, %cst_258 {dimension_numbers = #tpu.dot_dimension_numbers<[1], [0], [0], [1], [0, 0, 1, 1], [], []>} : vector<32x37xf32>, vector<37x18xf32>, vector<32x18xf32> -> vector<32x18xf32>
    %cst_259 = arith.constant dense<0.000000e+00> : vector<32xf32>
    %539 = vector.multi_reduction <add>, %538, %cst_259 [1] : vector<32x18xf32> to vector<32xf32>
    %540 = vector.shape_cast %539 : vector<32xf32> to vector<32x1xf32>
    %cst_260 = arith.constant dense<0.000000e+00> : vector<1xf32>
    %541 = vector.multi_reduction <add>, %540, %cst_260 [0] : vector<32x1xf32> to vector<1xf32>
    %542 = vector.shape_cast %541 : vector<1xf32> to vector<1x1xf32>
    %543 = arith.mulf %538, %538 : vector<32x18xf32>
    %cst_261 = arith.constant dense<0.000000e+00> : vector<32xf32>
    %544 = vector.multi_reduction <add>, %543, %cst_261 [1] : vector<32x18xf32> to vector<32xf32>
    %545 = vector.shape_cast %544 : vector<32xf32> to vector<32x1xf32>
    %cst_262 = arith.constant dense<0.000000e+00> : vector<1xf32>
    %546 = vector.multi_reduction <add>, %545, %cst_262 [0] : vector<32x1xf32> to vector<1xf32>
    %547 = vector.shape_cast %546 : vector<1xf32> to vector<1x1xf32>
    %cst_263 = arith.constant 0.00173611112 : f32
    %548 = vector.broadcast %cst_263 : f32 to vector<1x1xf32>
    %549 = arith.mulf %542, %548 : vector<1x1xf32>
    %cst_264 = arith.constant 0.00173611112 : f32
    %550 = vector.broadcast %cst_264 : f32 to vector<1x1xf32>
    %551 = arith.mulf %547, %550 : vector<1x1xf32>
    %552 = arith.mulf %549, %549 : vector<1x1xf32>
    %553 = arith.subf %551, %552 : vector<1x1xf32>
    %554 = vector.broadcast %549 : vector<1x1xf32> to vector<32x18xf32>
    %555 = arith.subf %538, %554 : vector<32x18xf32>
    %cst_265 = arith.constant 9.99999974E-6 : f32
    %556 = vector.broadcast %cst_265 : f32 to vector<1x1xf32>
    %557 = arith.addf %553, %556 : vector<1x1xf32>
    %558 = math.rsqrt %557 : vector<1x1xf32>
    %559 = vector.broadcast %558 : vector<1x1xf32> to vector<32x18xf32>
    %560 = arith.mulf %555, %559 : vector<32x18xf32>
    %c0_266 = arith.constant 0 : index
    %c54 = arith.constant 54 : index
    %561 = vector.load %arg14[%c0_266, %c54] : memref<32x144xf32, #tpu.memory_space<vmem>>, vector<32x18xf32>
    tpu.vector_store %arg14[%c0_266, %c54], %560 {strides = array<i32>} : memref<32x144xf32, #tpu.memory_space<vmem>>, vector<32x18xf32>,
    %c0_267 = arith.constant 0 : index
    %c4_268 = arith.constant 4 : index
    %562 = vector.load %arg13[%c0_267, %c4_268] : memref<1x8xf32, #tpu.memory_space<vmem>>, vector<1x1xf32>
    %c4_269 = arith.constant 4 : index
    %c0_270 = arith.constant 0 : index
    %563 = vector.load %arg12[%c4_269, %c0_270] : memref<8x8xf32, #tpu.memory_space<vmem>>, vector<1x1xf32>
    %564 = arith.mulf %563, %47 : vector<1x1xf32>
    %c0_271 = arith.constant 0 : index
    %c0_272 = arith.constant 0 : index
    %565 = vector.load %arg15[%c0_271, %c0_272] : memref<32x296xf32, #tpu.memory_space<vmem>>, vector<32x37xf32>
    %566 = vector.broadcast %564 : vector<1x1xf32> to vector<32x37xf32>
    %567 = arith.mulf %566, %565 : vector<32x37xf32>
    %568 = arith.mulf %564, %40 : vector<1x1xf32>
    %569 = arith.subf %562, %568 : vector<1x1xf32>
    %c4_273 = arith.constant 4 : index
    %c1_274 = arith.constant 1 : index
    %570 = vector.load %arg12[%c4_273, %c1_274] : memref<8x8xf32, #tpu.memory_space<vmem>>, vector<1x1xf32>
    %571 = arith.mulf %570, %66 : vector<1x1xf32>
    %c0_275 = arith.constant 0 : index
    %c37_276 = arith.constant 37 : index
    %572 = vector.load %arg15[%c0_275, %c37_276] : memref<32x296xf32, #tpu.memory_space<vmem>>, vector<32x37xf32>
    %573 = vector.broadcast %571 : vector<1x1xf32> to vector<32x37xf32>
    %574 = arith.mulf %573, %572 : vector<32x37xf32>
    %575 = arith.addf %567, %574 : vector<32x37xf32>
    %576 = arith.mulf %571, %59 : vector<1x1xf32>
    %577 = arith.subf %569, %576 : vector<1x1xf32>
    %c4_277 = arith.constant 4 : index
    %c2_278 = arith.constant 2 : index
    %578 = vector.load %arg12[%c4_277, %c2_278] : memref<8x8xf32, #tpu.memory_space<vmem>>, vector<1x1xf32>
    %579 = arith.mulf %578, %85 : vector<1x1xf32>
    %c0_279 = arith.constant 0 : index
    %c74_280 = arith.constant 74 : index
    %580 = vector.load %arg15[%c0_279, %c74_280] : memref<32x296xf32, #tpu.memory_space<vmem>>, vector<32x37xf32>
    %581 = vector.broadcast %579 : vector<1x1xf32> to vector<32x37xf32>
    %582 = arith.mulf %581, %580 : vector<32x37xf32>
    %583 = arith.addf %575, %582 : vector<32x37xf32>
    %584 = arith.mulf %579, %78 : vector<1x1xf32>
    %585 = arith.subf %577, %584 : vector<1x1xf32>
    %c4_281 = arith.constant 4 : index
    %c3_282 = arith.constant 3 : index
    %586 = vector.load %arg12[%c4_281, %c3_282] : memref<8x8xf32, #tpu.memory_space<vmem>>, vector<1x1xf32>
    %587 = arith.mulf %586, %104 : vector<1x1xf32>
    %c0_283 = arith.constant 0 : index
    %c111_284 = arith.constant 111 : index
    %588 = vector.load %arg15[%c0_283, %c111_284] : memref<32x296xf32, #tpu.memory_space<vmem>>, vector<32x37xf32>
    %589 = vector.broadcast %587 : vector<1x1xf32> to vector<32x37xf32>
    %590 = arith.mulf %589, %588 : vector<32x37xf32>
    %591 = arith.addf %583, %590 : vector<32x37xf32>
    %592 = arith.mulf %587, %97 : vector<1x1xf32>
    %593 = arith.subf %585, %592 : vector<1x1xf32>
    %c4_285 = arith.constant 4 : index
    %c4_286 = arith.constant 4 : index
    %594 = vector.load %arg12[%c4_285, %c4_286] : memref<8x8xf32, #tpu.memory_space<vmem>>, vector<1x1xf32>
    %595 = arith.mulf %594, %123 : vector<1x1xf32>
    %c0_287 = arith.constant 0 : index
    %c148_288 = arith.constant 148 : index
    %596 = vector.load %arg15[%c0_287, %c148_288] : memref<32x296xf32, #tpu.memory_space<vmem>>, vector<32x37xf32>
    %597 = vector.broadcast %595 : vector<1x1xf32> to vector<32x37xf32>
    %598 = arith.mulf %597, %596 : vector<32x37xf32>
    %599 = arith.addf %591, %598 : vector<32x37xf32>
    %600 = arith.mulf %595, %116 : vector<1x1xf32>
    %601 = arith.subf %593, %600 : vector<1x1xf32>
    %c4_289 = arith.constant 4 : index
    %c5_290 = arith.constant 5 : index
    %602 = vector.load %arg12[%c4_289, %c5_290] : memref<8x8xf32, #tpu.memory_space<vmem>>, vector<1x1xf32>
    %603 = arith.mulf %602, %142 : vector<1x1xf32>
    %c0_291 = arith.constant 0 : index
    %c185_292 = arith.constant 185 : index
    %604 = vector.load %arg15[%c0_291, %c185_292] : memref<32x296xf32, #tpu.memory_space<vmem>>, vector<32x37xf32>
    %605 = vector.broadcast %603 : vector<1x1xf32> to vector<32x37xf32>
    %606 = arith.mulf %605, %604 : vector<32x37xf32>
    %607 = arith.addf %599, %606 : vector<32x37xf32>
    %608 = arith.mulf %603, %135 : vector<1x1xf32>
    %609 = arith.subf %601, %608 : vector<1x1xf32>
    %c4_293 = arith.constant 4 : index
    %c6_294 = arith.constant 6 : index
    %610 = vector.load %arg12[%c4_293, %c6_294] : memref<8x8xf32, #tpu.memory_space<vmem>>, vector<1x1xf32>
    %611 = arith.mulf %610, %161 : vector<1x1xf32>
    %c0_295 = arith.constant 0 : index
    %c222_296 = arith.constant 222 : index
    %612 = vector.load %arg15[%c0_295, %c222_296] : memref<32x296xf32, #tpu.memory_space<vmem>>, vector<32x37xf32>
    %613 = vector.broadcast %611 : vector<1x1xf32> to vector<32x37xf32>
    %614 = arith.mulf %613, %612 : vector<32x37xf32>
    %615 = arith.addf %607, %614 : vector<32x37xf32>
    %616 = arith.mulf %611, %154 : vector<1x1xf32>
    %617 = arith.subf %609, %616 : vector<1x1xf32>
    %c4_297 = arith.constant 4 : index
    %c7_298 = arith.constant 7 : index
    %618 = vector.load %arg12[%c4_297, %c7_298] : memref<8x8xf32, #tpu.memory_space<vmem>>, vector<1x1xf32>
    %619 = arith.mulf %618, %180 : vector<1x1xf32>
    %c0_299 = arith.constant 0 : index
    %c259_300 = arith.constant 259 : index
    %620 = vector.load %arg15[%c0_299, %c259_300] : memref<32x296xf32, #tpu.memory_space<vmem>>, vector<32x37xf32>
    %621 = vector.broadcast %619 : vector<1x1xf32> to vector<32x37xf32>
    %622 = arith.mulf %621, %620 : vector<32x37xf32>
    %623 = arith.addf %615, %622 : vector<32x37xf32>
    %624 = arith.mulf %619, %173 : vector<1x1xf32>
    %625 = arith.subf %617, %624 : vector<1x1xf32>
    %626 = vector.broadcast %625 : vector<1x1xf32> to vector<32x37xf32>
    %627 = arith.addf %623, %626 : vector<32x37xf32>
    %cst_301 = arith.constant 0.000000e+00 : f32
    %628 = vector.broadcast %cst_301 : f32 to vector<32x37xf32>
    %629 = arith.cmpf oge, %627, %628 : vector<32x37xf32>
    %cst_302 = arith.constant 0.00999999977 : f32
    %630 = vector.broadcast %cst_302 : f32 to vector<32x37xf32>
    %631 = arith.mulf %630, %627 : vector<32x37xf32>
    %632 = arith.select %629, %627, %631 : vector<32x37xi1>, vector<32x37xf32>
    %cst_303 = arith.constant dense<0.000000e+00> : vector<32x18xf32>
    %633 = tpu.matmul %632, %181, %cst_303 {dimension_numbers = #tpu.dot_dimension_numbers<[1], [0], [0], [1], [0, 0, 1, 1], [], []>} : vector<32x37xf32>, vector<37x18xf32>, vector<32x18xf32> -> vector<32x18xf32>
    %cst_304 = arith.constant dense<0.000000e+00> : vector<32xf32>
    %634 = vector.multi_reduction <add>, %633, %cst_304 [1] : vector<32x18xf32> to vector<32xf32>
    %635 = vector.shape_cast %634 : vector<32xf32> to vector<32x1xf32>
    %cst_305 = arith.constant dense<0.000000e+00> : vector<1xf32>
    %636 = vector.multi_reduction <add>, %635, %cst_305 [0] : vector<32x1xf32> to vector<1xf32>
    %637 = vector.shape_cast %636 : vector<1xf32> to vector<1x1xf32>
    %638 = arith.mulf %633, %633 : vector<32x18xf32>
    %cst_306 = arith.constant dense<0.000000e+00> : vector<32xf32>
    %639 = vector.multi_reduction <add>, %638, %cst_306 [1] : vector<32x18xf32> to vector<32xf32>
    %640 = vector.shape_cast %639 : vector<32xf32> to vector<32x1xf32>
    %cst_307 = arith.constant dense<0.000000e+00> : vector<1xf32>
    %641 = vector.multi_reduction <add>, %640, %cst_307 [0] : vector<32x1xf32> to vector<1xf32>
    %642 = vector.shape_cast %641 : vector<1xf32> to vector<1x1xf32>
    %cst_308 = arith.constant 0.00173611112 : f32
    %643 = vector.broadcast %cst_308 : f32 to vector<1x1xf32>
    %644 = arith.mulf %637, %643 : vector<1x1xf32>
    %cst_309 = arith.constant 0.00173611112 : f32
    %645 = vector.broadcast %cst_309 : f32 to vector<1x1xf32>
    %646 = arith.mulf %642, %645 : vector<1x1xf32>
    %647 = arith.mulf %644, %644 : vector<1x1xf32>
    %648 = arith.subf %646, %647 : vector<1x1xf32>
    %649 = vector.broadcast %644 : vector<1x1xf32> to vector<32x18xf32>
    %650 = arith.subf %633, %649 : vector<32x18xf32>
    %cst_310 = arith.constant 9.99999974E-6 : f32
    %651 = vector.broadcast %cst_310 : f32 to vector<1x1xf32>
    %652 = arith.addf %648, %651 : vector<1x1xf32>
    %653 = math.rsqrt %652 : vector<1x1xf32>
    %654 = vector.broadcast %653 : vector<1x1xf32> to vector<32x18xf32>
    %655 = arith.mulf %650, %654 : vector<32x18xf32>
    %c0_311 = arith.constant 0 : index
    %c72 = arith.constant 72 : index
    %656 = vector.load %arg14[%c0_311, %c72] : memref<32x144xf32, #tpu.memory_space<vmem>>, vector<32x18xf32>
    tpu.vector_store %arg14[%c0_311, %c72], %655 {strides = array<i32>} : memref<32x144xf32, #tpu.memory_space<vmem>>, vector<32x18xf32>,
    %c0_312 = arith.constant 0 : index
    %c5_313 = arith.constant 5 : index
    %657 = vector.load %arg13[%c0_312, %c5_313] : memref<1x8xf32, #tpu.memory_space<vmem>>, vector<1x1xf32>
    %c5_314 = arith.constant 5 : index
    %c0_315 = arith.constant 0 : index
    %658 = vector.load %arg12[%c5_314, %c0_315] : memref<8x8xf32, #tpu.memory_space<vmem>>, vector<1x1xf32>
    %659 = arith.mulf %658, %47 : vector<1x1xf32>
    %c0_316 = arith.constant 0 : index
    %c0_317 = arith.constant 0 : index
    %660 = vector.load %arg15[%c0_316, %c0_317] : memref<32x296xf32, #tpu.memory_space<vmem>>, vector<32x37xf32>
    %661 = vector.broadcast %659 : vector<1x1xf32> to vector<32x37xf32>
    %662 = arith.mulf %661, %660 : vector<32x37xf32>
    %663 = arith.mulf %659, %40 : vector<1x1xf32>
    %664 = arith.subf %657, %663 : vector<1x1xf32>
    %c5_318 = arith.constant 5 : index
    %c1_319 = arith.constant 1 : index
    %665 = vector.load %arg12[%c5_318, %c1_319] : memref<8x8xf32, #tpu.memory_space<vmem>>, vector<1x1xf32>
    %666 = arith.mulf %665, %66 : vector<1x1xf32>
    %c0_320 = arith.constant 0 : index
    %c37_321 = arith.constant 37 : index
    %667 = vector.load %arg15[%c0_320, %c37_321] : memref<32x296xf32, #tpu.memory_space<vmem>>, vector<32x37xf32>
    %668 = vector.broadcast %666 : vector<1x1xf32> to vector<32x37xf32>
    %669 = arith.mulf %668, %667 : vector<32x37xf32>
    %670 = arith.addf %662, %669 : vector<32x37xf32>
    %671 = arith.mulf %666, %59 : vector<1x1xf32>
    %672 = arith.subf %664, %671 : vector<1x1xf32>
    %c5_322 = arith.constant 5 : index
    %c2_323 = arith.constant 2 : index
    %673 = vector.load %arg12[%c5_322, %c2_323] : memref<8x8xf32, #tpu.memory_space<vmem>>, vector<1x1xf32>
    %674 = arith.mulf %673, %85 : vector<1x1xf32>
    %c0_324 = arith.constant 0 : index
    %c74_325 = arith.constant 74 : index
    %675 = vector.load %arg15[%c0_324, %c74_325] : memref<32x296xf32, #tpu.memory_space<vmem>>, vector<32x37xf32>
    %676 = vector.broadcast %674 : vector<1x1xf32> to vector<32x37xf32>
    %677 = arith.mulf %676, %675 : vector<32x37xf32>
    %678 = arith.addf %670, %677 : vector<32x37xf32>
    %679 = arith.mulf %674, %78 : vector<1x1xf32>
    %680 = arith.subf %672, %679 : vector<1x1xf32>
    %c5_326 = arith.constant 5 : index
    %c3_327 = arith.constant 3 : index
    %681 = vector.load %arg12[%c5_326, %c3_327] : memref<8x8xf32, #tpu.memory_space<vmem>>, vector<1x1xf32>
    %682 = arith.mulf %681, %104 : vector<1x1xf32>
    %c0_328 = arith.constant 0 : index
    %c111_329 = arith.constant 111 : index
    %683 = vector.load %arg15[%c0_328, %c111_329] : memref<32x296xf32, #tpu.memory_space<vmem>>, vector<32x37xf32>
    %684 = vector.broadcast %682 : vector<1x1xf32> to vector<32x37xf32>
    %685 = arith.mulf %684, %683 : vector<32x37xf32>
    %686 = arith.addf %678, %685 : vector<32x37xf32>
    %687 = arith.mulf %682, %97 : vector<1x1xf32>
    %688 = arith.subf %680, %687 : vector<1x1xf32>
    %c5_330 = arith.constant 5 : index
    %c4_331 = arith.constant 4 : index
    %689 = vector.load %arg12[%c5_330, %c4_331] : memref<8x8xf32, #tpu.memory_space<vmem>>, vector<1x1xf32>
    %690 = arith.mulf %689, %123 : vector<1x1xf32>
    %c0_332 = arith.constant 0 : index
    %c148_333 = arith.constant 148 : index
    %691 = vector.load %arg15[%c0_332, %c148_333] : memref<32x296xf32, #tpu.memory_space<vmem>>, vector<32x37xf32>
    %692 = vector.broadcast %690 : vector<1x1xf32> to vector<32x37xf32>
    %693 = arith.mulf %692, %691 : vector<32x37xf32>
    %694 = arith.addf %686, %693 : vector<32x37xf32>
    %695 = arith.mulf %690, %116 : vector<1x1xf32>
    %696 = arith.subf %688, %695 : vector<1x1xf32>
    %c5_334 = arith.constant 5 : index
    %c5_335 = arith.constant 5 : index
    %697 = vector.load %arg12[%c5_334, %c5_335] : memref<8x8xf32, #tpu.memory_space<vmem>>, vector<1x1xf32>
    %698 = arith.mulf %697, %142 : vector<1x1xf32>
    %c0_336 = arith.constant 0 : index
    %c185_337 = arith.constant 185 : index
    %699 = vector.load %arg15[%c0_336, %c185_337] : memref<32x296xf32, #tpu.memory_space<vmem>>, vector<32x37xf32>
    %700 = vector.broadcast %698 : vector<1x1xf32> to vector<32x37xf32>
    %701 = arith.mulf %700, %699 : vector<32x37xf32>
    %702 = arith.addf %694, %701 : vector<32x37xf32>
    %703 = arith.mulf %698, %135 : vector<1x1xf32>
    %704 = arith.subf %696, %703 : vector<1x1xf32>
    %c5_338 = arith.constant 5 : index
    %c6_339 = arith.constant 6 : index
    %705 = vector.load %arg12[%c5_338, %c6_339] : memref<8x8xf32, #tpu.memory_space<vmem>>, vector<1x1xf32>
    %706 = arith.mulf %705, %161 : vector<1x1xf32>
    %c0_340 = arith.constant 0 : index
    %c222_341 = arith.constant 222 : index
    %707 = vector.load %arg15[%c0_340, %c222_341] : memref<32x296xf32, #tpu.memory_space<vmem>>, vector<32x37xf32>
    %708 = vector.broadcast %706 : vector<1x1xf32> to vector<32x37xf32>
    %709 = arith.mulf %708, %707 : vector<32x37xf32>
    %710 = arith.addf %702, %709 : vector<32x37xf32>
    %711 = arith.mulf %706, %154 : vector<1x1xf32>
    %712 = arith.subf %704, %711 : vector<1x1xf32>
    %c5_342 = arith.constant 5 : index
    %c7_343 = arith.constant 7 : index
    %713 = vector.load %arg12[%c5_342, %c7_343] : memref<8x8xf32, #tpu.memory_space<vmem>>, vector<1x1xf32>
    %714 = arith.mulf %713, %180 : vector<1x1xf32>
    %c0_344 = arith.constant 0 : index
    %c259_345 = arith.constant 259 : index
    %715 = vector.load %arg15[%c0_344, %c259_345] : memref<32x296xf32, #tpu.memory_space<vmem>>, vector<32x37xf32>
    %716 = vector.broadcast %714 : vector<1x1xf32> to vector<32x37xf32>
    %717 = arith.mulf %716, %715 : vector<32x37xf32>
    %718 = arith.addf %710, %717 : vector<32x37xf32>
    %719 = arith.mulf %714, %173 : vector<1x1xf32>
    %720 = arith.subf %712, %719 : vector<1x1xf32>
    %721 = vector.broadcast %720 : vector<1x1xf32> to vector<32x37xf32>
    %722 = arith.addf %718, %721 : vector<32x37xf32>
    %cst_346 = arith.constant 0.000000e+00 : f32
    %723 = vector.broadcast %cst_346 : f32 to vector<32x37xf32>
    %724 = arith.cmpf oge, %722, %723 : vector<32x37xf32>
    %cst_347 = arith.constant 0.00999999977 : f32
    %725 = vector.broadcast %cst_347 : f32 to vector<32x37xf32>
    %726 = arith.mulf %725, %722 : vector<32x37xf32>
    %727 = arith.select %724, %722, %726 : vector<32x37xi1>, vector<32x37xf32>
    %cst_348 = arith.constant dense<0.000000e+00> : vector<32x18xf32>
    %728 = tpu.matmul %727, %181, %cst_348 {dimension_numbers = #tpu.dot_dimension_numbers<[1], [0], [0], [1], [0, 0, 1, 1], [], []>} : vector<32x37xf32>, vector<37x18xf32>, vector<32x18xf32> -> vector<32x18xf32>
    %cst_349 = arith.constant dense<0.000000e+00> : vector<32xf32>
    %729 = vector.multi_reduction <add>, %728, %cst_349 [1] : vector<32x18xf32> to vector<32xf32>
    %730 = vector.shape_cast %729 : vector<32xf32> to vector<32x1xf32>
    %cst_350 = arith.constant dense<0.000000e+00> : vector<1xf32>
    %731 = vector.multi_reduction <add>, %730, %cst_350 [0] : vector<32x1xf32> to vector<1xf32>
    %732 = vector.shape_cast %731 : vector<1xf32> to vector<1x1xf32>
    %733 = arith.mulf %728, %728 : vector<32x18xf32>
    %cst_351 = arith.constant dense<0.000000e+00> : vector<32xf32>
    %734 = vector.multi_reduction <add>, %733, %cst_351 [1] : vector<32x18xf32> to vector<32xf32>
    %735 = vector.shape_cast %734 : vector<32xf32> to vector<32x1xf32>
    %cst_352 = arith.constant dense<0.000000e+00> : vector<1xf32>
    %736 = vector.multi_reduction <add>, %735, %cst_352 [0] : vector<32x1xf32> to vector<1xf32>
    %737 = vector.shape_cast %736 : vector<1xf32> to vector<1x1xf32>
    %cst_353 = arith.constant 0.00173611112 : f32
    %738 = vector.broadcast %cst_353 : f32 to vector<1x1xf32>
    %739 = arith.mulf %732, %738 : vector<1x1xf32>
    %cst_354 = arith.constant 0.00173611112 : f32
    %740 = vector.broadcast %cst_354 : f32 to vector<1x1xf32>
    %741 = arith.mulf %737, %740 : vector<1x1xf32>
    %742 = arith.mulf %739, %739 : vector<1x1xf32>
    %743 = arith.subf %741, %742 : vector<1x1xf32>
    %744 = vector.broadcast %739 : vector<1x1xf32> to vector<32x18xf32>
    %745 = arith.subf %728, %744 : vector<32x18xf32>
    %cst_355 = arith.constant 9.99999974E-6 : f32
    %746 = vector.broadcast %cst_355 : f32 to vector<1x1xf32>
    %747 = arith.addf %743, %746 : vector<1x1xf32>
    %748 = math.rsqrt %747 : vector<1x1xf32>
    %749 = vector.broadcast %748 : vector<1x1xf32> to vector<32x18xf32>
    %750 = arith.mulf %745, %749 : vector<32x18xf32>
    %c0_356 = arith.constant 0 : index
    %c90 = arith.constant 90 : index
    %751 = vector.load %arg14[%c0_356, %c90] : memref<32x144xf32, #tpu.memory_space<vmem>>, vector<32x18xf32>
    tpu.vector_store %arg14[%c0_356, %c90], %750 {strides = array<i32>} : memref<32x144xf32, #tpu.memory_space<vmem>>, vector<32x18xf32>,
    %c0_357 = arith.constant 0 : index
    %c6_358 = arith.constant 6 : index
    %752 = vector.load %arg13[%c0_357, %c6_358] : memref<1x8xf32, #tpu.memory_space<vmem>>, vector<1x1xf32>
    %c6_359 = arith.constant 6 : index
    %c0_360 = arith.constant 0 : index
    %753 = vector.load %arg12[%c6_359, %c0_360] : memref<8x8xf32, #tpu.memory_space<vmem>>, vector<1x1xf32>
    %754 = arith.mulf %753, %47 : vector<1x1xf32>
    %c0_361 = arith.constant 0 : index
    %c0_362 = arith.constant 0 : index
    %755 = vector.load %arg15[%c0_361, %c0_362] : memref<32x296xf32, #tpu.memory_space<vmem>>, vector<32x37xf32>
    %756 = vector.broadcast %754 : vector<1x1xf32> to vector<32x37xf32>
    %757 = arith.mulf %756, %755 : vector<32x37xf32>
    %758 = arith.mulf %754, %40 : vector<1x1xf32>
    %759 = arith.subf %752, %758 : vector<1x1xf32>
    %c6_363 = arith.constant 6 : index
    %c1_364 = arith.constant 1 : index
    %760 = vector.load %arg12[%c6_363, %c1_364] : memref<8x8xf32, #tpu.memory_space<vmem>>, vector<1x1xf32>
    %761 = arith.mulf %760, %66 : vector<1x1xf32>
    %c0_365 = arith.constant 0 : index
    %c37_366 = arith.constant 37 : index
    %762 = vector.load %arg15[%c0_365, %c37_366] : memref<32x296xf32, #tpu.memory_space<vmem>>, vector<32x37xf32>
    %763 = vector.broadcast %761 : vector<1x1xf32> to vector<32x37xf32>
    %764 = arith.mulf %763, %762 : vector<32x37xf32>
    %765 = arith.addf %757, %764 : vector<32x37xf32>
    %766 = arith.mulf %761, %59 : vector<1x1xf32>
    %767 = arith.subf %759, %766 : vector<1x1xf32>
    %c6_367 = arith.constant 6 : index
    %c2_368 = arith.constant 2 : index
    %768 = vector.load %arg12[%c6_367, %c2_368] : memref<8x8xf32, #tpu.memory_space<vmem>>, vector<1x1xf32>
    %769 = arith.mulf %768, %85 : vector<1x1xf32>
    %c0_369 = arith.constant 0 : index
    %c74_370 = arith.constant 74 : index
    %770 = vector.load %arg15[%c0_369, %c74_370] : memref<32x296xf32, #tpu.memory_space<vmem>>, vector<32x37xf32>
    %771 = vector.broadcast %769 : vector<1x1xf32> to vector<32x37xf32>
    %772 = arith.mulf %771, %770 : vector<32x37xf32>
    %773 = arith.addf %765, %772 : vector<32x37xf32>
    %774 = arith.mulf %769, %78 : vector<1x1xf32>
    %775 = arith.subf %767, %774 : vector<1x1xf32>
    %c6_371 = arith.constant 6 : index
    %c3_372 = arith.constant 3 : index
    %776 = vector.load %arg12[%c6_371, %c3_372] : memref<8x8xf32, #tpu.memory_space<vmem>>, vector<1x1xf32>
    %777 = arith.mulf %776, %104 : vector<1x1xf32>
    %c0_373 = arith.constant 0 : index
    %c111_374 = arith.constant 111 : index
    %778 = vector.load %arg15[%c0_373, %c111_374] : memref<32x296xf32, #tpu.memory_space<vmem>>, vector<32x37xf32>
    %779 = vector.broadcast %777 : vector<1x1xf32> to vector<32x37xf32>
    %780 = arith.mulf %779, %778 : vector<32x37xf32>
    %781 = arith.addf %773, %780 : vector<32x37xf32>
    %782 = arith.mulf %777, %97 : vector<1x1xf32>
    %783 = arith.subf %775, %782 : vector<1x1xf32>
    %c6_375 = arith.constant 6 : index
    %c4_376 = arith.constant 4 : index
    %784 = vector.load %arg12[%c6_375, %c4_376] : memref<8x8xf32, #tpu.memory_space<vmem>>, vector<1x1xf32>
    %785 = arith.mulf %784, %123 : vector<1x1xf32>
    %c0_377 = arith.constant 0 : index
    %c148_378 = arith.constant 148 : index
    %786 = vector.load %arg15[%c0_377, %c148_378] : memref<32x296xf32, #tpu.memory_space<vmem>>, vector<32x37xf32>
    %787 = vector.broadcast %785 : vector<1x1xf32> to vector<32x37xf32>
    %788 = arith.mulf %787, %786 : vector<32x37xf32>
    %789 = arith.addf %781, %788 : vector<32x37xf32>
    %790 = arith.mulf %785, %116 : vector<1x1xf32>
    %791 = arith.subf %783, %790 : vector<1x1xf32>
    %c6_379 = arith.constant 6 : index
    %c5_380 = arith.constant 5 : index
    %792 = vector.load %arg12[%c6_379, %c5_380] : memref<8x8xf32, #tpu.memory_space<vmem>>, vector<1x1xf32>
    %793 = arith.mulf %792, %142 : vector<1x1xf32>
    %c0_381 = arith.constant 0 : index
    %c185_382 = arith.constant 185 : index
    %794 = vector.load %arg15[%c0_381, %c185_382] : memref<32x296xf32, #tpu.memory_space<vmem>>, vector<32x37xf32>
    %795 = vector.broadcast %793 : vector<1x1xf32> to vector<32x37xf32>
    %796 = arith.mulf %795, %794 : vector<32x37xf32>
    %797 = arith.addf %789, %796 : vector<32x37xf32>
    %798 = arith.mulf %793, %135 : vector<1x1xf32>
    %799 = arith.subf %791, %798 : vector<1x1xf32>
    %c6_383 = arith.constant 6 : index
    %c6_384 = arith.constant 6 : index
    %800 = vector.load %arg12[%c6_383, %c6_384] : memref<8x8xf32, #tpu.memory_space<vmem>>, vector<1x1xf32>
    %801 = arith.mulf %800, %161 : vector<1x1xf32>
    %c0_385 = arith.constant 0 : index
    %c222_386 = arith.constant 222 : index
    %802 = vector.load %arg15[%c0_385, %c222_386] : memref<32x296xf32, #tpu.memory_space<vmem>>, vector<32x37xf32>
    %803 = vector.broadcast %801 : vector<1x1xf32> to vector<32x37xf32>
    %804 = arith.mulf %803, %802 : vector<32x37xf32>
    %805 = arith.addf %797, %804 : vector<32x37xf32>
    %806 = arith.mulf %801, %154 : vector<1x1xf32>
    %807 = arith.subf %799, %806 : vector<1x1xf32>
    %c6_387 = arith.constant 6 : index
    %c7_388 = arith.constant 7 : index
    %808 = vector.load %arg12[%c6_387, %c7_388] : memref<8x8xf32, #tpu.memory_space<vmem>>, vector<1x1xf32>
    %809 = arith.mulf %808, %180 : vector<1x1xf32>
    %c0_389 = arith.constant 0 : index
    %c259_390 = arith.constant 259 : index
    %810 = vector.load %arg15[%c0_389, %c259_390] : memref<32x296xf32, #tpu.memory_space<vmem>>, vector<32x37xf32>
    %811 = vector.broadcast %809 : vector<1x1xf32> to vector<32x37xf32>
    %812 = arith.mulf %811, %810 : vector<32x37xf32>
    %813 = arith.addf %805, %812 : vector<32x37xf32>
    %814 = arith.mulf %809, %173 : vector<1x1xf32>
    %815 = arith.subf %807, %814 : vector<1x1xf32>
    %816 = vector.broadcast %815 : vector<1x1xf32> to vector<32x37xf32>
    %817 = arith.addf %813, %816 : vector<32x37xf32>
    %cst_391 = arith.constant 0.000000e+00 : f32
    %818 = vector.broadcast %cst_391 : f32 to vector<32x37xf32>
    %819 = arith.cmpf oge, %817, %818 : vector<32x37xf32>
    %cst_392 = arith.constant 0.00999999977 : f32
    %820 = vector.broadcast %cst_392 : f32 to vector<32x37xf32>
    %821 = arith.mulf %820, %817 : vector<32x37xf32>
    %822 = arith.select %819, %817, %821 : vector<32x37xi1>, vector<32x37xf32>
    %cst_393 = arith.constant dense<0.000000e+00> : vector<32x18xf32>
    %823 = tpu.matmul %822, %181, %cst_393 {dimension_numbers = #tpu.dot_dimension_numbers<[1], [0], [0], [1], [0, 0, 1, 1], [], []>} : vector<32x37xf32>, vector<37x18xf32>, vector<32x18xf32> -> vector<32x18xf32>
    %cst_394 = arith.constant dense<0.000000e+00> : vector<32xf32>
    %824 = vector.multi_reduction <add>, %823, %cst_394 [1] : vector<32x18xf32> to vector<32xf32>
    %825 = vector.shape_cast %824 : vector<32xf32> to vector<32x1xf32>
    %cst_395 = arith.constant dense<0.000000e+00> : vector<1xf32>
    %826 = vector.multi_reduction <add>, %825, %cst_395 [0] : vector<32x1xf32> to vector<1xf32>
    %827 = vector.shape_cast %826 : vector<1xf32> to vector<1x1xf32>
    %828 = arith.mulf %823, %823 : vector<32x18xf32>
    %cst_396 = arith.constant dense<0.000000e+00> : vector<32xf32>
    %829 = vector.multi_reduction <add>, %828, %cst_396 [1] : vector<32x18xf32> to vector<32xf32>
    %830 = vector.shape_cast %829 : vector<32xf32> to vector<32x1xf32>
    %cst_397 = arith.constant dense<0.000000e+00> : vector<1xf32>
    %831 = vector.multi_reduction <add>, %830, %cst_397 [0] : vector<32x1xf32> to vector<1xf32>
    %832 = vector.shape_cast %831 : vector<1xf32> to vector<1x1xf32>
    %cst_398 = arith.constant 0.00173611112 : f32
    %833 = vector.broadcast %cst_398 : f32 to vector<1x1xf32>
    %834 = arith.mulf %827, %833 : vector<1x1xf32>
    %cst_399 = arith.constant 0.00173611112 : f32
    %835 = vector.broadcast %cst_399 : f32 to vector<1x1xf32>
    %836 = arith.mulf %832, %835 : vector<1x1xf32>
    %837 = arith.mulf %834, %834 : vector<1x1xf32>
    %838 = arith.subf %836, %837 : vector<1x1xf32>
    %839 = vector.broadcast %834 : vector<1x1xf32> to vector<32x18xf32>
    %840 = arith.subf %823, %839 : vector<32x18xf32>
    %cst_400 = arith.constant 9.99999974E-6 : f32
    %841 = vector.broadcast %cst_400 : f32 to vector<1x1xf32>
    %842 = arith.addf %838, %841 : vector<1x1xf32>
    %843 = math.rsqrt %842 : vector<1x1xf32>
    %844 = vector.broadcast %843 : vector<1x1xf32> to vector<32x18xf32>
    %845 = arith.mulf %840, %844 : vector<32x18xf32>
    %c0_401 = arith.constant 0 : index
    %c108 = arith.constant 108 : index
    %846 = vector.load %arg14[%c0_401, %c108] : memref<32x144xf32, #tpu.memory_space<vmem>>, vector<32x18xf32>
    tpu.vector_store %arg14[%c0_401, %c108], %845 {strides = array<i32>} : memref<32x144xf32, #tpu.memory_space<vmem>>, vector<32x18xf32>,
    %c0_402 = arith.constant 0 : index
    %c7_403 = arith.constant 7 : index
    %847 = vector.load %arg13[%c0_402, %c7_403] : memref<1x8xf32, #tpu.memory_space<vmem>>, vector<1x1xf32>
    %c7_404 = arith.constant 7 : index
    %c0_405 = arith.constant 0 : index
    %848 = vector.load %arg12[%c7_404, %c0_405] : memref<8x8xf32, #tpu.memory_space<vmem>>, vector<1x1xf32>
    %849 = arith.mulf %848, %47 : vector<1x1xf32>
    %c0_406 = arith.constant 0 : index
    %c0_407 = arith.constant 0 : index
    %850 = vector.load %arg15[%c0_406, %c0_407] : memref<32x296xf32, #tpu.memory_space<vmem>>, vector<32x37xf32>
    %851 = vector.broadcast %849 : vector<1x1xf32> to vector<32x37xf32>
    %852 = arith.mulf %851, %850 : vector<32x37xf32>
    %853 = arith.mulf %849, %40 : vector<1x1xf32>
    %854 = arith.subf %847, %853 : vector<1x1xf32>
    %c7_408 = arith.constant 7 : index
    %c1_409 = arith.constant 1 : index
    %855 = vector.load %arg12[%c7_408, %c1_409] : memref<8x8xf32, #tpu.memory_space<vmem>>, vector<1x1xf32>
    %856 = arith.mulf %855, %66 : vector<1x1xf32>
    %c0_410 = arith.constant 0 : index
    %c37_411 = arith.constant 37 : index
    %857 = vector.load %arg15[%c0_410, %c37_411] : memref<32x296xf32, #tpu.memory_space<vmem>>, vector<32x37xf32>
    %858 = vector.broadcast %856 : vector<1x1xf32> to vector<32x37xf32>
    %859 = arith.mulf %858, %857 : vector<32x37xf32>
    %860 = arith.addf %852, %859 : vector<32x37xf32>
    %861 = arith.mulf %856, %59 : vector<1x1xf32>
    %862 = arith.subf %854, %861 : vector<1x1xf32>
    %c7_412 = arith.constant 7 : index
    %c2_413 = arith.constant 2 : index
    %863 = vector.load %arg12[%c7_412, %c2_413] : memref<8x8xf32, #tpu.memory_space<vmem>>, vector<1x1xf32>
    %864 = arith.mulf %863, %85 : vector<1x1xf32>
    %c0_414 = arith.constant 0 : index
    %c74_415 = arith.constant 74 : index
    %865 = vector.load %arg15[%c0_414, %c74_415] : memref<32x296xf32, #tpu.memory_space<vmem>>, vector<32x37xf32>
    %866 = vector.broadcast %864 : vector<1x1xf32> to vector<32x37xf32>
    %867 = arith.mulf %866, %865 : vector<32x37xf32>
    %868 = arith.addf %860, %867 : vector<32x37xf32>
    %869 = arith.mulf %864, %78 : vector<1x1xf32>
    %870 = arith.subf %862, %869 : vector<1x1xf32>
    %c7_416 = arith.constant 7 : index
    %c3_417 = arith.constant 3 : index
    %871 = vector.load %arg12[%c7_416, %c3_417] : memref<8x8xf32, #tpu.memory_space<vmem>>, vector<1x1xf32>
    %872 = arith.mulf %871, %104 : vector<1x1xf32>
    %c0_418 = arith.constant 0 : index
    %c111_419 = arith.constant 111 : index
    %873 = vector.load %arg15[%c0_418, %c111_419] : memref<32x296xf32, #tpu.memory_space<vmem>>, vector<32x37xf32>
    %874 = vector.broadcast %872 : vector<1x1xf32> to vector<32x37xf32>
    %875 = arith.mulf %874, %873 : vector<32x37xf32>
    %876 = arith.addf %868, %875 : vector<32x37xf32>
    %877 = arith.mulf %872, %97 : vector<1x1xf32>
    %878 = arith.subf %870, %877 : vector<1x1xf32>
    %c7_420 = arith.constant 7 : index
    %c4_421 = arith.constant 4 : index
    %879 = vector.load %arg12[%c7_420, %c4_421] : memref<8x8xf32, #tpu.memory_space<vmem>>, vector<1x1xf32>
    %880 = arith.mulf %879, %123 : vector<1x1xf32>
    %c0_422 = arith.constant 0 : index
    %c148_423 = arith.constant 148 : index
    %881 = vector.load %arg15[%c0_422, %c148_423] : memref<32x296xf32, #tpu.memory_space<vmem>>, vector<32x37xf32>
    %882 = vector.broadcast %880 : vector<1x1xf32> to vector<32x37xf32>
    %883 = arith.mulf %882, %881 : vector<32x37xf32>
    %884 = arith.addf %876, %883 : vector<32x37xf32>
    %885 = arith.mulf %880, %116 : vector<1x1xf32>
    %886 = arith.subf %878, %885 : vector<1x1xf32>
    %c7_424 = arith.constant 7 : index
    %c5_425 = arith.constant 5 : index
    %887 = vector.load %arg12[%c7_424, %c5_425] : memref<8x8xf32, #tpu.memory_space<vmem>>, vector<1x1xf32>
    %888 = arith.mulf %887, %142 : vector<1x1xf32>
    %c0_426 = arith.constant 0 : index
    %c185_427 = arith.constant 185 : index
    %889 = vector.load %arg15[%c0_426, %c185_427] : memref<32x296xf32, #tpu.memory_space<vmem>>, vector<32x37xf32>
    %890 = vector.broadcast %888 : vector<1x1xf32> to vector<32x37xf32>
    %891 = arith.mulf %890, %889 : vector<32x37xf32>
    %892 = arith.addf %884, %891 : vector<32x37xf32>
    %893 = arith.mulf %888, %135 : vector<1x1xf32>
    %894 = arith.subf %886, %893 : vector<1x1xf32>
    %c7_428 = arith.constant 7 : index
    %c6_429 = arith.constant 6 : index
    %895 = vector.load %arg12[%c7_428, %c6_429] : memref<8x8xf32, #tpu.memory_space<vmem>>, vector<1x1xf32>
    %896 = arith.mulf %895, %161 : vector<1x1xf32>
    %c0_430 = arith.constant 0 : index
    %c222_431 = arith.constant 222 : index
    %897 = vector.load %arg15[%c0_430, %c222_431] : memref<32x296xf32, #tpu.memory_space<vmem>>, vector<32x37xf32>
    %898 = vector.broadcast %896 : vector<1x1xf32> to vector<32x37xf32>
    %899 = arith.mulf %898, %897 : vector<32x37xf32>
    %900 = arith.addf %892, %899 : vector<32x37xf32>
    %901 = arith.mulf %896, %154 : vector<1x1xf32>
    %902 = arith.subf %894, %901 : vector<1x1xf32>
    %c7_432 = arith.constant 7 : index
    %c7_433 = arith.constant 7 : index
    %903 = vector.load %arg12[%c7_432, %c7_433] : memref<8x8xf32, #tpu.memory_space<vmem>>, vector<1x1xf32>
    %904 = arith.mulf %903, %180 : vector<1x1xf32>
    %c0_434 = arith.constant 0 : index
    %c259_435 = arith.constant 259 : index
    %905 = vector.load %arg15[%c0_434, %c259_435] : memref<32x296xf32, #tpu.memory_space<vmem>>, vector<32x37xf32>
    %906 = vector.broadcast %904 : vector<1x1xf32> to vector<32x37xf32>
    %907 = arith.mulf %906, %905 : vector<32x37xf32>
    %908 = arith.addf %900, %907 : vector<32x37xf32>
    %909 = arith.mulf %904, %173 : vector<1x1xf32>
    %910 = arith.subf %902, %909 : vector<1x1xf32>
    %911 = vector.broadcast %910 : vector<1x1xf32> to vector<32x37xf32>
    %912 = arith.addf %908, %911 : vector<32x37xf32>
    %cst_436 = arith.constant 0.000000e+00 : f32
    %913 = vector.broadcast %cst_436 : f32 to vector<32x37xf32>
    %914 = arith.cmpf oge, %912, %913 : vector<32x37xf32>
    %cst_437 = arith.constant 0.00999999977 : f32
    %915 = vector.broadcast %cst_437 : f32 to vector<32x37xf32>
    %916 = arith.mulf %915, %912 : vector<32x37xf32>
    %917 = arith.select %914, %912, %916 : vector<32x37xi1>, vector<32x37xf32>
    %cst_438 = arith.constant dense<0.000000e+00> : vector<32x18xf32>
    %918 = tpu.matmul %917, %181, %cst_438 {dimension_numbers = #tpu.dot_dimension_numbers<[1], [0], [0], [1], [0, 0, 1, 1], [], []>} : vector<32x37xf32>, vector<37x18xf32>, vector<32x18xf32> -> vector<32x18xf32>
    %cst_439 = arith.constant dense<0.000000e+00> : vector<32xf32>
    %919 = vector.multi_reduction <add>, %918, %cst_439 [1] : vector<32x18xf32> to vector<32xf32>
    %920 = vector.shape_cast %919 : vector<32xf32> to vector<32x1xf32>
    %cst_440 = arith.constant dense<0.000000e+00> : vector<1xf32>
    %921 = vector.multi_reduction <add>, %920, %cst_440 [0] : vector<32x1xf32> to vector<1xf32>
    %922 = vector.shape_cast %921 : vector<1xf32> to vector<1x1xf32>
    %923 = arith.mulf %918, %918 : vector<32x18xf32>
    %cst_441 = arith.constant dense<0.000000e+00> : vector<32xf32>
    %924 = vector.multi_reduction <add>, %923, %cst_441 [1] : vector<32x18xf32> to vector<32xf32>
    %925 = vector.shape_cast %924 : vector<32xf32> to vector<32x1xf32>
    %cst_442 = arith.constant dense<0.000000e+00> : vector<1xf32>
    %926 = vector.multi_reduction <add>, %925, %cst_442 [0] : vector<32x1xf32> to vector<1xf32>
    %927 = vector.shape_cast %926 : vector<1xf32> to vector<1x1xf32>
    %cst_443 = arith.constant 0.00173611112 : f32
    %928 = vector.broadcast %cst_443 : f32 to vector<1x1xf32>
    %929 = arith.mulf %922, %928 : vector<1x1xf32>
    %cst_444 = arith.constant 0.00173611112 : f32
    %930 = vector.broadcast %cst_444 : f32 to vector<1x1xf32>
    %931 = arith.mulf %927, %930 : vector<1x1xf32>
    %932 = arith.mulf %929, %929 : vector<1x1xf32>
    %933 = arith.subf %931, %932 : vector<1x1xf32>
    %934 = vector.broadcast %929 : vector<1x1xf32> to vector<32x18xf32>
    %935 = arith.subf %918, %934 : vector<32x18xf32>
    %cst_445 = arith.constant 9.99999974E-6 : f32
    %936 = vector.broadcast %cst_445 : f32 to vector<1x1xf32>
    %937 = arith.addf %933, %936 : vector<1x1xf32>
    %938 = math.rsqrt %937 : vector<1x1xf32>
    %939 = vector.broadcast %938 : vector<1x1xf32> to vector<32x18xf32>
    %940 = arith.mulf %935, %939 : vector<32x18xf32>
    %c0_446 = arith.constant 0 : index
    %c126 = arith.constant 126 : index
    %941 = vector.load %arg14[%c0_446, %c126] : memref<32x144xf32, #tpu.memory_space<vmem>>, vector<32x18xf32>
    tpu.vector_store %arg14[%c0_446, %c126], %940 {strides = array<i32>} : memref<32x144xf32, #tpu.memory_space<vmem>>, vector<32x18xf32>,
    return
  }
  func.func @transform_0(%arg0: i32) -> (i32, i32) {
    %c0_i32 = arith.constant 0 : i32
    %c0_i32_0 = arith.constant 0 : i32
    %c0_i32_1 = arith.constant 0 : i32
    return %c0_i32, %c0_i32_0 : i32, i32
  }
  func.func @transform_1(%arg0: i32) -> (i32, i32) {
    %c0_i32 = arith.constant 0 : i32
    %c0_i32_0 = arith.constant 0 : i32
    %c0_i32_1 = arith.constant 0 : i32
    return %c0_i32, %c0_i32_0 : i32, i32
  }
  func.func @transform_2(%arg0: i32) -> (i32, i32) {
    %c0_i32 = arith.constant 0 : i32
    %c0_i32_0 = arith.constant 0 : i32
    %c0_i32_1 = arith.constant 0 : i32
    return %c0_i32, %c0_i32_0 : i32, i32
  }
  func.func @transform_3(%arg0: i32) -> (i32, i32) {
    %c0_i32 = arith.constant 0 : i32
    %c0_i32_0 = arith.constant 0 : i32
    %c0_i32_1 = arith.constant 0 : i32
    return %c0_i32, %c0_i32_0 : i32, i32
  }
  func.func @transform_4(%arg0: i32) -> (i32, i32) {
    %c0_i32 = arith.constant 0 : i32
    %c0_i32_0 = arith.constant 0 : i32
    %c0_i32_1 = arith.constant 0 : i32
    return %c0_i32, %c0_i32_0 : i32, i32
  }
  func.func @transform_5(%arg0: i32) -> (i32, i32) {
    %c0_i32 = arith.constant 0 : i32
    %c0_i32_0 = arith.constant 0 : i32
    %c0_i32_1 = arith.constant 0 : i32
    return %c0_i32, %c0_i32_0 : i32, i32
  }
  func.func @transform_6(%arg0: i32) -> (i32, i32) {
    %c0_i32 = arith.constant 0 : i32
    %c0_i32_0 = arith.constant 0 : i32
    %c0_i32_1 = arith.constant 0 : i32
    return %c0_i32, %c0_i32_0 : i32, i32
  }
  func.func @transform_7(%arg0: i32) -> (i32, i32) {
    %c0_i32 = arith.constant 0 : i32
    %c0_i32_0 = arith.constant 0 : i32
    %c0_i32_1 = arith.constant 0 : i32
    return %c0_i32, %c0_i32_0 : i32, i32
  }
  func.func @transform_8(%arg0: i32) -> (i32, i32) {
    %c0_i32 = arith.constant 0 : i32
    %c0_i32_0 = arith.constant 0 : i32
    %c0_i32_1 = arith.constant 0 : i32
    return %c0_i32, %c0_i32_0 : i32, i32
  }
  func.func @transform_9(%arg0: i32) -> (i32, i32) {
    %c0_i32 = arith.constant 0 : i32
    %c0_i32_0 = arith.constant 0 : i32
    %c0_i32_1 = arith.constant 0 : i32
    return %c0_i32, %c0_i32_0 : i32, i32
  }
  func.func @transform_10(%arg0: i32) -> (i32, i32) {
    %c0_i32 = arith.constant 0 : i32
    %c0_i32_0 = arith.constant 0 : i32
    %c0_i32_1 = arith.constant 0 : i32
    return %c0_i32, %c0_i32_0 : i32, i32
  }
  func.func @transform_11(%arg0: i32) -> (i32, i32) {
    %c0_i32 = arith.constant 0 : i32
    %c0_i32_0 = arith.constant 0 : i32
    %c0_i32_1 = arith.constant 0 : i32
    return %c0_i32, %c0_i32_0 : i32, i32
  }
  func.func @transform_12(%arg0: i32) -> (i32, i32) {
    %c0_i32 = arith.constant 0 : i32
    %c0_i32_0 = arith.constant 0 : i32
    %c0_i32_1 = arith.constant 0 : i32
    return %c0_i32, %c0_i32_0 : i32, i32
  }
  func.func @transform_13(%arg0: i32) -> (i32, i32) {
    %c0_i32 = arith.constant 0 : i32
    %c0_i32_0 = arith.constant 0 : i32
    %c0_i32_1 = arith.constant 0 : i32
    return %c0_i32, %c0_i32_0 : i32, i32
  }
}

module attributes {stable_mosaic.version = 11 : i64} {
  func.func @_graph2_kernel(%arg0: i32, %arg1: memref<32x32xf32, #tpu.memory_space<vmem>>, %arg2: memref<32x144xf32, #tpu.memory_space<vmem>>, %arg3: memref<144x24xf32, #tpu.memory_space<vmem>>, %arg4: memref<1x24xf32, #tpu.memory_space<vmem>>, %arg5: memref<24x24xf32, #tpu.memory_space<vmem>>, %arg6: memref<1x24xf32, #tpu.memory_space<vmem>>, %arg7: memref<32x48xf32, #tpu.memory_space<vmem>>) attributes {dimension_semantics = [#tpu.dimension_semantics<arbitrary>], iteration_bounds = array<i64: 1>, scalar_prefetch = 0 : i64, scratch_operands = 0 : i64, tpu.core_type = #tpu.core_type<tc>, window_params = [{pipeline_mode = #tpu.pipeline_mode<synchronous>, transform_indices = @transform_0, window_bounds = array<i64: 32, 32>}, {pipeline_mode = #tpu.pipeline_mode<synchronous>, transform_indices = @transform_1, window_bounds = array<i64: 32, 144>}, {pipeline_mode = #tpu.pipeline_mode<synchronous>, transform_indices = @transform_2, window_bounds = array<i64: 144, 24>}, {pipeline_mode = #tpu.pipeline_mode<synchronous>, transform_indices = @transform_3, window_bounds = array<i64: 1, 24>}, {pipeline_mode = #tpu.pipeline_mode<synchronous>, transform_indices = @transform_4, window_bounds = array<i64: 24, 24>}, {pipeline_mode = #tpu.pipeline_mode<synchronous>, transform_indices = @transform_5, window_bounds = array<i64: 1, 24>}, {pipeline_mode = #tpu.pipeline_mode<synchronous>, transform_indices = @transform_6, window_bounds = array<i64: 32, 48>}]} {
    %c0 = arith.constant 0 : index
    %c0_0 = arith.constant 0 : index
    %0 = vector.load %arg1[%c0, %c0_0] : memref<32x32xf32, #tpu.memory_space<vmem>>, vector<32x32xf32>
    %c0_1 = arith.constant 0 : index
    %c0_2 = arith.constant 0 : index
    %1 = vector.load %arg2[%c0_1, %c0_2] : memref<32x144xf32, #tpu.memory_space<vmem>>, vector<32x144xf32>
    %cst = arith.constant dense<0.000000e+00> : vector<32x144xf32>
    %2 = tpu.matmul %0, %1, %cst {dimension_numbers = #tpu.dot_dimension_numbers<[1], [0], [0], [1], [0, 0, 1, 1], [], []>} : vector<32x32xf32>, vector<32x144xf32>, vector<32x144xf32> -> vector<32x144xf32>
    %c0_3 = arith.constant 0 : index
    %c0_4 = arith.constant 0 : index
    %3 = vector.load %arg3[%c0_3, %c0_4] : memref<144x24xf32, #tpu.memory_space<vmem>>, vector<144x24xf32>
    %cst_5 = arith.constant dense<0.000000e+00> : vector<32x24xf32>
    %4 = tpu.matmul %2, %3, %cst_5 {dimension_numbers = #tpu.dot_dimension_numbers<[1], [0], [0], [1], [0, 0, 1, 1], [], []>} : vector<32x144xf32>, vector<144x24xf32>, vector<32x24xf32> -> vector<32x24xf32>
    %c0_6 = arith.constant 0 : index
    %c0_7 = arith.constant 0 : index
    %5 = vector.load %arg4[%c0_6, %c0_7] : memref<1x24xf32, #tpu.memory_space<vmem>>, vector<1x24xf32>
    %6 = vector.broadcast %5 : vector<1x24xf32> to vector<32x24xf32>
    %7 = arith.subf %4, %6 : vector<32x24xf32>
    %cst_8 = arith.constant dense<0.000000e+00> : vector<32x24xf32>
    %8 = tpu.matmul %0, %7, %cst_8 {dimension_numbers = #tpu.dot_dimension_numbers<[1], [0], [0], [1], [0, 0, 1, 1], [], []>} : vector<32x32xf32>, vector<32x24xf32>, vector<32x24xf32> -> vector<32x24xf32>
    %c0_9 = arith.constant 0 : index
    %c0_10 = arith.constant 0 : index
    %9 = vector.load %arg5[%c0_9, %c0_10] : memref<24x24xf32, #tpu.memory_space<vmem>>, vector<24x24xf32>
    %cst_11 = arith.constant dense<0.000000e+00> : vector<32x24xf32>
    %10 = tpu.matmul %8, %9, %cst_11 {dimension_numbers = #tpu.dot_dimension_numbers<[1], [0], [0], [1], [0, 0, 1, 1], [], []>} : vector<32x24xf32>, vector<24x24xf32>, vector<32x24xf32> -> vector<32x24xf32>
    %c0_12 = arith.constant 0 : index
    %c0_13 = arith.constant 0 : index
    %11 = vector.load %arg6[%c0_12, %c0_13] : memref<1x24xf32, #tpu.memory_space<vmem>>, vector<1x24xf32>
    %12 = vector.broadcast %11 : vector<1x24xf32> to vector<32x24xf32>
    %13 = arith.subf %10, %12 : vector<32x24xf32>
    %c0_14 = arith.constant 0 : index
    %c0_15 = arith.constant 0 : index
    %14 = vector.load %arg7[%c0_14, %c0_15] : memref<32x48xf32, #tpu.memory_space<vmem>>, vector<32x24xf32>
    tpu.vector_store %arg7[%c0_14, %c0_15], %7 {strides = array<i32>} : memref<32x48xf32, #tpu.memory_space<vmem>>, vector<32x24xf32>,
    %c0_16 = arith.constant 0 : index
    %c24 = arith.constant 24 : index
    %15 = vector.load %arg7[%c0_16, %c24] : memref<32x48xf32, #tpu.memory_space<vmem>>, vector<32x24xf32>
    tpu.vector_store %arg7[%c0_16, %c24], %13 {strides = array<i32>} : memref<32x48xf32, #tpu.memory_space<vmem>>, vector<32x24xf32>,
    return
  }
  func.func @transform_0(%arg0: i32) -> (i32, i32) {
    %c0_i32 = arith.constant 0 : i32
    %c0_i32_0 = arith.constant 0 : i32
    %c0_i32_1 = arith.constant 0 : i32
    return %c0_i32, %c0_i32_0 : i32, i32
  }
  func.func @transform_1(%arg0: i32) -> (i32, i32) {
    %c0_i32 = arith.constant 0 : i32
    %c0_i32_0 = arith.constant 0 : i32
    %c0_i32_1 = arith.constant 0 : i32
    return %c0_i32, %c0_i32_0 : i32, i32
  }
  func.func @transform_2(%arg0: i32) -> (i32, i32) {
    %c0_i32 = arith.constant 0 : i32
    %c0_i32_0 = arith.constant 0 : i32
    %c0_i32_1 = arith.constant 0 : i32
    return %c0_i32, %c0_i32_0 : i32, i32
  }
  func.func @transform_3(%arg0: i32) -> (i32, i32) {
    %c0_i32 = arith.constant 0 : i32
    %c0_i32_0 = arith.constant 0 : i32
    %c0_i32_1 = arith.constant 0 : i32
    return %c0_i32, %c0_i32_0 : i32, i32
  }
  func.func @transform_4(%arg0: i32) -> (i32, i32) {
    %c0_i32 = arith.constant 0 : i32
    %c0_i32_0 = arith.constant 0 : i32
    %c0_i32_1 = arith.constant 0 : i32
    return %c0_i32, %c0_i32_0 : i32, i32
  }
  func.func @transform_5(%arg0: i32) -> (i32, i32) {
    %c0_i32 = arith.constant 0 : i32
    %c0_i32_0 = arith.constant 0 : i32
    %c0_i32_1 = arith.constant 0 : i32
    return %c0_i32, %c0_i32_0 : i32, i32
  }
  func.func @transform_6(%arg0: i32) -> (i32, i32) {
    %c0_i32 = arith.constant 0 : i32
    %c0_i32_0 = arith.constant 0 : i32
    %c0_i32_1 = arith.constant 0 : i32
    return %c0_i32, %c0_i32_0 : i32, i32
  }
}

module attributes {stable_mosaic.version = 11 : i64} {
  func.func @_graph2_kernel(%arg0: i32, %arg1: memref<32x32xf32, #tpu.memory_space<vmem>>, %arg2: memref<32x32xf32, #tpu.memory_space<vmem>>, %arg3: memref<32x16xf32, #tpu.memory_space<vmem>>, %arg4: memref<1x16xf32, #tpu.memory_space<vmem>>, %arg5: memref<16x16xf32, #tpu.memory_space<vmem>>, %arg6: memref<1x16xf32, #tpu.memory_space<vmem>>, %arg7: memref<32x32xf32, #tpu.memory_space<vmem>>) attributes {dimension_semantics = [#tpu.dimension_semantics<arbitrary>], iteration_bounds = array<i64: 1>, scalar_prefetch = 0 : i64, scratch_operands = 0 : i64, tpu.core_type = #tpu.core_type<tc>, window_params = [{pipeline_mode = #tpu.pipeline_mode<synchronous>, transform_indices = @transform_0, window_bounds = array<i64: 32, 32>}, {pipeline_mode = #tpu.pipeline_mode<synchronous>, transform_indices = @transform_1, window_bounds = array<i64: 32, 32>}, {pipeline_mode = #tpu.pipeline_mode<synchronous>, transform_indices = @transform_2, window_bounds = array<i64: 32, 16>}, {pipeline_mode = #tpu.pipeline_mode<synchronous>, transform_indices = @transform_3, window_bounds = array<i64: 1, 16>}, {pipeline_mode = #tpu.pipeline_mode<synchronous>, transform_indices = @transform_4, window_bounds = array<i64: 16, 16>}, {pipeline_mode = #tpu.pipeline_mode<synchronous>, transform_indices = @transform_5, window_bounds = array<i64: 1, 16>}, {pipeline_mode = #tpu.pipeline_mode<synchronous>, transform_indices = @transform_6, window_bounds = array<i64: 32, 32>}]} {
    %c0 = arith.constant 0 : index
    %c0_0 = arith.constant 0 : index
    %0 = vector.load %arg1[%c0, %c0_0] : memref<32x32xf32, #tpu.memory_space<vmem>>, vector<32x32xf32>
    %c0_1 = arith.constant 0 : index
    %c0_2 = arith.constant 0 : index
    %1 = vector.load %arg2[%c0_1, %c0_2] : memref<32x32xf32, #tpu.memory_space<vmem>>, vector<32x32xf32>
    %cst = arith.constant dense<0.000000e+00> : vector<32x32xf32>
    %2 = tpu.matmul %0, %1, %cst {dimension_numbers = #tpu.dot_dimension_numbers<[1], [0], [0], [1], [0, 0, 1, 1], [], []>} : vector<32x32xf32>, vector<32x32xf32>, vector<32x32xf32> -> vector<32x32xf32>
    %c0_3 = arith.constant 0 : index
    %c0_4 = arith.constant 0 : index
    %3 = vector.load %arg3[%c0_3, %c0_4] : memref<32x16xf32, #tpu.memory_space<vmem>>, vector<32x16xf32>
    %cst_5 = arith.constant dense<0.000000e+00> : vector<32x16xf32>
    %4 = tpu.matmul %2, %3, %cst_5 {dimension_numbers = #tpu.dot_dimension_numbers<[1], [0], [0], [1], [0, 0, 1, 1], [], []>} : vector<32x32xf32>, vector<32x16xf32>, vector<32x16xf32> -> vector<32x16xf32>
    %c0_6 = arith.constant 0 : index
    %c0_7 = arith.constant 0 : index
    %5 = vector.load %arg4[%c0_6, %c0_7] : memref<1x16xf32, #tpu.memory_space<vmem>>, vector<1x16xf32>
    %6 = vector.broadcast %5 : vector<1x16xf32> to vector<32x16xf32>
    %7 = arith.subf %4, %6 : vector<32x16xf32>
    %cst_8 = arith.constant dense<0.000000e+00> : vector<32x16xf32>
    %8 = tpu.matmul %0, %7, %cst_8 {dimension_numbers = #tpu.dot_dimension_numbers<[1], [0], [0], [1], [0, 0, 1, 1], [], []>} : vector<32x32xf32>, vector<32x16xf32>, vector<32x16xf32> -> vector<32x16xf32>
    %c0_9 = arith.constant 0 : index
    %c0_10 = arith.constant 0 : index
    %9 = vector.load %arg5[%c0_9, %c0_10] : memref<16x16xf32, #tpu.memory_space<vmem>>, vector<16x16xf32>
    %cst_11 = arith.constant dense<0.000000e+00> : vector<32x16xf32>
    %10 = tpu.matmul %8, %9, %cst_11 {dimension_numbers = #tpu.dot_dimension_numbers<[1], [0], [0], [1], [0, 0, 1, 1], [], []>} : vector<32x16xf32>, vector<16x16xf32>, vector<32x16xf32> -> vector<32x16xf32>
    %c0_12 = arith.constant 0 : index
    %c0_13 = arith.constant 0 : index
    %11 = vector.load %arg6[%c0_12, %c0_13] : memref<1x16xf32, #tpu.memory_space<vmem>>, vector<1x16xf32>
    %12 = vector.broadcast %11 : vector<1x16xf32> to vector<32x16xf32>
    %13 = arith.subf %10, %12 : vector<32x16xf32>
    %c0_14 = arith.constant 0 : index
    %c0_15 = arith.constant 0 : index
    %14 = vector.load %arg7[%c0_14, %c0_15] : memref<32x32xf32, #tpu.memory_space<vmem>>, vector<32x16xf32>
    tpu.vector_store %arg7[%c0_14, %c0_15], %7 {strides = array<i32>} : memref<32x32xf32, #tpu.memory_space<vmem>>, vector<32x16xf32>,
    %c0_16 = arith.constant 0 : index
    %c16 = arith.constant 16 : index
    %15 = vector.load %arg7[%c0_16, %c16] : memref<32x32xf32, #tpu.memory_space<vmem>>, vector<32x16xf32>
    tpu.vector_store %arg7[%c0_16, %c16], %13 {strides = array<i32>} : memref<32x32xf32, #tpu.memory_space<vmem>>, vector<32x16xf32>,
    return
  }
  func.func @transform_0(%arg0: i32) -> (i32, i32) {
    %c0_i32 = arith.constant 0 : i32
    %c0_i32_0 = arith.constant 0 : i32
    %c0_i32_1 = arith.constant 0 : i32
    return %c0_i32, %c0_i32_0 : i32, i32
  }
  func.func @transform_1(%arg0: i32) -> (i32, i32) {
    %c0_i32 = arith.constant 0 : i32
    %c0_i32_0 = arith.constant 0 : i32
    %c0_i32_1 = arith.constant 0 : i32
    return %c0_i32, %c0_i32_0 : i32, i32
  }
  func.func @transform_2(%arg0: i32) -> (i32, i32) {
    %c0_i32 = arith.constant 0 : i32
    %c0_i32_0 = arith.constant 0 : i32
    %c0_i32_1 = arith.constant 0 : i32
    return %c0_i32, %c0_i32_0 : i32, i32
  }
  func.func @transform_3(%arg0: i32) -> (i32, i32) {
    %c0_i32 = arith.constant 0 : i32
    %c0_i32_0 = arith.constant 0 : i32
    %c0_i32_1 = arith.constant 0 : i32
    return %c0_i32, %c0_i32_0 : i32, i32
  }
  func.func @transform_4(%arg0: i32) -> (i32, i32) {
    %c0_i32 = arith.constant 0 : i32
    %c0_i32_0 = arith.constant 0 : i32
    %c0_i32_1 = arith.constant 0 : i32
    return %c0_i32, %c0_i32_0 : i32, i32
  }
  func.func @transform_5(%arg0: i32) -> (i32, i32) {
    %c0_i32 = arith.constant 0 : i32
    %c0_i32_0 = arith.constant 0 : i32
    %c0_i32_1 = arith.constant 0 : i32
    return %c0_i32, %c0_i32_0 : i32, i32
  }
  func.func @transform_6(%arg0: i32) -> (i32, i32) {
    %c0_i32 = arith.constant 0 : i32
    %c0_i32_0 = arith.constant 0 : i32
    %c0_i32_1 = arith.constant 0 : i32
    return %c0_i32, %c0_i32_0 : i32, i32
  }
}

</mosaic_0001>

<bundles_post_ra>
// kernel: mcgp_forward.4
= control target key start
LH: loop header
LB: loop body
LE: loop exit
PB: predicated region body
PF: predicated region fallthrough
CT: control target
= control target key end

     0   :  { %v599_v3 = vmov 0.0   ;;  %v600_v4 = vmov 0.0|0.0   ;;  %vm35_vm0 = vcmask 261120   ;;  %vm155_vm1 = vcmask 130048   ;;  %s803_s1 = inlined_call_operand.vmem [shape: f32[32,144], index: 1, kind: input, shape index: {}]   ;;  %s804_s2 = inlined_call_operand.vmem [shape: f32[144,24], index: 2, kind: input, shape index: {}]   ;;  %s805_s0 = inlined_call_operand.vmem [shape: f32[32,32], index: 0, kind: input, shape index: {}]   ;;  %s806_s3 = inlined_call_operand.vmem [shape: f32[1,24], index: 3, kind: input, shape index: {}]   ;;  %s807_s6 = inlined_call_operand.vmem [shape: f32[32,48], index: 6, kind: output, shape index: {}]   ;;  %s808_s4 = inlined_call_operand.vmem [shape: f32[24,24], index: 4, kind: input, shape index: {}]   ;;  %s809_s5 = inlined_call_operand.vmem [shape: f32[1,24], index: 5, kind: input, shape index: {}]  }
   0x1   :  { %v28_v0 = vld [vmem:[%s803_s1 + $0x8] sm:$0xff]  ;;  %v30_v1 = vld [vmem:[%s803_s1 + $0x18] sm:$0xff]  ;;  %v27_v2 = vld [vmem:[%s803_s1] sm:$0xff]  ;;  %112 = vmatprep.mubr.f32.mxu0 %v599_v3  ;;  %557 = vmatprep.subr.bf16.mxu1 %v600_v4  ;;  %vm352_vm2 = vcmask 195584   ;;  %vm481_vm3 = vcmask 392384  }
   0x2   :  { %v549_v5 = vpack.c.bf16 %v30_v1, %v28_v0  ;;  %v29_v6 = vld [vmem:[%s803_s1 + $0x10] sm:$0xff]  ;;  %v32_v7 = vld [vmem:[%s803_s1 + $0x28] sm:$0xff]  ;;  %v34_v8 = vld [vmem:[%s803_s1 + $0x38] sm:$0xff] }
   0x3   :  { %v551_v9 = vpack.c.bf16 %v29_v6, %v27_v2  ;;  %v553_v10 = vpack.c.bf16 %v34_v8, %v32_v7  ;;  %v31_v11 = vld [vmem:[%s803_s1 + $0x20] sm:$0xff]  ;;  %v33_v12 = vld [vmem:[%s803_s1 + $0x30] sm:$0xff]  ;;  %v138_v15 = vld [vmem:[%s804_s2 + $0x8] sm:$0xff] }
   0x4   :  { %550 = vmatprep.subr.bf16.mxu0 %v549_v5  ;;  %v555_v13 = vpack.c.bf16 %v33_v12, %v31_v11  ;;  %v137_v14 = vld [vmem:[%s804_s2] sm:$0xff]  ;;  %v139_v16 = vld [vmem:[%s804_s2 + $0x10] sm:$0xff]  ;;  %v140_v18 = vld [vmem:[%s804_s2 + $0x18] sm:$0xff] }
   0x5   :  { %552 = vmatpush1.bf16.msra.mxu0 %v551_v9  ;;  %v558_v17 = vpack.c.bf16 %v138_v15, %v137_v14  ;;  %v561_v19 = vpack.c.bf16 %v140_v18, %v139_v16  ;;  %v23_v20 = vld [vmem:[%s805_s0] sm:$0xff]  ;;  %v142_v22 = vld [vmem:[%s804_s2 + $0x28] sm:$0xff]  ;;  %v143_v25 = vld [vmem:[%s804_s2 + $0x30] sm:$0xff] }
   0x6   :  { %554 = vmatprep.subr.bf16.mxu0 %v553_v10  ;;  %v141_v21 = vld [vmem:[%s804_s2 + $0x20] sm:$0xff]  ;;  %v688_v24 = vld [vmem:[%s805_s0 + $0x8] sm:$0xff]  ;;  %v144_v26 = vld [vmem:[%s804_s2 + $0x38] sm:$0xff] }
   0x7   :  { %559 = vmatpush1.bf16.msra.mxu1 %v558_v17  ;;  %v564_v23 = vpack.c.bf16 %v142_v22, %v141_v21  ;;  %v567_v27 = vpack.c.bf16 %v144_v26, %v143_v25  ;;  %v702_v28 = vld [vmem:[%s805_s0 + $0x10] sm:$0xff]  ;;  %v145_v29 = vld [vmem:[%s804_s2 + $0x40] sm:$0xff]  ;;  %v146_v30 = vld [vmem:[%s804_s2 + $0x48] sm:$0xff] }
   0x8   :  { %560 = vmatprep.subr.bf16.mxu1 %v600_v4  ;;  %v570_v31 = vpack.c.bf16 %v146_v30, %v145_v29  ;;  %v716_v32 = vld [vmem:[%s805_s0 + $0x18] sm:$0xff]  ;;  %v147_v33 = vld [vmem:[%s804_s2 + $0x50] sm:$0xff]  ;;  %v149_v36 = vld [vmem:[%s804_s2 + $0x60] sm:$0xff] }
   0x9   :  { %556 = vmatpush1.bf16.msra.mxu0 %v555_v13  ;;  %v148_v34 = vld [vmem:[%s804_s2 + $0x58] sm:$0xff]  ;;  %v150_v37 = vld [vmem:[%s804_s2 + $0x68] sm:$0xff]  ;;  %v151_v39 = vld [vmem:[%s804_s2 + $0x70] sm:$0xff] }
   0xa   :  { %v573_v35 = vpack.c.bf16 %v148_v34, %v147_v33  ;;  %v576_v38 = vpack.c.bf16 %v150_v37, %v149_v36  ;;  %v152_v40 = vld [vmem:[%s804_s2 + $0x78] sm:$0xff]  ;;  %v153_v42 = vld [vmem:[%s804_s2 + $0x80] sm:$0xff]  ;;  %v154_v43 = vld [vmem:[%s804_s2 + $0x88] sm:$0xff] }
   0xb   :  { %562 = vmatpush1.bf16.msra.mxu1 %v561_v19  ;;  %v579_v41 = vpack.c.bf16 %v152_v40, %v151_v39  ;;  %v582_v44 = vpack.c.bf16 %v154_v43, %v153_v42  ;;  %v498_v53 = vld [vmem:[%s806_s3] ss:$0 sm:$0xff]  ;;  %v350_v2 = vld [vmem:[%s808_s4 + $0x8] sm:$0xff]  ;;  %v351_v7 = vld [vmem:[%s808_s4 + $0x10] sm:$0xff] }
   0xc   :  { %490 = vmatmul.mubr.msk.f32.vlgmr.msra.gmra.mrb[0].mxu0 %vm35_vm0, %v23_v20  ;;  %563 = vmatprep.subr.bf16.mxu1 %v600_v4  ;;  %v349_v1 = vld [vmem:[%s808_s4] sm:$0xff]  ;;  %s601_s4 = smov 24  }
   0xd   :  { %118 = vmatprep.mubr.f32.mxu0 %v599_v3  ;;  %v592_v6 = vpack.c.bf16 %v350_v2, %v349_v1  ;;  %v507_v12 = vld [vmem:[%s809_s5] ss:$0 sm:$0xff] }
   0xf   :  { %565 = vmatpush1.bf16.msra.mxu1 %v564_v23 }
  0x10   :  { %491 = vmatmul.mubr.msk.f32.gmra.mrb[2].mxu0 %vm35_vm0, %v688_v24  ;;  %566 = vmatprep.subr.bf16.mxu1 %v600_v4 }
  0x11   :  { %124 = vmatprep.mubr.f32.mxu0 %v599_v3 }
  0x13   :  { %568 = vmatpush1.bf16.msra.mxu1 %v567_v27 }
  0x14   :  { %492 = vmatmul.mubr.msk.f32.gmra.mrb[4].mxu0 %vm35_vm0, %v702_v28  ;;  %569 = vmatprep.subr.bf16.mxu1 %v600_v4 }
  0x15   :  { %130 = vmatprep.mubr.f32.mxu0 %v599_v3 }
  0x17   :  { %571 = vmatpush1.bf16.msra.mxu1 %v570_v31 }
  0x18   :  { %493 = vmatmul.mubr.msk.f32.gmra.mrb[6].mxu0 %vm35_vm0, %v716_v32  ;;  %572 = vmatprep.subr.bf16.mxu1 %v600_v4 }
  0x19   :  { %531 = vmatprep.mubr.msk.f32.mxu0 %vm35_vm0, %v23_v20 }
  0x1b   :  { %574 = vmatpush1.bf16.msra.mxu1 %v573_v35 }
  0x1c   :  { %575 = vmatprep.subr.bf16.mxu1 %v600_v4 }
  0x1f   :  { %577 = vmatpush1.bf16.msra.mxu1 %v576_v38 }
  0x20   :  { %578 = vmatprep.subr.bf16.mxu1 %v600_v4 }
  0x23   :  { %580 = vmatpush1.bf16.msra.mxu1 %v579_v41 }
  0x24   :  { %581 = vmatprep.subr.bf16.mxu1 %v600_v4 }
  0x27   :  { %583 = vmatpush1.bf16.msra.mxu1 %v582_v44 }
  0xdf   :  { %v114_v45 = vpop.f32.mrb[0].mxu0 }
  0xe0   :  { %v116_v46 = vpop.f32.mrb[1].mxu0 }
  0xe1   :  { %494 = vmatprep.mubr.msk.f32.mxu1 %vm155_vm1, %v116_v46 }
  0xe2   :  { %233 = vmatmul.mubr.f32.vlgmr.msra.gmra.mrb[0].mxu1 %v114_v45 }
  0xe3   :  { %v120_v47 = vpop.f32.mrb[2].mxu0 }
  0xe4   :  { %v122_v48 = vpop.f32.mrb[3].mxu0 }
  0xe5   :  { %495 = vmatprep.mubr.msk.f32.mxu1 %vm155_vm1, %v122_v48 }
  0xe6   :  { %238 = vmatmul.mubr.f32.gmra.mrb[2].mxu1 %v120_v47 }
  0xe7   :  { %v126_v49 = vpop.f32.mrb[4].mxu0 }
  0xe8   :  { %v128_v50 = vpop.f32.mrb[5].mxu0 }
  0xe9   :  { %496 = vmatprep.mubr.msk.f32.mxu1 %vm155_vm1, %v128_v50 }
  0xea   :  { %243 = vmatmul.mubr.f32.gmra.mrb[4].mxu1 %v126_v49 }
  0xeb   :  { %v132_v51 = vpop.f32.mrb[6].mxu0 }
  0xec   :  { %v134_v52 = vpop.f32.mrb[7].mxu0 }
  0xed   :  { %497 = vmatprep.mubr.msk.f32.mxu1 %vm155_vm1, %v134_v52 }
  0xee   :  { %248 = vmatmul.mubr.f32.gmra.mrb[6].mxu1 %v132_v51 }
 0x1b5   :  { %v234_v54 = vpop.f32.mrb[0].mxu1 }
 0x1b6   :  { %v260_v55 = vsub.f32 %v234_v54, %v498_v53  ;;  %v236_v56 = vpop.f32.mrb[1].mxu1 }
 0x1b8   :  { %461 = vst.msk [vmem:[%s807_s6] sm:$0xff] %vm352_vm2, %v260_v55 }
 0x1b9   :  { %v239_v57 = vpop.f32.mrb[2].mxu1 }
 0x1ba   :  { %v261_v58 = vsub.f32 %v239_v57, %v498_v53  ;;  %v241_v59 = vpop.f32.mrb[3].mxu1 }
 0x1bc   :  { %v584_v60 = vpack.c.bf16 %v261_v58, %v260_v55  ;;  %462 = vst.msk [vmem:[%s807_s6 + $0x8] sm:$0xff] %vm352_vm2, %v261_v58 }
 0x1bd   :  { %v244_v61 = vpop.f32.mrb[4].mxu1 }
 0x1be   :  { %v262_v62 = vsub.f32 %v244_v61, %v498_v53  ;;  %v246_v63 = vpop.f32.mrb[5].mxu1  ;;  %585 = vmatprep.subr.bf16.mxu0 %v584_v60 }
 0x1bf   :  { %587 = vmatpush3.bf16.msra.mxu0 %v584_v60 }
 0x1c0   :  { %463 = vst.msk [vmem:[%s807_s6 + $0x10] sm:$0xff] %vm352_vm2, %v262_v62 }
 0x1c1   :  { %v249_v0 = vpop.f32.mrb[6].mxu1 }
 0x1c2   :  { %v263_v3 = vsub.f32 %v249_v0, %v498_v53  ;;  %v251_v4 = vpop.f32.mrb[7].mxu1 }
 0x1c4   :  { %v588_v5 = vpack.c.bf16 %v263_v3, %v262_v62  ;;  %464 = vst.msk [vmem:[%s807_s6 + $0x18] sm:$0xff] %vm352_vm2, %v263_v3 }
 0x1c6   :  { %589 = vmatprep.subr.bf16.mxu0 %v588_v5 }
 0x1c7   :  { %591 = vmatpush3.bf16.msra.mxu0 %v588_v5 }
 0x1c8   :  { %593 = vmatprep.subr.bf16.mxu0 %v592_v6 }
 0x1ca   :  { %532 = vmatmul.mubr.msk.f32.vlgmr.msra.gmra.mrb[8].mxu0 %vm35_vm0, %v688_v24 }
 0x1cb   :  { %534 = vmatprep.mubr.msk.f32.mxu0 %vm35_vm0, %v702_v28  ;;  %595 = vmatpush3.bf16.msra.mxu0 %v592_v6 }
 0x1cc   :  { %541 = vmatprep.subr.mxu0 %v351_v7 }
 0x1ce   :  { %535 = vmatmul.mubr.msk.f32.gmra.mrb[10].mxu0 %vm35_vm0, %v716_v32 }
 0x1cf   :  { %542 = vmatpush3.msra.mxu0 %v351_v7 }
 0x29d   :  { %v533_v8 = vpop.f32.mrb[8].mxu0 }
 0x29e   :  { %v330_v9 = vpop.f32.mrb[9].mxu0 }
 0x29f   :  { %543 = vmatprep.mubr.msk.f32.mxu0 %vm352_vm2, %v330_v9 }
 0x2a0   :  { %544 = vmatmul.mubr.msk.f32.vlgmr.msra.gmra.mrb[12].mxu0 %vm352_vm2, %v533_v8 }
 0x2a1   :  { %v536_v10 = vpop.f32.mrb[10].mxu0 }
 0x2a2   :  { %v340_v11 = vpop.f32.mrb[11].mxu0 }
 0x2a3   :  { %546 = vmatprep.mubr.msk.f32.mxu0 %vm352_vm2, %v340_v11 }
 0x2a4   :  { %547 = vmatmul.mubr.msk.f32.gmra.mrb[14].mxu0 %vm352_vm2, %v536_v10 }
 0x373   :  { %v545_v13 = vpop.f32.mrb[12].mxu0 }
 0x374   :  { %v431_v14 = vpop.f32.mrb[13].mxu0  ;;  %v458_v18 = vsub.f32 %v545_v13, %v507_v12 }
 0x375   :  { %v457_v15 = vsub.f32 %v431_v14, %v507_v12 }
 0x377   :  { %469 = vrot.lane.b32.xlu0 %v457_v15, %s601_s4  ;;  %v548_v16 = vpop.f32.mrb[14].mxu0 }
 0x378   :  { %v441_v17 = vpop.f32.mrb[15].mxu0  ;;  %v460_v20 = vsub.f32 %v548_v16, %v507_v12 }
 0x379   :  { %v459_v19 = vsub.f32 %v441_v17, %v507_v12 }
 0x37b   :  { %471 = vrot.lane.b32.xlu0 %v458_v18, %s601_s4  ;;  %473 = vrot.lane.b32.xlu1 %v459_v19, %s601_s4 }
 0x37f   :  { %475 = vrot.lane.b32.xlu1 %v460_v20, %s601_s4 }
 0x3e9   :  { %v470_v21 = vpop.permute.xlu0 %469 }
 0x3ea   :  { %482 = vst.msk [vmem:[%s807_s6] sm:$0xff] %vm481_vm3, %v470_v21 }
 0x3ed   :  { %v472_v22 = vpop.permute.xlu0 %471  ;;  %v474_v23 = vpop.permute.xlu1 %473 }
 0x3ee   :  { %483 = vst.msk [vmem:[%s807_s6 + $0x8] sm:$0xff] %vm481_vm3, %v472_v22  ;;  %484 = vst.msk [vmem:[%s807_s6 + $0x10] sm:$0xff] %vm481_vm3, %v474_v23 }
 0x3f1   :  { %v476_v24 = vpop.permute.xlu1 %475 }
 0x3f2   :  { %485 = vst.msk [vmem:[%s807_s6 + $0x18] sm:$0xff] %vm481_vm3, %v476_v24 }

// kernel: mcgp_forward.5
= control target key start
LH: loop header
LB: loop body
LE: loop exit
PB: predicated region body
PF: predicated region fallthrough
CT: control target
= control target key end

     0   :  { %vm31_vm0 = vcmask 261120   ;;  %vm328_vm1 = vcmask 130048   ;;  %s595_s8 = smov 16   ;;  %vm457_vm2 = vcmask 261248   ;;  %s723_s1 = inlined_call_operand.vmem [shape: f32[32,32], index: 1, kind: input, shape index: {}]   ;;  %s724_s0 = inlined_call_operand.vmem [shape: f32[32,32], index: 0, kind: input, shape index: {}]   ;;  %s725_s2 = inlined_call_operand.vmem [shape: f32[32,16], index: 2, kind: input, shape index: {}]   ;;  %s726_s4 = inlined_call_operand.vmem [shape: f32[16,16], index: 4, kind: input, shape index: {}]   ;;  %s727_s3 = inlined_call_operand.vmem [shape: f32[1,16], index: 3, kind: input, shape index: {}]   ;;  %s728_s6 = inlined_call_operand.vmem [shape: f32[32,32], index: 6, kind: output, shape index: {}]   ;;  %s729_s5 = inlined_call_operand.vmem [shape: f32[1,16], index: 5, kind: input, shape index: {}]  }
   0x1   :  { %v27_v0 = vld [vmem:[%s723_s1] sm:$0xff]  ;;  %v28_v1 = vld [vmem:[%s723_s1 + $0x8] sm:$0xff]  ;;  %v29_v2 = vld [vmem:[%s723_s1 + $0x10] sm:$0xff] }
   0x2   :  { %v566_v3 = vpack.c.bf16 %v28_v1, %v27_v0  ;;  %v30_v4 = vld [vmem:[%s723_s1 + $0x18] sm:$0xff]  ;;  %v23_v5 = vld [vmem:[%s724_s0] sm:$0xff]  ;;  %v130_v8 = vld [vmem:[%s725_s2 + $0x8] sm:$0xff] }
   0x3   :  { %v570_v6 = vpack.c.bf16 %v30_v4, %v29_v2  ;;  %522 = vmatprep.mubr.msk.f32.mxu0 %vm31_vm0, %v23_v5  ;;  %v129_v7 = vld [vmem:[%s725_s2] sm:$0xff]  ;;  %v131_v9 = vld [vmem:[%s725_s2 + $0x10] sm:$0xff]  ;;  %v132_v10 = vld [vmem:[%s725_s2 + $0x18] sm:$0xff] }
   0x4   :  { %567 = vmatprep.subr.bf16.mxu0 %v566_v3  ;;  %v574_v11 = vpack.c.bf16 %v130_v8, %v129_v7  ;;  %v578_v12 = vpack.c.bf16 %v132_v10, %v131_v9  ;;  %v24_v13 = vld [vmem:[%s724_s0 + $0x8] sm:$0xff]  ;;  %v25_v14 = vld [vmem:[%s724_s0 + $0x10] sm:$0xff]  ;;  %v26_v15 = vld [vmem:[%s724_s0 + $0x18] sm:$0xff] }
   0x5   :  { %569 = vmatpush3.bf16.msra.mxu0 %v566_v3  ;;  %v326_v20 = vld [vmem:[%s726_s4] sm:$0xff]  ;;  %v327_v21 = vld [vmem:[%s726_s4 + $0x8] sm:$0xff] }
   0x6   :  { %571 = vmatprep.subr.bf16.mxu0 %v570_v6  ;;  %575 = vmatprep.subr.bf16.mxu1 %v574_v11  ;;  %v590_v22 = vpack.c.bf16 %v327_v21, %v326_v20  ;;  %v474_v23 = vld [vmem:[%s727_s3] ss:$0 sm:$0xff] }
   0x7   :  { %577 = vmatpush3.bf16.msra.mxu1 %v574_v11  ;;  %v483_v38 = vld [vmem:[%s729_s5] ss:$0 sm:$0xff] }
   0x8   :  { %579 = vmatprep.subr.bf16.mxu1 %v578_v12 }
   0x9   :  { %573 = vmatpush3.bf16.msra.mxu0 %v570_v6 }
   0xb   :  { %581 = vmatpush3.bf16.msra.mxu1 %v578_v12 }
   0xc   :  { %523 = vmatmul.mubr.msk.f32.vlgmr.msra.gmra.mrb[0].mxu0 %vm31_vm0, %v24_v13  ;;  %591 = vmatprep.subr.bf16.mxu1 %v590_v22 }
   0xd   :  { %525 = vmatprep.mubr.msk.f32.mxu0 %vm31_vm0, %v25_v14 }
  0x10   :  { %526 = vmatmul.mubr.msk.f32.gmra.mrb[2].mxu0 %vm31_vm0, %v26_v15 }
  0x11   :  { %550 = vmatprep.mubr.msk.f32.mxu0 %vm31_vm0, %v23_v5 }
  0xdf   :  { %v524_v16 = vpop.f32.mrb[0].mxu0 }
  0xe0   :  { %v110_v17 = vpop.f32.mrb[1].mxu0 }
  0xe1   :  { %536 = vmatprep.mubr.msk.f32.mxu1 %vm31_vm0, %v110_v17 }
  0xe2   :  { %537 = vmatmul.mubr.msk.f32.vlgmr.msra.gmra.mrb[0].mxu1 %vm31_vm0, %v524_v16 }
  0xe3   :  { %v527_v18 = vpop.f32.mrb[2].mxu0  ;;  %593 = vmatpush3.bf16.msra.mxu1 %v590_v22 }
  0xe4   :  { %v120_v19 = vpop.f32.mrb[3].mxu0 }
  0xe5   :  { %539 = vmatprep.mubr.msk.f32.mxu1 %vm31_vm0, %v120_v19 }
  0xe6   :  { %540 = vmatmul.mubr.msk.f32.gmra.mrb[2].mxu1 %vm31_vm0, %v527_v18 }
 0x1b5   :  { %v538_v24 = vpop.f32.mrb[0].mxu1 }
 0x1b6   :  { %v238_v25 = vsub.f32 %v538_v24, %v474_v23  ;;  %v211_v26 = vpop.f32.mrb[1].mxu1 }
 0x1b7   :  { %v237_v27 = vsub.f32 %v211_v26, %v474_v23 }
 0x1b8   :  { %438 = vst.msk [vmem:[%s728_s6 + $0x8] sm:$0xff] %vm328_vm1, %v238_v25 }
 0x1b9   :  { %v582_v28 = vpack.c.bf16 %v238_v25, %v237_v27  ;;  %437 = vst.msk [vmem:[%s728_s6] sm:$0xff] %vm328_vm1, %v237_v27  ;;  %v541_v29 = vpop.f32.mrb[2].mxu1 }
 0x1ba   :  { %v240_v30 = vsub.f32 %v541_v29, %v474_v23  ;;  %v221_v31 = vpop.f32.mrb[3].mxu1 }
 0x1bb   :  { %v239_v32 = vsub.f32 %v221_v31, %v474_v23  ;;  %583 = vmatprep.subr.bf16.mxu0 %v582_v28 }
 0x1bc   :  { %440 = vst.msk [vmem:[%s728_s6 + $0x18] sm:$0xff] %vm328_vm1, %v240_v30  ;;  %585 = vmatpush3.bf16.msra.mxu0 %v582_v28 }
 0x1bd   :  { %v586_v33 = vpack.c.bf16 %v240_v30, %v239_v32  ;;  %439 = vst.msk [vmem:[%s728_s6 + $0x10] sm:$0xff] %vm328_vm1, %v239_v32 }
 0x1bf   :  { %587 = vmatprep.subr.bf16.mxu0 %v586_v33 }
 0x1c0   :  { %589 = vmatpush3.bf16.msra.mxu0 %v586_v33 }
 0x1c3   :  { %551 = vmatmul.mubr.msk.f32.vlgmr.msra.gmra.mrb[4].mxu0 %vm31_vm0, %v24_v13 }
 0x1c4   :  { %553 = vmatprep.mubr.msk.f32.mxu0 %vm31_vm0, %v25_v14 }
 0x1c7   :  { %554 = vmatmul.mubr.msk.f32.gmra.mrb[6].mxu0 %vm31_vm0, %v26_v15 }
 0x296   :  { %v552_v34 = vpop.f32.mrb[4].mxu0 }
 0x297   :  { %v307_v35 = vpop.f32.mrb[5].mxu0 }
 0x298   :  { %560 = vmatprep.mubr.msk.f32.mxu1 %vm328_vm1, %v307_v35 }
 0x299   :  { %561 = vmatmul.mubr.msk.f32.vlgmr.msra.gmra.mrb[4].mxu1 %vm328_vm1, %v552_v34 }
 0x29a   :  { %v555_v36 = vpop.f32.mrb[6].mxu0 }
 0x29b   :  { %v317_v37 = vpop.f32.mrb[7].mxu0 }
 0x29c   :  { %563 = vmatprep.mubr.msk.f32.mxu1 %vm328_vm1, %v317_v37 }
 0x29d   :  { %564 = vmatmul.mubr.msk.f32.gmra.mrb[6].mxu1 %vm328_vm1, %v555_v36 }
 0x36c   :  { %v562_v39 = vpop.f32.mrb[4].mxu1 }
 0x36d   :  { %v407_v40 = vpop.f32.mrb[5].mxu1  ;;  %v434_v44 = vsub.f32 %v562_v39, %v483_v38 }
 0x36e   :  { %v433_v41 = vsub.f32 %v407_v40, %v483_v38 }
 0x370   :  { %445 = vrot.lane.b32.xlu0 %v433_v41, %s595_s8  ;;  %v565_v42 = vpop.f32.mrb[6].mxu1 }
 0x371   :  { %v417_v43 = vpop.f32.mrb[7].mxu1  ;;  %v436_v46 = vsub.f32 %v565_v42, %v483_v38 }
 0x372   :  { %v435_v45 = vsub.f32 %v417_v43, %v483_v38 }
 0x374   :  { %447 = vrot.lane.b32.xlu0 %v434_v44, %s595_s8  ;;  %449 = vrot.lane.b32.xlu1 %v435_v45, %s595_s8 }
 0x378   :  { %451 = vrot.lane.b32.xlu1 %v436_v46, %s595_s8 }
 0x3e2   :  { %v446_v47 = vpop.permute.xlu0 %445 }
 0x3e3   :  { %458 = vst.msk [vmem:[%s728_s6] sm:$0xff] %vm457_vm2, %v446_v47 }
 0x3e6   :  { %v448_v48 = vpop.permute.xlu0 %447  ;;  %v450_v49 = vpop.permute.xlu1 %449 }
 0x3e7   :  { %459 = vst.msk [vmem:[%s728_s6 + $0x8] sm:$0xff] %vm457_vm2, %v448_v48  ;;  %460 = vst.msk [vmem:[%s728_s6 + $0x10] sm:$0xff] %vm457_vm2, %v450_v49 }
 0x3ea   :  { %v452_v50 = vpop.permute.xlu1 %451 }
 0x3eb   :  { %461 = vst.msk [vmem:[%s728_s6 + $0x18] sm:$0xff] %vm457_vm2, %v452_v50 }

// kernel: mcgp_forward.3
= control target key start
LH: loop header
LB: loop body
LE: loop exit
PB: predicated region body
PF: predicated region fallthrough
CT: control target
= control target key end

     0   :  { %v9554_v3 = vmov 0.0   ;;  %vm102_vm0 = vcmask 523264   ;;  %vm911_vm1 = vcmask 588800   ;;  %vm1272_vm2 = vcmask 850944   ;;  %s9557_s15 = smov 17   ;;  %s9560_s16 = smov 125   ;;  %s15499_s1 = inlined_call_operand.vmem [shape: f32[64,488], index: 1, kind: input, shape index: {}]   ;;  %s15500_s4 = inlined_call_operand.vmem [shape: f32[64,456], index: 4, kind: input, shape index: {}]   ;;  %s15501_s0 = inlined_call_operand.vmem [shape: f32[32,64], index: 0, kind: input, shape index: {}]   ;;  %s15502_s6 = inlined_call_operand.vmem [shape: f32[456,296], index: 6, kind: input, shape index: {}]   ;;  %s15503_s5 = inlined_call_operand.vmem [shape: f32[1,456], index: 5, kind: input, shape index: {}]   ;;  %s15504_s2 = inlined_call_operand.vmem [shape: f32[1,488], index: 2, kind: input, shape index: {}]   ;;  %s15505_s3 = inlined_call_operand.vmem [shape: f32[488,296], index: 3, kind: input, shape index: {}]   ;;  %s15506_s7 = inlined_call_operand.vmem [shape: f32[64,360], index: 7, kind: input, shape index: {}]   ;;  %s15507_s9 = inlined_call_operand.vmem [shape: f32[360,296], index: 9, kind: input, shape index: {}]   ;;  %s15508_s8 = inlined_call_operand.vmem [shape: f32[1,360], index: 8, kind: input, shape index: {}]   ;;  %s15509_s11 = inlined_call_operand.vmem [shape: f32[8,8], index: 11, kind: input, shape index: {}]   ;;  %s15510_s12 = inlined_call_operand.vmem [shape: f32[1,8], index: 12, kind: input, shape index: {}]   ;;  %s15511_s10 = inlined_call_operand.vmem [shape: f32[37,18], index: 10, kind: input, shape index: {}]   ;;  %s15512_s13 = inlined_call_operand.vmem [shape: f32[32,144], index: 13, kind: output, shape index: {}]  }
   0x1   :  { %v49_v0 = vld [vmem:[%s15499_s1 + $0x8] sm:$0xff]  ;;  %v48_v2 = vld [vmem:[%s15499_s1] sm:$0xff]  ;;  %179 = vmatprep.mubr.f32.mxu0 %v9554_v3  ;;  %268 = vmatprep.mubr.f32.mxu1 %v9554_v3  ;;  %v51_v30 = vld [vmem:[%s15499_s1 + $0x18] sm:$0xff]  ;;  %vm2393_vm3 = vcmask 326656   ;;  %s9561_s17 = smov 108   ;;  %vm2408_vm4 = vcmask 302080  }
   0x2   :  { %v53_v1 = vld [vmem:[%s15499_s1 + $0x28] sm:$0xff]  ;;  %v52_v5 = vld [vmem:[%s15499_s1 + $0x20] sm:$0xff]  ;;  %v55_v31 = vld [vmem:[%s15499_s1 + $0x38] sm:$0xff]  ;;  %s9562_s18 = smov 71   ;;  %vm2637_vm5 = vcmask 138240   ;;  %vm2894_vm6 = vcmask 277504  }
   0x3   :  { %v8548_v4 = vpack.c.bf16 %v53_v1, %v49_v0  ;;  %v57_v6 = vld [vmem:[%s15499_s1 + $0x48] sm:$0xff]  ;;  %v8550_v8 = vpack.c.bf16 %v52_v5, %v48_v2  ;;  %v56_v10 = vld [vmem:[%s15499_s1 + $0x40] sm:$0xff]  ;;  %v50_v32 = vld [vmem:[%s15499_s1 + $0x10] sm:$0xff]  ;;  %v8564_v34 = vpack.c.bf16 %v55_v31, %v51_v30  ;;  %s15532_s24 = smov 1   ;;  %s15534_s25 = smov 3   ;;  %vm3507_vm7 = vcmask 1044480  }
   0x4   :  { %v61_v7 = vld [vmem:[%s15499_s1 + $0x68] sm:$0xff]  ;;  %v60_v11 = vld [vmem:[%s15499_s1 + $0x60] sm:$0xff]  ;;  %v54_v35 = vld [vmem:[%s15499_s1 + $0x30] sm:$0xff]  ;;  %s9567_s28 = smov 127   ;;  %s15538_s19 = smov 124  }
   0x5   :  { %v8552_v9 = vpack.c.bf16 %v61_v7, %v57_v6  ;;  %v65_v12 = vld [vmem:[%s15499_s1 + $0x88] sm:$0xff]  ;;  %8549 = vmatprep.subr.bf16.mxu0 %v8548_v4  ;;  %v8554_v14 = vpack.c.bf16 %v60_v11, %v56_v10  ;;  %v64_v16 = vld [vmem:[%s15499_s1 + $0x80] sm:$0xff]  ;;  %v59_v36 = vld [vmem:[%s15499_s1 + $0x58] sm:$0xff]  ;;  %v8566_v39 = vpack.c.bf16 %v54_v35, %v50_v32  ;;  %8565 = vmatprep.subr.bf16.mxu1 %v8564_v34  ;;  %s9571_s20 = smov 123  }
   0x6   :  { %v69_v13 = vld [vmem:[%s15499_s1 + $0xa8] sm:$0xff]  ;;  %8551 = vmatpush1.bf16.msra.mxu0 %v8550_v8  ;;  %v68_v17 = vld [vmem:[%s15499_s1 + $0xa0] sm:$0xff]  ;;  %v63_v37 = vld [vmem:[%s15499_s1 + $0x78] sm:$0xff] }
   0x7   :  { %8553 = vmatprep.subr.bf16.mxu0 %v8552_v9  ;;  %v8556_v15 = vpack.c.bf16 %v69_v13, %v65_v12  ;;  %v73_v18 = vld [vmem:[%s15499_s1 + $0xc8] sm:$0xff]  ;;  %v8558_v20 = vpack.c.bf16 %v68_v17, %v64_v16  ;;  %v72_v22 = vld [vmem:[%s15499_s1 + $0xc0] sm:$0xff]  ;;  %v8568_v40 = vpack.c.bf16 %v63_v37, %v59_v36  ;;  %v58_v41 = vld [vmem:[%s15499_s1 + $0x50] sm:$0xff]  ;;  %8567 = vmatpush1.bf16.msra.mxu1 %v8566_v39 }
   0x8   :  { %v77_v19 = vld [vmem:[%s15499_s1 + $0xe8] sm:$0xff]  ;;  %v76_v23 = vld [vmem:[%s15499_s1 + $0xe0] sm:$0xff]  ;;  %v62_v42 = vld [vmem:[%s15499_s1 + $0x70] sm:$0xff] }
   0x9   :  { %v8560_v21 = vpack.c.bf16 %v77_v19, %v73_v18  ;;  %v493_v24 = vld [vmem:[%s15500_s4 + $0x8] sm:$0xff]  ;;  %v492_v26 = vld [vmem:[%s15500_s4] sm:$0xff]  ;;  %v8562_v28 = vpack.c.bf16 %v76_v23, %v72_v22  ;;  %v67_v43 = vld [vmem:[%s15499_s1 + $0x98] sm:$0xff]  ;;  %8569 = vmatprep.subr.bf16.mxu1 %v8568_v40  ;;  %v8570_v51 = vpack.c.bf16 %v62_v42, %v58_v41 }
   0xa   :  { %8555 = vmatpush1.bf16.msra.mxu0 %v8554_v14  ;;  %v497_v25 = vld [vmem:[%s15500_s4 + $0x28] sm:$0xff]  ;;  %v496_v27 = vld [vmem:[%s15500_s4 + $0x20] sm:$0xff]  ;;  %v71_v44 = vld [vmem:[%s15499_s1 + $0xb8] sm:$0xff] }
   0xb   :  { %8557 = vmatprep.subr.bf16.mxu0 %v8556_v15  ;;  %v501_v29 = vld [vmem:[%s15500_s4 + $0x48] sm:$0xff]  ;;  %v8580_v33 = vpack.c.bf16 %v497_v25, %v493_v24  ;;  %v9760_v45 = vld [vmem:[%s15501_s0] sm:$0xff]  ;;  %v8582_v46 = vpack.c.bf16 %v496_v27, %v492_v26  ;;  %v8572_v53 = vpack.c.bf16 %v71_v44, %v67_v43  ;;  %v66_v54 = vld [vmem:[%s15499_s1 + $0x90] sm:$0xff]  ;;  %8571 = vmatpush1.bf16.msra.mxu1 %v8570_v51 }
   0xc   :  { %v505_v38 = vld [vmem:[%s15500_s4 + $0x68] sm:$0xff]  ;;  %v500_v48 = vld [vmem:[%s15500_s4 + $0x40] sm:$0xff]  ;;  %v70_v55 = vld [vmem:[%s15499_s1 + $0xb0] sm:$0xff] }
   0xd   :  { %v8584_v47 = vpack.c.bf16 %v505_v38, %v501_v29  ;;  %v504_v49 = vld [vmem:[%s15500_s4 + $0x60] sm:$0xff]  ;;  %v509_v50 = vld [vmem:[%s15500_s4 + $0x88] sm:$0xff]  ;;  %v75_v56 = vld [vmem:[%s15499_s1 + $0xd8] sm:$0xff]  ;;  %v8574_v0 = vpack.c.bf16 %v70_v55, %v66_v54  ;;  %8573 = vmatprep.subr.bf16.mxu1 %v8572_v53 }
   0xe   :  { %8559 = vmatpush1.bf16.msra.mxu0 %v8558_v20  ;;  %v513_v52 = vld [vmem:[%s15500_s4 + $0xa8] sm:$0xff]  ;;  %v79_v57 = vld [vmem:[%s15499_s1 + $0xf8] sm:$0xff]  ;;  %v8586_v59 = vpack.c.bf16 %v504_v49, %v500_v48  ;;  %v508_v61 = vld [vmem:[%s15500_s4 + $0x80] sm:$0xff] }
   0xf   :  { %8561 = vmatprep.subr.bf16.mxu0 %v8560_v21  ;;  %v9792_v58 = vld [vmem:[%s15501_s0 + $0x8] sm:$0xff]  ;;  %v8588_v60 = vpack.c.bf16 %v513_v52, %v509_v50  ;;  %v512_v62 = vld [vmem:[%s15500_s4 + $0xa0] sm:$0xff]  ;;  %v8576_v2 = vpack.c.bf16 %v79_v57, %v75_v56  ;;  %v74_v4 = vld [vmem:[%s15499_s1 + $0xd0] sm:$0xff]  ;;  %8575 = vmatpush1.bf16.msra.mxu1 %v8574_v0 }
  0x10   :  { %v517_v63 = vld [vmem:[%s15500_s4 + $0xc8] sm:$0xff]  ;;  %v78_v5 = vld [vmem:[%s15499_s1 + $0xf0] sm:$0xff]  ;;  %v495_v6 = vld [vmem:[%s15500_s4 + $0x18] sm:$0xff]  ;;  %v8590_v9 = vpack.c.bf16 %v512_v62, %v508_v61  ;;  %s15530_s1 = smov 2  }
  0x11   :  { %v521_v1 = vld [vmem:[%s15500_s4 + $0xe8] sm:$0xff]  ;;  %v499_v7 = vld [vmem:[%s15500_s4 + $0x38] sm:$0xff]  ;;  %v9824_v8 = vld [vmem:[%s15501_s0 + $0x10] sm:$0xff]  ;;  %v8578_v13 = vpack.c.bf16 %v78_v5, %v74_v4  ;;  %8577 = vmatprep.subr.bf16.mxu1 %v8576_v2 }
  0x12   :  { %8563 = vmatpush1.bf16.msra.mxu0 %v8562_v28  ;;  %v8592_v10 = vpack.c.bf16 %v521_v1, %v517_v63  ;;  %v516_v11 = vld [vmem:[%s15500_s4 + $0xc0] sm:$0xff]  ;;  %v8596_v14 = vpack.c.bf16 %v499_v7, %v495_v6  ;;  %v741_v15 = vld [vmem:[%s15502_s6 + $0x8] sm:$0xff]  ;;  %v494_v17 = vld [vmem:[%s15500_s4 + $0x10] sm:$0xff] }
  0x13   :  { %8581 = vmatprep.subr.bf16.mxu0 %v8580_v33  ;;  %v520_v12 = vld [vmem:[%s15500_s4 + $0xe0] sm:$0xff]  ;;  %v498_v18 = vld [vmem:[%s15500_s4 + $0x30] sm:$0xff]  ;;  %v9850_v19 = vld [vmem:[%s15501_s0 + $0x18] sm:$0xff]  ;;  %8579 = vmatpush1.bf16.msra.mxu1 %v8578_v13 }
  0x14   :  { %v744_v16 = vld [vmem:[%s15502_s6 + $0x20] sm:$0xff]  ;;  %v8594_v20 = vpack.c.bf16 %v520_v12, %v516_v11  ;;  %v503_v21 = vld [vmem:[%s15500_s4 + $0x58] sm:$0xff]  ;;  %8597 = vmatprep.subr.bf16.mxu1 %v8596_v14  ;;  %v8598_v26 = vpack.c.bf16 %v498_v18, %v494_v17  ;;  %v750_v28 = vld [vmem:[%s15502_s6 + $0x50] sm:$0xff] }
  0x15   :  { %8045 = vmatmul.mubr.msk.f32.vlgmr.msra.gmra.mrb[0].mxu0 %vm102_vm0, %v9760_v45  ;;  %v507_v22 = vld [vmem:[%s15500_s4 + $0x78] sm:$0xff]  ;;  %v8612_v23 = vpack.c.bf16 %v744_v16, %v741_v15  ;;  %v740_v24 = vld [vmem:[%s15502_s6] sm:$0xff]  ;;  %v502_v30 = vld [vmem:[%s15500_s4 + $0x50] sm:$0xff] }
  0x16   :  { %8583 = vmatpush1.bf16.msra.mxu0 %v8582_v46  ;;  %185 = vmatprep.mubr.f32.mxu0 %v9554_v3  ;;  %v743_v25 = vld [vmem:[%s15502_s6 + $0x18] sm:$0xff]  ;;  %v8600_v29 = vpack.c.bf16 %v507_v22, %v503_v21  ;;  %v506_v31 = vld [vmem:[%s15500_s4 + $0x70] sm:$0xff]  ;;  %v749_v37 = vld [vmem:[%s15502_s6 + $0x48] sm:$0xff] }
  0x17   :  { %8585 = vmatprep.subr.bf16.mxu0 %v8584_v47  ;;  %v747_v27 = vld [vmem:[%s15502_s6 + $0x38] sm:$0xff]  ;;  %v8614_v34 = vpack.c.bf16 %v743_v25, %v740_v24  ;;  %8049 = vmatmul.mubr.msk.f32.vlgmr.msra.gmra.mrb[0].mxu1 %vm102_vm0, %v9760_v45  ;;  %v746_v36 = vld [vmem:[%s15502_s6 + $0x30] sm:$0xff]  ;;  %v8602_v38 = vpack.c.bf16 %v506_v31, %v502_v30  ;;  %v753_v39 = vld [vmem:[%s15502_s6 + $0x68] sm:$0xff] }
  0x18   :  { %v511_v32 = vld [vmem:[%s15500_s4 + $0x98] sm:$0xff]  ;;  %v8616_v35 = vpack.c.bf16 %v750_v28, %v747_v27  ;;  %8599 = vmatpush1.bf16.msra.mxu1 %v8598_v26  ;;  %274 = vmatprep.mubr.f32.mxu1 %v9554_v3  ;;  %v756_v40 = vld [vmem:[%s15502_s6 + $0x80] sm:$0xff]  ;;  %v510_v42 = vld [vmem:[%s15500_s4 + $0x90] sm:$0xff]  ;;  %v8618_v47 = vpack.c.bf16 %v749_v37, %v746_v36 }
  0x19   :  { %8046 = vmatmul.mubr.msk.f32.gmra.mrb[2].mxu0 %vm102_vm0, %v9792_v58  ;;  %v515_v33 = vld [vmem:[%s15500_s4 + $0xb8] sm:$0xff]  ;;  %8601 = vmatprep.subr.bf16.mxu1 %v8600_v29  ;;  %v514_v43 = vld [vmem:[%s15500_s4 + $0xb0] sm:$0xff]  ;;  %v8620_v48 = vpack.c.bf16 %v756_v40, %v753_v39  ;;  %v752_v49 = vld [vmem:[%s15502_s6 + $0x60] sm:$0xff] }
  0x1a   :  { %8587 = vmatpush1.bf16.msra.mxu0 %v8586_v59  ;;  %191 = vmatprep.mubr.f32.mxu0 %v9554_v3  ;;  %v8604_v41 = vpack.c.bf16 %v515_v33, %v511_v32  ;;  %v519_v44 = vld [vmem:[%s15500_s4 + $0xd8] sm:$0xff]  ;;  %v8606_v51 = vpack.c.bf16 %v514_v43, %v510_v42  ;;  %v762_v53 = vld [vmem:[%s15502_s6 + $0xb0] sm:$0xff]  ;;  %v761_v63 = vld [vmem:[%s15502_s6 + $0xa8] sm:$0xff] }
  0x1b   :  { %8589 = vmatprep.subr.bf16.mxu0 %v8588_v60  ;;  %v523_v46 = vld [vmem:[%s15500_s4 + $0xf8] sm:$0xff]  ;;  %8050 = vmatmul.mubr.msk.f32.gmra.mrb[2].mxu1 %vm102_vm0, %v9792_v58  ;;  %v518_v55 = vld [vmem:[%s15500_s4 + $0xd0] sm:$0xff]  ;;  %v793_v60 = vld [vmem:[%s15502_s6 + $0x1a8] sm:$0xff] }
  0x1c   :  { %v755_v50 = vld [vmem:[%s15502_s6 + $0x78] sm:$0xff]  ;;  %8603 = vmatpush1.bf16.msra.mxu1 %v8602_v38  ;;  %280 = vmatprep.mubr.f32.mxu1 %v9554_v3  ;;  %v8608_v54 = vpack.c.bf16 %v523_v46, %v519_v44  ;;  %v522_v56 = vld [vmem:[%s15500_s4 + $0xf0] sm:$0xff]  ;;  %v765_v1 = vld [vmem:[%s15502_s6 + $0xc8] sm:$0xff] }
  0x1d   :  { %8047 = vmatmul.mubr.msk.f32.gmra.mrb[4].mxu0 %vm102_vm0, %v9824_v8  ;;  %v759_v52 = vld [vmem:[%s15502_s6 + $0x98] sm:$0xff]  ;;  %8605 = vmatprep.subr.bf16.mxu1 %v8604_v41  ;;  %v8622_v57 = vpack.c.bf16 %v755_v50, %v752_v49  ;;  %v790_v59 = vld [vmem:[%s15502_s6 + $0x190] sm:$0xff]  ;;  %v8610_v0 = vpack.c.bf16 %v522_v56, %v518_v55  ;;  %v768_v2 = vld [vmem:[%s15502_s6 + $0xe0] sm:$0xff] }
  0x1e   :  { %8591 = vmatpush1.bf16.msra.mxu0 %v8590_v9  ;;  %197 = vmatprep.mubr.f32.mxu0 %v9554_v3  ;;  %v8624_v61 = vpack.c.bf16 %v762_v53, %v759_v52  ;;  %v758_v62 = vld [vmem:[%s15502_s6 + $0x90] sm:$0xff]  ;;  %v8724_v4 = vpack.c.bf16 %v793_v60, %v790_v59  ;;  %v745_v6 = vld [vmem:[%s15502_s6 + $0x28] sm:$0xff]  ;;  %v796_v9 = vld [vmem:[%s15502_s6 + $0x1c0] sm:$0xff]  ;;  %v8628_v11 = vpack.c.bf16 %v768_v2, %v765_v1 }
  0x1f   :  { %8593 = vmatprep.subr.bf16.mxu0 %v8592_v10  ;;  %8051 = vmatmul.mubr.msk.f32.gmra.mrb[4].mxu1 %vm102_vm0, %v9824_v8  ;;  %v742_v5 = vld [vmem:[%s15502_s6 + $0x10] sm:$0xff]  ;;  %v8626_v7 = vpack.c.bf16 %v761_v63, %v758_v62  ;;  %v799_v10 = vld [vmem:[%s15502_s6 + $0x1d8] sm:$0xff]  ;;  %v764_v12 = vld [vmem:[%s15502_s6 + $0xc0] sm:$0xff] }
  0x20   :  { %8607 = vmatpush1.bf16.msra.mxu1 %v8606_v51  ;;  %286 = vmatprep.mubr.f32.mxu1 %v9554_v3  ;;  %v767_v13 = vld [vmem:[%s15502_s6 + $0xd8] sm:$0xff]  ;;  %v774_v15 = vld [vmem:[%s15502_s6 + $0x110] sm:$0xff]  ;;  %v8726_v16 = vpack.c.bf16 %v745_v6, %v742_v5  ;;  %v8728_v17 = vpack.c.bf16 %v799_v10, %v796_v9  ;;  %v748_v18 = vld [vmem:[%s15502_s6 + $0x40] sm:$0xff] }
  0x21   :  { %8048 = vmatmul.mubr.msk.f32.gmra.mrb[6].mxu0 %vm102_vm0, %v9850_v19  ;;  %8609 = vmatprep.subr.bf16.mxu1 %v8608_v54  ;;  %v771_v14 = vld [vmem:[%s15502_s6 + $0xf8] sm:$0xff]  ;;  %v8630_v21 = vpack.c.bf16 %v767_v13, %v764_v12  ;;  %v802_v22 = vld [vmem:[%s15502_s6 + $0x1f0] sm:$0xff]  ;;  %v773_v26 = vld [vmem:[%s15502_s6 + $0x108] sm:$0xff] }
  0x22   :  { %8595 = vmatpush1.bf16.msra.mxu0 %v8594_v20  ;;  %610 = vmatprep.mubr.f32.mxu0 %v9554_v3  ;;  %v751_v20 = vld [vmem:[%s15502_s6 + $0x58] sm:$0xff]  ;;  %v8632_v24 = vpack.c.bf16 %v774_v15, %v771_v14  ;;  %v770_v25 = vld [vmem:[%s15502_s6 + $0xf0] sm:$0xff]  ;;  %v777_v27 = vld [vmem:[%s15502_s6 + $0x128] sm:$0xff] }
  0x23   :  { %8613 = vmatprep.subr.bf16.mxu0 %v8612_v23  ;;  %8052 = vmatmul.mubr.msk.f32.gmra.mrb[6].mxu1 %vm102_vm0, %v9850_v19  ;;  %v805_v23 = vld [vmem:[%s15502_s6 + $0x208] sm:$0xff]  ;;  %v8730_v28 = vpack.c.bf16 %v751_v20, %v748_v18  ;;  %v754_v30 = vld [vmem:[%s15502_s6 + $0x70] sm:$0xff]  ;;  %v8634_v32 = vpack.c.bf16 %v773_v26, %v770_v25  ;;  %v783_v36 = vld [vmem:[%s15502_s6 + $0x158] sm:$0xff] }
  0x24   :  { %8611 = vmatpush1.bf16.msra.mxu1 %v8610_v0  ;;  %699 = vmatprep.mubr.f32.mxu1 %v9554_v3  ;;  %v8732_v29 = vpack.c.bf16 %v805_v23, %v802_v22  ;;  %v757_v31 = vld [vmem:[%s15502_s6 + $0x88] sm:$0xff]  ;;  %v782_v40 = vld [vmem:[%s15502_s6 + $0x150] sm:$0xff]  ;;  %v788_v46 = vld [vmem:[%s15502_s6 + $0x180] sm:$0xff] }
  0x25   :  { %8053 = vmatmul.mubr.msk.f32.vlgmr.msra.gmra.mrb[8].mxu0 %vm102_vm0, %v9760_v45  ;;  %8725 = vmatprep.subr.bf16.mxu1 %v8724_v4  ;;  %v8734_v37 = vpack.c.bf16 %v757_v31, %v754_v30  ;;  %v785_v41 = vld [vmem:[%s15502_s6 + $0x168] sm:$0xff]  ;;  %v798_v49 = vld [vmem:[%s15502_s6 + $0x1d0] sm:$0xff]  ;;  %v804_v54 = vld [vmem:[%s15502_s6 + $0x200] sm:$0xff] }
  0x26   :  { %616 = vmatprep.mubr.f32.mxu0 %v9554_v3  ;;  %8615 = vmatpush1.bf16.msra.mxu0 %v8614_v34  ;;  %v776_v34 = vld [vmem:[%s15502_s6 + $0x120] sm:$0xff]  ;;  %v789_v42 = vld [vmem:[%s15502_s6 + $0x188] sm:$0xff]  ;;  %v8642_v43 = vpack.c.bf16 %v785_v41, %v782_v40  ;;  %v794_v51 = vld [vmem:[%s15502_s6 + $0x1b0] sm:$0xff] }
  0x27   :  { %8617 = vmatprep.subr.bf16.mxu0 %v8616_v35  ;;  %8057 = vmatmul.mubr.msk.f32.vlgmr.msra.gmra.mrb[8].mxu1 %vm102_vm0, %v9760_v45  ;;  %v780_v45 = vld [vmem:[%s15502_s6 + $0x140] sm:$0xff]  ;;  %v779_v35 = vld [vmem:[%s15502_s6 + $0x138] sm:$0xff]  ;;  %v797_v52 = vld [vmem:[%s15502_s6 + $0x1c8] sm:$0xff] }
  0x28   :  { %705 = vmatprep.mubr.f32.mxu1 %v9554_v3  ;;  %8727 = vmatpush3.bf16.msra.mxu1 %v8726_v16  ;;  %v8636_v33 = vpack.c.bf16 %v780_v45, %v777_v27  ;;  %v8638_v38 = vpack.c.bf16 %v779_v35, %v776_v34  ;;  %v801_v53 = vld [vmem:[%s15502_s6 + $0x1e8] sm:$0xff]  ;;  %v8650_v55 = vpack.c.bf16 %v797_v52, %v794_v51  ;;  %v803_v59 = vld [vmem:[%s15502_s6 + $0x1f8] sm:$0xff]  ;;  %v810_v62 = vld [vmem:[%s15502_s6 + $0x230] sm:$0xff] }
  0x29   :  { %8054 = vmatmul.mubr.msk.f32.gmra.mrb[10].mxu0 %vm102_vm0, %v9792_v58  ;;  %8729 = vmatprep.subr.bf16.mxu1 %v8728_v17  ;;  %v8652_v56 = vpack.c.bf16 %v804_v54, %v801_v53  ;;  %v808_v63 = vld [vmem:[%s15502_s6 + $0x220] sm:$0xff]  ;;  %v811_v1 = vld [vmem:[%s15502_s6 + $0x238] sm:$0xff]  ;;  %v806_v2 = vld [vmem:[%s15502_s6 + $0x210] sm:$0xff] }
  0x2a   :  { %622 = vmatprep.mubr.f32.mxu0 %v9554_v3  ;;  %8619 = vmatpush1.bf16.msra.mxu0 %v8618_v47  ;;  %v791_v47 = vld [vmem:[%s15502_s6 + $0x198] sm:$0xff]  ;;  %v809_v4 = vld [vmem:[%s15502_s6 + $0x228] sm:$0xff]  ;;  %v8736_v5 = vpack.c.bf16 %v811_v1, %v808_v63  ;;  %v816_v12 = vld [vmem:[%s15502_s6 + $0x260] sm:$0xff] }
  0x2b   :  { %8621 = vmatprep.subr.bf16.mxu0 %v8620_v48  ;;  %8058 = vmatmul.mubr.msk.f32.gmra.mrb[10].mxu1 %vm102_vm0, %v9792_v58  ;;  %v786_v58 = vld [vmem:[%s15502_s6 + $0x170] sm:$0xff]  ;;  %v795_v48 = vld [vmem:[%s15502_s6 + $0x1b8] sm:$0xff]  ;;  %v8658_v6 = vpack.c.bf16 %v809_v4, %v806_v2  ;;  %v817_v15 = vld [vmem:[%s15502_s6 + $0x268] sm:$0xff] }
  0x2c   :  { %711 = vmatprep.mubr.f32.mxu1 %v9554_v3  ;;  %8731 = vmatpush3.bf16.msra.mxu1 %v8730_v28  ;;  %v8640_v39 = vpack.c.bf16 %v786_v58, %v783_v36  ;;  %v8648_v50 = vpack.c.bf16 %v798_v49, %v795_v48  ;;  %v763_v9 = vld [vmem:[%s15502_s6 + $0xb8] sm:$0xff]  ;;  %v814_v13 = vld [vmem:[%s15502_s6 + $0x250] sm:$0xff]  ;;  %v812_v16 = vld [vmem:[%s15502_s6 + $0x240] sm:$0xff] }
  0x2d   :  { %8055 = vmatmul.mubr.msk.f32.gmra.mrb[12].mxu0 %vm102_vm0, %v9824_v8  ;;  %8733 = vmatprep.subr.bf16.mxu1 %v8732_v29  ;;  %v815_v17 = vld [vmem:[%s15502_s6 + $0x258] sm:$0xff]  ;;  %v8740_v18 = vpack.c.bf16 %v817_v15, %v814_v13  ;;  %v769_v22 = vld [vmem:[%s15502_s6 + $0xe8] sm:$0xff]  ;;  %v822_v25 = vld [vmem:[%s15502_s6 + $0x290] sm:$0xff] }
  0x2e   :  { %628 = vmatprep.mubr.f32.mxu0 %v9554_v3  ;;  %8623 = vmatpush1.bf16.msra.mxu0 %v8622_v57  ;;  %v800_v57 = vld [vmem:[%s15502_s6 + $0x1e0] sm:$0xff]  ;;  %v8662_v20 = vpack.c.bf16 %v815_v17, %v812_v16  ;;  %v823_v45 = vld [vmem:[%s15502_s6 + $0x298] sm:$0xff]  ;;  %v818_v28 = vld [vmem:[%s15502_s6 + $0x270] sm:$0xff] }
  0x2f   :  { %8625 = vmatprep.subr.bf16.mxu0 %v8624_v61  ;;  %8059 = vmatmul.mubr.msk.f32.gmra.mrb[12].mxu1 %vm102_vm0, %v9824_v8  ;;  %v792_v8 = vld [vmem:[%s15502_s6 + $0x1a0] sm:$0xff]  ;;  %v8654_v60 = vpack.c.bf16 %v803_v59, %v800_v57  ;;  %v807_v61 = vld [vmem:[%s15502_s6 + $0x218] sm:$0xff]  ;;  %v821_v29 = vld [vmem:[%s15502_s6 + $0x288] sm:$0xff] }
  0x30   :  { %717 = vmatprep.mubr.f32.mxu1 %v9554_v3  ;;  %8735 = vmatpush3.bf16.msra.mxu1 %v8734_v37  ;;  %v8644_v44 = vpack.c.bf16 %v792_v8, %v789_v42  ;;  %v8656_v0 = vpack.c.bf16 %v810_v62, %v807_v61  ;;  %v820_v26 = vld [vmem:[%s15502_s6 + $0x280] sm:$0xff]  ;;  %v8666_v31 = vpack.c.bf16 %v821_v29, %v818_v28  ;;  %v825_v35 = vld [vmem:[%s15502_s6 + $0x2a8] sm:$0xff]  ;;  %v826_v58 = vld [vmem:[%s15502_s6 + $0x2b0] sm:$0xff]  ;;  %v9555_v61 = vmov 0.0|0.0  }
  0x31   :  { %8056 = vmatmul.mubr.msk.f32.gmra.mrb[14].mxu0 %vm102_vm0, %v9850_v19  ;;  %8737 = vmatprep.subr.bf16.mxu1 %v8736_v5  ;;  %v8744_v30 = vpack.c.bf16 %v823_v45, %v820_v26  ;;  %v828_v36 = vld [vmem:[%s15502_s6 + $0x2c0] sm:$0xff]  ;;  %v827_v40 = vld [vmem:[%s15502_s6 + $0x2b8] sm:$0xff]  ;;  %v778_v8 = vld [vmem:[%s15502_s6 + $0x130] sm:$0xff] }
  0x32   :  { %8627 = vmatpush1.bf16.msra.mxu0 %v8626_v7  ;;  %v760_v7 = vld [vmem:[%s15502_s6 + $0xa0] sm:$0xff]  ;;  %v8668_v37 = vpack.c.bf16 %v828_v36, %v825_v35  ;;  %v833_v51 = vld [vmem:[%s15502_s6 + $0x2e8] sm:$0xff]  ;;  %v839_v26 = vld [vmem:[%s15502_s6 + $0x318] sm:$0xff] }
  0x33   :  { %8629 = vmatprep.subr.bf16.mxu0 %v8628_v11  ;;  %8060 = vmatmul.mubr.msk.f32.gmra.mrb[14].mxu1 %vm102_vm0, %v9850_v19  ;;  %v8646_v19 = vpack.c.bf16 %v791_v47, %v788_v46  ;;  %v8738_v10 = vpack.c.bf16 %v763_v9, %v760_v7  ;;  %v813_v11 = vld [vmem:[%s15502_s6 + $0x248] sm:$0xff]  ;;  %v831_v46 = vld [vmem:[%s15502_s6 + $0x2d8] sm:$0xff]  ;;  %v834_v47 = vld [vmem:[%s15502_s6 + $0x2f0] sm:$0xff] }
  0x34   :  { %v8660_v14 = vpack.c.bf16 %v816_v12, %v813_v11  ;;  %v832_v48 = vld [vmem:[%s15502_s6 + $0x2e0] sm:$0xff]  ;;  %v8672_v49 = vpack.c.bf16 %v834_v47, %v831_v46  ;;  %v837_v57 = vld [vmem:[%s15502_s6 + $0x308] sm:$0xff]  ;;  %v843_v29 = vld [vmem:[%s15502_s6 + $0x338] sm:$0xff] }
  0x35   :  { %8739 = vmatpush3.bf16.msra.mxu1 %v8738_v10  ;;  %v784_v54 = vld [vmem:[%s15502_s6 + $0x160] sm:$0xff]  ;;  %v841_v45 = vld [vmem:[%s15502_s6 + $0x328] sm:$0xff]  ;;  %v842_v36 = vld [vmem:[%s15502_s6 + $0x330] sm:$0xff] }
  0x36   :  { %8631 = vmatpush1.bf16.msra.mxu0 %v8630_v21  ;;  %v766_v21 = vld [vmem:[%s15502_s6 + $0xd0] sm:$0xff]  ;;  %8741 = vmatprep.subr.bf16.mxu1 %v8740_v18  ;;  %v840_v59 = vld [vmem:[%s15502_s6 + $0x320] sm:$0xff] }
  0x37   :  { %8633 = vmatprep.subr.bf16.mxu0 %v8632_v24  ;;  %v8742_v23 = vpack.c.bf16 %v769_v22, %v766_v21  ;;  %v819_v24 = vld [vmem:[%s15502_s6 + $0x278] sm:$0xff]  ;;  %v10232_v9 = vld [vmem:[%s15503_s5] sm:$0xf]  ;;  %s9559_s5 = smov 34  }
  0x38   :  { %v8664_v27 = vpack.c.bf16 %v822_v25, %v819_v24  ;;  %v10237_v10 = vld [vmem:[%s15504_s2] sm:$0xf] }
  0x39   :  { %8743 = vmatpush3.bf16.msra.mxu1 %v8742_v23  ;;  %v836_v22 = vld [vmem:[%s15502_s6 + $0x300] sm:$0xff] }
  0x3a   :  { %8635 = vmatpush1.bf16.msra.mxu0 %v8634_v32  ;;  %v772_v32 = vld [vmem:[%s15502_s6 + $0x100] sm:$0xff]  ;;  %8745 = vmatprep.subr.bf16.mxu1 %v8744_v30  ;;  %v846_v30 = vld [vmem:[%s15502_s6 + $0x350] sm:$0xff] }
  0x3b   :  { %8637 = vmatprep.subr.bf16.mxu0 %v8636_v33  ;;  %v775_v33 = vld [vmem:[%s15502_s6 + $0x118] sm:$0xff]  ;;  %v852_v46 = vld [vmem:[%s15502_s6 + $0x380] sm:$0xff] }
  0x3c   :  { %v8746_v34 = vpack.c.bf16 %v775_v33, %v772_v32 }
  0x3e   :  { %8639 = vmatpush1.bf16.msra.mxu0 %v8638_v38  ;;  %8747 = vmatpush3.bf16.msra.mxu1 %v8746_v34  ;;  %v829_v38 = vld [vmem:[%s15502_s6 + $0x2c8] sm:$0xff]  ;;  %v8678_v34 = vpack.c.bf16 %v839_v26, %v836_v22  ;;  %v858_v22 = vld [vmem:[%s15502_s6 + $0x3b0] sm:$0xff] }
  0x3f   :  { %8641 = vmatprep.subr.bf16.mxu0 %v8640_v39  ;;  %v824_v39 = vld [vmem:[%s15502_s6 + $0x2a0] sm:$0xff]  ;;  %v8748_v41 = vpack.c.bf16 %v829_v38, %v826_v58  ;;  %v845_v58 = vld [vmem:[%s15502_s6 + $0x348] sm:$0xff] }
  0x40   :  { %v8670_v42 = vpack.c.bf16 %v827_v40, %v824_v39  ;;  %v8680_v40 = vpack.c.bf16 %v846_v30, %v843_v29  ;;  %v854_v29 = vld [vmem:[%s15502_s6 + $0x390] sm:$0xff]  ;;  %v857_v30 = vld [vmem:[%s15502_s6 + $0x3a8] sm:$0xff] }
  0x41   :  { %8749 = vmatprep.subr.bf16.mxu1 %v8748_v41  ;;  %v844_v41 = vld [vmem:[%s15502_s6 + $0x340] sm:$0xff] }
  0x42   :  { %8643 = vmatpush1.bf16.msra.mxu0 %v8642_v43  ;;  %v781_v43 = vld [vmem:[%s15502_s6 + $0x148] sm:$0xff] }
  0x43   :  { %8645 = vmatprep.subr.bf16.mxu0 %v8644_v44  ;;  %v8750_v44 = vpack.c.bf16 %v781_v43, %v778_v8 }
  0x45   :  { %8751 = vmatpush3.bf16.msra.mxu1 %v8750_v44  ;;  %v849_v44 = vld [vmem:[%s15502_s6 + $0x368] sm:$0xff] }
  0x46   :  { %8647 = vmatpush1.bf16.msra.mxu0 %v8646_v19  ;;  %v835_v19 = vld [vmem:[%s15502_s6 + $0x2f8] sm:$0xff] }
  0x47   :  { %8649 = vmatprep.subr.bf16.mxu0 %v8648_v50  ;;  %v830_v50 = vld [vmem:[%s15502_s6 + $0x2d0] sm:$0xff]  ;;  %v8752_v52 = vpack.c.bf16 %v835_v19, %v832_v48  ;;  %v848_v19 = vld [vmem:[%s15502_s6 + $0x360] sm:$0xff] }
  0x48   :  { %v8674_v53 = vpack.c.bf16 %v833_v51, %v830_v50 }
  0x49   :  { %8753 = vmatprep.subr.bf16.mxu1 %v8752_v52 }
  0x4a   :  { %8651 = vmatpush1.bf16.msra.mxu0 %v8650_v55  ;;  %v787_v55 = vld [vmem:[%s15502_s6 + $0x178] sm:$0xff] }
  0x4b   :  { %8653 = vmatprep.subr.bf16.mxu0 %v8652_v56  ;;  %v8754_v56 = vpack.c.bf16 %v787_v55, %v784_v54  ;;  %v850_v54 = vld [vmem:[%s15502_s6 + $0x370] sm:$0xff]  ;;  %v853_v55 = vld [vmem:[%s15502_s6 + $0x388] sm:$0xff] }
  0x4d   :  { %8755 = vmatpush3.bf16.msra.mxu1 %v8754_v56 }
  0x4e   :  { %8655 = vmatpush1.bf16.msra.mxu0 %v8654_v60  ;;  %v8676_v60 = vpack.c.bf16 %v840_v59, %v837_v57  ;;  %8756 = vmatprep.subr.bf16.mxu1 %v9555_v61 }
  0x4f   :  { %8657 = vmatprep.subr.bf16.mxu0 %v8656_v0  ;;  %v82_v0 = vlaneseq }
  0x51   :  { %v10222_v4 = vshrl.u32 %v82_v0, 7 }
  0x52   :  { %8659 = vmatpush1.bf16.msra.mxu0 %v8658_v6 }
  0x53   :  { %8661 = vmatprep.subr.bf16.mxu0 %v8660_v14  ;;  %v96_v6 = vsub.s32 3, %v10222_v4  ;;  %v10240_v11 = vsub.s32 0, %v10222_v4  ;;  %v10243_v12 = vsub.s32 1, %v10222_v4 }
  0x55   :  { %15605 = vst [vmem:[#allocation3_spill] sm:$0xff] %v10240_v11  ;;  %v10250_v14 = vrot.slane %v10237_v10, %v96_v6  ;;  %v10256_v16 = vrot.slane %v10232_v9, %v10240_v11  ;;  %v10260_v17 = vrot.slane %v10232_v9, %v10243_v12 }
  0x56   :  { %8663 = vmatpush1.bf16.msra.mxu0 %v8662_v20 }
  0x57   :  { %8665 = vmatprep.subr.bf16.mxu0 %v8664_v27  ;;  %v838_v27 = vld [vmem:[%s15502_s6 + $0x310] sm:$0xff] }
  0x58   :  { %v8757_v35 = vpack.c.bf16 %v841_v45, %v838_v27  ;;  %v8763_v27 = vpack.c.bf16 %v853_v55, %v850_v54 }
  0x5a   :  { %8667 = vmatpush1.bf16.msra.mxu0 %v8666_v31 }
  0x5b   :  { %8669 = vmatprep.subr.bf16.mxu0 %v8668_v37 }
  0x5e   :  { %8671 = vmatpush1.bf16.msra.mxu0 %v8670_v42  ;;  %v847_v42 = vld [vmem:[%s15502_s6 + $0x358] sm:$0xff] }
  0x5f   :  { %8673 = vmatprep.subr.bf16.mxu0 %v8672_v49  ;;  %v8682_v49 = vpack.c.bf16 %v845_v58, %v842_v36  ;;  %v8760_v52 = vpack.c.bf16 %v847_v42, %v844_v41  ;;  %v856_v58 = vld [vmem:[%s15502_s6 + $0x3a0] sm:$0xff] }
  0x62   :  { %8675 = vmatpush1.bf16.msra.mxu0 %v8674_v53  ;;  %v851_v53 = vld [vmem:[%s15502_s6 + $0x378] sm:$0xff] }
  0x63   :  { %8677 = vmatprep.subr.bf16.mxu0 %v8676_v60  ;;  %v8684_v60 = vpack.c.bf16 %v852_v46, %v849_v44  ;;  %v8686_v26 = vpack.c.bf16 %v851_v53, %v848_v19  ;;  %v860_v46 = vld [vmem:[%s15502_s6 + $0x3c0] sm:$0xff]  ;;  %v863_v19 = vld [vmem:[%s15502_s6 + $0x3d8] sm:$0xff]  ;;  %v870_v53 = vld [vmem:[%s15502_s6 + $0x410] sm:$0xff] }
  0xe8   :  { %v10214_v62 = vpop.f32.mrb[0].mxu0 }
  0xe9   :  { %v10216_v63 = vpop.f32.mrb[1].mxu0 }
  0xea   :  { %v10262_v18 = vpop.f32.mrb[0].mxu1 }
  0xeb   :  { %v272_v20 = vpop.f32.mrb[1].mxu1 }
  0xec   :  { %v10218_v1 = vpop.f32.mrb[2].mxu0  ;;  %v10268_v23 = vadd.f32 %v272_v20, %v10250_v14 }
  0xed   :  { %v10220_v2 = vpop.f32.mrb[3].mxu0 }
  0xee   :  { %v10287_v31 = vpop.f32.mrb[2].mxu1 }
  0xef   :  { %v278_v32 = vpop.f32.mrb[3].mxu1 }
  0xf0   :  { %v10224_v5 = vpop.f32.mrb[4].mxu0  ;;  %v10296_v38 = vadd.f32 %v278_v32, %v10250_v14 }
  0xf1   :  { %v10227_v7 = vpop.f32.mrb[5].mxu0 }
  0xf2   :  { %v10312_v48 = vpop.f32.mrb[4].mxu1 }
  0xf3   :  { %v284_v51 = vpop.f32.mrb[5].mxu1 }
  0xf4   :  { %v10245_v13 = vpop.f32.mrb[6].mxu0  ;;  %v10327_v59 = vadd.f32 %v284_v51, %v10250_v14  ;;  %v865_v51 = vld [vmem:[%s15502_s6 + $0x3e8] sm:$0xff] }
  0xf5   :  { %v10252_v15 = vpop.f32.mrb[7].mxu0 }
  0xf8   :  { %v612_v21 = vpop.f32.mrb[8].mxu0 }
  0xf9   :  { %v613_v24 = vadd.f32 %v612_v21, %v10256_v16  ;;  %v614_v25 = vpop.f32.mrb[9].mxu0  ;;  %v855_v21 = vld [vmem:[%s15502_s6 + $0x398] sm:$0xff] }
  0xfa   :  { %v615_v28 = vadd.f32 %v614_v25, %v10260_v17  ;;  %v10338_v25 = vpop.f32.mrb[6].mxu1  ;;  %v8688_v36 = vpack.c.bf16 %v858_v22, %v855_v21  ;;  %v869_v21 = vld [vmem:[%s15502_s6 + $0x408] sm:$0xff]  ;;  %v868_v22 = vld [vmem:[%s15502_s6 + $0x400] sm:$0xff] }
  0xfb   :  { %v724_v39 = vmul.f32 %v613_v24, %v613_v24 }
  0xfc   :  { %v725_v33 = vmul.f32 %v615_v28, %v615_v28  ;;  %v618_v37 = vpop.f32.mrb[10].mxu0  ;;  %v290_v28 = vpop.f32.mrb[7].mxu1 }
  0xfd   :  { %v619_v8 = vadd.f32 %v618_v37, %v10256_v16  ;;  %v620_v43 = vpop.f32.mrb[11].mxu0  ;;  %v859_v37 = vld [vmem:[%s15502_s6 + $0x3b8] sm:$0xff]  ;;  %v10369_v42 = vpop.f32.mrb[8].mxu1 }
  0xfe   :  { %988 = vmatprep.mubr.f32.mxu0 %v725_v33  ;;  %1166 = vmatprep.mubr.f32.mxu1 %v725_v33  ;;  %v621_v47 = vadd.f32 %v620_v43, %v10260_v17  ;;  %v8766_v44 = vpack.c.bf16 %v859_v37, %v856_v58  ;;  %v874_v58 = vld [vmem:[%s15502_s6 + $0x430] sm:$0xff]  ;;  %v877_v37 = vld [vmem:[%s15502_s6 + $0x448] sm:$0xff] }
  0xff   :  { %989 = vmatmul.mubr.f32.vlgmr.msra.gmra.mrb[16].mxu0 %v724_v39  ;;  %1167 = vmatmul.mubr.f32.vlgmr.msra.gmra.mrb[16].mxu1 %v724_v39  ;;  %v728_v50 = vmul.f32 %v619_v8, %v619_v8  ;;  %v8690_v8 = vpack.c.bf16 %v857_v30, %v854_v29 }
 0x100   :  { %8679 = vmatpush1.bf16.msra.mxu0 %v8678_v34  ;;  %8758 = vmatpush1.bf16.msra.mxu1 %v8757_v35  ;;  %v729_v56 = vmul.f32 %v621_v47, %v621_v47  ;;  %v624_v57 = vpop.f32.mrb[12].mxu0  ;;  %v10347_v34 = vadd.f32 %v290_v28, %v10250_v14  ;;  %v10352_v35 = vrot.slane %v10232_v9, %v96_v6  ;;  %v861_v6 = vld [vmem:[%s15502_s6 + $0x3c8] sm:$0xff] }
 0x101   :  { %8681 = vmatprep.subr.bf16.mxu0 %v8680_v40  ;;  %8759 = vmatprep.subr.bf16.mxu1 %v9555_v61  ;;  %v625_v0 = vadd.f32 %v624_v57, %v10256_v16  ;;  %v626_v20 = vpop.f32.mrb[13].mxu0  ;;  %v864_v40 = vld [vmem:[%s15502_s6 + $0x3e0] sm:$0xff]  ;;  %v8694_v57 = vpack.c.bf16 %v863_v19, %v860_v46 }
 0x102   :  { %v627_v24 = vadd.f32 %v626_v20, %v10260_v17  ;;  %1171 = vmatprep.mubr.f32.mxu1 %v729_v56  ;;  %994 = vmatprep.mubr.f32.mxu0 %v729_v56  ;;  %v880_v46 = vld [vmem:[%s15502_s6 + $0x460] sm:$0xff] }
 0x103   :  { %v732_v45 = vmul.f32 %v625_v0, %v625_v0  ;;  %1172 = vmatmul.mubr.f32.gmra.mrb[18].mxu1 %v728_v50  ;;  %995 = vmatmul.mubr.f32.gmra.mrb[18].mxu0 %v728_v50  ;;  %v862_v50 = vld [vmem:[%s15502_s6 + $0x3d0] sm:$0xff] }
 0x104   :  { %8683 = vmatpush1.bf16.msra.mxu0 %v8682_v49  ;;  %8761 = vmatpush1.bf16.msra.mxu1 %v8760_v52  ;;  %v733_v32 = vmul.f32 %v627_v24, %v627_v24  ;;  %v630_v33 = vpop.f32.mrb[14].mxu0  ;;  %v867_v52 = vld [vmem:[%s15502_s6 + $0x3f8] sm:$0xff]  ;;  %v866_v0 = vld [vmem:[%s15502_s6 + $0x3f0] sm:$0xff] }
 0x105   :  { %8685 = vmatprep.subr.bf16.mxu0 %v8684_v60  ;;  %8762 = vmatprep.subr.bf16.mxu1 %v9555_v61  ;;  %v631_v14 = vadd.f32 %v630_v33, %v10256_v16  ;;  %v632_v39 = vpop.f32.mrb[15].mxu0  ;;  %v703_v16 = vpop.f32.mrb[9].mxu1  ;;  %v8769_v60 = vpack.c.bf16 %v865_v51, %v862_v50  ;;  %v8696_v20 = vpack.c.bf16 %v870_v53, %v867_v52  ;;  %v871_v24 = vld [vmem:[%s15502_s6 + $0x418] sm:$0xff]  ;;  %v884_v51 = vld [vmem:[%s15502_s6 + $0x480] sm:$0xff] }
 0x106   :  { %v633_v41 = vadd.f32 %v632_v39, %v10260_v17  ;;  %1176 = vmatprep.mubr.f32.mxu1 %v733_v32  ;;  %1000 = vmatprep.mubr.f32.mxu0 %v733_v32  ;;  %v704_v49 = vadd.f32 %v703_v16, %v10352_v35  ;;  %v8692_v17 = vpack.c.bf16 %v864_v40, %v861_v6  ;;  %v10391_v55 = vpop.f32.mrb[10].mxu1  ;;  %v872_v32 = vld [vmem:[%s15502_s6 + $0x420] sm:$0xff]  ;;  %v882_v39 = vld [vmem:[%s15502_s6 + $0x470] sm:$0xff]  ;;  %v887_v53 = vld [vmem:[%s15502_s6 + $0x498] sm:$0xff] }
 0x107   :  { %v736_v43 = vmul.f32 %v631_v14, %v631_v14  ;;  %1177 = vmatmul.mubr.f32.gmra.mrb[20].mxu1 %v732_v45  ;;  %1001 = vmatmul.mubr.f32.gmra.mrb[20].mxu0 %v732_v45  ;;  %v10393_v56 = vpop.f32.mrb[11].mxu1  ;;  %v8698_v29 = vpack.c.bf16 %v869_v21, %v866_v0  ;;  %v8772_v30 = vpack.c.bf16 %v871_v24, %v868_v22  ;;  %v879_v14 = vld [vmem:[%s15502_s6 + $0x458] sm:$0xff]  ;;  %v894_v0 = vld [vmem:[%s15502_s6 + $0x4d0] sm:$0xff] }
 0x108   :  { %8687 = vmatpush1.bf16.msra.mxu0 %v8686_v26  ;;  %8764 = vmatpush1.bf16.msra.mxu1 %v8763_v27  ;;  %v737_v47 = vmul.f32 %v633_v41, %v633_v41  ;;  %v727_v54 = vmul.f32 %v704_v49, %v704_v49  ;;  %v873_v26 = vld [vmem:[%s15502_s6 + $0x428] sm:$0xff]  ;;  %v876_v27 = vld [vmem:[%s15502_s6 + $0x440] sm:$0xff]  ;;  %v10416_v45 = vpop.f32.mrb[12].mxu1  ;;  %v8704_v16 = vpack.c.bf16 %v882_v39, %v879_v14  ;;  %v890_v22 = vld [vmem:[%s15502_s6 + $0x4b0] sm:$0xff] }
 0x109   :  { %8689 = vmatprep.subr.bf16.mxu0 %v8688_v36  ;;  %8765 = vmatprep.subr.bf16.mxu1 %v9555_v61  ;;  %v10418_v28 = vpop.f32.mrb[13].mxu1  ;;  %v8700_v33 = vpack.c.bf16 %v876_v27, %v873_v26  ;;  %v875_v36 = vld [vmem:[%s15502_s6 + $0x438] sm:$0xff]  ;;  %v885_v49 = vld [vmem:[%s15502_s6 + $0x488] sm:$0xff]  ;;  %v892_v27 = vld [vmem:[%s15502_s6 + $0x4c0] sm:$0xff] }
 0x10a   :  { %1181 = vmatprep.mubr.f32.mxu1 %v737_v47  ;;  %1006 = vmatprep.mubr.f32.mxu0 %v737_v47  ;;  %v10439_v6 = vpop.f32.mrb[14].mxu1  ;;  %v8702_v41 = vpack.c.bf16 %v875_v36, %v872_v32  ;;  %v883_v47 = vld [vmem:[%s15502_s6 + $0x478] sm:$0xff]  ;;  %v893_v26 = vld [vmem:[%s15502_s6 + $0x4c8] sm:$0xff]  ;;  %v900_v32 = vld [vmem:[%s15502_s6 + $0x500] sm:$0xff] }
 0x10b   :  { %1182 = vmatmul.mubr.f32.gmra.mrb[22].mxu1 %v736_v43  ;;  %1007 = vmatmul.mubr.f32.gmra.mrb[22].mxu0 %v736_v43  ;;  %v10441_v40 = vpop.f32.mrb[15].mxu1  ;;  %v878_v43 = vld [vmem:[%s15502_s6 + $0x450] sm:$0xff]  ;;  %v8778_v50 = vpack.c.bf16 %v883_v47, %v880_v46  ;;  %v899_v14 = vld [vmem:[%s15502_s6 + $0x4f8] sm:$0xff] }
 0x10c   :  { %8691 = vmatpush1.bf16.msra.mxu0 %v8690_v8  ;;  %8767 = vmatpush1.bf16.msra.mxu1 %v8766_v44  ;;  %v8775_v8 = vpack.c.bf16 %v877_v37, %v874_v58  ;;  %v881_v44 = vld [vmem:[%s15502_s6 + $0x468] sm:$0xff]  ;;  %v896_v58 = vld [vmem:[%s15502_s6 + $0x4e0] sm:$0xff]  ;;  %v898_v39 = vld [vmem:[%s15502_s6 + $0x4f0] sm:$0xff] }
 0x10d   :  { %8693 = vmatprep.subr.bf16.mxu0 %v8692_v17  ;;  %8768 = vmatprep.subr.bf16.mxu1 %v9555_v61  ;;  %v888_v17 = vld [vmem:[%s15502_s6 + $0x4a0] sm:$0xff]  ;;  %v8706_v19 = vpack.c.bf16 %v881_v44, %v878_v43  ;;  %v906_v43 = vld [vmem:[%s15502_s6 + $0x530] sm:$0xff]  ;;  %v8718_v44 = vpack.c.bf16 %v899_v14, %v896_v58 }
 0x10e   :  { %8061 = vmatprep.mubr.msk.f32.mxu0 %vm911_vm1, %v727_v54  ;;  %8065 = vmatprep.mubr.msk.f32.mxu1 %vm911_vm1, %v727_v54  ;;  %v8708_v52 = vpack.c.bf16 %v888_v17, %v885_v49  ;;  %v886_v54 = vld [vmem:[%s15502_s6 + $0x490] sm:$0xff]  ;;  %v365_v14 = vld [vmem:[%s15505_s3 + $0x1c0] sm:$0xff] }
 0x10f   :  { %v902_v47 = vld [vmem:[%s15502_s6 + $0x510] sm:$0xff] }
 0x110   :  { %8695 = vmatpush1.bf16.msra.mxu0 %v8694_v57  ;;  %8770 = vmatpush1.bf16.msra.mxu1 %v8769_v60  ;;  %v889_v57 = vld [vmem:[%s15502_s6 + $0x4a8] sm:$0xff]  ;;  %v891_v60 = vld [vmem:[%s15502_s6 + $0x4b8] sm:$0xff] }
 0x111   :  { %8697 = vmatprep.subr.bf16.mxu0 %v8696_v20  ;;  %8771 = vmatprep.subr.bf16.mxu1 %v9555_v61  ;;  %v8710_v20 = vpack.c.bf16 %v887_v53, %v884_v51  ;;  %v8781_v21 = vpack.c.bf16 %v889_v57, %v886_v54  ;;  %v8712_v24 = vpack.c.bf16 %v894_v0, %v891_v60  ;;  %v907_v51 = vld [vmem:[%s15502_s6 + $0x538] sm:$0xff]  ;;  %v909_v54 = vld [vmem:[%s15502_s6 + $0x548] sm:$0xff]  ;;  %v313_v60 = vld [vmem:[%s15505_s3 + $0x20] sm:$0xff] }
 0x112   :  { %v310_v57 = vld [vmem:[%s15505_s3 + $0x8] sm:$0xff]  ;;  %v359_v0 = vld [vmem:[%s15505_s3 + $0x190] sm:$0xff] }
 0x114   :  { %8699 = vmatpush1.bf16.msra.mxu0 %v8698_v29  ;;  %8773 = vmatpush1.bf16.msra.mxu1 %v8772_v30  ;;  %v895_v29 = vld [vmem:[%s15502_s6 + $0x4d8] sm:$0xff]  ;;  %v897_v30 = vld [vmem:[%s15502_s6 + $0x4e8] sm:$0xff] }
 0x115   :  { %8701 = vmatprep.subr.bf16.mxu0 %v8700_v33  ;;  %8774 = vmatprep.subr.bf16.mxu1 %v9555_v61  ;;  %v8714_v33 = vpack.c.bf16 %v893_v26, %v890_v22  ;;  %v8784_v36 = vpack.c.bf16 %v895_v29, %v892_v27  ;;  %v8716_v37 = vpack.c.bf16 %v900_v32, %v897_v30  ;;  %v312_v22 = vld [vmem:[%s15505_s3 + $0x18] sm:$0xff]  ;;  %v314_v26 = vld [vmem:[%s15505_s3 + $0x28] sm:$0xff]  ;;  %v910_v30 = vld [vmem:[%s15502_s6 + $0x550] sm:$0xff] }
 0x116   :  { %v8792_v32 = vpack.c.bf16 %v313_v60, %v310_v57  ;;  %v321_v57 = vld [vmem:[%s15505_s3 + $0x60] sm:$0xff] }
 0x118   :  { %8703 = vmatpush1.bf16.msra.mxu0 %v8702_v41  ;;  %8776 = vmatpush1.bf16.msra.mxu1 %v8775_v8  ;;  %v901_v41 = vld [vmem:[%s15502_s6 + $0x508] sm:$0xff]  ;;  %v903_v8 = vld [vmem:[%s15502_s6 + $0x518] sm:$0xff] }
 0x119   :  { %8705 = vmatprep.subr.bf16.mxu0 %v8704_v16  ;;  %8777 = vmatprep.subr.bf16.mxu1 %v9555_v61  ;;  %v10520_v16 = vsub.s32 2, %v10222_v4  ;;  %v8787_v46 = vpack.c.bf16 %v901_v41, %v898_v39  ;;  %v8720_v17 = vpack.c.bf16 %v906_v43, %v903_v8  ;;  %v368_v39 = vld [vmem:[%s15505_s3 + $0x1d8] sm:$0xff]  ;;  %v315_v41 = vld [vmem:[%s15505_s3 + $0x30] sm:$0xff]  ;;  %v716_v43 = vadd.f32 %v10418_v28, %v10352_v35 }
 0x11b   :  { %v10528_v49 = vrot.slane %v10232_v9, %v10520_v16  ;;  %v735_v60 = vmul.f32 %v716_v43, %v716_v43  ;;  %v383_v43 = vld [vmem:[%s15505_s3 + $0x250] sm:$0xff] }
 0x11c   :  { %8707 = vmatpush1.bf16.msra.mxu0 %v8706_v19  ;;  %8779 = vmatpush1.bf16.msra.mxu1 %v8778_v50  ;;  %v905_v19 = vld [vmem:[%s15502_s6 + $0x528] sm:$0xff]  ;;  %v904_v50 = vld [vmem:[%s15502_s6 + $0x520] sm:$0xff] }
 0x11d   :  { %8709 = vmatprep.subr.bf16.mxu0 %v8708_v52  ;;  %8780 = vmatprep.subr.bf16.mxu1 %v9555_v61  ;;  %v8722_v52 = vpack.c.bf16 %v905_v19, %v902_v47  ;;  %v8790_v53 = vpack.c.bf16 %v907_v51, %v904_v50  ;;  %v702_v9 = vadd.f32 %v10369_v42, %v10528_v49  ;;  %v362_v42 = vld [vmem:[%s15505_s3 + $0x1a8] sm:$0xff]  ;;  %v320_v47 = vld [vmem:[%s15505_s3 + $0x58] sm:$0xff] }
 0x11e   :  { %v708_v29 = vadd.f32 %v10391_v55, %v10528_v49  ;;  %v319_v55 = vld [vmem:[%s15505_s3 + $0x50] sm:$0xff]  ;;  %v714_v19 = vadd.f32 %v10416_v45, %v10528_v49  ;;  %v8916_v50 = vpack.c.bf16 %v368_v39, %v365_v14  ;;  %v322_v51 = vld [vmem:[%s15505_s3 + $0x68] sm:$0xff]  ;;  %v332_v14 = vld [vmem:[%s15505_s3 + $0xb8] sm:$0xff] }
 0x11f   :  { %v726_v27 = vmul.f32 %v702_v9, %v702_v9  ;;  %v371_v45 = vld [vmem:[%s15505_s3 + $0x1f0] sm:$0xff]  ;;  %v334_v39 = vld [vmem:[%s15505_s3 + $0xc8] sm:$0xff] }
 0x120   :  { %8711 = vmatpush1.bf16.msra.mxu0 %v8710_v20  ;;  %8782 = vmatpush1.bf16.msra.mxu1 %v8781_v21  ;;  %v309_v20 = vld [vmem:[%s15505_s3] sm:$0xff]  ;;  %v710_v21 = vadd.f32 %v10393_v56, %v10352_v35 }
 0x121   :  { %8713 = vmatprep.subr.bf16.mxu0 %v8712_v24  ;;  %8783 = vmatprep.subr.bf16.mxu1 %v9555_v61  ;;  %v311_v24 = vld [vmem:[%s15505_s3 + $0x10] sm:$0xff]  ;;  %v908_v56 = vld [vmem:[%s15502_s6 + $0x540] sm:$0xff]  ;;  %v8794_v58 = vpack.c.bf16 %v312_v22, %v309_v20  ;;  %v10638_v22 = vrot.slane %v10237_v10, %v10243_v12 }
 0x122   :  { %v731_v8 = vmul.f32 %v710_v21, %v710_v21  ;;  %v323_v20 = vld [vmem:[%s15505_s3 + $0x70] sm:$0xff]  ;;  %v326_v21 = vld [vmem:[%s15505_s3 + $0x88] sm:$0xff] }
 0x124   :  { %8715 = vmatpush1.bf16.msra.mxu0 %v8714_v33  ;;  %8785 = vmatpush1.bf16.msra.mxu1 %v8784_v36  ;;  %v8912_v33 = vpack.c.bf16 %v362_v42, %v359_v0  ;;  %v316_v36 = vld [vmem:[%s15505_s3 + $0x38] sm:$0xff]  ;;  %v722_v0 = vadd.f32 %v10441_v40, %v10352_v35  ;;  %v720_v35 = vadd.f32 %v10439_v6, %v10528_v49  ;;  %v377_v6 = vld [vmem:[%s15505_s3 + $0x220] sm:$0xff] }
 0x125   :  { %8717 = vmatprep.subr.bf16.mxu0 %v8716_v37  ;;  %8786 = vmatprep.subr.bf16.mxu1 %v9555_v61  ;;  %v8914_v37 = vpack.c.bf16 %v314_v26, %v311_v24  ;;  %v8796_v28 = vpack.c.bf16 %v319_v55, %v316_v36  ;;  %v324_v42 = vld [vmem:[%s15505_s3 + $0x78] sm:$0xff]  ;;  %v734_v24 = vmul.f32 %v714_v19, %v714_v19  ;;  %v330_v36 = vld [vmem:[%s15505_s3 + $0xa8] sm:$0xff] }
 0x126   :  { %v380_v49 = vld [vmem:[%s15505_s3 + $0x238] sm:$0xff]  ;;  %v184_v55 = vadd.f32 %v10216_v63, %v10638_v22  ;;  %v337_v63 = vld [vmem:[%s15505_s3 + $0xe0] sm:$0xff] }
 0x127   :  { %v336_v19 = vld [vmem:[%s15505_s3 + $0xd8] sm:$0xff] }
 0x128   :  { %8719 = vmatpush1.bf16.msra.mxu0 %v8718_v44  ;;  %8788 = vmatpush1.bf16.msra.mxu1 %v8787_v46  ;;  %v318_v44 = vld [vmem:[%s15505_s3 + $0x48] sm:$0xff]  ;;  %v317_v46 = vld [vmem:[%s15505_s3 + $0x40] sm:$0xff] }
 0x129   :  { %8721 = vmatprep.subr.bf16.mxu0 %v8720_v17  ;;  %8789 = vmatprep.subr.bf16.mxu1 %v9555_v61  ;;  %v730_v17 = vmul.f32 %v708_v29, %v708_v29  ;;  %v8918_v9 = vpack.c.bf16 %v320_v47, %v317_v46  ;;  %v8802_v29 = vpack.c.bf16 %v324_v42, %v321_v57  ;;  %v392_v57 = vld [vmem:[%s15505_s3 + $0x298] sm:$0xff] }
 0x12c   :  { %8723 = vmatpush1.bf16.msra.mxu0 %v8722_v52  ;;  %8791 = vmatpush1.bf16.msra.mxu1 %v8790_v53  ;;  %v325_v52 = vld [vmem:[%s15505_s3 + $0x80] sm:$0xff]  ;;  %v8798_v53 = vpack.c.bf16 %v318_v44, %v315_v41  ;;  %v386_v44 = vld [vmem:[%s15505_s3 + $0x268] sm:$0xff] }
 0x12d   :  { %1061 = vmatprep.subr.mxu0 %v909_v54  ;;  %1235 = vmatprep.subr.mxu1 %v9554_v3  ;;  %v374_v54 = vld [vmem:[%s15505_s3 + $0x208] sm:$0xff]  ;;  %v8800_v40 = vpack.c.bf16 %v325_v52, %v322_v51  ;;  %v8808_v51 = vpack.c.bf16 %v337_v63, %v334_v39  ;;  %v8928_v52 = vpack.c.bf16 %v386_v44, %v383_v43  ;;  %v401_v39 = vld [vmem:[%s15505_s3 + $0x2e0] sm:$0xff]  ;;  %v351_v44 = vld [vmem:[%s15505_s3 + $0x150] sm:$0xff] }
 0x12e   :  { %v8920_v26 = vpack.c.bf16 %v374_v54, %v371_v45  ;;  %v343_v45 = vld [vmem:[%s15505_s3 + $0x110] sm:$0xff]  ;;  %v389_v54 = vld [vmem:[%s15505_s3 + $0x280] sm:$0xff] }
 0x130   :  { %1062 = vmatpush1.msra.mxu0 %v908_v56  ;;  %1236 = vmatpush1.msra.mxu1 %v910_v30  ;;  %v8922_v56 = vpack.c.bf16 %v326_v21, %v323_v20  ;;  %v331_v30 = vld [vmem:[%s15505_s3 + $0xb0] sm:$0xff]  ;;  %v342_v21 = vld [vmem:[%s15505_s3 + $0x108] sm:$0xff] }
 0x131   :  { %1078 = vmatmul.mubr.f32.vlgmr.msra.gmra.mrb[16].mxu0 %v726_v27  ;;  %1252 = vmatmul.mubr.f32.vlgmr.msra.gmra.mrb[24].mxu1 %v726_v27  ;;  %v328_v27 = vld [vmem:[%s15505_s3 + $0x98] sm:$0xff]  ;;  %v339_v20 = vld [vmem:[%s15505_s3 + $0xf0] sm:$0xff] }
 0x132   :  { %8793 = vmatprep.subr.bf16.mxu0 %v8792_v32  ;;  %8913 = vmatprep.subr.bf16.mxu1 %v8912_v33  ;;  %v739_v32 = vmul.f32 %v722_v0, %v722_v0  ;;  %v327_v33 = vld [vmem:[%s15505_s3 + $0x90] sm:$0xff]  ;;  %v8804_v41 = vpack.c.bf16 %v331_v30, %v328_v27  ;;  %v349_v27 = vld [vmem:[%s15505_s3 + $0x140] sm:$0xff]  ;;  %v8814_v30 = vpack.c.bf16 %v342_v21, %v339_v20 }
 0x133   :  { %8795 = vmatpush1.bf16.msra.mxu0 %v8794_v58  ;;  %8915 = vmatpush3.bf16.msra.mxu1 %v8914_v37  ;;  %v738_v58 = vmul.f32 %v720_v35, %v720_v35  ;;  %v329_v37 = vld [vmem:[%s15505_s3 + $0xa0] sm:$0xff]  ;;  %v8806_v46 = vpack.c.bf16 %v330_v36, %v327_v33  ;;  %v8932_v35 = vpack.c.bf16 %v392_v57, %v389_v54  ;;  %v348_v33 = vld [vmem:[%s15505_s3 + $0x138] sm:$0xff]  ;;  %v347_v36 = vld [vmem:[%s15505_s3 + $0x130] sm:$0xff] }
 0x134   :  { %8062 = vmatprep.mubr.msk.f32.mxu0 %vm911_vm1, %v731_v8  ;;  %8066 = vmatprep.mubr.msk.f32.mxu1 %vm911_vm1, %v731_v8  ;;  %v8924_v8 = vpack.c.bf16 %v380_v49, %v377_v6  ;;  %v8926_v47 = vpack.c.bf16 %v332_v14, %v329_v37  ;;  %v352_v37 = vld [vmem:[%s15505_s3 + $0x158] sm:$0xff]  ;;  %v355_v14 = vld [vmem:[%s15505_s3 + $0x170] sm:$0xff] }
 0x135   :  { %1084 = vmatmul.mubr.f32.gmra.mrb[18].mxu0 %v730_v17  ;;  %1257 = vmatmul.mubr.f32.gmra.mrb[26].mxu1 %v730_v17  ;;  %v333_v17 = vld [vmem:[%s15505_s3 + $0xc0] sm:$0xff]  ;;  %v8820_v43 = vpack.c.bf16 %v355_v14, %v352_v37  ;;  %v407_v57 = vld [vmem:[%s15505_s3 + $0x310] sm:$0xff]  ;;  %v422_v14 = vld [vmem:[%s15505_s3 + $0x388] sm:$0xff] }
 0x136   :  { %8797 = vmatprep.subr.bf16.mxu0 %v8796_v28  ;;  %8917 = vmatprep.subr.bf16.mxu1 %v8916_v50  ;;  %v335_v28 = vld [vmem:[%s15505_s3 + $0xd0] sm:$0xff]  ;;  %v294_v50 = vmul.f32 %v184_v55, %v184_v55 }
 0x137   :  { %8799 = vmatpush1.bf16.msra.mxu0 %v8798_v53  ;;  %8919 = vmatpush3.bf16.msra.mxu1 %v8918_v9  ;;  %v338_v53 = vld [vmem:[%s15505_s3 + $0xe8] sm:$0xff]  ;;  %v340_v9 = vld [vmem:[%s15505_s3 + $0xf8] sm:$0xff]  ;;  %v419_v37 = vld [vmem:[%s15505_s3 + $0x370] sm:$0xff] }
 0x138   :  { %8063 = vmatprep.mubr.msk.f32.mxu0 %vm911_vm1, %v735_v60  ;;  %8067 = vmatprep.mubr.msk.f32.mxu1 %vm911_vm1, %v735_v60  ;;  %v8810_v60 = vpack.c.bf16 %v336_v19, %v333_v17  ;;  %v8930_v0 = vpack.c.bf16 %v338_v53, %v335_v28  ;;  %v8812_v42 = vpack.c.bf16 %v343_v45, %v340_v9  ;;  %v356_v28 = vld [vmem:[%s15505_s3 + $0x178] sm:$0xff]  ;;  %v357_v9 = vld [vmem:[%s15505_s3 + $0x180] sm:$0xff] }
 0x139   :  { %1090 = vmatmul.mubr.f32.gmra.mrb[20].mxu0 %v734_v24  ;;  %1262 = vmatmul.mubr.f32.gmra.mrb[28].mxu1 %v734_v24  ;;  %v341_v24 = vld [vmem:[%s15505_s3 + $0x100] sm:$0xff]  ;;  %v10767_v17 = vrot.slane %v10237_v10, %v10240_v11  ;;  %v360_v45 = vld [vmem:[%s15505_s3 + $0x198] sm:$0xff] }
 0x13a   :  { %8801 = vmatprep.subr.bf16.mxu0 %v8800_v40  ;;  %8921 = vmatprep.subr.bf16.mxu1 %v8920_v26  ;;  %v344_v40 = vld [vmem:[%s15505_s3 + $0x118] sm:$0xff]  ;;  %v346_v26 = vld [vmem:[%s15505_s3 + $0x128] sm:$0xff]  ;;  %v8826_v20 = vpack.c.bf16 %v360_v45, %v357_v9  ;;  %v431_v9 = vld [vmem:[%s15505_s3 + $0x3d0] sm:$0xff] }
 0x13b   :  { %8803 = vmatpush1.bf16.msra.mxu0 %v8802_v29  ;;  %8923 = vmatpush3.bf16.msra.mxu1 %v8922_v56  ;;  %v395_v29 = vld [vmem:[%s15505_s3 + $0x2b0] sm:$0xff]  ;;  %v398_v56 = vld [vmem:[%s15505_s3 + $0x2c8] sm:$0xff]  ;;  %v8934_v6 = vpack.c.bf16 %v344_v40, %v341_v24  ;;  %v8816_v49 = vpack.c.bf16 %v349_v27, %v346_v26  ;;  %v182_v54 = vadd.f32 %v10214_v62, %v10767_v17  ;;  %v413_v27 = vld [vmem:[%s15505_s3 + $0x340] sm:$0xff] }
 0x13c   :  { %8064 = vmatprep.mubr.msk.f32.mxu0 %vm911_vm1, %v739_v32  ;;  %8068 = vmatprep.mubr.msk.f32.mxu1 %vm911_vm1, %v739_v32  ;;  %v345_v32 = vld [vmem:[%s15505_s3 + $0x120] sm:$0xff]  ;;  %v8936_v55 = vpack.c.bf16 %v398_v56, %v395_v29  ;;  %v367_v62 = vld [vmem:[%s15505_s3 + $0x1d0] sm:$0xff]  ;;  %v188_v40 = vadd.f32 %v10218_v1, %v10767_v17  ;;  %v416_v29 = vld [vmem:[%s15505_s3 + $0x358] sm:$0xff] }
 0x13d   :  { %1096 = vmatmul.mubr.f32.gmra.mrb[22].mxu0 %v738_v58  ;;  %1267 = vmatmul.mubr.f32.gmra.mrb[30].mxu1 %v738_v58  ;;  %v350_v58 = vld [vmem:[%s15505_s3 + $0x148] sm:$0xff]  ;;  %v363_v24 = vld [vmem:[%s15505_s3 + $0x1b0] sm:$0xff] }
 0x13e   :  { %8805 = vmatprep.subr.bf16.mxu0 %v8804_v41  ;;  %8925 = vmatprep.subr.bf16.mxu1 %v8924_v8  ;;  %v404_v41 = vld [vmem:[%s15505_s3 + $0x2f8] sm:$0xff]  ;;  %v8818_v8 = vpack.c.bf16 %v348_v33, %v345_v32  ;;  %v8938_v63 = vpack.c.bf16 %v350_v58, %v347_v36  ;;  %v370_v1 = vld [vmem:[%s15505_s3 + $0x1e8] sm:$0xff]  ;;  %v8948_v32 = vpack.c.bf16 %v416_v29, %v413_v27  ;;  %v397_v27 = vld [vmem:[%s15505_s3 + $0x2c0] sm:$0xff] }
 0x13f   :  { %8807 = vmatpush1.bf16.msra.mxu0 %v8806_v46  ;;  %1349 = vmatprep.mubr.f32.mxu0 %v294_v50  ;;  %v354_v46 = vld [vmem:[%s15505_s3 + $0x168] sm:$0xff]  ;;  %v8940_v19 = vpack.c.bf16 %v404_v41, %v401_v39  ;;  %v372_v33 = vld [vmem:[%s15505_s3 + $0x1f8] sm:$0xff]  ;;  %v10835_v36 = vmul.f32 %v188_v40, %v188_v40  ;;  %v202_v41 = vadd.f32 %v10252_v15, %v10638_v22  ;;  %v375_v15 = vld [vmem:[%s15505_s3 + $0x210] sm:$0xff] }
 0x140   :  { %8927 = vmatpush3.bf16.msra.mxu1 %v8926_v47  ;;  %1527 = vmatprep.mubr.f32.mxu1 %v294_v50  ;;  %v353_v47 = vld [vmem:[%s15505_s3 + $0x160] sm:$0xff]  ;;  %v358_v50 = vld [vmem:[%s15505_s3 + $0x188] sm:$0xff]  ;;  %v440_v40 = vld [vmem:[%s15505_s3 + $0x418] sm:$0xff] }
 0x141   :  { %8809 = vmatprep.subr.bf16.mxu0 %v8808_v51  ;;  %8929 = vmatprep.subr.bf16.mxu1 %v8928_v52  ;;  %v361_v51 = vld [vmem:[%s15505_s3 + $0x1a0] sm:$0xff]  ;;  %v8822_v52 = vpack.c.bf16 %v354_v46, %v351_v44  ;;  %v8942_v10 = vpack.c.bf16 %v356_v28, %v353_v47  ;;  %v200_v46 = vadd.f32 %v10245_v13, %v10767_v17  ;;  %v428_v28 = vld [vmem:[%s15505_s3 + $0x3b8] sm:$0xff] }
 0x142   :  { %v8824_v53 = vpack.c.bf16 %v361_v51, %v358_v50  ;;  %v10875_v50 = vmul.f32 %v202_v41, %v202_v41  ;;  %v382_v51 = vld [vmem:[%s15505_s3 + $0x248] sm:$0xff]  ;;  %v385_v13 = vld [vmem:[%s15505_s3 + $0x260] sm:$0xff]  ;;  %v399_v41 = vld [vmem:[%s15505_s3 + $0x2d0] sm:$0xff] }
 0x143   :  { %8811 = vmatpush1.bf16.msra.mxu0 %v8810_v60  ;;  %v410_v60 = vld [vmem:[%s15505_s3 + $0x328] sm:$0xff]  ;;  %v10894_v45 = vmul.f32 %v200_v46, %v200_v46 }
 0x144   :  { %8931 = vmatpush3.bf16.msra.mxu1 %v8930_v0  ;;  %8813 = vmatprep.subr.bf16.mxu0 %v8812_v42  ;;  %v190_v0 = vadd.f32 %v10220_v2, %v10638_v22  ;;  %v364_v42 = vld [vmem:[%s15505_s3 + $0x1b8] sm:$0xff]  ;;  %v8945_v21 = vpack.c.bf16 %v410_v60, %v407_v57  ;;  %v366_v2 = vld [vmem:[%s15505_s3 + $0x1c8] sm:$0xff] }
 0x145   :  { %8933 = vmatprep.subr.bf16.mxu1 %v8932_v35  ;;  %v10806_v35 = vmul.f32 %v182_v54, %v182_v54  ;;  %v8828_v26 = vpack.c.bf16 %v367_v62, %v364_v42  ;;  %v8840_v54 = vpack.c.bf16 %v385_v13, %v382_v51  ;;  %v434_v57 = vld [vmem:[%s15505_s3 + $0x3e8] sm:$0xff]  ;;  %v388_v60 = vld [vmem:[%s15505_s3 + $0x278] sm:$0xff]  ;;  %v10908_v42 = vmul.f32 %v10268_v23, %v10268_v23  ;;  %v437_v23 = vld [vmem:[%s15505_s3 + $0x400] sm:$0xff] }
 0x146   :  { %v10817_v56 = vmul.f32 %v190_v0, %v190_v0  ;;  %v391_v0 = vld [vmem:[%s15505_s3 + $0x290] sm:$0xff]  ;;  %v458_v13 = vld [vmem:[%s15505_s3 + $0x4a8] sm:$0xff] }
 0x147   :  { %8815 = vmatpush1.bf16.msra.mxu0 %v8814_v30  ;;  %v196_v30 = vadd.f32 %v10227_v7, %v10638_v22  ;;  %v369_v7 = vld [vmem:[%s15505_s3 + $0x1e0] sm:$0xff]  ;;  %v378_v22 = vld [vmem:[%s15505_s3 + $0x228] sm:$0xff]  ;;  %v455_v51 = vld [vmem:[%s15505_s3 + $0x490] sm:$0xff] }
 0x148   :  { %8935 = vmatpush3.bf16.msra.mxu1 %v8934_v6  ;;  %8817 = vmatprep.subr.bf16.mxu0 %v8816_v49  ;;  %v373_v6 = vld [vmem:[%s15505_s3 + $0x200] sm:$0xff]  ;;  %v8830_v49 = vpack.c.bf16 %v366_v2, %v363_v24  ;;  %v387_v24 = vld [vmem:[%s15505_s3 + $0x270] sm:$0xff]  ;;  %v390_v2 = vld [vmem:[%s15505_s3 + $0x288] sm:$0xff] }
 0x149   :  { %8937 = vmatprep.subr.bf16.mxu1 %v8936_v55  ;;  %v194_v55 = vadd.f32 %v10224_v5, %v10767_v17  ;;  %v8832_v58 = vpack.c.bf16 %v373_v6, %v370_v1  ;;  %v10846_v39 = vmul.f32 %v196_v30, %v196_v30  ;;  %v376_v5 = vld [vmem:[%s15505_s3 + $0x218] sm:$0xff]  ;;  %v8838_v17 = vpack.c.bf16 %v378_v22, %v375_v15  ;;  %v393_v6 = vld [vmem:[%s15505_s3 + $0x2a0] sm:$0xff] }
 0x14a   :  { %v8846_v29 = vpack.c.bf16 %v390_v2, %v387_v24  ;;  %v8960_v30 = vpack.c.bf16 %v440_v40, %v437_v23  ;;  %v409_v15 = vld [vmem:[%s15505_s3 + $0x320] sm:$0xff]  ;;  %v420_v40 = vld [vmem:[%s15505_s3 + $0x378] sm:$0xff] }
 0x14b   :  { %8819 = vmatpush1.bf16.msra.mxu0 %v8818_v8  ;;  %v379_v8 = vld [vmem:[%s15505_s3 + $0x230] sm:$0xff]  ;;  %v10864_v44 = vmul.f32 %v194_v55, %v194_v55  ;;  %v417_v23 = vld [vmem:[%s15505_s3 + $0x360] sm:$0xff] }
 0x14c   :  { %8939 = vmatpush3.bf16.msra.mxu1 %v8938_v63  ;;  %8821 = vmatprep.subr.bf16.mxu0 %v8820_v43  ;;  %v8834_v63 = vpack.c.bf16 %v372_v33, %v369_v7  ;;  %v8951_v43 = vpack.c.bf16 %v422_v14, %v419_v37  ;;  %v8836_v47 = vpack.c.bf16 %v379_v8, %v376_v5  ;;  %v446_v7 = vld [vmem:[%s15505_s3 + $0x448] sm:$0xff]  ;;  %v400_v33 = vld [vmem:[%s15505_s3 + $0x2d8] sm:$0xff]  ;;  %v403_v55 = vld [vmem:[%s15505_s3 + $0x2f0] sm:$0xff] }
 0x14d   :  { %8941 = vmatprep.subr.bf16.mxu1 %v8940_v19  ;;  %v425_v19 = vld [vmem:[%s15505_s3 + $0x3a0] sm:$0xff]  ;;  %v8852_v14 = vpack.c.bf16 %v403_v55, %v400_v33  ;;  %v402_v5 = vld [vmem:[%s15505_s3 + $0x2e8] sm:$0xff] }
 0x14e   :  { %v449_v8 = vld [vmem:[%s15505_s3 + $0x460] sm:$0xff]  ;;  %v8854_v22 = vpack.c.bf16 %v402_v5, %v399_v41  ;;  %v436_v41 = vld [vmem:[%s15505_s3 + $0x3f8] sm:$0xff]  ;;  %v439_v5 = vld [vmem:[%s15505_s3 + $0x410] sm:$0xff] }
 0x14f   :  { %8823 = vmatpush1.bf16.msra.mxu0 %v8822_v52  ;;  %v8954_v52 = vpack.c.bf16 %v428_v28, %v425_v19  ;;  %v405_v19 = vld [vmem:[%s15505_s3 + $0x300] sm:$0xff]  ;;  %v408_v28 = vld [vmem:[%s15505_s3 + $0x318] sm:$0xff] }
 0x150   :  { %8943 = vmatpush3.bf16.msra.mxu1 %v8942_v10  ;;  %8825 = vmatprep.subr.bf16.mxu0 %v8824_v53  ;;  %v381_v10 = vld [vmem:[%s15505_s3 + $0x240] sm:$0xff]  ;;  %v384_v53 = vld [vmem:[%s15505_s3 + $0x258] sm:$0xff] }
 0x151   :  { %8944 = vmatprep.subr.bf16.mxu1 %v9555_v61  ;;  %v8842_v62 = vpack.c.bf16 %v384_v53, %v381_v10  ;;  %v8858_v10 = vpack.c.bf16 %v408_v28, %v405_v19  ;;  %v8969_v53 = vpack.c.bf16 %v458_v13, %v455_v51  ;;  %v9516_v19 = vld [vmem:[%s15504_s2] sm:$0xf] }
 0x152   :  { %v11097_v28 = vrot.slane %v9516_v19, %v10520_v16 }
 0x153   :  { %1528 = vmatmul.mubr.f32.vlgmr.msra.gmra.mrb[32].mxu1 %v10806_v35  ;;  %8827 = vmatpush1.bf16.msra.mxu0 %v8826_v20  ;;  %v8957_v20 = vpack.c.bf16 %v434_v57, %v431_v9  ;;  %v414_v57 = vld [vmem:[%s15505_s3 + $0x348] sm:$0xff] }
 0x154   :  { %1532 = vmatprep.mubr.f32.mxu1 %v10817_v56  ;;  %8946 = vmatpush1.bf16.msra.mxu1 %v8945_v21  ;;  %v8844_v21 = vpack.c.bf16 %v391_v0, %v388_v60  ;;  %v461_v60 = vld [vmem:[%s15505_s3 + $0x4c0] sm:$0xff]  ;;  %v464_v0 = vld [vmem:[%s15505_s3 + $0x4d8] sm:$0xff] }
 0x155   :  { %8829 = vmatprep.subr.bf16.mxu0 %v8828_v26  ;;  %8947 = vmatprep.subr.bf16.mxu1 %v9555_v61  ;;  %v394_v26 = vld [vmem:[%s15505_s3 + $0x2a8] sm:$0xff]  ;;  %v8972_v24 = vpack.c.bf16 %v464_v0, %v461_v60  ;;  %v271_v60 = vadd.f32 %v10262_v18, %v11097_v28  ;;  %v1633_v0 = vld [vmem:[%s15506_s7] sm:$0xff] }
 0x156   :  { %v8848_v1 = vpack.c.bf16 %v397_v27, %v394_v26  ;;  %v424_v26 = vld [vmem:[%s15505_s3 + $0x398] sm:$0xff]  ;;  %v427_v27 = vld [vmem:[%s15505_s3 + $0x3b0] sm:$0xff]  ;;  %v450_v18 = vld [vmem:[%s15505_s3 + $0x468] sm:$0xff] }
 0x157   :  { %1533 = vmatmul.mubr.f32.gmra.mrb[34].mxu1 %v10835_v36  ;;  %8831 = vmatpush1.bf16.msra.mxu0 %v8830_v49  ;;  %v396_v49 = vld [vmem:[%s15505_s3 + $0x2b8] sm:$0xff] }
 0x158   :  { %1537 = vmatprep.mubr.f32.mxu1 %v10846_v39  ;;  %8949 = vmatpush1.bf16.msra.mxu1 %v8948_v32  ;;  %v443_v32 = vld [vmem:[%s15505_s3 + $0x430] sm:$0xff] }
 0x159   :  { %8833 = vmatprep.subr.bf16.mxu0 %v8832_v58  ;;  %8950 = vmatprep.subr.bf16.mxu1 %v9555_v61  ;;  %v8850_v58 = vpack.c.bf16 %v396_v49, %v393_v6  ;;  %v8963_v37 = vpack.c.bf16 %v446_v7, %v443_v32  ;;  %v423_v6 = vld [vmem:[%s15505_s3 + $0x390] sm:$0xff]  ;;  %v426_v49 = vld [vmem:[%s15505_s3 + $0x3a8] sm:$0xff]  ;;  %v433_v7 = vld [vmem:[%s15505_s3 + $0x3e0] sm:$0xff] }
 0x15a   :  { %v430_v32 = vld [vmem:[%s15505_s3 + $0x3c8] sm:$0xff]  ;;  %v8870_v33 = vpack.c.bf16 %v426_v49, %v423_v6  ;;  %v1639_v6 = vld [vmem:[%s15506_s7 + $0x30] sm:$0xff] }
 0x15b   :  { %1538 = vmatmul.mubr.f32.gmra.mrb[36].mxu1 %v10864_v44  ;;  %8835 = vmatpush1.bf16.msra.mxu0 %v8834_v63  ;;  %v452_v63 = vld [vmem:[%s15505_s3 + $0x478] sm:$0xff]  ;;  %v1642_v49 = vld [vmem:[%s15506_s7 + $0x48] sm:$0xff] }
 0x15c   :  { %1542 = vmatprep.mubr.f32.mxu1 %v10875_v50  ;;  %8952 = vmatpush1.bf16.msra.mxu1 %v8951_v43  ;;  %v406_v43 = vld [vmem:[%s15505_s3 + $0x308] sm:$0xff]  ;;  %v8966_v46 = vpack.c.bf16 %v452_v63, %v449_v8 }
 0x15d   :  { %8837 = vmatprep.subr.bf16.mxu0 %v8836_v47  ;;  %8953 = vmatprep.subr.bf16.mxu1 %v9555_v61  ;;  %v8856_v47 = vpack.c.bf16 %v409_v15, %v406_v43  ;;  %v8876_v43 = vpack.c.bf16 %v439_v5, %v436_v41  ;;  %v435_v15 = vld [vmem:[%s15505_s3 + $0x3f0] sm:$0xff]  ;;  %v1645_v41 = vld [vmem:[%s15506_s7 + $0x60] sm:$0xff]  ;;  %v1648_v5 = vld [vmem:[%s15506_s7 + $0x78] sm:$0xff] }
 0x15f   :  { %1543 = vmatmul.mubr.f32.gmra.mrb[38].mxu1 %v10894_v45  ;;  %8839 = vmatpush1.bf16.msra.mxu0 %v8838_v17  ;;  %v412_v17 = vld [vmem:[%s15505_s3 + $0x338] sm:$0xff] }
 0x160   :  { %8955 = vmatpush1.bf16.msra.mxu1 %v8954_v52  ;;  %8073 = vmatprep.mubr.msk.f32.mxu1 %vm1272_vm2, %v10908_v42  ;;  %v415_v52 = vld [vmem:[%s15505_s3 + $0x350] sm:$0xff] }
 0x161   :  { %8841 = vmatprep.subr.bf16.mxu0 %v8840_v54  ;;  %8956 = vmatprep.subr.bf16.mxu1 %v9555_v61  ;;  %v8860_v9 = vpack.c.bf16 %v415_v52, %v412_v17  ;;  %v411_v54 = vld [vmem:[%s15505_s3 + $0x330] sm:$0xff]  ;;  %v441_v52 = vld [vmem:[%s15505_s3 + $0x420] sm:$0xff] }
 0x163   :  { %8843 = vmatpush1.bf16.msra.mxu0 %v8842_v62  ;;  %v418_v62 = vld [vmem:[%s15505_s3 + $0x368] sm:$0xff] }
 0x164   :  { %8958 = vmatpush1.bf16.msra.mxu1 %v8957_v20  ;;  %8845 = vmatprep.subr.bf16.mxu0 %v8844_v21  ;;  %v421_v20 = vld [vmem:[%s15505_s3 + $0x380] sm:$0xff]  ;;  %v8862_v21 = vpack.c.bf16 %v414_v57, %v411_v54  ;;  %v1634_v54 = vld [vmem:[%s15506_s7 + $0x8] sm:$0xff] }
 0x165   :  { %8959 = vmatprep.subr.bf16.mxu1 %v9555_v61  ;;  %v8864_v2 = vpack.c.bf16 %v421_v20, %v418_v62  ;;  %v1637_v57 = vld [vmem:[%s15506_s7 + $0x20] sm:$0xff]  ;;  %v1636_v62 = vld [vmem:[%s15506_s7 + $0x18] sm:$0xff]  ;;  %v447_v20 = vld [vmem:[%s15505_s3 + $0x450] sm:$0xff] }
 0x167   :  { %8847 = vmatpush1.bf16.msra.mxu0 %v8846_v29  ;;  %v8866_v29 = vpack.c.bf16 %v420_v40, %v417_v23  ;;  %v491_v23 = vld [vmem:[%s15505_s3 + $0x5b0] sm:$0xff]  ;;  %v8986_v40 = vpack.c.bf16 %v1637_v57, %v1634_v54 }
 0x168   :  { %8961 = vmatpush1.bf16.msra.mxu1 %v8960_v30  ;;  %8849 = vmatprep.subr.bf16.mxu0 %v8848_v1  ;;  %v8868_v1 = vpack.c.bf16 %v427_v27, %v424_v26  ;;  %v8988_v26 = vpack.c.bf16 %v1636_v62, %v1633_v0  ;;  %v11148_v27 = vmul.f32 %v271_v60, %v271_v60  ;;  %v475_v54 = vld [vmem:[%s15505_s3 + $0x530] sm:$0xff] }
 0x169   :  { %8962 = vmatprep.subr.bf16.mxu1 %v9555_v61  ;;  %v471_v0 = vld [vmem:[%s15505_s3 + $0x510] sm:$0xff] }
 0x16b   :  { %8851 = vmatpush1.bf16.msra.mxu0 %v8850_v58  ;;  %v8872_v58 = vpack.c.bf16 %v433_v7, %v430_v32  ;;  %v456_v32 = vld [vmem:[%s15505_s3 + $0x498] sm:$0xff]  ;;  %v1646_v7 = vld [vmem:[%s15506_s7 + $0x68] sm:$0xff] }
 0x16c   :  { %8964 = vmatpush1.bf16.msra.mxu1 %v8963_v37  ;;  %8853 = vmatprep.subr.bf16.mxu0 %v8852_v14  ;;  %v429_v37 = vld [vmem:[%s15505_s3 + $0x3c0] sm:$0xff]  ;;  %v432_v14 = vld [vmem:[%s15505_s3 + $0x3d8] sm:$0xff] }
 0x16d   :  { %8965 = vmatprep.subr.bf16.mxu1 %v9555_v61  ;;  %v8874_v8 = vpack.c.bf16 %v432_v14, %v429_v37  ;;  %v8992_v37 = vpack.c.bf16 %v1642_v49, %v1639_v6  ;;  %v9517_v6 = vld [vmem:[%s15501_s0] sm:$0xff]  ;;  %v484_v49 = vld [vmem:[%s15505_s3 + $0x578] sm:$0xff] }
 0x16f   :  { %8855 = vmatpush1.bf16.msra.mxu0 %v8854_v22  ;;  %v438_v22 = vld [vmem:[%s15505_s3 + $0x408] sm:$0xff] }
 0x170   :  { %8967 = vmatpush1.bf16.msra.mxu1 %v8966_v46  ;;  %8857 = vmatprep.subr.bf16.mxu0 %v8856_v47  ;;  %v442_v46 = vld [vmem:[%s15505_s3 + $0x428] sm:$0xff]  ;;  %v445_v47 = vld [vmem:[%s15505_s3 + $0x440] sm:$0xff]  ;;  %v8878_v51 = vpack.c.bf16 %v438_v22, %v435_v15  ;;  %v1652_v15 = vld [vmem:[%s15506_s7 + $0x98] sm:$0xff] }
 0x171   :  { %8968 = vmatprep.subr.bf16.mxu1 %v9555_v61  ;;  %v8880_v17 = vpack.c.bf16 %v445_v47, %v442_v46  ;;  %v1655_v22 = vld [vmem:[%s15506_s7 + $0xb0] sm:$0xff]  ;;  %v8996_v46 = vpack.c.bf16 %v1648_v5, %v1645_v41  ;;  %v289_v47 = vadd.f32 %v10338_v25, %v11097_v28  ;;  %v490_v41 = vld [vmem:[%s15505_s3 + $0x5a8] sm:$0xff] }
 0x172   :  { %1350 = vmatmul.mubr.f32.vlgmr.msra.gmra.mrb[16].mxu0 %v10806_v35  ;;  %v467_v35 = vld [vmem:[%s15505_s3 + $0x4f0] sm:$0xff] }
 0x173   :  { %1355 = vmatprep.mubr.f32.mxu0 %v10817_v56  ;;  %8859 = vmatpush1.bf16.msra.mxu0 %v8858_v10  ;;  %v470_v56 = vld [vmem:[%s15505_s3 + $0x508] sm:$0xff]  ;;  %v444_v10 = vld [vmem:[%s15505_s3 + $0x438] sm:$0xff]  ;;  %v11253_v60 = vmul.f32 %v289_v47, %v289_v47  ;;  %v9519_v5 = vld [vmem:[%s15501_s0 + $0x10] sm:$0xff] }
 0x174   :  { %8970 = vmatpush1.bf16.msra.mxu1 %v8969_v53  ;;  %8861 = vmatprep.subr.bf16.mxu0 %v8860_v9  ;;  %v8975_v30 = vpack.c.bf16 %v470_v56, %v467_v35  ;;  %v448_v53 = vld [vmem:[%s15505_s3 + $0x458] sm:$0xff]  ;;  %v451_v9 = vld [vmem:[%s15505_s3 + $0x470] sm:$0xff]  ;;  %v454_v35 = vld [vmem:[%s15505_s3 + $0x488] sm:$0xff] }
 0x175   :  { %8971 = vmatprep.subr.bf16.mxu1 %v9555_v61  ;;  %v457_v56 = vld [vmem:[%s15505_s3 + $0x4a0] sm:$0xff]  ;;  %v1873_v47 = vld [vmem:[%s15507_s9 + $0x68] sm:$0xff] }
 0x176   :  { %1356 = vmatmul.mubr.f32.gmra.mrb[18].mxu0 %v10835_v36  ;;  %v473_v36 = vld [vmem:[%s15505_s3 + $0x520] sm:$0xff] }
 0x177   :  { %1361 = vmatprep.mubr.f32.mxu0 %v10846_v39  ;;  %8863 = vmatpush1.bf16.msra.mxu0 %v8862_v21  ;;  %v476_v39 = vld [vmem:[%s15505_s3 + $0x538] sm:$0xff]  ;;  %v8884_v21 = vpack.c.bf16 %v451_v9, %v448_v53  ;;  %v1635_v53 = vld [vmem:[%s15506_s7 + $0x10] sm:$0xff]  ;;  %v1638_v9 = vld [vmem:[%s15506_s7 + $0x28] sm:$0xff] }
 0x178   :  { %8973 = vmatpush1.bf16.msra.mxu1 %v8972_v24  ;;  %8865 = vmatprep.subr.bf16.mxu0 %v8864_v2  ;;  %v8978_v55 = vpack.c.bf16 %v476_v39, %v473_v36  ;;  %v1640_v24 = vld [vmem:[%s15506_s7 + $0x38] sm:$0xff]  ;;  %v1643_v2 = vld [vmem:[%s15506_s7 + $0x50] sm:$0xff]  ;;  %v453_v36 = vld [vmem:[%s15505_s3 + $0x480] sm:$0xff]  ;;  %v11163_v39 = vmul.f32 %v10296_v38, %v10296_v38  ;;  %v9002_v62 = vpack.c.bf16 %v1638_v9, %v1635_v53 }
 0x179   :  { %8974 = vmatprep.subr.bf16.mxu1 %v9555_v61  ;;  %v460_v38 = vld [vmem:[%s15505_s3 + $0x4b8] sm:$0xff]  ;;  %v1878_v9 = vld [vmem:[%s15507_s9 + $0x90] sm:$0xff] }
 0x17a   :  { %1362 = vmatmul.mubr.f32.gmra.mrb[20].mxu0 %v10864_v44  ;;  %v479_v44 = vld [vmem:[%s15505_s3 + $0x550] sm:$0xff] }
 0x17b   :  { %1367 = vmatprep.mubr.f32.mxu0 %v10875_v50  ;;  %8867 = vmatpush1.bf16.msra.mxu0 %v8866_v29  ;;  %v482_v50 = vld [vmem:[%s15505_s3 + $0x568] sm:$0xff]  ;;  %v277_v29 = vadd.f32 %v10287_v31, %v11097_v28  ;;  %v8888_v31 = vpack.c.bf16 %v457_v56, %v454_v35  ;;  %v477_v35 = vld [vmem:[%s15505_s3 + $0x540] sm:$0xff] }
 0x17c   :  { %8976 = vmatpush1.bf16.msra.mxu1 %v8975_v30  ;;  %8869 = vmatprep.subr.bf16.mxu0 %v8868_v1  ;;  %v8981_v63 = vpack.c.bf16 %v482_v50, %v479_v44  ;;  %v8886_v30 = vpack.c.bf16 %v450_v18, %v447_v20  ;;  %v8990_v1 = vpack.c.bf16 %v1643_v2, %v1640_v24  ;;  %v1641_v18 = vld [vmem:[%s15506_s7 + $0x40] sm:$0xff]  ;;  %v1644_v24 = vld [vmem:[%s15506_s7 + $0x58] sm:$0xff]  ;;  %v478_v2 = vld [vmem:[%s15505_s3 + $0x548] sm:$0xff] }
 0x17d   :  { %8977 = vmatprep.subr.bf16.mxu1 %v9555_v61  ;;  %v11185_v14 = vmul.f32 %v277_v29, %v277_v29  ;;  %v8890_v44 = vpack.c.bf16 %v456_v32, %v453_v36  ;;  %v9006_v56 = vpack.c.bf16 %v1644_v24, %v1641_v18  ;;  %v480_v29 = vld [vmem:[%s15505_s3 + $0x558] sm:$0xff]  ;;  %v487_v36 = vld [vmem:[%s15505_s3 + $0x590] sm:$0xff] }
 0x17e   :  { %1368 = vmatmul.mubr.f32.gmra.mrb[22].mxu0 %v10894_v45  ;;  %v485_v45 = vld [vmem:[%s15505_s3 + $0x580] sm:$0xff]  ;;  %v483_v32 = vld [vmem:[%s15505_s3 + $0x570] sm:$0xff]  ;;  %v1891_v18 = vld [vmem:[%s15507_s9 + $0xf8] sm:$0xff] }
 0x17f   :  { %8871 = vmatpush1.bf16.msra.mxu0 %v8870_v33  ;;  %8069 = vmatprep.mubr.msk.f32.mxu0 %vm1272_vm2, %v10908_v42  ;;  %v488_v42 = vld [vmem:[%s15505_s3 + $0x598] sm:$0xff]  ;;  %v1649_v33 = vld [vmem:[%s15506_s7 + $0x80] sm:$0xff] }
 0x180   :  { %8979 = vmatpush1.bf16.msra.mxu1 %v8978_v55  ;;  %8873 = vmatprep.subr.bf16.mxu0 %v8872_v58  ;;  %v8984_v13 = vpack.c.bf16 %v488_v42, %v485_v45  ;;  %v463_v55 = vld [vmem:[%s15505_s3 + $0x4d0] sm:$0xff]  ;;  %v283_v58 = vadd.f32 %v10312_v48, %v11097_v28  ;;  %v8994_v50 = vpack.c.bf16 %v1649_v33, %v1646_v7  ;;  %v469_v45 = vld [vmem:[%s15505_s3 + $0x500] sm:$0xff]  ;;  %v468_v28 = vld [vmem:[%s15505_s3 + $0x4f8] sm:$0xff] }
 0x181   :  { %8980 = vmatprep.subr.bf16.mxu1 %v9555_v61  ;;  %v459_v48 = vld [vmem:[%s15505_s3 + $0x4b0] sm:$0xff]  ;;  %v8908_v33 = vpack.c.bf16 %v487_v36, %v484_v49  ;;  %v1893_v49 = vld [vmem:[%s15507_s9 + $0x108] sm:$0xff]  ;;  %v1871_v36 = vld [vmem:[%s15507_s9 + $0x58] sm:$0xff] }
 0x182   :  { %v11216_v42 = vmul.f32 %v283_v58, %v283_v58  ;;  %v1656_v58 = vld [vmem:[%s15506_s7 + $0xb8] sm:$0xff] }
 0x183   :  { %8875 = vmatpush1.bf16.msra.mxu0 %v8874_v8  ;;  %v11198_v8 = vmul.f32 %v10327_v59, %v10327_v59  ;;  %v466_v59 = vld [vmem:[%s15505_s3 + $0x4e8] sm:$0xff] }
 0x184   :  { %8982 = vmatpush1.bf16.msra.mxu1 %v8981_v63  ;;  %8877 = vmatprep.subr.bf16.mxu0 %v8876_v43  ;;  %v8892_v63 = vpack.c.bf16 %v463_v55, %v460_v38  ;;  %v462_v43 = vld [vmem:[%s15505_s3 + $0x4c8] sm:$0xff]  ;;  %v8896_v25 = vpack.c.bf16 %v469_v45, %v466_v59  ;;  %v1653_v55 = vld [vmem:[%s15506_s7 + $0xa0] sm:$0xff]  ;;  %v1870_v59 = vld [vmem:[%s15507_s9 + $0x50] sm:$0xff] }
 0x185   :  { %8983 = vmatprep.subr.bf16.mxu1 %v9555_v61  ;;  %v8882_v61 = vpack.c.bf16 %v444_v10, %v441_v52  ;;  %v8894_v19 = vpack.c.bf16 %v462_v43, %v459_v48  ;;  %v465_v52 = vld [vmem:[%s15505_s3 + $0x4e0] sm:$0xff]  ;;  %v11233_v10 = vmul.f32 %v10347_v34, %v10347_v34  ;;  %v472_v34 = vld [vmem:[%s15505_s3 + $0x518] sm:$0xff]  ;;  %v486_v38 = vld [vmem:[%s15505_s3 + $0x588] sm:$0xff] }
 0x186   :  { %v8900_v20 = vpack.c.bf16 %v475_v54, %v472_v34  ;;  %v489_v48 = vld [vmem:[%s15505_s3 + $0x5a0] sm:$0xff]  ;;  %v1861_v43 = vld [vmem:[%s15507_s9 + $0x8] sm:$0xff]  ;;  %v1866_v45 = vld [vmem:[%s15507_s9 + $0x30] sm:$0xff] }
 0x187   :  { %8879 = vmatpush1.bf16.msra.mxu0 %v8878_v51  ;;  %v8998_v51 = vpack.c.bf16 %v1655_v22, %v1652_v15  ;;  %v1867_v15 = vld [vmem:[%s15507_s9 + $0x38] sm:$0xff]  ;;  %v1881_v34 = vld [vmem:[%s15507_s9 + $0xa8] sm:$0xff] }
 0x188   :  { %8985 = vmatpush1.bf16.msra.mxu1 %v8984_v13  ;;  %8881 = vmatprep.subr.bf16.mxu0 %v8880_v17  ;;  %v1651_v13 = vld [vmem:[%s15506_s7 + $0x90] sm:$0xff]  ;;  %v1654_v17 = vld [vmem:[%s15506_s7 + $0xa8] sm:$0xff] }
 0x189   :  { %1604 = vmatprep.subr.mxu1 %v9554_v3  ;;  %v9000_v57 = vpack.c.bf16 %v1654_v17, %v1651_v13  ;;  %v1872_v17 = vld [vmem:[%s15507_s9 + $0x60] sm:$0xff]  ;;  %v1885_v54 = vld [vmem:[%s15507_s9 + $0xc8] sm:$0xff] }
 0x18b   :  { %8883 = vmatpush1.bf16.msra.mxu0 %v8882_v61  ;;  %v8898_v61 = vpack.c.bf16 %v468_v28, %v465_v52  ;;  %v1875_v52 = vld [vmem:[%s15507_s9 + $0x78] sm:$0xff] }
 0x18c   :  { %1605 = vmatpush1.msra.mxu1 %v491_v23  ;;  %8885 = vmatprep.subr.bf16.mxu0 %v8884_v21  ;;  %v474_v21 = vld [vmem:[%s15505_s3 + $0x528] sm:$0xff]  ;;  %v481_v23 = vld [vmem:[%s15505_s3 + $0x560] sm:$0xff]  ;;  %v9028_v28 = vpack.c.bf16 %v1875_v52, %v1872_v17  ;;  %s15542_s3 = smov 121  }
 0x18d   :  { %1613 = vmatmul.mubr.f32.vlgmr.msra.gmra.mrb[24].mxu1 %v11148_v27  ;;  %8987 = vmatprep.subr.bf16.mxu1 %v8986_v40  ;;  %v8902_v40 = vpack.c.bf16 %v474_v21, %v471_v0  ;;  %v1884_v0 = vld [vmem:[%s15507_s9 + $0xc0] sm:$0xff] }
 0x18e   :  { %8074 = vmatprep.mubr.msk.f32.mxu1 %vm1272_vm2, %v11163_v39  ;;  %8989 = vmatpush1.bf16.msra.mxu1 %v8988_v26  ;;  %v8904_v26 = vpack.c.bf16 %v481_v23, %v478_v2  ;;  %v1862_v2 = vld [vmem:[%s15507_s9 + $0x10] sm:$0xff]  ;;  %v1865_v23 = vld [vmem:[%s15507_s9 + $0x28] sm:$0xff] }
 0x18f   :  { %8887 = vmatpush1.bf16.msra.mxu0 %v8886_v30  ;;  %8991 = vmatprep.subr.bf16.mxu1 %v8990_v1  ;;  %v1647_v30 = vld [vmem:[%s15506_s7 + $0x70] sm:$0xff]  ;;  %v1650_v1 = vld [vmem:[%s15506_s7 + $0x88] sm:$0xff]  ;;  %s9558_s7 = smov 54  }
 0x190   :  { %8889 = vmatprep.subr.bf16.mxu0 %v8888_v31  ;;  %v8906_v31 = vpack.c.bf16 %v480_v29, %v477_v35  ;;  %v9010_v7 = vpack.c.bf16 %v1650_v1, %v1647_v30  ;;  %v9108_v35 = vpack.c.bf16 %v1865_v23, %v1862_v2  ;;  %v1868_v30 = vld [vmem:[%s15507_s9 + $0x40] sm:$0xff] }
 0x191   :  { %1618 = vmatmul.mubr.f32.gmra.mrb[26].mxu1 %v11185_v14 }
 0x192   :  { %8075 = vmatprep.mubr.msk.f32.mxu1 %vm1272_vm2, %v11198_v8  ;;  %8993 = vmatpush1.bf16.msra.mxu1 %v8992_v37  ;;  %v9518_v37 = vld [vmem:[%s15501_s0 + $0x8] sm:$0xff] }
 0x193   :  { %8891 = vmatpush1.bf16.msra.mxu0 %v8890_v44  ;;  %8995 = vmatprep.subr.bf16.mxu1 %v8994_v50  ;;  %v8910_v44 = vpack.c.bf16 %v486_v38, %v483_v32  ;;  %v9014_v50 = vpack.c.bf16 %v1656_v58, %v1653_v55  ;;  %v1897_v32 = vld [vmem:[%s15507_s9 + $0x128] sm:$0xff]  ;;  %v1900_v55 = vld [vmem:[%s15507_s9 + $0x140] sm:$0xff] }
 0x194   :  { %8893 = vmatprep.subr.bf16.mxu0 %v8892_v63  ;;  %v9520_v63 = vld [vmem:[%s15501_s0 + $0x18] sm:$0xff]  ;;  %v1925_v38 = vld [vmem:[%s15507_s9 + $0x208] sm:$0xff]  ;;  %s15540_s0 = smov 126  }
 0x195   :  { %1623 = vmatmul.mubr.f32.gmra.mrb[28].mxu1 %v11216_v42 }
 0x196   :  { %8076 = vmatprep.mubr.msk.f32.mxu1 %vm1272_vm2, %v11233_v10  ;;  %8997 = vmatpush1.bf16.msra.mxu1 %v8996_v46  ;;  %v9022_v46 = vpack.c.bf16 %v1870_v59, %v1867_v15  ;;  %v1905_v15 = vld [vmem:[%s15507_s9 + $0x168] sm:$0xff]  ;;  %v1912_v59 = vld [vmem:[%s15507_s9 + $0x1a0] sm:$0xff] }
 0x197   :  { %8895 = vmatpush1.bf16.msra.mxu0 %v8894_v19  ;;  %8999 = vmatprep.subr.bf16.mxu1 %v8998_v51  ;;  %v1876_v19 = vld [vmem:[%s15507_s9 + $0x80] sm:$0xff] }
 0x198   :  { %8897 = vmatprep.subr.bf16.mxu0 %v8896_v25  ;;  %v9026_v13 = vpack.c.bf16 %v1876_v19, %v1873_v47  ;;  %v1882_v25 = vld [vmem:[%s15507_s9 + $0xb0] sm:$0xff]  ;;  %v1911_v47 = vld [vmem:[%s15507_s9 + $0x198] sm:$0xff] }
 0x199   :  { %1628 = vmatmul.mubr.f32.gmra.mrb[30].mxu1 %v11253_v60  ;;  %v1915_v19 = vld [vmem:[%s15507_s9 + $0x1b8] sm:$0xff] }
 0x19a   :  { %9001 = vmatpush1.bf16.msra.mxu1 %v9000_v57  ;;  %1738 = vmatprep.mubr.f32.mxu1 %v9554_v3  ;;  %v1888_v57 = vld [vmem:[%s15507_s9 + $0xe0] sm:$0xff] }
 0x19b   :  { %8899 = vmatpush1.bf16.msra.mxu0 %v8898_v61  ;;  %9003 = vmatprep.subr.bf16.mxu1 %v9002_v62  ;;  %v9032_v61 = vpack.c.bf16 %v1881_v34, %v1878_v9  ;;  %v9034_v21 = vpack.c.bf16 %v1888_v57, %v1885_v54  ;;  %v1921_v9 = vld [vmem:[%s15507_s9 + $0x1e8] sm:$0xff]  ;;  %v1924_v34 = vld [vmem:[%s15507_s9 + $0x200] sm:$0xff] }
 0x19c   :  { %8901 = vmatprep.subr.bf16.mxu0 %v8900_v20  ;;  %v1913_v20 = vld [vmem:[%s15507_s9 + $0x1a8] sm:$0xff] }
 0x19d   :  { %8077 = vmatmul.mubr.msk.f32.vlgmr.msra.gmra.mrb[40].mxu1 %vm102_vm0, %v9517_v6 }
 0x19e   :  { %1744 = vmatprep.mubr.f32.mxu1 %v9554_v3  ;;  %9005 = vmatpush3.bf16.msra.mxu1 %v9002_v62  ;;  %v1887_v62 = vld [vmem:[%s15507_s9 + $0xd8] sm:$0xff] }
 0x19f   :  { %8903 = vmatpush1.bf16.msra.mxu0 %v8902_v40  ;;  %9007 = vmatprep.subr.bf16.mxu1 %v9006_v56  ;;  %v1894_v40 = vld [vmem:[%s15507_s9 + $0x110] sm:$0xff]  ;;  %v9036_v1 = vpack.c.bf16 %v1887_v62, %v1884_v0  ;;  %v9058_v0 = vpack.c.bf16 %v1924_v34, %v1921_v9  ;;  %v1920_v62 = vld [vmem:[%s15507_s9 + $0x1e0] sm:$0xff]  ;;  %v1947_v9 = vld [vmem:[%s15507_s9 + $0x2b8] sm:$0xff] }
 0x1a0   :  { %8905 = vmatprep.subr.bf16.mxu0 %v8904_v26  ;;  %v1919_v26 = vld [vmem:[%s15507_s9 + $0x1d8] sm:$0xff] }
 0x1a1   :  { %8078 = vmatmul.mubr.msk.f32.gmra.mrb[42].mxu1 %vm102_vm0, %v9518_v37 }
 0x1a2   :  { %1750 = vmatprep.mubr.f32.mxu1 %v9554_v3  ;;  %9009 = vmatpush3.bf16.msra.mxu1 %v9006_v56  ;;  %v1916_v56 = vld [vmem:[%s15507_s9 + $0x1c0] sm:$0xff] }
 0x1a3   :  { %8907 = vmatpush1.bf16.msra.mxu0 %v8906_v31  ;;  %9011 = vmatprep.subr.bf16.mxu1 %v9010_v7  ;;  %v9110_v29 = vpack.c.bf16 %v1919_v26, %v1916_v56  ;;  %v9038_v31 = vpack.c.bf16 %v1894_v40, %v1891_v18  ;;  %v1930_v56 = vld [vmem:[%s15507_s9 + $0x230] sm:$0xff]  ;;  %v1928_v26 = vld [vmem:[%s15507_s9 + $0x220] sm:$0xff] }
 0x1a4   :  { %8909 = vmatprep.subr.bf16.mxu0 %v8908_v33  ;;  %v1922_v33 = vld [vmem:[%s15507_s9 + $0x1f0] sm:$0xff] }
 0x1a5   :  { %8079 = vmatmul.mubr.msk.f32.gmra.mrb[44].mxu1 %vm102_vm0, %v9519_v5  ;;  %v9114_v58 = vpack.c.bf16 %v1925_v38, %v1922_v33  ;;  %v1933_v38 = vld [vmem:[%s15507_s9 + $0x248] sm:$0xff] }
 0x1a6   :  { %1756 = vmatprep.mubr.f32.mxu1 %v9554_v3  ;;  %9013 = vmatpush3.bf16.msra.mxu1 %v9010_v7  ;;  %v9112_v7 = vpack.c.bf16 %v1871_v36, %v1868_v30 }
 0x1a7   :  { %8911 = vmatpush1.bf16.msra.mxu0 %v8910_v44  ;;  %9015 = vmatprep.subr.bf16.mxu1 %v9014_v50  ;;  %v1877_v44 = vld [vmem:[%s15507_s9 + $0x88] sm:$0xff] }
 0x1a8   :  { %1430 = vmatprep.subr.mxu0 %v490_v41 }
 0x1a9   :  { %8080 = vmatmul.mubr.msk.f32.gmra.mrb[46].mxu1 %vm102_vm0, %v9520_v63 }
 0x1aa   :  { %9017 = vmatpush3.bf16.msra.mxu1 %v9014_v50  ;;  %8382 = vmatprep.mubr.msk.f32.mxu1 %vm102_vm0, %v9517_v6  ;;  %v1890_v6 = vld [vmem:[%s15507_s9 + $0xf0] sm:$0xff] }
 0x1ab   :  { %1431 = vmatpush1.msra.mxu0 %v489_v48  ;;  %v9040_v50 = vpack.c.bf16 %v1893_v49, %v1890_v6  ;;  %v1896_v48 = vld [vmem:[%s15507_s9 + $0x120] sm:$0xff]  ;;  %v1926_v6 = vld [vmem:[%s15507_s9 + $0x210] sm:$0xff]  ;;  %v1929_v49 = vld [vmem:[%s15507_s9 + $0x228] sm:$0xff] }
 0x1ac   :  { %1439 = vmatmul.mubr.f32.vlgmr.msra.gmra.mrb[16].mxu0 %v11148_v27  ;;  %v1864_v27 = vld [vmem:[%s15507_s9 + $0x20] sm:$0xff] }
 0x1ad   :  { %8070 = vmatprep.mubr.msk.f32.mxu0 %vm1272_vm2, %v11163_v39  ;;  %8383 = vmatmul.mubr.msk.f32.vlgmr.msra.gmra.mrb[48].mxu1 %vm102_vm0, %v9518_v37  ;;  %v9018_v39 = vpack.c.bf16 %v1864_v27, %v1861_v43  ;;  %v1874_v37 = vld [vmem:[%s15507_s9 + $0x70] sm:$0xff]  ;;  %v1903_v43 = vld [vmem:[%s15507_s9 + $0x158] sm:$0xff] }
 0x1ae   :  { %8385 = vmatprep.mubr.msk.f32.mxu1 %vm102_vm0, %v9519_v5  ;;  %v9116_v41 = vpack.c.bf16 %v1877_v44, %v1874_v37  ;;  %v9042_v5 = vpack.c.bf16 %v1900_v55, %v1897_v32  ;;  %v1906_v27 = vld [vmem:[%s15507_s9 + $0x170] sm:$0xff]  ;;  %v1880_v32 = vld [vmem:[%s15507_s9 + $0xa0] sm:$0xff]  ;;  %v1937_v44 = vld [vmem:[%s15507_s9 + $0x268] sm:$0xff] }
 0x1af   :  { %9019 = vmatprep.subr.bf16.mxu0 %v9018_v39  ;;  %v1936_v55 = vld [vmem:[%s15507_s9 + $0x260] sm:$0xff] }
 0x1b0   :  { %1445 = vmatmul.mubr.f32.gmra.mrb[18].mxu0 %v11185_v14  ;;  %v1860_v14 = vld [vmem:[%s15507_s9] sm:$0xff]  ;;  %v9066_v37 = vpack.c.bf16 %v1936_v55, %v1933_v38 }
 0x1b1   :  { %8071 = vmatprep.mubr.msk.f32.mxu0 %vm1272_vm2, %v11198_v8  ;;  %8386 = vmatmul.mubr.msk.f32.gmra.mrb[50].mxu1 %vm102_vm0, %v9520_v63  ;;  %v1863_v8 = vld [vmem:[%s15507_s9 + $0x18] sm:$0xff] }
 0x1b2   :  { %v9020_v22 = vpack.c.bf16 %v1863_v8, %v1860_v14  ;;  %v1899_v63 = vld [vmem:[%s15507_s9 + $0x138] sm:$0xff]  ;;  %v9046_v14 = vpack.c.bf16 %v1906_v27, %v1903_v43  ;;  %v1902_v8 = vld [vmem:[%s15507_s9 + $0x150] sm:$0xff]  ;;  %v1889_v43 = vld [vmem:[%s15507_s9 + $0xe8] sm:$0xff] }
 0x1b3   :  { %v9044_v39 = vpack.c.bf16 %v1899_v63, %v1896_v48  ;;  %v1886_v63 = vld [vmem:[%s15507_s9 + $0xd0] sm:$0xff] }
 0x1b4   :  { %1451 = vmatmul.mubr.f32.gmra.mrb[20].mxu0 %v11216_v42  ;;  %v1869_v42 = vld [vmem:[%s15507_s9 + $0x48] sm:$0xff]  ;;  %v9124_v27 = vpack.c.bf16 %v1889_v43, %v1886_v63 }
 0x1b5   :  { %8072 = vmatprep.mubr.msk.f32.mxu0 %vm1272_vm2, %v11233_v10  ;;  %9021 = vmatpush1.bf16.msra.mxu0 %v9020_v22  ;;  %v9024_v51 = vpack.c.bf16 %v1869_v42, %v1866_v45  ;;  %v1879_v10 = vld [vmem:[%s15507_s9 + $0x98] sm:$0xff]  ;;  %v1909_v22 = vld [vmem:[%s15507_s9 + $0x188] sm:$0xff]  ;;  %v9048_v45 = vpack.c.bf16 %v1905_v15, %v1902_v8  ;;  %v1940_v8 = vld [vmem:[%s15507_s9 + $0x280] sm:$0xff] }
 0x1b6   :  { %9023 = vmatprep.subr.bf16.mxu0 %v9022_v46  ;;  %v9030_v53 = vpack.c.bf16 %v1882_v25, %v1879_v10  ;;  %v9050_v42 = vpack.c.bf16 %v1912_v59, %v1909_v22  ;;  %v1908_v46 = vld [vmem:[%s15507_s9 + $0x180] sm:$0xff]  ;;  %v1943_v22 = vld [vmem:[%s15507_s9 + $0x298] sm:$0xff]  ;;  %v1938_v59 = vld [vmem:[%s15507_s9 + $0x270] sm:$0xff] }
 0x1b7   :  { %v9052_v52 = vpack.c.bf16 %v1911_v47, %v1908_v46  ;;  %v1892_v47 = vld [vmem:[%s15507_s9 + $0x100] sm:$0xff] }
 0x1b8   :  { %1457 = vmatmul.mubr.f32.gmra.mrb[22].mxu0 %v11253_v60  ;;  %v1910_v60 = vld [vmem:[%s15507_s9 + $0x190] sm:$0xff] }
 0x1b9   :  { %9025 = vmatpush1.bf16.msra.mxu0 %v9024_v51  ;;  %v9106_v24 = vpack.c.bf16 %v1913_v20, %v1910_v60  ;;  %v1918_v51 = vld [vmem:[%s15507_s9 + $0x1d0] sm:$0xff]  ;;  %v1923_v20 = vld [vmem:[%s15507_s9 + $0x1f8] sm:$0xff] }
 0x1ba   :  { %9027 = vmatprep.subr.bf16.mxu0 %v9026_v13  ;;  %v9054_v25 = vpack.c.bf16 %v1918_v51, %v1915_v19  ;;  %v1895_v19 = vld [vmem:[%s15507_s9 + $0x118] sm:$0xff] }
 0x1bb   :  { %9107 = vmatprep.subr.bf16.mxu1 %v9106_v24  ;;  %v9060_v24 = vpack.c.bf16 %v1923_v20, %v1920_v62  ;;  %v9128_v51 = vpack.c.bf16 %v1895_v19, %v1892_v47  ;;  %v1951_v62 = vld [vmem:[%s15507_s9 + $0x2d8] sm:$0xff]  ;;  %v1954_v20 = vld [vmem:[%s15507_s9 + $0x2f0] sm:$0xff] }
 0x1bc   :  { %9109 = vmatpush3.bf16.msra.mxu1 %v9108_v35  ;;  %v1927_v35 = vld [vmem:[%s15507_s9 + $0x218] sm:$0xff] }
 0x1bd   :  { %9029 = vmatpush1.bf16.msra.mxu0 %v9028_v28  ;;  %9111 = vmatprep.subr.bf16.mxu1 %v9110_v29  ;;  %v1914_v28 = vld [vmem:[%s15507_s9 + $0x1b0] sm:$0xff]  ;;  %v9062_v30 = vpack.c.bf16 %v1930_v56, %v1927_v35 }
 0x1be   :  { %9031 = vmatprep.subr.bf16.mxu0 %v9030_v53  ;;  %v1917_v53 = vld [vmem:[%s15507_s9 + $0x1c8] sm:$0xff] }
 0x1bf   :  { %v9056_v60 = vpack.c.bf16 %v1917_v53, %v1914_v28  ;;  %v1949_v28 = vld [vmem:[%s15507_s9 + $0x2c8] sm:$0xff]  ;;  %v1944_v53 = vld [vmem:[%s15507_s9 + $0x2a0] sm:$0xff] }
 0x1c0   :  { %9113 = vmatpush3.bf16.msra.mxu1 %v9112_v7  ;;  %v1883_v7 = vld [vmem:[%s15507_s9 + $0xb8] sm:$0xff] }
 0x1c1   :  { %9033 = vmatpush1.bf16.msra.mxu0 %v9032_v61  ;;  %9115 = vmatprep.subr.bf16.mxu1 %v9114_v58  ;;  %v9120_v33 = vpack.c.bf16 %v1883_v7, %v1880_v32  ;;  %v1934_v58 = vld [vmem:[%s15507_s9 + $0x250] sm:$0xff]  ;;  %v1961_v32 = vld [vmem:[%s15507_s9 + $0x328] sm:$0xff] }
 0x1c2   :  { %9035 = vmatprep.subr.bf16.mxu0 %v9034_v21 }
 0x1c4   :  { %9117 = vmatpush3.bf16.msra.mxu1 %v9116_v41  ;;  %v1935_v41 = vld [vmem:[%s15507_s9 + $0x258] sm:$0xff] }
 0x1c5   :  { %9037 = vmatpush1.bf16.msra.mxu0 %v9036_v1  ;;  %v1931_v1 = vld [vmem:[%s15507_s9 + $0x238] sm:$0xff] }
 0x1c6   :  { %9039 = vmatprep.subr.bf16.mxu0 %v9038_v31  ;;  %v9118_v36 = vpack.c.bf16 %v1931_v1, %v1928_v26  ;;  %v9064_v31 = vpack.c.bf16 %v1929_v49, %v1926_v6  ;;  %v1904_v26 = vld [vmem:[%s15507_s9 + $0x160] sm:$0xff]  ;;  %v1957_v6 = vld [vmem:[%s15507_s9 + $0x308] sm:$0xff] }
 0x1c7   :  { %v1960_v49 = vld [vmem:[%s15507_s9 + $0x320] sm:$0xff] }
 0x1c8   :  { %9119 = vmatprep.subr.bf16.mxu1 %v9118_v36  ;;  %v1958_v36 = vld [vmem:[%s15507_s9 + $0x310] sm:$0xff] }
 0x1c9   :  { %9041 = vmatpush1.bf16.msra.mxu0 %v9040_v50  ;;  %9121 = vmatpush3.bf16.msra.mxu1 %v9120_v33  ;;  %v1932_v50 = vld [vmem:[%s15507_s9 + $0x240] sm:$0xff]  ;;  %v11652_v7 = vpack.c.bf16 %v1961_v32, %v1958_v36 }
 0x1ca   :  { %9043 = vmatprep.subr.bf16.mxu0 %v9042_v5  ;;  %v9122_v5 = vpack.c.bf16 %v1937_v44, %v1934_v58  ;;  %v9068_v48 = vpack.c.bf16 %v1935_v41, %v1932_v50 }
 0x1cc   :  { %9123 = vmatprep.subr.bf16.mxu1 %v9122_v5 }
 0x1cd   :  { %9045 = vmatpush1.bf16.msra.mxu0 %v9044_v39  ;;  %v1939_v39 = vld [vmem:[%s15507_s9 + $0x278] sm:$0xff]  ;;  %9125 = vmatpush3.bf16.msra.mxu1 %v9124_v27 }
 0x1ce   :  { %9047 = vmatprep.subr.bf16.mxu0 %v9046_v14  ;;  %v1942_v14 = vld [vmem:[%s15507_s9 + $0x290] sm:$0xff] }
 0x1cf   :  { %v9070_v15 = vpack.c.bf16 %v1942_v14, %v1939_v39 }
 0x1d1   :  { %9049 = vmatpush1.bf16.msra.mxu0 %v9048_v45  ;;  %v1941_v45 = vld [vmem:[%s15507_s9 + $0x288] sm:$0xff] }
 0x1d2   :  { %v8165_v13 = vpop.f32.mrb[16].mxu1  ;;  %9051 = vmatprep.subr.bf16.mxu0 %v9050_v42  ;;  %v9126_v42 = vpack.c.bf16 %v1943_v22, %v1940_v8  ;;  %v9072_v46 = vpack.c.bf16 %v1941_v45, %v1938_v59 }
 0x1d3   :  { %v8166_v17 = vpop.f32.mrb[17].mxu1 }
 0x1d4   :  { %v11494_v10 = vadd.f32 %v8166_v17, %v8165_v13  ;;  %9127 = vmatprep.subr.bf16.mxu1 %v9126_v42  ;;  %v1945_v13 = vld [vmem:[%s15507_s9 + $0x2a8] sm:$0xff]  ;;  %v1948_v17 = vld [vmem:[%s15507_s9 + $0x2c0] sm:$0xff] }
 0x1d5   :  { %9053 = vmatpush1.bf16.msra.mxu0 %v9052_v52  ;;  %v1946_v52 = vld [vmem:[%s15507_s9 + $0x2b0] sm:$0xff]  ;;  %9129 = vmatpush3.bf16.msra.mxu1 %v9128_v51 }
 0x1d6   :  { %v8168_v54 = vpop.f32.mrb[18].mxu1  ;;  %9055 = vmatprep.subr.bf16.mxu0 %v9054_v25  ;;  %v9074_v25 = vpack.c.bf16 %v1948_v17, %v1945_v13  ;;  %v9130_v34 = vpack.c.bf16 %v1949_v28, %v1946_v52 }
 0x1d7   :  { %v8169_v57 = vpop.f32.mrb[19].mxu1 }
 0x1d8   :  { %v11508_v61 = vadd.f32 %v8169_v57, %v8168_v54  ;;  %v9076_v54 = vpack.c.bf16 %v1947_v9, %v1944_v53  ;;  %v1898_v57 = vld [vmem:[%s15507_s9 + $0x130] sm:$0xff]  ;;  %9131 = vmatprep.subr.bf16.mxu1 %v9130_v34  ;;  %v1956_v53 = vld [vmem:[%s15507_s9 + $0x300] sm:$0xff]  ;;  %v1959_v9 = vld [vmem:[%s15507_s9 + $0x318] sm:$0xff] }
 0x1d9   :  { %9057 = vmatpush1.bf16.msra.mxu0 %v9056_v60  ;;  %v1901_v60 = vld [vmem:[%s15507_s9 + $0x148] sm:$0xff]  ;;  %v1963_v34 = vld [vmem:[%s15507_s9 + $0x338] sm:$0xff] }
 0x1da   :  { %v8171_v21 = vpop.f32.mrb[20].mxu1  ;;  %9059 = vmatprep.subr.bf16.mxu0 %v9058_v0  ;;  %v9132_v0 = vpack.c.bf16 %v1901_v60, %v1898_v57  ;;  %v1964_v57 = vld [vmem:[%s15507_s9 + $0x340] sm:$0xff]  ;;  %v1967_v60 = vld [vmem:[%s15507_s9 + $0x358] sm:$0xff] }
 0x1db   :  { %v8172_v18 = vpop.f32.mrb[21].mxu1 }
 0x1dc   :  { %v11516_v2 = vadd.f32 %v8172_v18, %v8171_v21  ;;  %v1952_v21 = vld [vmem:[%s15507_s9 + $0x2e0] sm:$0xff]  ;;  %9133 = vmatpush3.bf16.msra.mxu1 %v9132_v0  ;;  %v9078_v18 = vpack.c.bf16 %v1954_v20, %v1951_v62  ;;  %v9084_v62 = vpack.c.bf16 %v1959_v9, %v1956_v53 }
 0x1dd   :  { %9061 = vmatpush1.bf16.msra.mxu0 %v9060_v24  ;;  %v1955_v24 = vld [vmem:[%s15507_s9 + $0x2f8] sm:$0xff] }
 0x1de   :  { %v8174_v23 = vpop.f32.mrb[22].mxu1  ;;  %9063 = vmatprep.subr.bf16.mxu0 %v9062_v30  ;;  %v9134_v35 = vpack.c.bf16 %v1955_v24, %v1952_v21  ;;  %v1907_v30 = vld [vmem:[%s15507_s9 + $0x178] sm:$0xff]  ;;  %v9142_v24 = vpack.c.bf16 %v1967_v60, %v1964_v57 }
 0x1df   :  { %v8175_v40 = vpop.f32.mrb[23].mxu1  ;;  %v9136_v1 = vpack.c.bf16 %v1907_v30, %v1904_v26  ;;  %v1969_v26 = vld [vmem:[%s15507_s9 + $0x368] sm:$0xff]  ;;  %v1987_v57 = vld [vmem:[%s15507_s9 + $0x3f8] sm:$0xff] }
 0x1e0   :  { %v11527_v29 = vadd.f32 %v8175_v40, %v8174_v23  ;;  %v1950_v23 = vld [vmem:[%s15507_s9 + $0x2d0] sm:$0xff]  ;;  %v1953_v40 = vld [vmem:[%s15507_s9 + $0x2e8] sm:$0xff]  ;;  %9135 = vmatprep.subr.bf16.mxu1 %v9134_v35 }
 0x1e1   :  { %9065 = vmatpush1.bf16.msra.mxu0 %v9064_v31  ;;  %v9080_v56 = vpack.c.bf16 %v1953_v40, %v1950_v23  ;;  %9137 = vmatpush3.bf16.msra.mxu1 %v9136_v1  ;;  %v9082_v31 = vpack.c.bf16 %v1960_v49, %v1957_v6  ;;  %v1962_v40 = vld [vmem:[%s15507_s9 + $0x330] sm:$0xff]  ;;  %v1965_v35 = vld [vmem:[%s15507_s9 + $0x348] sm:$0xff]  ;;  %v1972_v1 = vld [vmem:[%s15507_s9 + $0x380] sm:$0xff] }
 0x1e2   :  { %9067 = vmatprep.subr.bf16.mxu0 %v9066_v37  ;;  %9139 = vmatprep.subr.bf16.mxu1 %v11652_v7  ;;  %v1970_v6 = vld [vmem:[%s15507_s9 + $0x370] sm:$0xff]  ;;  %v1973_v49 = vld [vmem:[%s15507_s9 + $0x388] sm:$0xff] }
 0x1e5   :  { %9069 = vmatpush1.bf16.msra.mxu0 %v9068_v48 }
 0x1e6   :  { %9071 = vmatprep.subr.bf16.mxu0 %v9070_v15 }
 0x1e9   :  { %9073 = vmatpush1.bf16.msra.mxu0 %v9072_v46 }
 0x1ea   :  { %9075 = vmatprep.subr.bf16.mxu0 %v9074_v25 }
 0x1ed   :  { %9077 = vmatpush1.bf16.msra.mxu0 %v9076_v54 }
 0x1ee   :  { %9079 = vmatprep.subr.bf16.mxu0 %v9078_v18 }
 0x1f1   :  { %9081 = vmatpush1.bf16.msra.mxu0 %v9080_v56 }
 0x1f2   :  { %9083 = vmatprep.subr.bf16.mxu0 %v9082_v31  ;;  %v9088_v31 = vpack.c.bf16 %v1965_v35, %v1962_v40  ;;  %v1986_v35 = vld [vmem:[%s15507_s9 + $0x3f0] sm:$0xff] }
 0x226   :  { %v8209_v33 = vpop.f32.mrb[32].mxu1 }
 0x227   :  { %v8210_v38 = vpop.f32.mrb[33].mxu1 }
 0x228   :  { %v8211_v55 = vadd.f32 %v8210_v38, %v8209_v33  ;;  %v9090_v38 = vpack.c.bf16 %v1972_v1, %v1969_v26 }
 0x22a   :  { %v8212_v58 = vpop.f32.mrb[34].mxu1  ;;  %v9232_v37 = vadd.f32 %v8211_v55, %v11494_v10  ;;  %v9146_v55 = vpack.c.bf16 %v1973_v49, %v1970_v6  ;;  %v1993_v49 = vld [vmem:[%s15507_s9 + $0x428] sm:$0xff] }
 0x22b   :  { %v8213_v44 = vpop.f32.mrb[35].mxu1 }
 0x22c   :  { %v8214_v50 = vadd.f32 %v8213_v44, %v8212_v58  ;;  %v1971_v44 = vld [vmem:[%s15507_s9 + $0x378] sm:$0xff] }
 0x22e   :  { %v8215_v41 = vpop.f32.mrb[36].mxu1  ;;  %v9234_v5 = vadd.f32 %v8214_v50, %v11508_v61 }
 0x22f   :  { %v8216_v48 = vpop.f32.mrb[37].mxu1 }
 0x230   :  { %v8217_v63 = vadd.f32 %v8216_v48, %v8215_v41  ;;  %v1976_v48 = vld [vmem:[%s15507_s9 + $0x3a0] sm:$0xff] }
 0x232   :  { %v8218_v43 = vpop.f32.mrb[38].mxu1  ;;  %v9236_v27 = vadd.f32 %v8217_v63, %v11516_v2  ;;  %v11668_v2 = vld [vmem:[%s15508_s8] sm:$0x7]  ;;  %v1979_v63 = vld [vmem:[%s15507_s9 + $0x3b8] sm:$0xff]  ;;  %s15536_s8 = smov 122  }
 0x233   :  { %v8219_v39 = vpop.f32.mrb[39].mxu1  ;;  %v11674_v13 = vrot.slane %v11668_v2, %v10240_v11  ;;  %v11678_v17 = vrot.slane %v11668_v2, %v10243_v12  ;;  %v1966_v12 = vld [vmem:[%s15507_s9 + $0x350] sm:$0xff] }
 0x234   :  { %v8220_v14 = vadd.f32 %v8219_v39, %v8218_v43  ;;  %v9086_v18 = vpack.c.bf16 %v1966_v12, %v1963_v34  ;;  %v1980_v12 = vld [vmem:[%s15507_s9 + $0x3c0] sm:$0xff] }
 0x236   :  { %v9238_v8 = vadd.f32 %v8220_v14, %v11527_v29 }
 0x260   :  { %v1614_v15 = vpop.f32.mrb[24].mxu1 }
 0x261   :  { %v11659_v22 = vadd.f32 %v9232_v37, %v1614_v15  ;;  %v1616_v59 = vpop.f32.mrb[25].mxu1  ;;  %v1968_v37 = vld [vmem:[%s15507_s9 + $0x360] sm:$0xff]  ;;  %v9150_v15 = vpack.c.bf16 %v1979_v63, %v1976_v48 }
 0x264   :  { %v1619_v45 = vpop.f32.mrb[26].mxu1 }
 0x265   :  { %v11661_v10 = vadd.f32 %v9234_v5, %v1619_v45  ;;  %v1621_v42 = vpop.f32.mrb[27].mxu1  ;;  %v1978_v5 = vld [vmem:[%s15507_s9 + $0x3b0] sm:$0xff] }
 0x266   :  { %v1974_v45 = vld [vmem:[%s15507_s9 + $0x390] sm:$0xff]  ;;  %v1977_v42 = vld [vmem:[%s15507_s9 + $0x3a8] sm:$0xff] }
 0x268   :  { %v1624_v46 = vpop.f32.mrb[28].mxu1 }
 0x269   :  { %v11663_v47 = vadd.f32 %v9236_v27, %v1624_v46  ;;  %v1626_v61 = vpop.f32.mrb[29].mxu1  ;;  %v9092_v27 = vpack.c.bf16 %v1971_v44, %v1968_v37 }
 0x26a   :  { %v1981_v61 = vld [vmem:[%s15507_s9 + $0x3c8] sm:$0xff] }
 0x26c   :  { %v1629_v19 = vpop.f32.mrb[30].mxu1 }
 0x26d   :  { %v11670_v51 = vadd.f32 %v9238_v8, %v1629_v19  ;;  %v1631_v29 = vpop.f32.mrb[31].mxu1 }
 0x26e   :  { %v1984_v29 = vld [vmem:[%s15507_s9 + $0x3e0] sm:$0xff] }
 0x26f   :  { %v9098_v34 = vpack.c.bf16 %v1984_v29, %v1981_v61 }
 0x270   :  { %v1740_v52 = vpop.f32.mrb[40].mxu1 }
 0x271   :  { %v1741_v25 = vadd.f32 %v1740_v52, %v11674_v13  ;;  %v1742_v28 = vpop.f32.mrb[41].mxu1  ;;  %v1985_v52 = vld [vmem:[%s15507_s9 + $0x3e8] sm:$0xff] }
 0x272   :  { %v1743_v54 = vadd.f32 %v1742_v28, %v11678_v17 }
 0x273   :  { %v1848_v21 = vmul.f32 %v1741_v25, %v1741_v25  ;;  %v1670_v25 = vrot.slane %v11668_v2, %v10520_v16  ;;  %v1983_v16 = vld [vmem:[%s15507_s9 + $0x3d8] sm:$0xff] }
 0x274   :  { %v1849_v0 = vmul.f32 %v1743_v54, %v1743_v54  ;;  %v1746_v20 = vpop.f32.mrb[42].mxu1 }
 0x275   :  { %v1747_v23 = vadd.f32 %v1746_v20, %v11674_v13  ;;  %v1748_v56 = vpop.f32.mrb[43].mxu1  ;;  %v1991_v20 = vld [vmem:[%s15507_s9 + $0x418] sm:$0xff] }
 0x276   :  { %2071 = vmatprep.mubr.f32.mxu0 %v1849_v0  ;;  %2249 = vmatprep.mubr.f32.mxu1 %v1849_v0  ;;  %v1749_v30 = vadd.f32 %v1748_v56, %v11678_v17  ;;  %v1990_v0 = vld [vmem:[%s15507_s9 + $0x410] sm:$0xff]  ;;  %v1989_v56 = vld [vmem:[%s15507_s9 + $0x408] sm:$0xff] }
 0x277   :  { %2072 = vmatmul.mubr.f32.vlgmr.msra.gmra.mrb[16].mxu0 %v1848_v21  ;;  %2250 = vmatmul.mubr.f32.vlgmr.msra.gmra.mrb[52].mxu1 %v1848_v21  ;;  %v1851_v36 = vmul.f32 %v1747_v23, %v1747_v23  ;;  %v9100_v21 = vpack.c.bf16 %v1983_v16, %v1980_v12  ;;  %v9102_v23 = vpack.c.bf16 %v1990_v0, %v1987_v57 }
 0x278   :  { %9085 = vmatpush1.bf16.msra.mxu0 %v9084_v62  ;;  %9141 = vmatpush3.bf16.msra.mxu1 %v11652_v7  ;;  %v1852_v32 = vmul.f32 %v1749_v30, %v1749_v30  ;;  %v1752_v33 = vpop.f32.mrb[44].mxu1  ;;  %v1975_v7 = vld [vmem:[%s15507_s9 + $0x398] sm:$0xff]  ;;  %v1988_v62 = vld [vmem:[%s15507_s9 + $0x400] sm:$0xff]  ;;  %v9104_v30 = vpack.c.bf16 %v1989_v56, %v1986_v35 }
 0x279   :  { %9087 = vmatprep.subr.bf16.mxu0 %v9086_v18  ;;  %9143 = vmatprep.subr.bf16.mxu1 %v9142_v24  ;;  %v1753_v58 = vadd.f32 %v1752_v33, %v11674_v13  ;;  %v1754_v50 = vpop.f32.mrb[45].mxu1  ;;  %v9094_v8 = vpack.c.bf16 %v1978_v5, %v1975_v7  ;;  %v9158_v40 = vpack.c.bf16 %v1991_v20, %v1988_v62  ;;  %v1992_v33 = vld [vmem:[%s15507_s9 + $0x420] sm:$0xff] }
 0x27a   :  { %v1755_v41 = vadd.f32 %v1754_v50, %v11678_v17  ;;  %2254 = vmatprep.mubr.f32.mxu1 %v1852_v32  ;;  %2077 = vmatprep.mubr.f32.mxu0 %v1852_v32 }
 0x27b   :  { %v1854_v43 = vmul.f32 %v1753_v58, %v1753_v58  ;;  %2255 = vmatmul.mubr.f32.gmra.mrb[54].mxu1 %v1851_v36  ;;  %2078 = vmatmul.mubr.f32.gmra.mrb[18].mxu0 %v1851_v36  ;;  %v1994_v36 = vld [vmem:[%s15507_s9 + $0x430] sm:$0xff] }
 0x27c   :  { %9089 = vmatpush1.bf16.msra.mxu0 %v9088_v31  ;;  %9145 = vmatpush3.bf16.msra.mxu1 %v9142_v24  ;;  %v1855_v39 = vmul.f32 %v1755_v41, %v1755_v41  ;;  %v1758_v14 = vpop.f32.mrb[46].mxu1 }
 0x27d   :  { %9091 = vmatprep.subr.bf16.mxu0 %v9090_v38  ;;  %9147 = vmatprep.subr.bf16.mxu1 %v9146_v55  ;;  %v1759_v59 = vadd.f32 %v1758_v14, %v11674_v13  ;;  %v1760_v46 = vpop.f32.mrb[47].mxu1  ;;  %v1982_v13 = vld [vmem:[%s15507_s9 + $0x3d0] sm:$0xff]  ;;  %s9556_s9 = smov 91  }
 0x27e   :  { %v1761_v19 = vadd.f32 %v1760_v46, %v11678_v17  ;;  %2259 = vmatprep.mubr.f32.mxu1 %v1855_v39  ;;  %2083 = vmatprep.mubr.f32.mxu0 %v1855_v39  ;;  %v9096_v17 = vpack.c.bf16 %v1977_v42, %v1974_v45  ;;  %v9154_v54 = vpack.c.bf16 %v1985_v52, %v1982_v13 }
 0x27f   :  { %v1857_v28 = vmul.f32 %v1759_v59, %v1759_v59  ;;  %2260 = vmatmul.mubr.f32.gmra.mrb[56].mxu1 %v1854_v43  ;;  %2084 = vmatmul.mubr.f32.gmra.mrb[20].mxu0 %v1854_v43 }
 0x280   :  { %9093 = vmatpush1.bf16.msra.mxu0 %v9092_v27  ;;  %9149 = vmatpush3.bf16.msra.mxu1 %v9146_v55  ;;  %v1858_v53 = vmul.f32 %v1761_v19, %v1761_v19  ;;  %v8384_v9 = vpop.f32.mrb[48].mxu1 }
 0x281   :  { %9095 = vmatprep.subr.bf16.mxu0 %v9094_v8  ;;  %9151 = vmatprep.subr.bf16.mxu1 %v9150_v15  ;;  %v1829_v2 = vpop.f32.mrb[49].mxu1  ;;  %v1835_v1 = vadd.f32 %v8384_v9, %v1670_v25 }
 0x282   :  { %2264 = vmatprep.mubr.f32.mxu1 %v1858_v53  ;;  %v1830_v60 = vadd.f32 %v1829_v2, %v1670_v25  ;;  %2089 = vmatprep.mubr.f32.mxu0 %v1858_v53 }
 0x283   :  { %2265 = vmatmul.mubr.f32.gmra.mrb[58].mxu1 %v1857_v28  ;;  %2090 = vmatmul.mubr.f32.gmra.mrb[22].mxu0 %v1857_v28  ;;  %v1853_v31 = vmul.f32 %v1835_v1, %v1835_v1 }
 0x284   :  { %9097 = vmatpush1.bf16.msra.mxu0 %v9096_v17  ;;  %9153 = vmatpush3.bf16.msra.mxu1 %v9150_v15  ;;  %v1850_v18 = vmul.f32 %v1830_v60, %v1830_v60  ;;  %v8387_v24 = vpop.f32.mrb[50].mxu1 }
 0x285   :  { %9099 = vmatprep.subr.bf16.mxu0 %v9098_v34  ;;  %9155 = vmatprep.subr.bf16.mxu1 %v9154_v54  ;;  %v1839_v26 = vpop.f32.mrb[51].mxu1  ;;  %v1845_v32 = vadd.f32 %v8387_v24, %v1670_v25 }
 0x286   :  { %2160 = vmatprep.mubr.f32.mxu0 %v9554_v3  ;;  %8414 = vmatprep.mubr.msk.f32.mxu1 %vm1272_vm2, %v1850_v18  ;;  %v1840_v6 = vadd.f32 %v1839_v26, %v1670_v25 }
 0x287   :  { %v1859_v55 = vmul.f32 %v1845_v32, %v1845_v32 }
 0x288   :  { %9101 = vmatpush1.bf16.msra.mxu0 %v9100_v21  ;;  %9157 = vmatpush3.bf16.msra.mxu1 %v9154_v54  ;;  %v1856_v38 = vmul.f32 %v1840_v6, %v1840_v6 }
 0x289   :  { %9103 = vmatprep.subr.bf16.mxu0 %v9102_v23  ;;  %9159 = vmatprep.subr.bf16.mxu1 %v9158_v40 }
 0x28c   :  { %9105 = vmatpush1.bf16.msra.mxu0 %v9104_v30  ;;  %9161 = vmatpush3.bf16.msra.mxu1 %v9158_v40 }
 0x28d   :  { %2120 = vmatprep.subr.mxu0 %v1993_v49  ;;  %8412 = vmatprep.subr.mxu1 %v1994_v36 }
 0x290   :  { %2121 = vmatpush1.msra.mxu0 %v1992_v33  ;;  %8413 = vmatpush3.msra.mxu1 %v1994_v36 }
 0x291   :  { %8085 = vmatmul.mubr.msk.f32.vlgmr.msra.gmra.mrb[16].mxu0 %vm1272_vm2, %v1850_v18  ;;  %8415 = vmatmul.mubr.msk.f32.vlgmr.msra.gmra.mrb[60].mxu1 %vm1272_vm2, %v1853_v31 }
 0x292   :  { %2166 = vmatprep.mubr.f32.mxu0 %v9554_v3  ;;  %8417 = vmatprep.mubr.msk.f32.mxu1 %vm1272_vm2, %v1856_v38 }
 0x295   :  { %8086 = vmatmul.mubr.msk.f32.gmra.mrb[18].mxu0 %vm1272_vm2, %v1853_v31  ;;  %8418 = vmatmul.mubr.msk.f32.gmra.mrb[62].mxu1 %vm1272_vm2, %v1859_v55 }
 0x296   :  { %2172 = vmatprep.mubr.f32.mxu0 %v9554_v3 }
 0x299   :  { %8087 = vmatmul.mubr.msk.f32.gmra.mrb[20].mxu0 %vm1272_vm2, %v1856_v38 }
 0x29a   :  { %2178 = vmatprep.mubr.f32.mxu0 %v9554_v3 }
 0x29d   :  { %8088 = vmatmul.mubr.msk.f32.gmra.mrb[22].mxu0 %vm1272_vm2, %v1859_v55 }
 0x34a   :  { %v8265_v58 = vpop.f32.mrb[52].mxu1 }
 0x34b   :  { %v8266_v37 = vpop.f32.mrb[53].mxu1 }
 0x34c   :  { %v8267_v44 = vadd.f32 %v8266_v37, %v8265_v58 }
 0x34e   :  { %v8268_v50 = vpop.f32.mrb[54].mxu1 }
 0x34f   :  { %v8269_v7 = vpop.f32.mrb[55].mxu1 }
 0x350   :  { %v8270_v41 = vadd.f32 %v8269_v7, %v8268_v50 }
 0x352   :  { %v8271_v5 = vpop.f32.mrb[56].mxu1 }
 0x353   :  { %v8272_v48 = vpop.f32.mrb[57].mxu1 }
 0x354   :  { %v8273_v63 = vadd.f32 %v8272_v48, %v8271_v5 }
 0x356   :  { %v8274_v43 = vpop.f32.mrb[58].mxu1 }
 0x357   :  { %v8275_v27 = vpop.f32.mrb[59].mxu1 }
 0x358   :  { %v8276_v39 = vadd.f32 %v8275_v27, %v8274_v43 }
 0x364   :  { %v2162_v14 = vpop.f32.mrb[16].mxu0  ;;  %v8416_v8 = vpop.f32.mrb[60].mxu1 }
 0x365   :  { %9460 = vlog2.f32 %v2162_v14  ;;  %v2342_v15 = vadd.f32 %v8416_v8, %v8270_v41  ;;  %v2164_v59 = vpop.f32.mrb[17].mxu0  ;;  %v2336_v3 = vpop.f32.mrb[61].mxu1 }
 0x366   :  { %9462 = vlog2.f32 %v2164_v59  ;;  %v2337_v45 = vadd.f32 %v8267_v44, %v2336_v3 }
 0x367   :  { %v2360_v42 = vadd.f32 %v11661_v10, %v2342_v15 }
 0x368   :  { %v2357_v46 = vadd.f32 %v11659_v22, %v2337_v45  ;;  %v2168_v61 = vpop.f32.mrb[18].mxu0  ;;  %v8419_v19 = vpop.f32.mrb[62].mxu1 }
 0x369   :  { %9464 = vlog2.f32 %v2360_v42  ;;  %v2352_v29 = vadd.f32 %v8419_v19, %v8276_v39  ;;  %v2170_v13 = vpop.f32.mrb[19].mxu0  ;;  %v2346_v52 = vpop.f32.mrb[63].mxu1 }
 0x36a   :  { %9466 = vlog2.f32 %v2357_v46  ;;  %v2347_v25 = vadd.f32 %v8273_v63, %v2346_v52 }
 0x36b   :  { %9468 = vlog2.f32 %v2168_v61  ;;  %v2366_v28 = vadd.f32 %v11670_v51, %v2352_v29 }
 0x36c   :  { %9470 = vlog2.f32 %v2170_v13  ;;  %v2363_v17 = vadd.f32 %v11663_v47, %v2347_v25  ;;  %v2174_v53 = vpop.f32.mrb[20].mxu0 }
 0x36d   :  { %9472 = vlog2.f32 %v2366_v28  ;;  %v2176_v9 = vpop.f32.mrb[21].mxu0 }
 0x36e   :  { %9474 = vlog2.f32 %v2363_v17 }
 0x36f   :  { %v9461_v10 = vpop.eup %9460  ;;  %9476 = vlog2.f32 %v2174_v53 }
 0x370   :  { %v9463_v22 = vpop.eup %9462  ;;  %v11812_v34 = vmul.f32 0.6931472, %v9461_v10  ;;  %9478 = vlog2.f32 %v2176_v9  ;;  %v2180_v54 = vpop.f32.mrb[22].mxu0 }
 0x371   :  { %v11814_v12 = vmul.f32 0.6931472, %v9463_v22  ;;  %9480 = vlog2.f32 %v2180_v54  ;;  %v2182_v16 = vpop.f32.mrb[23].mxu0 }
 0x372   :  { %2391 = vst [vmem:[#allocation2] sm:$0xff] %v11812_v34  ;;  %9482 = vlog2.f32 %v2182_v16  ;;  %2465 = vrot.lane.b32.xlu0 %v11812_v34, %s9556_s9  ;;  %v2409_v32 = vsel %vm2408_vm4, %v11812_v34, 0.0  ;;  %v2430_v58 = vmul.f32 %v11812_v34, %v11812_v34 }
 0x373   :  { %v9465_v47 = vpop.eup %9464  ;;  %2392 = vst [vmem:[#allocation2 + $0x8] sm:$0xff] %v11814_v12  ;;  %2623 = vrot.lane.b32.xlu1 %v11814_v12, %s9557_s15  ;;  %v11824_v0 = vmul.f32 %v11814_v12, %v11814_v12 }
 0x374   :  { %v9467_v51 = vpop.eup %9466  ;;  %v2378_v2 = vmul.f32 0.6931472, %v9465_v47  ;;  %v2434_v44 = vsel %vm2408_vm4, %v2430_v58, 0.0 }
 0x375   :  { %v9469_v57 = vpop.eup %9468  ;;  %v2372_v60 = vmul.f32 0.6931472, %v9467_v51 }
 0x376   :  { %v9471_v62 = vpop.eup %9470  ;;  %2397 = vst.msk [vmem:[#allocation2 + $0x28] sm:$0xff] %vm2393_vm3, %v2378_v2  ;;  %v11827_v20 = vmul.f32 0.6931472, %v9469_v57  ;;  %2541 = vrot.lane.b32.xlu0 %v11812_v34, %s9558_s7 }
 0x377   :  { %v9473_v21 = vpop.eup %9472  ;;  %2394 = vst.msk [vmem:[#allocation2 + $0x10] sm:$0xff] %vm2393_vm3, %v2372_v60  ;;  %v2376_v18 = vmul.f32 0.6931472, %v9471_v62  ;;  %2677 = vrot.lane.b32.xlu1 %v11824_v0, %s9557_s15 }
 0x378   :  { %v9475_v24 = vpop.eup %9474  ;;  %2395 = vst [vmem:[#allocation2 + $0x18] sm:$0xff] %v11827_v20  ;;  %v2390_v23 = vmul.f32 0.6931472, %v9473_v21  ;;  %v2431_v38 = vmul.f32 %v11827_v20, %v11827_v20  ;;  %v2412_v48 = vsel %vm2408_vm4, %v11827_v20, 0.0 }
 0x379   :  { %v9477_v40 = vpop.eup %9476  ;;  %2396 = vst [vmem:[#allocation2 + $0x20] sm:$0xff] %v2376_v18  ;;  %v2384_v35 = vmul.f32 0.6931472, %v9475_v24  ;;  %v2668_v50 = vmul.f32 %v2376_v18, %v2376_v18 }
 0x37a   :  { %v9479_v56 = vpop.eup %9478  ;;  %2403 = vst.msk [vmem:[#allocation2 + $0x58] sm:$0xff] %vm2393_vm3, %v2390_v23  ;;  %v11836_v26 = vmul.f32 0.6931472, %v9477_v40  ;;  %2621 = vrot.lane.b32.xlu0 %v11812_v34, %s9557_s15  ;;  %v2437_v37 = vsel %vm2408_vm4, %v2431_v38, 0.0 }
 0x37b   :  { %v9481_v30 = vpop.eup %9480  ;;  %2400 = vst.msk [vmem:[#allocation2 + $0x40] sm:$0xff] %vm2393_vm3, %v2384_v35  ;;  %v11841_v1 = vmul.f32 0.6931472, %v9479_v56  ;;  %2467 = vrot.lane.b32.xlu1 %v11827_v20, %s9556_s9 }
 0x37c   :  { %v9483_v6 = vpop.eup %9482  ;;  %2398 = vst [vmem:[#allocation2 + $0x30] sm:$0xff] %v11836_v26  ;;  %v11846_v49 = vmul.f32 0.6931472, %v9481_v30  ;;  %v2415_v27 = vsel %vm2408_vm4, %v11836_v26, 0.0  ;;  %v2432_v59 = vmul.f32 %v11836_v26, %v11836_v26 }
 0x37d   :  { %2399 = vst [vmem:[#allocation2 + $0x38] sm:$0xff] %v11841_v1  ;;  %v11849_v36 = vmul.f32 0.6931472, %v9483_v6  ;;  %v2871_v31 = vld [vmem:[#allocation2 + $0x28] sm:$0xff]  ;;  %v2669_v13 = vmul.f32 %v11841_v1, %v11841_v1 }
 0x37e   :  { %2401 = vst [vmem:[#allocation2 + $0x48] sm:$0xff] %v11846_v49  ;;  %v2870_v33 = vld [vmem:[#allocation2 + $0x10] sm:$0xff]  ;;  %v2925_v55 = vmul.f32 %v2871_v31, %v2871_v31  ;;  %v2440_v25 = vsel %vm2408_vm4, %v2432_v59, 0.0 }
 0x37f   :  { %2402 = vst [vmem:[#allocation2 + $0x50] sm:$0xff] %v11849_v36  ;;  %2543 = vrot.lane.b32.xlu1 %v11827_v20, %s9558_s7  ;;  %v2924_v7 = vmul.f32 %v2870_v33, %v2870_v33  ;;  %v11991_v51 = vmul.f32 %v11849_v36, %v11849_v36 }
 0x381   :  { %v2873_v41 = vld [vmem:[#allocation2 + $0x58] sm:$0xff] }
 0x382   :  { %v2872_v45 = vld [vmem:[#allocation2 + $0x40] sm:$0xff]  ;;  %v2927_v19 = vmul.f32 %v2873_v41, %v2873_v41 }
 0x383   :  { %2625 = vrot.lane.b32.xlu1 %v11827_v20, %s9557_s15  ;;  %v2926_v17 = vmul.f32 %v2872_v45, %v2872_v45 }
 0x387   :  { %2884 = vrot.lane.b32.xlu1 %v2871_v31, %s9559_s5 }
 0x38b   :  { %2985 = vrot.lane.b32.xlu1 %v2871_v31, %s9560_s16 }
 0x38f   :  { %2627 = vrot.lane.b32.xlu1 %v2376_v18, %s9557_s15 }
 0x393   :  { %2728 = vrot.lane.b32.xlu1 %v2376_v18, %s9561_s17 }
 0x397   :  { %2800 = vrot.lane.b32.xlu1 %v2376_v18, %s9562_s18 }
 0x399   :  { %2410 = vadd.xlane.f32.xlu0 %v2409_v32 }
 0x39b   :  { %2880 = vrot.lane.b32.xlu1 %v2870_v33, %s9559_s5 }
 0x39f   :  { %2882 = vrot.lane.b32.xlu1 %v2376_v18, %s9559_s5  ;;  %v2418_v18 = vsel %vm2408_vm4, %v11846_v49, 0.0 }
 0x3a3   :  { %2504 = vrot.lane.b32.xlu1 %v2431_v38, %s9556_s9 }
 0x3a7   :  { %2576 = vrot.lane.b32.xlu1 %v2431_v38, %s9558_s7 }
 0x3ab   :  { %2679 = vrot.lane.b32.xlu1 %v2431_v38, %s9557_s15 }
 0x3af   :  { %2726 = vrot.lane.b32.xlu0 %v11814_v12, %s9561_s17  ;;  %2938 = vrot.lane.b32.xlu1 %v2925_v55, %s9559_s5 }
 0x3b3   :  { %2798 = vrot.lane.b32.xlu0 %v11814_v12, %s9562_s18  ;;  %3018 = vrot.lane.b32.xlu1 %v2925_v55, %s9560_s16 }
 0x3b7   :  { %2878 = vrot.lane.b32.xlu0 %v11814_v12, %s9559_s5  ;;  %v11983_v12 = vmul.f32 %v11846_v49, %v11846_v49 }
 0x3bb   :  { %2502 = vrot.lane.b32.xlu0 %v2430_v58, %s9556_s9 }
 0x3bf   :  { %2574 = vrot.lane.b32.xlu0 %v2430_v58, %s9558_s7 }
 0x3c3   :  { %2675 = vrot.lane.b32.xlu0 %v2430_v58, %s9557_s15 }
 0x3d7   :  { %2438 = vadd.xlane.f32.xlu1 %v2437_v37 }
 0x3e2   :  { %2435 = vadd.xlane.f32.xlu0 %v2434_v44 }
 0x3e4   :  { %v2466_v10 = vpop.permute.xlu0 %2465 }
 0x3e5   :  { %v11903_v5 = vpop.permute.xlu1 %2623  ;;  %v2477_v56 = vsel %vm2408_vm4, %v2466_v10, 0.0 }
 0x3e8   :  { %2681 = vrot.lane.b32.xlu1 %v2668_v50, %s9557_s15  ;;  %v2542_v34 = vpop.permute.xlu0 %2541 }
 0x3e9   :  { %v11907_v63 = vpop.permute.xlu1 %2677  ;;  %v2553_v30 = vsel %vm2408_vm4, %v2542_v34, 0.0 }
 0x3ec   :  { %2761 = vrot.lane.b32.xlu1 %v2668_v50, %s9561_s17  ;;  %v2622_v16 = vpop.permute.xlu0 %2621 }
 0x3ed   :  { %v11909_v43 = vpop.permute.xlu1 %2467 }
 0x3f0   :  { %2833 = vrot.lane.b32.xlu1 %v2668_v50, %s9562_s18 }
 0x3f1   :  { %v11913_v39 = vpop.permute.xlu1 %2543 }
 0x3f4   :  { %2934 = vrot.lane.b32.xlu1 %v2924_v7, %s9559_s5 }
 0x3f5   :  { %v11915_v14 = vpop.permute.xlu1 %2625 }
 0x3f8   :  { %2759 = vrot.lane.b32.xlu0 %v11824_v0, %s9561_s17  ;;  %2936 = vrot.lane.b32.xlu1 %v2668_v50, %s9559_s5  ;;  %v2638_v50 = vsel %vm2637_vm5, %v2622_v16, %v11903_v5 }
 0x3f9   :  { %v11918_v8 = vpop.permute.xlu1 %2884 }
 0x3fc   :  { %2831 = vrot.lane.b32.xlu0 %v11824_v0, %s9562_s18  ;;  %2469 = vrot.lane.b32.xlu1 %v11836_v26, %s9556_s9 }
 0x3fd   :  { %v11925_v15 = vpop.permute.xlu1 %2985 }
 0x400   :  { %2932 = vrot.lane.b32.xlu0 %v11824_v0, %s9559_s5  ;;  %2545 = vrot.lane.b32.xlu1 %v11836_v26, %s9558_s7 }
 0x401   :  { %v11933_v3 = vpop.permute.xlu1 %2627 }
 0x404   :  { %2892 = vrot.lane.b32.xlu1 %v2873_v41, %s9559_s5 }
 0x405   :  { %v11939_v42 = vpop.permute.xlu1 %2728 }
 0x408   :  { %2989 = vrot.lane.b32.xlu1 %v2873_v41, %s9560_s16 }
 0x409   :  { %v11942_v46 = vpop.permute.xlu1 %2800 }
 0x40d   :  { %v11946_v61 = vpop.permute.xlu1 %2880 }
 0x411   :  { %v11949_v29 = vpop.permute.xlu1 %2882 }
 0x415   :  { %v11955_v52 = vpop.permute.xlu1 %2504 }
 0x419   :  { %v11959_v28 = vpop.permute.xlu1 %2576 }
 0x41d   :  { %v11963_v53 = vpop.permute.xlu1 %2679 }
 0x41f   :  { %2413 = vadd.xlane.f32.xlu0 %v2412_v48 }
 0x421   :  { %v11966_v9 = vpop.permute.xlu1 %2938 }
 0x425   :  { %v11973_v22 = vpop.permute.xlu1 %3018 }
 0x426   :  { %v11993_v2 = vpop.xlane.xlu0 %2410 }
 0x42a   :  { %v2727_v60 = vpop.permute.xlu0 %2726 }
 0x42c   :  { %2416 = vadd.xlane.f32.xlu1 %v2415_v27 }
 0x42e   :  { %v2799_v62 = vpop.permute.xlu0 %2798 }
 0x42f   :  { %v2810_v32 = vsel %vm2408_vm4, %v2799_v62, 0.0 }
 0x432   :  { %v2879_v21 = vpop.permute.xlu0 %2878 }
 0x433   :  { %v2895_v34 = vsel %vm2894_vm6, %v2879_v21, %v11946_v61 }
 0x434   :  { %v2903_v16 = vsel %vm2408_vm4, %v2895_v34, 0.0 }
 0x435   :  { %2983 = vrot.lane.b32.xlu0 %v2870_v33, %s9560_s16 }
 0x436   :  { %v2503_v23 = vpop.permute.xlu0 %2502 }
 0x437   :  { %v2514_v55 = vsel %vm2408_vm4, %v2503_v23, 0.0 }
 0x439   :  { %3016 = vrot.lane.b32.xlu0 %v2924_v7, %s9560_s16  ;;  %v2646_v7 = vsel %vm2408_vm4, %v2638_v50, 0.0 }
 0x43a   :  { %v2575_v35 = vpop.permute.xlu0 %2574 }
 0x43b   :  { %v2586_v37 = vsel %vm2408_vm4, %v2575_v35, 0.0 }
 0x43d   :  { %2629 = vrot.lane.b32.xlu0 %v11836_v26, %s9557_s15  ;;  %2631 = vrot.lane.b32.xlu1 %v11841_v1, %s9557_s15 }
 0x441   :  { %2886 = vrot.lane.b32.xlu0 %v11841_v1, %s9559_s5  ;;  %2730 = vrot.lane.b32.xlu1 %v11841_v1, %s9561_s17 }
 0x445   :  { %2683 = vrot.lane.b32.xlu0 %v2432_v59, %s9557_s15  ;;  %2802 = vrot.lane.b32.xlu1 %v11841_v1, %s9562_s18  ;;  %v2676_v1 = vpop.permute.xlu0 %2675 }
 0x446   :  { %v2691_v5 = vsel %vm2637_vm5, %v2676_v1, %v11907_v63 }
 0x449   :  { %2888 = vrot.lane.b32.xlu1 %v2872_v45, %s9559_s5 }
 0x44d   :  { %2987 = vrot.lane.b32.xlu1 %v2872_v45, %s9560_s16 }
 0x451   :  { %2506 = vrot.lane.b32.xlu1 %v2432_v59, %s9556_s9 }
 0x455   :  { %2578 = vrot.lane.b32.xlu1 %v2432_v59, %s9558_s7 }
 0x459   :  { %2946 = vrot.lane.b32.xlu1 %v2927_v19, %s9559_s5 }
 0x45d   :  { %3022 = vrot.lane.b32.xlu1 %v2927_v19, %s9560_s16 }
 0x461   :  { %2685 = vrot.lane.b32.xlu1 %v2669_v13, %s9557_s15 }
 0x464   :  { %2441 = vadd.xlane.f32.xlu0 %v2440_v25  ;;  %v11977_v54 = vpop.xlane.xlu1 %2438 }
 0x465   :  { %2763 = vrot.lane.b32.xlu1 %v2669_v13, %s9561_s17 }
 0x468   :  { %v11985_v47 = vpop.permute.xlu1 %2681 }
 0x469   :  { %2835 = vrot.lane.b32.xlu1 %v2669_v13, %s9562_s18 }
 0x46c   :  { %v11997_v57 = vpop.permute.xlu1 %2761 }
 0x46d   :  { %2942 = vrot.lane.b32.xlu1 %v2926_v17, %s9559_s5 }
 0x46f   :  { %v12014_v31 = vpop.xlane.xlu0 %2435 }
 0x470   :  { %v11999_v0 = vpop.permute.xlu1 %2833 }
 0x471   :  { %3020 = vrot.lane.b32.xlu1 %v2926_v17, %s9560_s16 }
 0x473   :  { %v2760_v38 = vpop.permute.xlu0 %2759 }
 0x474   :  { %v12001_v20 = vpop.permute.xlu1 %2934  ;;  %v2771_v48 = vsel %vm2408_vm4, %v2760_v38, 0.0 }
 0x475   :  { %2471 = vrot.lane.b32.xlu1 %v11846_v49, %s9556_s9 }
 0x477   :  { %v2832_v44 = vpop.permute.xlu0 %2831 }
 0x478   :  { %v12005_v24 = vpop.permute.xlu1 %2936  ;;  %v2843_v45 = vsel %vm2408_vm4, %v2832_v44, 0.0 }
 0x479   :  { %2547 = vrot.lane.b32.xlu1 %v11846_v49, %s9558_s7 }
 0x47a   :  { %2940 = vrot.lane.b32.xlu0 %v2669_v13, %s9559_s5  ;;  %v2699_v13 = vsel %vm2408_vm4, %v2691_v5, 0.0 }
 0x47b   :  { %v2933_v41 = vpop.permute.xlu0 %2932 }
 0x47c   :  { %v2470_v40 = vpop.permute.xlu1 %2469  ;;  %v2948_v61 = vsel %vm2894_vm6, %v2933_v41, %v12001_v20 }
 0x47e   :  { %2633 = vrot.lane.b32.xlu0 %v11846_v49, %s9557_s15  ;;  %v2738_v49 = vsel %vm2408_vm4, %v2727_v60, 0.0 }
 0x480   :  { %v2546_v26 = vpop.permute.xlu1 %2545 }
 0x481   :  { %v2559_v35 = vsel %vm2408_vm4, %v2546_v26, 0.0 }
 0x482   :  { %2890 = vrot.lane.b32.xlu0 %v11849_v36, %s9559_s5 }
 0x484   :  { %v12011_v6 = vpop.permute.xlu1 %2892 }
 0x486   :  { %2687 = vrot.lane.b32.xlu0 %v11983_v12, %s9557_s15 }
 0x488   :  { %v2990_v33 = vpop.permute.xlu1 %2989 }
 0x489   :  { %v3004_v1 = vsel %vm2408_vm4, %v2990_v33, 0.0 }
 0x48a   :  { %2944 = vrot.lane.b32.xlu0 %v11991_v51, %s9559_s5 }
 0x49d   :  { %2419 = vadd.xlane.f32.xlu1 %v2418_v18  ;;  %v2483_v18 = vsel %vm2408_vm4, %v2470_v40, 0.0 }
 0x4a9   :  { %2478 = vadd.xlane.f32.xlu0 %v2477_v56  ;;  %v2443_v56 = vsel %vm2408_vm4, %v11983_v12, 0.0 }
 0x4ac   :  { %v12033_v59 = vpop.xlane.xlu0 %2413 }
 0x4ad   :  { %2554 = vadd.xlane.f32.xlu0 %v2553_v30  ;;  %v2956_v30 = vsel %vm2408_vm4, %v2948_v61, 0.0  ;;  %v2556_v61 = vsel %vm2408_vm4, %v11913_v39, 0.0  ;;  %v2813_v39 = vsel %vm2408_vm4, %v11942_v46, 0.0  ;;  %v2639_v46 = vsel %vm2637_vm5, %v11915_v14, %v11933_v3 }
 0x4ae   :  { %2635 = vrot.lane.b32.xlu1 %v11849_v36, %s9557_s15 }
 0x4b0   :  { %v2984_v25 = vpop.permute.xlu0 %2983 }
 0x4b1   :  { %2739 = vadd.xlane.f32.xlu0 %v2738_v49  ;;  %v2995_v17 = vsel %vm2408_vm4, %v2984_v25, 0.0 }
 0x4b2   :  { %2732 = vrot.lane.b32.xlu1 %v11849_v36, %s9561_s17 }
 0x4b4   :  { %v3017_v60 = vpop.permute.xlu0 %3016 }
 0x4b5   :  { %2811 = vadd.xlane.f32.xlu0 %v2810_v32  ;;  %v3028_v63 = vsel %vm2408_vm4, %v3017_v60, 0.0 }
 0x4b6   :  { %2804 = vrot.lane.b32.xlu1 %v11849_v36, %s9562_s18 }
 0x4b8   :  { %v2630_v38 = vpop.permute.xlu0 %2629 }
 0x4b9   :  { %v12022_v58 = vpop.xlane.xlu1 %2416  ;;  %2515 = vadd.xlane.f32.xlu0 %v2514_v55 }
 0x4ba   :  { %2508 = vrot.lane.b32.xlu1 %v11983_v12, %s9556_s9 }
 0x4bc   :  { %v2887_v50 = vpop.permute.xlu0 %2886 }
 0x4bd   :  { %2587 = vadd.xlane.f32.xlu0 %v2586_v37  ;;  %v2632_v36 = vpop.permute.xlu1 %2631 }
 0x4be   :  { %2580 = vrot.lane.b32.xlu1 %v11983_v12, %s9558_s7  ;;  %v2640_v44 = vsel %vm2637_vm5, %v2630_v38, %v2632_v36 }
 0x4c1   :  { %2647 = vadd.xlane.f32.xlu0 %v2646_v7  ;;  %v2731_v27 = vpop.permute.xlu1 %2730  ;;  %v2652_v7 = vsel %vm2408_vm4, %v2640_v44, 0.0 }
 0x4c2   :  { %v2744_v40 = vsel %vm2408_vm4, %v2731_v27, 0.0 }
 0x4c5   :  { %2772 = vadd.xlane.f32.xlu0 %v2771_v48  ;;  %v2803_v19 = vpop.permute.xlu1 %2802 }
 0x4c6   :  { %v2816_v32 = vsel %vm2408_vm4, %v2803_v19, 0.0 }
 0x4c9   :  { %2844 = vadd.xlane.f32.xlu0 %v2843_v45  ;;  %v2889_v10 = vpop.permute.xlu1 %2888 }
 0x4ca   :  { %v2897_v41 = vsel %vm2894_vm6, %v2887_v50, %v2889_v10  ;;  %v2649_v50 = vsel %vm2408_vm4, %v2639_v46, 0.0 }
 0x4cb   :  { %v2909_v27 = vsel %vm2408_vm4, %v2897_v41, 0.0 }
 0x4cd   :  { %2700 = vadd.xlane.f32.xlu0 %v2699_v13  ;;  %v2988_v62 = vpop.permute.xlu1 %2987  ;;  %v2684_v13 = vpop.permute.xlu0 %2683 }
 0x4ce   :  { %v3001_v12 = vsel %vm2408_vm4, %v2988_v62, 0.0 }
 0x4d1   :  { %2996 = vadd.xlane.f32.xlu0 %v2995_v17  ;;  %v2507_v23 = vpop.permute.xlu1 %2506 }
 0x4d2   :  { %v2520_v33 = vsel %vm2408_vm4, %v2507_v23, 0.0 }
 0x4d5   :  { %2904 = vadd.xlane.f32.xlu0 %v2903_v16  ;;  %v2579_v21 = vpop.permute.xlu1 %2578 }
 0x4d6   :  { %v2592_v37 = vsel %vm2408_vm4, %v2579_v21, 0.0 }
 0x4d9   :  { %3029 = vadd.xlane.f32.xlu0 %v3028_v63  ;;  %v12052_v49 = vpop.permute.xlu1 %2946 }
 0x4dd   :  { %2484 = vadd.xlane.f32.xlu0 %v2483_v18  ;;  %v3023_v26 = vpop.permute.xlu1 %3022  ;;  %v2480_v18 = vsel %vm2408_vm4, %v11909_v43, 0.0 }
 0x4de   :  { %v3037_v5 = vsel %vm2408_vm4, %v3023_v26, 0.0 }
 0x4e1   :  { %2560 = vadd.xlane.f32.xlu0 %v2559_v35  ;;  %v2686_v20 = vpop.permute.xlu1 %2685 }
 0x4e2   :  { %2444 = vadd.xlane.f32.xlu1 %v2443_v56  ;;  %v2693_v63 = vsel %vm2637_vm5, %v2684_v13, %v2686_v20 }
 0x4e3   :  { %v2705_v35 = vsel %vm2408_vm4, %v2693_v63, 0.0 }
 0x4e5   :  { %2957 = vadd.xlane.f32.xlu0 %v2956_v30  ;;  %v2764_v55 = vpop.permute.xlu1 %2763 }
 0x4e9   :  { %3005 = vadd.xlane.f32.xlu0 %v3004_v1  ;;  %v2836_v48 = vpop.permute.xlu1 %2835  ;;  %v2998_v1 = vsel %vm2408_vm4, %v11925_v15, 0.0 }
 0x4ea   :  { %v2849_v36 = vsel %vm2408_vm4, %v2836_v48, 0.0 }
 0x4ed   :  { %2745 = vadd.xlane.f32.xlu0 %v2744_v40  ;;  %v2943_v45 = vpop.permute.xlu1 %2942  ;;  %v2741_v40 = vsel %vm2408_vm4, %v11939_v42, 0.0 }
 0x4f1   :  { %2817 = vadd.xlane.f32.xlu0 %v2816_v32  ;;  %v3021_v19 = vpop.permute.xlu1 %3020  ;;  %v12072_v17 = vpop.xlane.xlu0 %2441 }
 0x4f2   :  { %v3034_v10 = vsel %vm2408_vm4, %v3021_v19, 0.0  ;;  %v2774_v19 = vsel %vm2408_vm4, %v11997_v57, 0.0  ;;  %v2949_v57 = vsel %vm2894_vm6, %v12005_v24, %v11966_v9 }
 0x4f3   :  { %2689 = vrot.lane.b32.xlu1 %v11991_v51, %s9557_s15 }
 0x4f5   :  { %3002 = vadd.xlane.f32.xlu0 %v3001_v12  ;;  %v2472_v25 = vpop.permute.xlu1 %2471  ;;  %v2941_v60 = vpop.permute.xlu0 %2940 }
 0x4f6   :  { %v2486_v34 = vsel %vm2408_vm4, %v2472_v25, 0.0  ;;  %v2950_v56 = vsel %vm2894_vm6, %v2941_v60, %v2943_v45  ;;  %v2692_v25 = vsel %vm2637_vm5, %v11963_v53, %v11985_v47  ;;  %v2421_v53 = vadd.f32 %v12033_v59, %v11993_v2 }
 0x4f7   :  { %2765 = vrot.lane.b32.xlu1 %v11991_v51, %s9561_s17  ;;  %v2962_v21 = vsel %vm2408_vm4, %v2950_v56, 0.0 }
 0x4f8   :  { %v2422_v60 = vadd.f32 %v2421_v53, %v12022_v58 }
 0x4f9   :  { %2521 = vadd.xlane.f32.xlu0 %v2520_v33  ;;  %v2548_v16 = vpop.permute.xlu1 %2547  ;;  %v2634_v23 = vpop.permute.xlu0 %2633  ;;  %v2517_v33 = vsel %vm2408_vm4, %v11955_v52, 0.0 }
 0x4fa   :  { %v2562_v62 = vsel %vm2408_vm4, %v2548_v16, 0.0  ;;  %v2959_v16 = vsel %vm2408_vm4, %v2949_v57, 0.0  ;;  %v12204_v57 = vld [vmem:[%s15509_s11 + $0x7] sm:$0x1] }
 0x4fb   :  { %2837 = vrot.lane.b32.xlu1 %v11991_v51, %s9562_s18  ;;  %v2777_v51 = vsel %vm2408_vm4, %v2764_v55, 0.0  ;;  %v2589_v55 = vsel %vm2408_vm4, %v11959_v28, 0.0 }
 0x4fd   :  { %2593 = vadd.xlane.f32.xlu0 %v2592_v37  ;;  %v2891_v30 = vpop.permute.xlu0 %2890 }
 0x501   :  { %2653 = vadd.xlane.f32.xlu0 %v2652_v7  ;;  %v12089_v26 = vpop.permute.xlu0 %2687  ;;  %v2896_v7 = vsel %vm2894_vm6, %v11949_v29, %v11918_v8  ;;  %v3031_v8 = vsel %vm2408_vm4, %v11973_v22, 0.0  ;;  %v2846_v22 = vsel %vm2408_vm4, %v11999_v0, 0.0 }
 0x502   :  { %v2906_v14 = vsel %vm2408_vm4, %v2896_v7, 0.0 }
 0x505   :  { %2910 = vadd.xlane.f32.xlu0 %v2909_v27  ;;  %v12093_v12 = vpop.permute.xlu0 %2944 }
 0x509   :  { %3038 = vadd.xlane.f32.xlu0 %v3037_v5  ;;  %v2898_v5 = vsel %vm2894_vm6, %v2891_v30, %v12011_v6 }
 0x50a   :  { %v2912_v13 = vsel %vm2408_vm4, %v2898_v5, 0.0 }
 0x50d   :  { %2778 = vadd.xlane.f32.xlu0 %v2777_v51 }
 0x511   :  { %2850 = vadd.xlane.f32.xlu0 %v2849_v36 }
 0x515   :  { %3035 = vadd.xlane.f32.xlu0 %v3034_v10  ;;  %v2702_v10 = vsel %vm2408_vm4, %v2692_v25, 0.0 }
 0x519   :  { %2487 = vadd.xlane.f32.xlu0 %v2486_v34 }
 0x51d   :  { %2563 = vadd.xlane.f32.xlu0 %v2562_v62 }
 0x51f   :  { %2481 = vadd.xlane.f32.xlu1 %v2480_v18 }
 0x521   :  { %2706 = vadd.xlane.f32.xlu0 %v2705_v35 }
 0x523   :  { %2557 = vadd.xlane.f32.xlu1 %v2556_v61  ;;  %v2446_v61 = vadd.f32 %v11977_v54, %v12014_v31 }
 0x525   :  { %2963 = vadd.xlane.f32.xlu0 %v2962_v21  ;;  %v2447_v2 = vadd.f32 %v2446_v61, %v12072_v17 }
 0x527   :  { %2999 = vadd.xlane.f32.xlu1 %v2998_v1 }
 0x52a   :  { %v2420_v43 = vpop.xlane.xlu1 %2419 }
 0x52b   :  { %2742 = vadd.xlane.f32.xlu1 %v2741_v40  ;;  %v2423_v62 = vadd.f32 %v2422_v60, %v2420_v43  ;;  %v12213_v60 = vld [vmem:[%s15509_s11 + $0x2] sm:$0x1] }
 0x52d   :  { %v2424_v18 = vrot.slane %v2423_v62, 4 }
 0x52e   :  { %v2636_v32 = vpop.permute.xlu1 %2635 }
 0x52f   :  { %2814 = vadd.xlane.f32.xlu1 %v2813_v39  ;;  %v2641_v27 = vsel %vm2637_vm5, %v2634_v23, %v2636_v32  ;;  %v2425_v24 = vadd.f32 %v2424_v18, %v2423_v62 }
 0x530   :  { %v2655_v29 = vsel %vm2408_vm4, %v2641_v27, 0.0 }
 0x531   :  { %v2426_v35 = vrot.slane %v2425_v24, 2 }
 0x532   :  { %v2733_v20 = vpop.permute.xlu1 %2732 }
 0x533   :  { %2518 = vadd.xlane.f32.xlu1 %v2517_v33  ;;  %v2747_v15 = vsel %vm2408_vm4, %v2733_v20, 0.0  ;;  %v2427_v59 = vadd.f32 %v2426_v35, %v2425_v24 }
 0x534   :  { %2748 = vadd.xlane.f32.xlu0 %v2747_v15 }
 0x535   :  { %v2428_v1 = vrot.slane %v2427_v59, 1 }
 0x536   :  { %v2805_v38 = vpop.permute.xlu1 %2804  ;;  %v12098_v42 = vpop.xlane.xlu0 %2478 }
 0x537   :  { %2590 = vadd.xlane.f32.xlu1 %v2589_v55  ;;  %v2819_v37 = vsel %vm2408_vm4, %v2805_v38, 0.0  ;;  %v2429_v20 = vadd.f32 %v2428_v1, %v2427_v59 }
 0x538   :  { %2820 = vadd.xlane.f32.xlu0 %v2819_v37 }
 0x539   :  { %v12171_v31 = vmul.f32 0.0008445946, %v2429_v20 }
 0x53a   :  { %v2509_v44 = vpop.permute.xlu1 %2508  ;;  %v12106_v52 = vpop.xlane.xlu0 %2554 }
 0x53b   :  { %2650 = vadd.xlane.f32.xlu1 %v2649_v50  ;;  %v2523_v28 = vsel %vm2408_vm4, %v2509_v44, 0.0  ;;  %15606 = vst [vmem:[#allocation4_spill] sm:$0xff] %v12171_v31 }
 0x53c   :  { %2524 = vadd.xlane.f32.xlu0 %v2523_v28  ;;  %v2457_v28 = vmul.f32 %v12171_v31, %v12171_v31 }
 0x53e   :  { %v2581_v41 = vpop.permute.xlu1 %2580  ;;  %v12113_v48 = vpop.xlane.xlu0 %2739 }
 0x53f   :  { %2907 = vadd.xlane.f32.xlu1 %v2906_v14  ;;  %v2595_v3 = vsel %vm2408_vm4, %v2581_v41, 0.0 }
 0x540   :  { %2596 = vadd.xlane.f32.xlu0 %v2595_v3 }
 0x542   :  { %v12118_v45 = vpop.xlane.xlu0 %2811 }
 0x543   :  { %3032 = vadd.xlane.f32.xlu1 %v3031_v8  ;;  %v2951_v8 = vsel %vm2894_vm6, %v12093_v12, %v12052_v49  ;;  %v12199_v49 = vld [vmem:[%s15509_s11 + $0x1] sm:$0x1] }
 0x544   :  { %2656 = vadd.xlane.f32.xlu0 %v2655_v29 }
 0x546   :  { %v12125_v51 = vpop.xlane.xlu0 %2515 }
 0x547   :  { %2775 = vadd.xlane.f32.xlu1 %v2774_v19 }
 0x548   :  { %2913 = vadd.xlane.f32.xlu0 %v2912_v13  ;;  %v9563_v13 = vmov 1966171168  }
 0x54a   :  { %v12130_v36 = vpop.xlane.xlu0 %2587 }
 0x54b   :  { %2847 = vadd.xlane.f32.xlu1 %v2846_v22  ;;  %v3107_v22 = vunpack.c.l.s4 %v9563_v13 }
 0x54d   :  { %v3108_v12 = vunpack.c.0.s8 %v3107_v22 }
 0x54e   :  { %v12137_v6 = vpop.xlane.xlu0 %2647 }
 0x54f   :  { %2703 = vadd.xlane.f32.xlu1 %v2702_v10  ;;  %v12194_v10 = vld [vmem:[%s15509_s11] sm:$0x1]  ;;  %v12228_v35 = vsub.s32 %v3108_v12, %v10222_v4 }
 0x551   :  { %15609 = vst [vmem:[#allocation7_spill] sm:$0xff] %v12228_v35 }
 0x552   :  { %v12143_v34 = vpop.xlane.xlu0 %2772 }
 0x553   :  { %2960 = vadd.xlane.f32.xlu1 %v2959_v16 }
 0x556   :  { %v12146_v0 = vpop.xlane.xlu0 %2844 }
 0x55a   :  { %v12150_v47 = vpop.xlane.xlu0 %2700 }
 0x55e   :  { %v12153_v63 = vpop.xlane.xlu0 %2996 }
 0x562   :  { %v12155_v9 = vpop.xlane.xlu0 %2904 }
 0x566   :  { %v12157_v23 = vpop.xlane.xlu0 %3029 }
 0x56a   :  { %v12159_v56 = vpop.xlane.xlu0 %2484 }
 0x56e   :  { %v12164_v21 = vpop.xlane.xlu0 %2560 }
 0x56f   :  { %v2445_v58 = vpop.xlane.xlu1 %2444 }
 0x570   :  { %v2448_v30 = vadd.f32 %v2447_v2, %v2445_v58  ;;  %v12242_v58 = vld [vmem:[%s15509_s11 + $0x3] sm:$0x1] }
 0x572   :  { %v2449_v43 = vrot.slane %v2448_v30, 4  ;;  %v12166_v40 = vpop.xlane.xlu0 %2957 }
 0x573   :  { %v2690_v32 = vpop.permute.xlu1 %2689 }
 0x574   :  { %v2450_v39 = vadd.f32 %v2449_v43, %v2448_v30  ;;  %v2694_v7 = vsel %vm2637_vm5, %v12089_v26, %v2690_v32  ;;  %v2965_v26 = vsel %vm2408_vm4, %v2951_v8, 0.0 }
 0x575   :  { %v2708_v27 = vsel %vm2408_vm4, %v2694_v7, 0.0 }
 0x576   :  { %v2451_v33 = vrot.slane %v2450_v39, 2  ;;  %v12168_v15 = vpop.xlane.xlu0 %3005 }
 0x577   :  { %v2766_v38 = vpop.permute.xlu1 %2765 }
 0x578   :  { %v2452_v55 = vadd.f32 %v2451_v33, %v2450_v39  ;;  %v2780_v54 = vsel %vm2408_vm4, %v2766_v38, 0.0 }
 0x579   :  { %2781 = vadd.xlane.f32.xlu0 %v2780_v54 }
 0x57a   :  { %v2453_v17 = vrot.slane %v2452_v55, 1  ;;  %v12173_v46 = vpop.xlane.xlu0 %2745 }
 0x57b   :  { %v2838_v37 = vpop.permute.xlu1 %2837 }
 0x57c   :  { %v2454_v44 = vadd.f32 %v2453_v17, %v2452_v55  ;;  %v2852_v50 = vsel %vm2408_vm4, %v2838_v37, 0.0 }
 0x57d   :  { %2853 = vadd.xlane.f32.xlu0 %v2852_v50 }
 0x57e   :  { %v2456_v41 = vmul.f32 0.0008445946, %v2454_v44  ;;  %v12180_v14 = vpop.xlane.xlu0 %2817 }
 0x580   :  { %v2458_v3 = vsub.f32 %v2456_v41, %v2457_v28 }
 0x581   :  { %2709 = vadd.xlane.f32.xlu0 %v2708_v27 }
 0x582   :  { %v2459_v29 = vadd.f32 1e-05, %v2458_v3  ;;  %v3003_v5 = vpop.xlane.xlu0 %3002 }
 0x584   :  { %9484 = vrsqrt.f32 %v2459_v29 }
 0x585   :  { %2966 = vadd.xlane.f32.xlu0 %v2965_v26 }
 0x586   :  { %v12187_v19 = vpop.xlane.xlu0 %2521 }
 0x58a   :  { %v12189_v25 = vpop.xlane.xlu0 %2593 }
 0x58e   :  { %v12206_v16 = vpop.eup %9484  ;;  %v12208_v53 = vpop.xlane.xlu0 %2653 }
 0x58f   :  { %15607 = vst [vmem:[#allocation5_spill] sm:$0xff] %v12206_v16  ;;  %v12217_v62 = vmul.f32 %v12206_v16, %v12194_v10  ;;  %v12221_v18 = vmul.f32 %v12206_v16, %v12199_v49  ;;  %v12225_v24 = vmul.f32 %v12206_v16, %v12204_v57  ;;  %v12235_v2 = vmul.f32 %v12206_v16, %v12213_v60 }
 0x590   :  { %v12249_v1 = vmul.f32 %v12206_v16, %v12242_v58 }
 0x591   :  { %15608 = vst [vmem:[#allocation6_spill] sm:$0xff] %v12225_v24  ;;  %9288 = vpush %v12217_v62  ;;  %v3676_v61 = vmul.f32 %v12221_v18, %v12171_v31  ;;  %v4301_v4 = vmul.f32 %v12235_v2, %v12171_v31 }
 0x592   :  { %v12237_v59 = vpop.xlane.xlu0 %2910  ;;  %v4926_v20 = vmul.f32 %v12249_v1, %v12171_v31 }
 0x593   :  { %v3684_v30 = vrot.slane %v3676_v61, %v12228_v35  ;;  %v4309_v39 = vrot.slane %v4301_v4, %v12228_v35 }
 0x594   :  { %v4934_v55 = vrot.slane %v4926_v20, %v12228_v35 }
 0x595   :  { %v3691_v32 = vrot.slane %v3684_v30, %v12228_v35  ;;  %v4316_v38 = vrot.slane %v4309_v39, %v12228_v35 }
 0x596   :  { %v12251_v43 = vpop.xlane.xlu0 %3038  ;;  %v4941_v17 = vrot.slane %v4934_v55, %v12228_v35 }
 0x59a   :  { %v12257_v33 = vpop.xlane.xlu0 %2778 }
 0x59b   :  { %3692 = vrot.lane.b32.xlu0 %v3691_v32, %s15532_s24 }
 0x59e   :  { %v12262_v54 = vpop.xlane.xlu0 %2850 }
 0x59f   :  { %4317 = vrot.lane.b32.xlu0 %v4316_v38, %s15530_s1 }
 0x5a2   :  { %v3036_v37 = vpop.xlane.xlu0 %3035 }
 0x5a3   :  { %4942 = vrot.lane.b32.xlu0 %v4941_v17, %s15534_s25 }
 0x5a6   :  { %v2488_v44 = vpop.xlane.xlu0 %2487 }
 0x5aa   :  { %v2564_v41 = vpop.xlane.xlu0 %2563 }
 0x5ac   :  { %v2482_v50 = vpop.xlane.xlu1 %2481 }
 0x5ad   :  { %v2489_v7 = vadd.f32 %v2482_v50, %v12098_v42 }
 0x5ae   :  { %v12270_v29 = vpop.xlane.xlu0 %2706 }
 0x5af   :  { %v2490_v3 = vadd.f32 %v2489_v7, %v12159_v56 }
 0x5b0   :  { %v2558_v28 = vpop.xlane.xlu1 %2557 }
 0x5b1   :  { %v2565_v27 = vadd.f32 %v2558_v28, %v12106_v52  ;;  %v2491_v26 = vadd.f32 %v2490_v3, %v2488_v44 }
 0x5b2   :  { %v12278_v42 = vpop.xlane.xlu0 %2963 }
 0x5b3   :  { %v2566_v13 = vadd.f32 %v2565_v27, %v12164_v21  ;;  %v2492_v61 = vrot.slane %v2491_v26, 4 }
 0x5b4   :  { %v3000_v8 = vpop.xlane.xlu1 %2999 }
 0x5b5   :  { %v3007_v12 = vadd.f32 %v3000_v8, %v12153_v63  ;;  %v2567_v30 = vadd.f32 %v2566_v13, %v2564_v41  ;;  %v2493_v56 = vadd.f32 %v2492_v61, %v2491_v26 }
 0x5b7   :  { %v3008_v32 = vadd.f32 %v3007_v12, %v3003_v5  ;;  %v2568_v39 = vrot.slane %v2567_v30, 4  ;;  %v2494_v55 = vrot.slane %v2493_v56, 2 }
 0x5b8   :  { %v12273_v22 = vpop.xlane.xlu1 %2742 }
 0x5b9   :  { %v3009_v38 = vadd.f32 %v3008_v32, %v12168_v15  ;;  %v2569_v21 = vadd.f32 %v2568_v39, %v2567_v30  ;;  %v2495_v7 = vadd.f32 %v2494_v55, %v2493_v56 }
 0x5bb   :  { %v3010_v50 = vrot.slane %v3009_v38, 4  ;;  %v2570_v28 = vrot.slane %v2569_v21, 2  ;;  %v2496_v15 = vrot.slane %v2495_v7, 1 }
 0x5bc   :  { %v12276_v4 = vpop.xlane.xlu1 %2814 }
 0x5bd   :  { %v3011_v26 = vadd.f32 %v3010_v50, %v3009_v38  ;;  %v2571_v13 = vadd.f32 %v2570_v28, %v2569_v21 }
 0x5bf   :  { %v3012_v39 = vrot.slane %v3011_v26, 2 }
 0x5c0   :  { %v2519_v52 = vpop.xlane.xlu1 %2518 }
 0x5c1   :  { %v12280_v20 = vpop.xlane.xlu0 %2748  ;;  %v2526_v17 = vadd.f32 %v2519_v52, %v12125_v51  ;;  %v2497_v52 = vadd.f32 %v2496_v15, %v2495_v7  ;;  %v3013_v50 = vadd.f32 %v3012_v39, %v3011_v26 }
 0x5c2   :  { %s12683_s4 = spop %9288 }
 0x5c3   :  { %v2527_v3 = vadd.f32 %v2526_v17, %v12187_v19  ;;  %v12294_v28 = vmul.f32 0.0008445946, %v2497_v52  ;;  %v3014_v7 = vrot.slane %v3013_v50, 1 }
 0x5c4   :  { %v2591_v44 = vpop.xlane.xlu1 %2590 }
 0x5c5   :  { %v12284_v63 = vpop.xlane.xlu0 %2820  ;;  %v2598_v41 = vadd.f32 %v2591_v44, %v12130_v36  ;;  %v2572_v36 = vrot.slane %v2571_v13, 1  ;;  %15610 = vst [vmem:[#allocation8_spill] sm:$0xff] %v12294_v28 }
 0x5c7   :  { %v2599_v51 = vadd.f32 %v2598_v41, %v12189_v25 }
 0x5c8   :  { %v12287_v5 = vpop.xlane.xlu1 %2650 }
 0x5c9   :  { %v2525_v27 = vpop.xlane.xlu0 %2524 }
 0x5ca   :  { %v2528_v8 = vadd.f32 %v2527_v3, %v2525_v27  ;;  %v2573_v3 = vadd.f32 %v2572_v36, %v2571_v13 }
 0x5cc   :  { %v2529_v12 = vrot.slane %v2528_v8, 4  ;;  %v12290_v61 = vpop.xlane.xlu1 %2907 }
 0x5cd   :  { %v2597_v30 = vpop.xlane.xlu0 %2596 }
 0x5ce   :  { %v2530_v32 = vadd.f32 %v2529_v12, %v2528_v8  ;;  %v2600_v56 = vadd.f32 %v2599_v51, %v2597_v30  ;;  %v12297_v51 = vmul.f32 0.0008445946, %v2573_v3 }
 0x5d0   :  { %v2531_v55 = vrot.slane %v2530_v32, 2  ;;  %v2601_v44 = vrot.slane %v2600_v56, 4  ;;  %v3033_v24 = vpop.xlane.xlu1 %3032  ;;  %15611 = vst [vmem:[#allocation9_spill] sm:$0xff] %v12297_v51 }
 0x5d1   :  { %v3040_v19 = vadd.f32 %v3033_v24, %v12157_v23  ;;  %v2537_v23 = vmul.f32 %v12294_v28, %v12294_v28 }
 0x5d2   :  { %v2532_v17 = vadd.f32 %v2531_v55, %v2530_v32  ;;  %v2602_v38 = vadd.f32 %v2601_v44, %v2600_v56  ;;  %v3015_v56 = vadd.f32 %v3014_v7, %v3013_v50  ;;  %v6162_v7 = vld [vmem:[%s15509_s11 + $0x5] sm:$0x1] }
 0x5d3   :  { %v3041_v21 = vadd.f32 %v3040_v19, %v3036_v37 }
 0x5d4   :  { %v2533_v27 = vrot.slane %v2532_v17, 1  ;;  %v2603_v25 = vrot.slane %v2602_v38, 2  ;;  %v12303_v44 = vmul.f32 0.0008445946, %v3015_v56  ;;  %v2750_v56 = vadd.f32 %v12273_v22, %v12113_v48 }
 0x5d5   :  { %v3042_v41 = vadd.f32 %v3041_v21, %v12251_v43  ;;  %v2609_v43 = vmul.f32 %v12297_v51, %v12297_v51 }
 0x5d6   :  { %v2534_v8 = vadd.f32 %v2533_v27, %v2532_v17  ;;  %v2604_v12 = vadd.f32 %v2603_v25, %v2602_v38  ;;  %15612 = vst [vmem:[#allocation10_spill] sm:$0xff] %v12303_v44  ;;  %v3051_v21 = vmul.f32 %v12303_v44, %v12303_v44  ;;  %v2751_v48 = vadd.f32 %v2750_v56, %v12173_v46  ;;  %v2776_v56 = vpop.xlane.xlu1 %2775 }
 0x5d7   :  { %v3043_v15 = vrot.slane %v3042_v41, 4 }
 0x5d8   :  { %v2536_v30 = vmul.f32 0.0008445946, %v2534_v8  ;;  %v2605_v24 = vrot.slane %v2604_v12, 1 }
 0x5d9   :  { %v3044_v26 = vadd.f32 %v3043_v15, %v3042_v41 }
 0x5da   :  { %v2538_v37 = vsub.f32 %v2536_v30, %v2537_v23  ;;  %v2606_v32 = vadd.f32 %v2605_v24, %v2604_v12 }
 0x5db   :  { %v3045_v13 = vrot.slane %v3044_v26, 2 }
 0x5dc   :  { %v2539_v39 = vadd.f32 1e-05, %v2538_v37  ;;  %v2608_v52 = vmul.f32 0.0008445946, %v2606_v32 }
 0x5dd   :  { %v3046_v36 = vadd.f32 %v3045_v13, %v3044_v26 }
 0x5de   :  { %9486 = vrsqrt.f32 %v2539_v39  ;;  %v2610_v55 = vsub.f32 %v2608_v52, %v2609_v43 }
 0x5df   :  { %v3047_v19 = vrot.slane %v3046_v36, 1 }
 0x5e0   :  { %v2611_v17 = vadd.f32 1e-05, %v2610_v55  ;;  %v2822_v55 = vadd.f32 %v12276_v4, %v12118_v45 }
 0x5e1   :  { %v3048_v38 = vadd.f32 %v3047_v19, %v3046_v36  ;;  %v12357_v36 = vld [vmem:[%s15509_s11 + $0x4] sm:$0x1]  ;;  %v6787_v19 = vld [vmem:[%s15509_s11 + $0x6] sm:$0x1] }
 0x5e2   :  { %9488 = vrsqrt.f32 %v2611_v17 }
 0x5e3   :  { %v3050_v3 = vmul.f32 0.0008445946, %v3048_v38 }
 0x5e5   :  { %v3052_v50 = vsub.f32 %v3050_v3, %v3051_v21  ;;  %v2752_v21 = vadd.f32 %v2751_v48, %v12280_v20  ;;  %v2658_v20 = vadd.f32 %v12287_v5, %v12137_v6  ;;  %v2657_v5 = vpop.xlane.xlu0 %2656 }
 0x5e7   :  { %v3053_v27 = vadd.f32 1e-05, %v3052_v50 }
 0x5e8   :  { %v12307_v25 = vpop.eup %9486 }
 0x5e9   :  { %15613 = vst [vmem:[#allocation11_spill] sm:$0xff] %v12307_v25  ;;  %9490 = vrsqrt.f32 %v3053_v27  ;;  %v3696_v41 = vmul.f32 %v12307_v25, %v12199_v49  ;;  %v4321_v8 = vmul.f32 %v12307_v25, %v12213_v60  ;;  %v4946_v12 = vmul.f32 %v12307_v25, %v12242_v58 }
 0x5ea   :  { %v12319_v15 = vmul.f32 %v12307_v25, %v6162_v7  ;;  %v12333_v26 = vmul.f32 %v12307_v25, %v12204_v57  ;;  %v2823_v27 = vadd.f32 %v2822_v55, %v12180_v14 }
 0x5eb   :  { %3698 = vrot.lane.b32.xlu1 %v3696_v41, %s9567_s28  ;;  %v12323_v30 = vmul.f32 %v4321_v8, %v12294_v28  ;;  %v12326_v23 = vmul.f32 %v4946_v12, %v12294_v28  ;;  %v12329_v24 = vmul.f32 %v3696_v41, %v12294_v28  ;;  %v2753_v41 = vrot.slane %v2752_v21, 4 }
 0x5ec   :  { %15614 = vst [vmem:[#allocation12_spill] sm:$0xff] %v12319_v15  ;;  %15615 = vst [vmem:[#allocation13_spill] sm:$0xff] %v12333_v26  ;;  %v12335_v37 = vpop.eup %9488  ;;  %v12339_v32 = vmul.f32 %v12319_v15, %v12294_v28  ;;  %v12375_v38 = vmul.f32 %v12333_v26, %v12294_v28  ;;  %v2824_v14 = vadd.f32 %v2823_v27, %v12284_v63 }
 0x5ed   :  { %15616 = vst [vmem:[#allocation14_spill] sm:$0xff] %v12335_v37  ;;  %v4372_v13 = vmul.f32 %v12335_v37, %v12213_v60  ;;  %v4997_v39 = vmul.f32 %v12335_v37, %v12242_v58  ;;  %v12362_v22 = vmul.f32 %v12335_v37, %v12357_v36  ;;  %v12371_v17 = vmul.f32 %v12335_v37, %v12204_v57 }
 0x5ee   :  { %15617 = vst [vmem:[#allocation15_spill] sm:$0xff] %v12339_v32  ;;  %15620 = vst [vmem:[#allocation18_spill] sm:$0xff] %v12375_v38  ;;  %v12386_v4 = vmul.f32 %v12335_v37, %v6787_v19  ;;  %v2754_v48 = vadd.f32 %v2753_v41, %v2752_v21  ;;  %v2825_v55 = vrot.slane %v2824_v14, 4  ;;  %v2915_v27 = vadd.f32 %v12290_v61, %v12155_v9  ;;  %v2848_v38 = vpop.xlane.xlu1 %2847  ;;  %v2914_v41 = vpop.xlane.xlu0 %2913 }
 0x5ef   :  { %4323 = vrot.lane.b32.xlu1 %v4321_v8, %s9567_s28  ;;  %v12349_v52 = vmul.f32 %v4997_v39, %v12297_v51  ;;  %v12352_v43 = vmul.f32 %v4372_v13, %v12297_v51  ;;  %15618 = vst [vmem:[#allocation16_spill] sm:$0xff] %v12362_v22  ;;  %15619 = vst [vmem:[#allocation17_spill] sm:$0xff] %v12371_v17  ;;  %v12383_v45 = vmul.f32 %v12362_v22, %v12297_v51 }
 0x5f0   :  { %15623 = vst [vmem:[#allocation21_spill] sm:$0xff] %v12386_v4  ;;  %v12456_v26 = vmul.f32 %v12335_v37, %v12199_v49 }
 0x5f1   :  { %15622 = vst [vmem:[#allocation20_spill] sm:$0xff] %v12383_v45 }
 0x5f3   :  { %v12377_v46 = vpop.eup %9490  ;;  %4374 = vrot.lane.b32.xlu1 %v4372_v13, %s15540_s0 }
 0x5f4   :  { %15621 = vst [vmem:[#allocation19_spill] sm:$0xff] %v12377_v46  ;;  %v12390_v3 = vmul.f32 %v12377_v46, %v12194_v10  ;;  %v12393_v50 = vmul.f32 %v12377_v46, %v6162_v7  ;;  %v12407_v7 = vmul.f32 %v12386_v4, %v12297_v51  ;;  %v12412_v6 = vmul.f32 %v12377_v46, %v12199_v49 }
 0x5f5   :  { %v12416_v13 = vmul.f32 %v12377_v46, %v12204_v57  ;;  %v12424_v19 = vmul.f32 %v12377_v46, %v12213_v60  ;;  %v12432_v21 = vmul.f32 %v12377_v46, %v12242_v58 }
 0x5f6   :  { %15624 = vst [vmem:[#allocation22_spill] sm:$0xff] %v12393_v50  ;;  %3421 = vrot.lane.b32.xlu0 %v12390_v3, %s15542_s3  ;;  %v12403_v8 = vmul.f32 %v12393_v50, %v12303_v44  ;;  %15626 = vst [vmem:[#allocation24_spill] sm:$0xff] %v12407_v7 }
 0x5f7   :  { %4948 = vrot.lane.b32.xlu1 %v4946_v12, %s9567_s28  ;;  %15627 = vst [vmem:[#allocation25_spill] sm:$0xff] %v12416_v13  ;;  %v2659_v12 = vadd.f32 %v2658_v20, %v12208_v53  ;;  %v2755_v53 = vrot.slane %v2754_v48, 2  ;;  %v2826_v20 = vadd.f32 %v2825_v55, %v2824_v14  ;;  %v2704_v13 = vpop.xlane.xlu1 %2703  ;;  %v12440_v14 = vmul.f32 %v12307_v25, %v12194_v10 }
 0x5f8   :  { %15625 = vst [vmem:[#allocation23_spill] sm:$0xff] %v12403_v8  ;;  %v2855_v55 = vadd.f32 %v2848_v38, %v12146_v0 }
 0x5f9   :  { %v2660_v63 = vadd.f32 %v2659_v12, %v2657_v5  ;;  %v2916_v5 = vadd.f32 %v2915_v27, %v12237_v59  ;;  %v2756_v9 = vadd.f32 %v2755_v53, %v2754_v48  ;;  %v2827_v61 = vrot.slane %v2826_v20, 2 }
 0x5fa   :  { %4034 = vrot.lane.b32.xlu0 %v12412_v6, %s15542_s3  ;;  %v2856_v0 = vadd.f32 %v2855_v55, %v12262_v54 }
 0x5fb   :  { %4999 = vrot.lane.b32.xlu1 %v4997_v39, %s15540_s0  ;;  %v2661_v7 = vrot.slane %v2660_v63, 4  ;;  %v2783_v39 = vadd.f32 %v2776_v56, %v12143_v34  ;;  %v2917_v8 = vadd.f32 %v2916_v5, %v2914_v41  ;;  %v2757_v59 = vrot.slane %v2756_v9, 1  ;;  %v2961_v38 = vpop.xlane.xlu1 %2960 }
 0x5fc   :  { %v2828_v27 = vadd.f32 %v2827_v61, %v2826_v20 }
 0x5fd   :  { %v2662_v12 = vadd.f32 %v2661_v7, %v2660_v63  ;;  %v2784_v45 = vadd.f32 %v2783_v39, %v12257_v33  ;;  %v2918_v53 = vrot.slane %v2917_v8, 4  ;;  %v12448_v7 = vmul.f32 %v12335_v37, %v12194_v10 }
 0x5fe   :  { %4659 = vrot.lane.b32.xlu0 %v12424_v19, %s15542_s3  ;;  %v2711_v63 = vadd.f32 %v2704_v13, %v12150_v47  ;;  %v2758_v39 = vadd.f32 %v2757_v59, %v2756_v9  ;;  %v2829_v20 = vrot.slane %v2828_v27, 1  ;;  %v2968_v47 = vadd.f32 %v2961_v38, %v12166_v40 }
 0x5ff   :  { %v2663_v48 = vrot.slane %v2662_v12, 2 }
 0x600   :  { %v2712_v54 = vadd.f32 %v2711_v63, %v12270_v29  ;;  %v2969_v40 = vadd.f32 %v2968_v47, %v12278_v42 }
 0x601   :  { %v2664_v61 = vadd.f32 %v2663_v48, %v2662_v12 }
 0x602   :  { %5284 = vrot.lane.b32.xlu0 %v12432_v21, %s15542_s3 }
 0x603   :  { %v2665_v12 = vrot.slane %v2664_v61, 1 }
 0x606   :  { %v2782_v34 = vpop.xlane.xlu0 %2781  ;;  %3075 = vrot.lane.b32.xlu0 %v12440_v14, %s9567_s28 }
 0x607   :  { %v2785_v56 = vadd.f32 %v2784_v45, %v2782_v34  ;;  %v2919_v34 = vadd.f32 %v2918_v53, %v2917_v8  ;;  %v2830_v8 = vadd.f32 %v2829_v20, %v2828_v27 }
 0x609   :  { %v2786_v41 = vrot.slane %v2785_v56, 4  ;;  %v2920_v48 = vrot.slane %v2919_v34, 2  ;;  %v12465_v17 = vmul.f32 0.0008445946, %v2830_v8 }
 0x60a   :  { %v2854_v33 = vpop.xlane.xlu0 %2853  ;;  %3126 = vrot.lane.b32.xlu0 %v12448_v7, %s15540_s0 }
 0x60b   :  { %v2787_v5 = vadd.f32 %v2786_v41, %v2785_v56  ;;  %v2857_v45 = vadd.f32 %v2856_v0, %v2854_v33  ;;  %v12462_v41 = vmul.f32 0.0008445946, %v2758_v39  ;;  %15629 = vst [vmem:[#allocation27_spill] sm:$0xff] %v12465_v17 }
 0x60d   :  { %v2788_v13 = vrot.slane %v2787_v5, 2  ;;  %v2858_v32 = vrot.slane %v2857_v45, 4  ;;  %15628 = vst [vmem:[#allocation26_spill] sm:$0xff] %v12462_v41  ;;  %v2794_v39 = vmul.f32 %v12462_v41, %v12462_v41 }
 0x60e   :  { %v2710_v55 = vpop.xlane.xlu0 %2709  ;;  %3731 = vrot.lane.b32.xlu0 %v12456_v26, %s15540_s0 }
 0x60f   :  { %v2789_v9 = vadd.f32 %v2788_v13, %v2787_v5  ;;  %v2859_v59 = vadd.f32 %v2858_v32, %v2857_v45  ;;  %v2713_v56 = vadd.f32 %v2712_v54, %v2710_v55  ;;  %v2666_v5 = vadd.f32 %v2665_v12, %v2664_v61 }
 0x610   :  { %v2921_v32 = vadd.f32 %v2920_v48, %v2919_v34 }
 0x611   :  { %v2790_v53 = vrot.slane %v2789_v9, 1  ;;  %v2860_v0 = vrot.slane %v2859_v59, 2  ;;  %v2714_v33 = vrot.slane %v2713_v56, 4  ;;  %v12469_v47 = vmul.f32 0.0008445946, %v2666_v5 }
 0x612   :  { %v2967_v38 = vpop.xlane.xlu0 %2966 }
 0x613   :  { %v2791_v4 = vadd.f32 %v2790_v53, %v2789_v9  ;;  %v2861_v29 = vadd.f32 %v2860_v0, %v2859_v59  ;;  %v2715_v63 = vadd.f32 %v2714_v33, %v2713_v56  ;;  %v2970_v50 = vadd.f32 %v2969_v40, %v2967_v38  ;;  %15630 = vst [vmem:[#allocation28_spill] sm:$0xff] %v12469_v47 }
 0x614   :  { %v2922_v9 = vrot.slane %v2921_v32, 1  ;;  %v2866_v59 = vmul.f32 %v12465_v17, %v12465_v17 }
 0x615   :  { %v2793_v27 = vmul.f32 0.0008445946, %v2791_v4  ;;  %v2862_v45 = vrot.slane %v2861_v29, 1  ;;  %v2716_v20 = vrot.slane %v2715_v63, 2  ;;  %v2971_v13 = vrot.slane %v2970_v50, 4 }
 0x616   :  { %v2923_v53 = vadd.f32 %v2922_v9, %v2921_v32 }
 0x617   :  { %v2795_v54 = vsub.f32 %v2793_v27, %v2794_v39  ;;  %v2863_v55 = vadd.f32 %v2862_v45, %v2861_v29  ;;  %v2717_v15 = vadd.f32 %v2716_v20, %v2715_v63  ;;  %v2972_v42 = vadd.f32 %v2971_v13, %v2970_v50 }
 0x618   :  { %v2722_v50 = vmul.f32 %v12469_v47, %v12469_v47  ;;  %v12475_v63 = vmul.f32 0.0008445946, %v2923_v53 }
 0x619   :  { %v2796_v56 = vadd.f32 1e-05, %v2795_v54  ;;  %v2865_v61 = vmul.f32 0.0008445946, %v2863_v55  ;;  %v2718_v34 = vrot.slane %v2717_v15, 1  ;;  %v2973_v8 = vrot.slane %v2972_v42, 2 }
 0x61a   :  { %15631 = vst [vmem:[#allocation29_spill] sm:$0xff] %v12475_v63  ;;  %v2979_v27 = vmul.f32 %v12475_v63, %v12475_v63  ;;  %v3450_v54 = vmul.f32 %v12390_v3, %v12303_v44 }
 0x61b   :  { %9492 = vrsqrt.f32 %v2796_v56  ;;  %v2867_v12 = vsub.f32 %v2865_v61, %v2866_v59  ;;  %v2719_v4 = vadd.f32 %v2718_v34, %v2717_v15  ;;  %v2974_v48 = vadd.f32 %v2973_v8, %v2972_v42 }
 0x61c   :  { %v4063_v59 = vmul.f32 %v12412_v6, %v12303_v44  ;;  %v3458_v3 = vrot.slane %v3450_v54, %v12228_v35  ;;  %v4688_v34 = vmul.f32 %v12424_v19, %v12303_v44  ;;  %v3760_v54 = vmul.f32 %v12456_v26, %v12297_v51 }
 0x61d   :  { %v2868_v0 = vadd.f32 1e-05, %v2867_v12  ;;  %v2721_v33 = vmul.f32 0.0008445946, %v2719_v4  ;;  %v2975_v40 = vrot.slane %v2974_v48, 1  ;;  %v5313_v4 = vmul.f32 %v12432_v21, %v12303_v44 }
 0x61e   :  { %v3465_v8 = vrot.slane %v3458_v3, %v12228_v35  ;;  %v4071_v12 = vrot.slane %v4063_v59, %v12228_v35  ;;  %v4696_v19 = vrot.slane %v4688_v34, %v12228_v35  ;;  %v3768_v26 = vrot.slane %v3760_v54, %v12228_v35  ;;  %v12596_v54 = vpop.permute.xlu0 %3692 }
 0x61f   :  { %9494 = vrsqrt.f32 %v2868_v0  ;;  %v2723_v38 = vsub.f32 %v2721_v33, %v2722_v50  ;;  %v2976_v29 = vadd.f32 %v2975_v40, %v2974_v48  ;;  %v3104_v33 = vmul.f32 %v12440_v14, %v12294_v28 }
 0x620   :  { %v4078_v53 = vrot.slane %v4071_v12, %v12228_v35  ;;  %v4703_v50 = vrot.slane %v4696_v19, %v12228_v35  ;;  %v5321_v40 = vrot.slane %v5313_v4, %v12228_v35  ;;  %v3775_v12 = vrot.slane %v3768_v26, %v12228_v35 }
 0x621   :  { %v2724_v5 = vadd.f32 1e-05, %v2723_v38  ;;  %v2978_v39 = vmul.f32 0.0008445946, %v2976_v29  ;;  %v3112_v29 = vrot.slane %v3104_v33, %v12228_v35 }
 0x623   :  { %9496 = vrsqrt.f32 %v2724_v5  ;;  %v2980_v32 = vsub.f32 %v2978_v39, %v2979_v27  ;;  %v3155_v5 = vmul.f32 %v12448_v7, %v12297_v51  ;;  %v5328_v27 = vrot.slane %v5321_v40, %v12228_v35 }
 0x624   :  { %v3119_v7 = vrot.slane %v3112_v29, %v12228_v35 }
 0x625   :  { %v12479_v15 = vpop.eup %9492  ;;  %v2981_v55 = vadd.f32 1e-05, %v2980_v32  ;;  %v3163_v59 = vrot.slane %v3155_v5, %v12228_v35 }
 0x626   :  { %15632 = vst [vmem:[#allocation30_spill] sm:$0xff] %v12479_v15  ;;  %v3246_v45 = vmul.f32 %v12479_v15, %v12194_v10  ;;  %v12485_v20 = vmul.f32 %v12479_v15, %v12204_v57  ;;  %v3855_v56 = vmul.f32 %v12479_v15, %v12199_v49  ;;  %v4480_v48 = vmul.f32 %v12479_v15, %v12213_v60 }
 0x627   :  { %9498 = vrsqrt.f32 %v2981_v55  ;;  %v5105_v39 = vmul.f32 %v12479_v15, %v12242_v58  ;;  %v3170_v3 = vrot.slane %v3163_v59, %v12228_v35 }
 0x628   :  { %15633 = vst [vmem:[#allocation31_spill] sm:$0xff] %v12485_v20  ;;  %3248 = vrot.lane.b32.xlu0 %v3246_v45, %s15538_s19  ;;  %v4511_v29 = vmul.f32 %v4480_v48, %v12462_v41 }
 0x629   :  { %v12488_v13 = vpop.eup %9494  ;;  %v5136_v26 = vmul.f32 %v5105_v39, %v12462_v41 }
 0x62a   :  { %15634 = vst [vmem:[#allocation32_spill] sm:$0xff] %v12488_v13  ;;  %v3297_v42 = vmul.f32 %v12488_v13, %v12194_v10  ;;  %v3906_v6 = vmul.f32 %v12488_v13, %v12199_v49  ;;  %v4531_v21 = vmul.f32 %v12488_v13, %v12213_v60  ;;  %v12551_v32 = vmul.f32 %v12488_v13, %v12204_v57 }
 0x62b   :  { %v5156_v55 = vmul.f32 %v12488_v13, %v12242_v58  ;;  %v4519_v59 = vrot.slane %v4511_v29, %v12228_v35 }
 0x62c   :  { %3299 = vrot.lane.b32.xlu0 %v3297_v42, %s9571_s20  ;;  %15639 = vst [vmem:[#allocation37_spill] sm:$0xff] %v12551_v32 }
 0x62d   :  { %v12495_v9 = vpop.eup %9496 }
 0x62e   :  { %15635 = vst [vmem:[#allocation33_spill] sm:$0xff] %v12495_v9  ;;  %v12503_v61 = vmul.f32 %v12495_v9, %v12242_v58  ;;  %v12542_v14 = vmul.f32 %v12495_v9, %v12204_v57  ;;  %v3175_v34 = vmul.f32 %v12495_v9, %v12194_v10  ;;  %v3780_v33 = vmul.f32 %v12495_v9, %v12199_v49 }
 0x630   :  { %3857 = vrot.lane.b32.xlu0 %v3855_v56, %s15538_s19  ;;  %5054 = vrot.lane.b32.xlu1 %v12503_v61, %s9560_s16  ;;  %15638 = vst [vmem:[#allocation36_spill] sm:$0xff] %v12542_v14 }
 0x631   :  { %v12523_v0 = vpop.eup %9498 }
 0x632   :  { %15636 = vst [vmem:[#allocation34_spill] sm:$0xff] %v12523_v0  ;;  %v12535_v38 = vmul.f32 %v12523_v0, %v12204_v57  ;;  %v3277_v57 = vmul.f32 %v3246_v45, %v12462_v41  ;;  %v3348_v4 = vmul.f32 %v12523_v0, %v12194_v10  ;;  %v3937_v10 = vmul.f32 %v3906_v6, %v12465_v17 }
 0x633   :  { %v3957_v40 = vmul.f32 %v12523_v0, %v12199_v49  ;;  %v4562_v49 = vmul.f32 %v4531_v21, %v12465_v17 }
 0x634   :  { %3908 = vrot.lane.b32.xlu0 %v3906_v6, %s9571_s20  ;;  %3466 = vrot.lane.b32.xlu1 %v3465_v8, %s15542_s3  ;;  %15637 = vst [vmem:[#allocation35_spill] sm:$0xff] %v12535_v38  ;;  %v3328_v8 = vmul.f32 %v3297_v42, %v12465_v17  ;;  %v3285_v45 = vrot.slane %v3277_v57, %v12228_v35 }
 0x635   :  { %v3945_v6 = vrot.slane %v3937_v10, %v12228_v35  ;;  %v4360_v57 = vrot.slane %v12323_v30, %v12228_v35  ;;  %v5187_v30 = vmul.f32 %v5156_v55, %v12465_v17  ;;  %v5036_v10 = vrot.slane %v12349_v52, %v12228_v35 }
 0x636   :  { %v3292_v19 = vrot.slane %v3285_v45, %v12228_v35  ;;  %v3336_v42 = vrot.slane %v3328_v8, %v12228_v35  ;;  %v5207_v8 = vmul.f32 %v12523_v0, %v12242_v58  ;;  %v3835_v52 = vmul.f32 %v3780_v33, %v12469_v47 }
 0x638   :  { %4482 = vrot.lane.b32.xlu0 %v4480_v48, %s15538_s19  ;;  %4079 = vrot.lane.b32.xlu1 %v4078_v53, %s15536_s8  ;;  %v3886_v53 = vmul.f32 %v3855_v56, %v12462_v41  ;;  %v4582_v48 = vmul.f32 %v12523_v0, %v12213_v60 }
 0x63a   :  { %v3894_v56 = vrot.slane %v3886_v53, %v12228_v35  ;;  %v5144_v53 = vrot.slane %v5136_v26, %v12228_v35  ;;  %v3843_v26 = vrot.slane %v3835_v52, %v12228_v35 }
 0x63c   :  { %4533 = vrot.lane.b32.xlu0 %v4531_v21, %s9571_s20  ;;  %4704 = vrot.lane.b32.xlu1 %v4703_v50, %s9571_s20  ;;  %v3343_v50 = vrot.slane %v3336_v42, %v12228_v35  ;;  %v3901_v5 = vrot.slane %v3894_v56, %v12228_v35  ;;  %v4526_v21 = vrot.slane %v4519_v59, %v12228_v35 }
 0x63d   :  { %v3226_v42 = vmul.f32 %v3175_v34, %v12469_v47  ;;  %v3399_v56 = vmul.f32 %v3348_v4, %v12475_v63 }
 0x640   :  { %5107 = vrot.lane.b32.xlu0 %v5105_v39, %s15538_s19  ;;  %5329 = vrot.lane.b32.xlu1 %v5328_v27, %s15538_s19  ;;  %v4405_v27 = vmul.f32 %v12495_v9, %v12213_v60  ;;  %v4570_v60 = vrot.slane %v4562_v49, %v12228_v35  ;;  %v4367_v39 = vrot.slane %v4360_v57, %v12228_v35  ;;  %v3065_v9 = vstv %s12683_s4 }
 0x642   :  { %v4577_v45 = vrot.slane %v4570_v60, %v12228_v35  ;;  %v3850_v60 = vrot.slane %v3843_v26, %v12228_v35 }
 0x644   :  { %5158 = vrot.lane.b32.xlu0 %v5156_v55, %s9571_s20  ;;  %3120 = vrot.lane.b32.xlu1 %v3119_v7, %s9567_s28  ;;  %v3952_v7 = vrot.slane %v3945_v6, %v12228_v35  ;;  %v5195_v55 = vrot.slane %v5187_v30, %v12228_v35 }
 0x646   :  { %v5202_v29 = vrot.slane %v5195_v55, %v12228_v35 }
 0x648   :  { %3171 = vrot.lane.b32.xlu1 %v3170_v3, %s15540_s0  ;;  %3177 = vrot.lane.b32.xlu0 %v3175_v34, %s9560_s16  ;;  %v12609_v3 = vpop.permute.xlu0 %4317  ;;  %v3234_v34 = vrot.slane %v3226_v42, %v12228_v35 }
 0x64a   :  { %v3241_v49 = vrot.slane %v3234_v34, %v12228_v35 }
 0x64c   :  { %3776 = vrot.lane.b32.xlu1 %v3775_v12, %s9567_s28  ;;  %3350 = vrot.lane.b32.xlu0 %v3348_v4, %s15536_s8  ;;  %v4985_v12 = vrot.slane %v12326_v23, %v12228_v35  ;;  %v5151_v23 = vrot.slane %v5144_v53, %v12228_v35  ;;  %v4012_v4 = vmul.f32 %v3957_v40, %v12475_v63  ;;  %v9573_v53 = vmov 1  }
 0x64d   :  { %9451 = vset.pattern.permute.xlu0 %v9573_v53 }
 0x64e   :  { %v4992_v58 = vrot.slane %v4985_v12, %v12228_v35  ;;  %v4020_v12 = vrot.slane %v4012_v4, %v12228_v35 }
 0x650   :  { %3293 = vrot.lane.b32.xlu1 %v3292_v19, %s15538_s19  ;;  %3786 = vrot.lane.b32.xlu0 %v3780_v33, %s9560_s16  ;;  %v12624_v19 = vpop.permute.xlu0 %4942  ;;  %v4460_v33 = vmul.f32 %v4405_v27, %v12469_v47 }
 0x654   :  { %3344 = vrot.lane.b32.xlu1 %v3343_v50, %s9571_s20  ;;  %3963 = vrot.lane.b32.xlu0 %v3957_v40, %s15536_s8  ;;  %v4637_v40 = vmul.f32 %v4582_v48, %v12475_v63 }
 0x658   :  { %3902 = vrot.lane.b32.xlu1 %v3901_v5, %s9560_s16  ;;  %4411 = vrot.lane.b32.xlu0 %v4405_v27, %s9560_s16  ;;  %v5043_v5 = vrot.slane %v5036_v10, %v12228_v35  ;;  %v5262_v27 = vmul.f32 %v5207_v8, %v12475_v63 }
 0x65a   :  { %v5270_v55 = vrot.slane %v5262_v27, %v12228_v35 }
 0x65c   :  { %3953 = vrot.lane.b32.xlu1 %v3952_v7, %s15538_s19  ;;  %4588 = vrot.lane.b32.xlu0 %v4582_v48, %s15536_s8  ;;  %v3407_v7 = vrot.slane %v3399_v56, %v12228_v35  ;;  %v5277_v56 = vrot.slane %v5270_v55, %v12228_v35 }
 0x65d   :  { %v3699_v10 = vpop.permute.xlu1 %3698 }
 0x65e   :  { %v3414_v57 = vrot.slane %v3407_v7, %v12228_v35 }
 0x660   :  { %4527 = vrot.lane.b32.xlu1 %v4526_v21, %s15540_s0  ;;  %5213 = vrot.lane.b32.xlu0 %v5207_v8, %s15536_s8 }
 0x664   :  { %4578 = vrot.lane.b32.xlu1 %v4577_v45, %s9560_s16  ;;  %4368 = vrot.lane.b32.xlu0 %v4367_v39, %s15532_s24  ;;  %v4027_v45 = vrot.slane %v4020_v12, %v12228_v35  ;;  %v4468_v39 = vrot.slane %v4460_v33, %v12228_v35 }
 0x666   :  { %v4475_v42 = vrot.slane %v4468_v39, %v12228_v35 }
 0x668   :  { %v12634_v50 = vpop.permute.xlu0 %3421  ;;  %5152 = vrot.lane.b32.xlu1 %v5151_v23, %s9567_s28  ;;  %4993 = vrot.lane.b32.xlu0 %v4992_v58, %s15530_s1  ;;  %v4645_v23 = vrot.slane %v4637_v40, %v12228_v35  ;;  %v12689_v40 = vld [vmem:[#allocation2] sm:$0xff] }
 0x66a   :  { %v4652_v48 = vrot.slane %v4645_v23, %v12228_v35 }
 0x66c   :  { %v12642_v6 = vpop.permute.xlu0 %4034  ;;  %5203 = vrot.lane.b32.xlu1 %v5202_v29, %s15540_s0  ;;  %5044 = vrot.lane.b32.xlu0 %v5043_v5, %s15532_s24  ;;  %v4324_v29 = vpop.permute.xlu1 %4323 }
 0x670   :  { %v12649_v59 = vpop.permute.xlu0 %4659  ;;  %3242 = vrot.lane.b32.xlu1 %v3241_v49, %s9560_s16  ;;  %v4375_v5 = vpop.permute.xlu1 %4374 }
 0x674   :  { %v12655_v21 = vpop.permute.xlu0 %5284  ;;  %3415 = vrot.lane.b32.xlu1 %v3414_v57, %s15536_s8  ;;  %v12675_v34 = vpop.permute.xlu1 %4948 }
 0x678   :  { %v3076_v30 = vpop.permute.xlu0 %3075  ;;  %3851 = vrot.lane.b32.xlu1 %v3850_v60, %s15540_s0  ;;  %v12677_v49 = vpop.permute.xlu1 %4999 }
 0x679   :  { %9290 = vpush %v3076_v30 }
 0x67c   :  { %v3127_v58 = vpop.permute.xlu0 %3126  ;;  %4028 = vrot.lane.b32.xlu1 %v4027_v45, %s9571_s20 }
 0x67d   :  { %9292 = vpush %v3127_v58  ;;  %v12696_v58 = vld [vmem:[#allocation2 + $0x18] sm:$0xff] }
 0x680   :  { %4476 = vrot.lane.b32.xlu1 %v4475_v42, %s9567_s28  ;;  %v3732_v8 = vpop.permute.xlu0 %3731 }
 0x684   :  { %4653 = vrot.lane.b32.xlu1 %v4652_v48, %s15538_s19  ;;  %v12703_v48 = vld [vmem:[#allocation2 + $0x30] sm:$0xff] }
 0x688   :  { %5278 = vrot.lane.b32.xlu1 %v5277_v56, %s9560_s16 }
 0x69a   :  { %v3249_v52 = vpop.permute.xlu0 %3248 }
 0x69e   :  { %v3300_v7 = vpop.permute.xlu0 %3299 }
 0x6a2   :  { %v3858_v4 = vpop.permute.xlu0 %3857  ;;  %v12679_v57 = vpop.permute.xlu1 %5054 }
 0x6a6   :  { %v3909_v26 = vpop.permute.xlu0 %3908  ;;  %v12681_v33 = vpop.permute.xlu1 %3466 }
 0x6aa   :  { %s9291_s21 = spop %9290  ;;  %v4483_v60 = vpop.permute.xlu0 %4482  ;;  %v12685_v12 = vpop.permute.xlu1 %4079 }
 0x6ab   :  { %v12687_v30 = vstv %s9291_s21 }
 0x6ac   :  { %v3080_v45 = vmul.f32 %v12689_v40, %v12687_v30  ;;  %v3081_v27 = vmul.f32 %v12696_v58, %v12687_v30  ;;  %v3082_v55 = vmul.f32 %v12703_v48, %v12687_v30 }
 0x6ae   :  { %v4534_v39 = vpop.permute.xlu0 %4533  ;;  %3088 = vrot.lane.b32.xlu1 %v3080_v45, %s9556_s9  ;;  %v12694_v53 = vpop.permute.xlu1 %4704  ;;  %s9293_s22 = spop %9292 }
 0x6af   :  { %v12707_v56 = vstv %s9293_s22 }
 0x6b0   :  { %v3131_v17 = vmul.f32 %v12689_v40, %v12707_v56  ;;  %v3133_v63 = vmul.f32 %v12703_v48, %v12707_v56 }
 0x6b2   :  { %v5108_v42 = vpop.permute.xlu0 %5107  ;;  %3090 = vrot.lane.b32.xlu1 %v3081_v27, %s9556_s9  ;;  %v12701_v23 = vpop.permute.xlu1 %5329 }
 0x6b6   :  { %v5159_v45 = vpop.permute.xlu0 %5158  ;;  %3092 = vrot.lane.b32.xlu1 %v3082_v55, %s9556_s9  ;;  %v3121_v44 = vpop.permute.xlu1 %3120 }
 0x6ba   :  { %v3178_v32 = vpop.permute.xlu0 %3177  ;;  %3139 = vrot.lane.b32.xlu1 %v3131_v17, %s9558_s7  ;;  %v12713_v27 = vpop.permute.xlu1 %3171 }
 0x6bb   :  { %9294 = vpush %v3178_v32 }
 0x6bc   :  { %9296 = vpush %v3249_v52 }
 0x6bd   :  { %9298 = vpush %v3300_v7 }
 0x6be   :  { %v3351_v14 = vpop.permute.xlu0 %3350  ;;  %3143 = vrot.lane.b32.xlu1 %v3133_v63, %s9558_s7  ;;  %v3777_v41 = vpop.permute.xlu1 %3776 }
 0x6bf   :  { %9300 = vpush %v3351_v14 }
 0x6c0   :  { %9302 = vpush %v12634_v50 }
 0x6c1   :  { %9304 = vpush %v12221_v18 }
 0x6c2   :  { %9306 = vpush %v3699_v10  ;;  %v3787_v55 = vpop.permute.xlu0 %3786  ;;  %v12720_v17 = vpop.permute.xlu1 %3293 }
 0x6c3   :  { %9308 = vpush %v3732_v8  ;;  %v3060_v8 = vld [vmem:[%s15510_s12] sm:$0x1] }
 0x6c4   :  { %9310 = vpush %v3787_v55 }
 0x6c5   :  { %9312 = vpush %v3858_v4 }
 0x6c6   :  { %9314 = vpush %v3909_v26  ;;  %v3964_v32 = vpop.permute.xlu0 %3963  ;;  %v3345_v52 = vpop.permute.xlu1 %3344 }
 0x6c7   :  { %9316 = vpush %v3964_v32 }
 0x6c8   :  { %9318 = vpush %v12642_v6 }
 0x6c9   :  { %9320 = vpush %v12235_v2 }
 0x6ca   :  { %9322 = vpush %v4324_v29  ;;  %v4412_v63 = vpop.permute.xlu0 %4411  ;;  %v3903_v14 = vpop.permute.xlu1 %3902  ;;  %v12733_v29 = vmul.f32 %v12206_v16, %v12357_v36 }
 0x6cb   :  { %9324 = vpush %v4375_v5 }
 0x6cc   :  { %9326 = vpush %v4412_v63  ;;  %15640 = vst [vmem:[#allocation38_spill] sm:$0xff] %v12733_v29 }
 0x6cd   :  { %9328 = vpush %v4483_v60 }
 0x6ce   :  { %9330 = vpush %v4534_v39  ;;  %v4589_v18 = vpop.permute.xlu0 %4588  ;;  %v3954_v50 = vpop.permute.xlu1 %3953 }
 0x6cf   :  { %9332 = vpush %v4589_v18 }
 0x6d0   :  { %9334 = vpush %v12649_v59  ;;  %v3071_v59 = vmul.f32 %v12217_v62, %v12171_v31 }
 0x6d1   :  { %9336 = vpush %v12249_v1 }
 0x6d2   :  { %9338 = vpush %v12675_v34  ;;  %v12727_v10 = vpop.permute.xlu1 %4527  ;;  %v5214_v2 = vpop.permute.xlu0 %5213  ;;  %v3661_v34 = vld [vmem:[%s15510_s12] sm:$0x1] }
 0x6d3   :  { %9340 = vpush %v12677_v49  ;;  %v3072_v49 = vsub.f32 %v3060_v8, %v3071_v59 }
 0x6d4   :  { %9342 = vpush %v12679_v57 }
 0x6d5   :  { %9344 = vpush %v5108_v42  ;;  %v3123_v4 = vsub.f32 %v3072_v49, %v3121_v44  ;;  %v4286_v42 = vld [vmem:[%s15510_s12] sm:$0x1] }
 0x6d6   :  { %9346 = vpush %v5159_v45  ;;  %v4579_v6 = vpop.permute.xlu1 %4578  ;;  %v4369_v36 = vpop.permute.xlu0 %4368  ;;  %v4911_v45 = vld [vmem:[%s15510_s12] sm:$0x1]  ;;  %v4320_v44 = vsub.f32 %v4286_v42, %v12609_v3  ;;  %v5103_v3 = vmul.f32 %v12503_v61, %v12469_v47 }
 0x6d7   :  { %9348 = vpush %v5214_v2  ;;  %v3174_v57 = vsub.f32 %v3123_v4, %v12713_v27 }
 0x6d8   :  { %9350 = vpush %v12655_v21  ;;  %v3695_v21 = vsub.f32 %v3661_v34, %v12596_v54  ;;  %v4945_v54 = vsub.f32 %v4911_v45, %v12624_v19  ;;  %v4371_v59 = vsub.f32 %v4320_v44, %v4369_v36 }
 0x6d9   :  { %9352 = vpush %v12733_v29 }
 0x6da   :  { %v12737_v1 = vpop.permute.xlu1 %5152  ;;  %v3728_v62 = vsub.f32 %v3695_v21, %v12329_v24  ;;  %v4994_v60 = vpop.permute.xlu0 %4993 }
 0x6db   :  { %v4996_v8 = vsub.f32 %v4945_v54, %v4994_v60  ;;  %v9525_v54 = vld [vmem:[#allocation2 + $0x8] sm:$0xff] }
 0x6dc   :  { %v3779_v55 = vsub.f32 %v3728_v62, %v3777_v41 }
 0x6de   :  { %v5204_v5 = vpop.permute.xlu1 %5203  ;;  %v5045_v24 = vpop.permute.xlu0 %5044 }
 0x6df   :  { %v5047_v41 = vsub.f32 %v4996_v8, %v5045_v24  ;;  %v9575_v24 = vmov 2  }
 0x6e1   :  { %v5104_v4 = vsub.f32 %v5047_v41, %v5103_v3  ;;  %v3132_v3 = vmul.f32 %v12696_v58, %v12707_v56 }
 0x6e2   :  { %v3243_v7 = vpop.permute.xlu1 %3242 }
 0x6e3   :  { %v3245_v39 = vsub.f32 %v3174_v57, %v3243_v7 }
 0x6e5   :  { %v3296_v27 = vsub.f32 %v3245_v39, %v12720_v17  ;;  %v4404_v17 = vsub.f32 %v4371_v59, %v12352_v43  ;;  %v5155_v39 = vsub.f32 %v5104_v4, %v12737_v1  ;;  %v12854_v4 = vld [vmem:[#allocation2] sm:$0xff] }
 0x6e6   :  { %v3416_v26 = vpop.permute.xlu1 %3415 }
 0x6e7   :  { %v3347_v7 = vsub.f32 %v3296_v27, %v3345_v52 }
 0x6e9   :  { %v3418_v57 = vsub.f32 %v3347_v7, %v3416_v26 }
 0x6ea   :  { %v3852_v32 = vpop.permute.xlu1 %3851 }
 0x6eb   :  { %v3854_v63 = vsub.f32 %v3779_v55, %v3852_v32  ;;  %v3469_v26 = vsub.f32 %v3418_v57, %v12681_v33  ;;  %v12786_v55 = vld [vmem:[#allocation2 + $0x48] sm:$0xff]  ;;  %v5206_v32 = vsub.f32 %v5155_v39, %v5204_v5  ;;  %v9574_v33 = vmov 0   ;;  %v12856_v57 = vld [vmem:[#allocation2 + $0x18] sm:$0xff] }
 0x6ec   :  { %s9295_s21 = spop %9294  ;;  %v3083_v41 = vmul.f32 %v12786_v55, %v12687_v30 }
 0x6ed   :  { %v3905_v18 = vsub.f32 %v3854_v63, %v3903_v14  ;;  %v12759_v2 = vstv %s9295_s21  ;;  %s9297_s22 = spop %9296  ;;  %v3474_v1 = vrot.slane %v3469_v26, %v10240_v11 }
 0x6ee   :  { %v4029_v34 = vpop.permute.xlu1 %4028  ;;  %v3182_v49 = vmul.f32 %v12689_v40, %v12759_v2  ;;  %v3184_v36 = vmul.f32 %v12696_v58, %v12759_v2  ;;  %s12771_s23 = spop %9298  ;;  %v12791_v63 = vstv %s9297_s22 }
 0x6ef   :  { %v3956_v21 = vsub.f32 %v3905_v18, %v3954_v50  ;;  %v3186_v50 = vmul.f32 %v12703_v48, %v12759_v2  ;;  %v3253_v5 = vmul.f32 %v9525_v54, %v12791_v63  ;;  %v12807_v18 = vld [vmem:[#allocation2 + $0x38] sm:$0xff]  ;;  %v12814_v8 = vstv %s12771_s23 }
 0x6f0   :  { %3198 = vrot.lane.b32.xlu1 %v3182_v49, %s9557_s15  ;;  %s12774_s6 = spop %9300  ;;  %v3255_v59 = vmul.f32 %v12807_v18, %v12791_v63  ;;  %v9576_v49 = vmov 3   ;;  %v3306_v7 = vmul.f32 %v12807_v18, %v12814_v8 }
 0x6f1   :  { %v4031_v19 = vsub.f32 %v3956_v21, %v4029_v34  ;;  %s12781_s26 = spop %9302  ;;  %v3304_v34 = vmul.f32 %v9525_v54, %v12814_v8  ;;  %v12831_v21 = vstv %s12774_s6 }
 0x6f2   :  { %v4477_v14 = vpop.permute.xlu1 %4476  ;;  %s12784_s27 = spop %9304  ;;  %v3355_v30 = vmul.f32 %v9525_v54, %v12831_v21  ;;  %v3359_v39 = vmul.f32 %v12807_v18, %v12831_v21 }
 0x6f3   :  { %v4082_v62 = vsub.f32 %v4031_v19, %v12685_v12  ;;  %v4479_v60 = vsub.f32 %v4404_v17, %v4477_v14  ;;  %s12793_s29 = spop %9306  ;;  %v3134_v19 = vmul.f32 %v12786_v55, %v12707_v56  ;;  %v3670_v17 = vstv %s12784_s27  ;;  %v9527_v14 = vld [vmem:[#allocation2 + $0x20] sm:$0xff] }
 0x6f4   :  { %3202 = vrot.lane.b32.xlu1 %v3184_v36, %s9557_s15  ;;  %s12797_s30 = spop %9308  ;;  %v3357_v36 = vmul.f32 %v9527_v14, %v12831_v21  ;;  %v12865_v56 = vmul.f32 %v3670_v17, %v12854_v4 }
 0x6f5   :  { %v4087_v52 = vrot.slane %v4082_v62, %v10240_v11  ;;  %v4530_v43 = vsub.f32 %v4479_v60, %v12727_v10  ;;  %v3188_v10 = vmul.f32 %v12786_v55, %v12759_v2  ;;  %s12800_s2 = spop %9310  ;;  %v12861_v62 = vld [vmem:[#allocation2 + $0x48] sm:$0xff]  ;;  %v12868_v60 = vmul.f32 %v3670_v17, %v12856_v57 }
 0x6f6   :  { %v4654_v61 = vpop.permute.xlu1 %4653  ;;  %s12802_s14 = spop %9312 }
 0x6f7   :  { %v4581_v12 = vsub.f32 %v4530_v43, %v4579_v6  ;;  %4089 = vperm.xlu0 %9451, %v4087_v52   ;;  %s12811_s21 = spop %9314  ;;  %15641 = vst [vmem:[#allocation39_spill] sm:$0xff] %v12868_v60  ;;  %v3183_v43 = vmul.f32 %v9525_v54, %v12759_v2 }
 0x6f8   :  { %3206 = vrot.lane.b32.xlu1 %v3186_v50, %s9557_s15  ;;  %s12816_s22 = spop %9316  ;;  %v12874_v50 = vld [vmem:[#allocation2 + $0x30] sm:$0xff] }
 0x6f9   :  { %v4656_v42 = vsub.f32 %v4581_v12, %v4654_v61  ;;  %s12819_s1 = spop %9318  ;;  %v12872_v61 = vmul.f32 %v3670_v17, %v12861_v62  ;;  %v12880_v26 = vmul.f32 %v3670_v17, %v12874_v50 }
 0x6fa   :  { %v5279_v45 = vpop.permute.xlu1 %5278  ;;  %s9321_s24 = spop %9320 }
 0x6fb   :  { %9452 = vset.pattern.permute.xlu0 %v9574_v33  ;;  %v4707_v6 = vsub.f32 %v4656_v42, %v12694_v53  ;;  %v5281_v44 = vsub.f32 %v5206_v32, %v5279_v45  ;;  %s12826_s23 = spop %9322  ;;  %v4295_v52 = vstv %s9321_s24  ;;  %15642 = vst [vmem:[#allocation40_spill] sm:$0xff] %v12872_v61  ;;  %15643 = vst [vmem:[#allocation41_spill] sm:$0xff] %v12880_v26  ;;  %v12891_v32 = vstv %s12781_s26 }
 0x6fc   :  { %3210 = vrot.lane.b32.xlu1 %v3188_v10, %s9557_s15  ;;  %3476 = vperm.xlu0 %9452, %v3474_v1   ;;  %s12833_s25 = spop %9324  ;;  %v12884_v42 = vmul.f32 %v4295_v52, %v12856_v57  ;;  %v3185_v45 = vmul.f32 %v9527_v14, %v12759_v2  ;;  %v12888_v10 = vmul.f32 %v4295_v52, %v12861_v62  ;;  %v9528_v1 = vld [vmem:[#allocation2 + $0x50] sm:$0xff] }
 0x6fd   :  { %v4712_v27 = vrot.slane %v4707_v6, %v10240_v11  ;;  %v5332_v53 = vsub.f32 %v5281_v44, %v12701_v23  ;;  %s12836_s8 = spop %9326  ;;  %v3361_v33 = vmul.f32 %v9528_v1, %v12831_v21  ;;  %v12896_v6 = vmul.f32 %v4295_v52, %v12854_v4 }
 0x6fe   :  { %s12841_s19 = spop %9328  ;;  %15644 = vst [vmem:[#allocation42_spill] sm:$0xff] %v12884_v42  ;;  %15645 = vst [vmem:[#allocation43_spill] sm:$0xff] %v12888_v10  ;;  %v12899_v44 = vmul.f32 %v4295_v52, %v12874_v50  ;;  %v3307_v52 = vmul.f32 %v9528_v1, %v12814_v8  ;;  %v4377_v16 = vstv %s12833_s25  ;;  %v13141_v22 = vstv %s12836_s8 }
 0x6ff   :  { %v5337_v23 = vrot.slane %v5332_v53, %v10240_v11  ;;  %s12845_s0 = spop %9330  ;;  %15646 = vst [vmem:[#allocation44_spill] sm:$0xff] %v12896_v6  ;;  %v4326_v11 = vstv %s12826_s23  ;;  %v13184_v42 = vstv %s12841_s19  ;;  %v4379_v31 = vmul.f32 %v4377_v16, %v12854_v4  ;;  %s15672_s23 = smov 121  }
 0x700   :  { %3261 = vrot.lane.b32.xlu1 %v3253_v5, %s9561_s17  ;;  %9453 = vset.pattern.permute.xlu0 %v9575_v24  ;;  %s12851_s6 = spop %9332  ;;  %15647 = vst [vmem:[#allocation45_spill] sm:$0xff] %v12899_v44  ;;  %v3187_v24 = vmul.f32 %v12807_v18, %v12759_v2  ;;  %v3254_v18 = vmul.f32 %v9527_v14, %v12791_v63  ;;  %v13203_v29 = vstv %s12845_s0 }
 0x701   :  { %4714 = vperm.xlu0 %9453, %v4712_v27   ;;  %s12858_s3 = spop %9334  ;;  %v4331_v38 = vmul.f32 %v4326_v11, %v12861_v62  ;;  %v4330_v6 = vmul.f32 %v4326_v11, %v12874_v50  ;;  %v4381_v15 = vmul.f32 %v4377_v16, %v12874_v50  ;;  %v13222_v46 = vstv %s12851_s6 }
 0x702   :  { %s9337_s27 = spop %9336 }
 0x703   :  { %v4920_v12 = vstv %s9337_s27  ;;  %s9577_s27 = smov 4  }
 0x704   :  { %3265 = vrot.lane.b32.xlu1 %v3255_v59, %s9561_s17  ;;  %v12902_v54 = vmul.f32 %v4920_v12, %v12856_v57  ;;  %v12905_v5 = vmul.f32 %v4920_v12, %v12861_v62  ;;  %v12909_v27 = vmul.f32 %v4920_v12, %v12854_v4  ;;  %v12912_v53 = vmul.f32 %v4920_v12, %v12874_v50  ;;  %v9529_v59 = vld [vmem:[#allocation2 + $0x10] sm:$0xff]  ;;  %v9531_v12 = vld [vmem:[#allocation2 + $0x28] sm:$0xff] }
 0x705   :  { %9454 = vset.pattern.permute.xlu0 %v9576_v49  ;;  %v9530_v49 = vld [vmem:[#allocation2 + $0x40] sm:$0xff] }
 0x706   :  { %5339 = vperm.xlu0 %9454, %v5337_v23   ;;  %15648 = vst [vmem:[#allocation46_spill] sm:$0xff] %v12902_v54  ;;  %15649 = vst [vmem:[#allocation47_spill] sm:$0xff] %v12905_v5  ;;  %v3426_v23 = vmul.f32 %v9529_v59, %v12891_v32  ;;  %v13154_v54 = vld [vmem:[#allocation2 + $0x58] sm:$0xff] }
 0x707   :  { %15650 = vst [vmem:[#allocation48_spill] sm:$0xff] %v12909_v27  ;;  %15651 = vst [vmem:[#allocation49_spill] sm:$0xff] %v12912_v53  ;;  %v4418_v27 = vmul.f32 %v13141_v22, %v12856_v57 }
 0x708   :  { %3312 = vrot.lane.b32.xlu1 %v3304_v34, %s9562_s18  ;;  %v3189_v34 = vmul.f32 %v9528_v1, %v12759_v2  ;;  %v3256_v2 = vmul.f32 %v9528_v1, %v12791_v63  ;;  %v3360_v1 = vmul.f32 %v9530_v49, %v12831_v21 }
 0x70a   :  { %3094 = vrot.lane.b32.xlu0 %v3083_v41, %s9556_s9  ;;  %v3428_v41 = vmul.f32 %v9530_v49, %v12891_v32 }
 0x70c   :  { %3316 = vrot.lane.b32.xlu1 %v3306_v7, %s9562_s18  ;;  %v3701_v7 = vstv %s12793_s29 }
 0x70d   :  { %v3706_v17 = vmul.f32 %v3701_v7, %v12861_v62 }
 0x70e   :  { %3141 = vrot.lane.b32.xlu0 %v3132_v3, %s9558_s7  ;;  %v3703_v3 = vmul.f32 %v3701_v7, %v12854_v4 }
 0x710   :  { %3371 = vrot.lane.b32.xlu1 %v3355_v30, %s9559_s5  ;;  %v3704_v30 = vmul.f32 %v3701_v7, %v12856_v57 }
 0x712   :  { %3145 = vrot.lane.b32.xlu0 %v3134_v19, %s9558_s7  ;;  %v3305_v19 = vmul.f32 %v9527_v14, %v12814_v8  ;;  %v3358_v8 = vmul.f32 %v9531_v12, %v12831_v21 }
 0x714   :  { %3375 = vrot.lane.b32.xlu1 %v3357_v36, %s9559_s5  ;;  %v12935_v36 = vstv %s12797_s30 }
 0x715   :  { %v3736_v63 = vmul.f32 %v12935_v36, %v12854_v4  ;;  %v3738_v14 = vmul.f32 %v12935_v36, %v12874_v50 }
 0x716   :  { %3200 = vrot.lane.b32.xlu0 %v3183_v43, %s9557_s15  ;;  %v3356_v43 = vmul.f32 %v9529_v59, %v12831_v21 }
 0x718   :  { %3379 = vrot.lane.b32.xlu1 %v3359_v39, %s9559_s5  ;;  %v12948_v39 = vstv %s12800_s2  ;;  %s15674_s2 = smov 126  }
 0x71a   :  { %3204 = vrot.lane.b32.xlu0 %v3185_v45, %s9557_s15  ;;  %v3791_v45 = vmul.f32 %v12948_v39, %v12854_v4 }
 0x71c   :  { %3383 = vrot.lane.b32.xlu1 %v3361_v33, %s9559_s5  ;;  %v3793_v33 = vmul.f32 %v12948_v39, %v12856_v57 }
 0x71e   :  { %3208 = vrot.lane.b32.xlu0 %v3187_v24, %s9557_s15  ;;  %v9532_v24 = vld [vmem:[#allocation2 + $0x58] sm:$0xff] }
 0x71f   :  { %v3362_v59 = vmul.f32 %v9532_v24, %v12831_v21  ;;  %v3797_v21 = vmul.f32 %v12948_v39, %v12861_v62 }
 0x720   :  { %3434 = vrot.lane.b32.xlu1 %v3426_v23, %s9560_s16  ;;  %v3795_v23 = vmul.f32 %v12948_v39, %v12874_v50  ;;  %v12968_v49 = vpop.permute.xlu1 %3088 }
 0x722   :  { %3212 = vrot.lane.b32.xlu0 %v3189_v34, %s9557_s15  ;;  %v3427_v34 = vmul.f32 %v9531_v12, %v12891_v32 }
 0x724   :  { %3438 = vrot.lane.b32.xlu1 %v3428_v41, %s9560_s16  ;;  %v3055_v41 = vld [vmem:[%s15511_s10] sm:$0xff] }
 0x726   :  { %3263 = vrot.lane.b32.xlu0 %v3254_v18, %s9561_s17  ;;  %v3056_v18 = vld [vmem:[%s15511_s10 + $0x8] sm:$0xff] }
 0x728   :  { %3711 = vrot.lane.b32.xlu1 %v3703_v3, %s9556_s9  ;;  %v12978_v3 = vpack.c.bf16 %v3056_v18, %v3055_v41 }
 0x72a   :  { %3267 = vrot.lane.b32.xlu0 %v3256_v2, %s9561_s17  ;;  %v12981_v2 = vstv %s12802_s14  ;;  %9163 = vmatprep.subr.bf16.mxu1 %v12978_v3  ;;  %s15676_s14 = smov 124  }
 0x72b   :  { %9165 = vmatpush3.bf16.msra.mxu1 %v12978_v3  ;;  %9219 = vmatprep.subr.bf16.mxu0 %v12978_v3 }
 0x72c   :  { %3713 = vrot.lane.b32.xlu1 %v3704_v30, %s9556_s9  ;;  %v3429_v30 = vmul.f32 %v9532_v24, %v12891_v32  ;;  %9221 = vmatpush3.bf16.msra.mxu0 %v12978_v3  ;;  %v12999_v32 = vld [vmem:[#allocation2 + $0x38] sm:$0xff] }
 0x72d   :  { %v3864_v12 = vmul.f32 %v12981_v2, %v12999_v32  ;;  %v4597_v60 = vmul.f32 %v13222_v46, %v12999_v32 }
 0x72e   :  { %3314 = vrot.lane.b32.xlu0 %v3305_v19, %s9562_s18  ;;  %v12987_v19 = vld [vmem:[#allocation2 + $0x8] sm:$0xff] }
 0x72f   :  { %v4417_v13 = vmul.f32 %v13141_v22, %v12987_v19 }
 0x730   :  { %3717 = vrot.lane.b32.xlu1 %v3706_v17, %s9556_s9  ;;  %v3862_v17 = vmul.f32 %v12981_v2, %v12987_v19 }
 0x732   :  { %3318 = vrot.lane.b32.xlu0 %v3307_v52, %s9562_s18  ;;  %v12994_v52 = vpop.permute.xlu1 %3090 }
 0x734   :  { %3744 = vrot.lane.b32.xlu1 %v3736_v63, %s9558_s7  ;;  %v3705_v63 = vmul.f32 %v3701_v7, %v12874_v50  ;;  %v13018_v7 = vld [vmem:[%s15511_s10 + $0x20] sm:$0x1f] }
 0x736   :  { %3373 = vrot.lane.b32.xlu0 %v3356_v43, %s9559_s5  ;;  %v3057_v43 = vld [vmem:[%s15511_s10 + $0x10] sm:$0xff] }
 0x738   :  { %3748 = vrot.lane.b32.xlu1 %v3738_v14, %s9558_s7  ;;  %v3058_v14 = vld [vmem:[%s15511_s10 + $0x18] sm:$0xff] }
 0x73a   :  { %3377 = vrot.lane.b32.xlu0 %v3358_v8, %s9559_s5  ;;  %v13009_v8 = vpack.c.bf16 %v3058_v14, %v3057_v43  ;;  %v3796_v43 = vmul.f32 %v12948_v39, %v12999_v32 }
 0x73c   :  { %3807 = vrot.lane.b32.xlu1 %v3791_v45, %s9557_s15  ;;  %15652 = vst [vmem:[#allocation50_spill] sm:$0xff] %v13009_v8  ;;  %v13012_v45 = vstv %s12811_s21  ;;  %9167 = vmatprep.subr.bf16.mxu1 %v13009_v8  ;;  %s9581_s21 = smov 7  }
 0x73d   :  { %9169 = vmatpush3.bf16.msra.mxu1 %v13009_v8  ;;  %9223 = vmatprep.subr.bf16.mxu0 %v13009_v8  ;;  %v3913_v24 = vmul.f32 %v13012_v45, %v12987_v19 }
 0x73e   :  { %3381 = vrot.lane.b32.xlu0 %v3360_v1, %s9559_s5  ;;  %v3737_v1 = vmul.f32 %v12935_v36, %v12856_v57  ;;  %8428 = vmatprep.subr.msk.mxu1 %vm3507_vm7, %v13018_v7 }
 0x73f   :  { %9225 = vmatpush3.bf16.msra.mxu0 %v13009_v8 }
 0x740   :  { %3811 = vrot.lane.b32.xlu1 %v3793_v33, %s9557_s15  ;;  %v13024_v33 = vpop.permute.xlu1 %3092  ;;  %8540 = vmatprep.subr.msk.mxu0 %vm3507_vm7, %v13018_v7 }
 0x741   :  { %8429 = vmatpush3.msk.msra.mxu1 %vm3507_vm7, %v13018_v7 }
 0x742   :  { %3385 = vrot.lane.b32.xlu0 %v3362_v59, %s9559_s5  ;;  %v3739_v59 = vmul.f32 %v12935_v36, %v12861_v62  ;;  %9171 = vmatprep.subr.bf16.mxu1 %v12978_v3  ;;  %v3792_v36 = vmul.f32 %v12948_v39, %v12987_v19 }
 0x743   :  { %8541 = vmatpush3.msk.msra.mxu0 %vm3507_vm7, %v13018_v7 }
 0x744   :  { %3815 = vrot.lane.b32.xlu1 %v3795_v23, %s9557_s15  ;;  %v3915_v23 = vmul.f32 %v13012_v45, %v12999_v32  ;;  %v13049_v41 = vpop.permute.xlu1 %3139 }
 0x746   :  { %3436 = vrot.lane.b32.xlu0 %v3427_v34, %s9560_s16  ;;  %v13047_v34 = vstv %s12816_s22 }
 0x747   :  { %v3968_v18 = vmul.f32 %v13047_v34, %v12987_v19 }
 0x748   :  { %3819 = vrot.lane.b32.xlu1 %v3797_v21, %s9557_s15  ;;  %v13058_v21 = vld [vmem:[#allocation2 + $0x20] sm:$0xff] }
 0x749   :  { %v4595_v25 = vmul.f32 %v13222_v46, %v13058_v21 }
 0x74a   :  { %3440 = vrot.lane.b32.xlu0 %v3429_v30, %s9560_s16  ;;  %v13061_v30 = vpop.permute.xlu1 %3143 }
 0x74c   :  { %3870 = vrot.lane.b32.xlu1 %v3862_v17, %s9561_s17  ;;  %v3794_v17 = vmul.f32 %v12948_v39, %v13058_v21 }
 0x74e   :  { %3715 = vrot.lane.b32.xlu0 %v3705_v63, %s9556_s9  ;;  %v3970_v63 = vmul.f32 %v13047_v34, %v13058_v21 }
 0x750   :  { %3874 = vrot.lane.b32.xlu1 %v3864_v12, %s9561_s17  ;;  %v3972_v12 = vmul.f32 %v13047_v34, %v12999_v32 }
 0x752   :  { %3746 = vrot.lane.b32.xlu0 %v3737_v1, %s9558_s7  ;;  %v13076_v1 = vld [vmem:[#allocation2 + $0x50] sm:$0xff] }
 0x754   :  { %3921 = vrot.lane.b32.xlu1 %v3913_v24, %s9562_s18  ;;  %v3798_v24 = vmul.f32 %v12948_v39, %v13076_v1 }
 0x756   :  { %3750 = vrot.lane.b32.xlu0 %v3739_v59, %s9558_s7 }
 0x758   :  { %3925 = vrot.lane.b32.xlu1 %v3915_v23, %s9562_s18  ;;  %v3974_v23 = vmul.f32 %v13047_v34, %v13076_v1 }
 0x75a   :  { %3809 = vrot.lane.b32.xlu0 %v3792_v36, %s9557_s15  ;;  %v4037_v36 = vstv %s12819_s1  ;;  %s9339_s1 = spop %9338 }
 0x75b   :  { %s9341_s25 = spop %9340 }
 0x75c   :  { %3984 = vrot.lane.b32.xlu1 %v3968_v18, %s9559_s5  ;;  %v3863_v18 = vmul.f32 %v12981_v2, %v13058_v21  ;;  %s9343_s0 = spop %9342 }
 0x75e   :  { %3813 = vrot.lane.b32.xlu0 %v3794_v17, %s9557_s15  ;;  %v13090_v17 = vld [vmem:[#allocation2 + $0x10] sm:$0xff] }
 0x75f   :  { %v4039_v39 = vmul.f32 %v4037_v36, %v13090_v17 }
 0x760   :  { %3988 = vrot.lane.b32.xlu1 %v3970_v63, %s9559_s5 }
 0x762   :  { %v13071_v14 = vpop.permute.xlu1 %3198  ;;  %3817 = vrot.lane.b32.xlu0 %v3796_v43, %s9557_s15  ;;  %v3865_v43 = vmul.f32 %v12981_v2, %v13076_v1  ;;  %v3916_v2 = vmul.f32 %v13012_v45, %v13076_v1 }
 0x764   :  { %3992 = vrot.lane.b32.xlu1 %v3972_v12, %s9559_s5  ;;  %v13099_v12 = vld [vmem:[#allocation2 + $0x40] sm:$0xff] }
 0x766   :  { %v13081_v59 = vpop.permute.xlu1 %3202  ;;  %3821 = vrot.lane.b32.xlu0 %v3798_v24, %s9557_s15  ;;  %v4041_v24 = vmul.f32 %v4037_v36, %v13099_v12 }
 0x768   :  { %3996 = vrot.lane.b32.xlu1 %v3974_v23, %s9559_s5 }
 0x76a   :  { %v13092_v63 = vpop.permute.xlu1 %3206  ;;  %3872 = vrot.lane.b32.xlu0 %v3863_v18, %s9561_s17  ;;  %v3914_v18 = vmul.f32 %v13012_v45, %v13058_v21  ;;  %v13130_v45 = vld [vmem:[#allocation2 + $0x28] sm:$0xff] }
 0x76c   :  { %4047 = vrot.lane.b32.xlu1 %v4039_v39, %s9560_s16  ;;  %v4329_v39 = vmul.f32 %v4326_v11, %v12856_v57 }
 0x76e   :  { %v13102_v23 = vpop.permute.xlu1 %3210  ;;  %3876 = vrot.lane.b32.xlu0 %v3865_v43, %s9561_s17 }
 0x770   :  { %4051 = vrot.lane.b32.xlu1 %v4041_v24, %s9560_s16 }
 0x772   :  { %v13110_v51 = vpop.permute.xlu1 %3261  ;;  %3923 = vrot.lane.b32.xlu0 %v3914_v18, %s9562_s18  ;;  %v3969_v18 = vmul.f32 %v13047_v34, %v13090_v17 }
 0x774   :  { %4338 = vrot.lane.b32.xlu1 %v4329_v39, %s9556_s9  ;;  %v4380_v39 = vmul.f32 %v4377_v16, %v12856_v57 }
 0x776   :  { %v13117_v43 = vpop.permute.xlu0 %4089  ;;  %v13119_v24 = vpop.permute.xlu1 %3265  ;;  %3927 = vrot.lane.b32.xlu0 %v3916_v2, %s9562_s18  ;;  %v3971_v2 = vmul.f32 %v13047_v34, %v13130_v45 }
 0x777   :  { %15653 = vst [vmem:[#allocation51_spill] sm:$0xff] %v13117_v43 }
 0x778   :  { %4342 = vrot.lane.b32.xlu1 %v4331_v38, %s9556_s9  ;;  %v4382_v38 = vmul.f32 %v4377_v16, %v12861_v62  ;;  %v4593_v16 = vmul.f32 %v13222_v46, %v12987_v19 }
 0x77a   :  { %v13127_v47 = vpop.permute.xlu1 %3312  ;;  %3986 = vrot.lane.b32.xlu0 %v3969_v18, %s9559_s5  ;;  %v3973_v18 = vmul.f32 %v13047_v34, %v13099_v12 }
 0x77b   :  { %v13132_v20 = vpop.permute.xlu0 %3476 }
 0x77c   :  { %4389 = vrot.lane.b32.xlu1 %v4380_v39, %s9558_s7  ;;  %v4416_v39 = vmul.f32 %v13141_v22, %v12854_v4 }
 0x77e   :  { %v13138_v28 = vpop.permute.xlu1 %3316  ;;  %3990 = vrot.lane.b32.xlu0 %v3971_v2, %s9559_s5  ;;  %v3975_v2 = vmul.f32 %v13047_v34, %v13154_v54  ;;  %v4420_v34 = vmul.f32 %v13141_v22, %v12874_v50 }
 0x780   :  { %4393 = vrot.lane.b32.xlu1 %v4382_v38, %s9558_s7  ;;  %v13147_v0 = vpop.permute.xlu0 %4714 }
 0x781   :  { %15654 = vst [vmem:[#allocation52_spill] sm:$0xff] %v13147_v0 }
 0x782   :  { %v13149_v5 = vpop.permute.xlu1 %3371  ;;  %3994 = vrot.lane.b32.xlu0 %v3973_v18, %s9559_s5  ;;  %v4040_v18 = vmul.f32 %v4037_v36, %v13130_v45 }
 0x784   :  { %4432 = vrot.lane.b32.xlu1 %v4416_v39, %s9557_s15 }
 0x785   :  { %v13159_v38 = vpop.permute.xlu0 %5339 }
 0x786   :  { %15655 = vst [vmem:[#allocation53_spill] sm:$0xff] %v13159_v38  ;;  %v13161_v53 = vpop.permute.xlu1 %3375  ;;  %3998 = vrot.lane.b32.xlu0 %v3975_v2, %s9559_s5  ;;  %v4042_v38 = vmul.f32 %v4037_v36, %v13154_v54 }
 0x788   :  { %4436 = vrot.lane.b32.xlu1 %v4418_v27, %s9557_s15  ;;  %v4422_v27 = vmul.f32 %v13141_v22, %v12861_v62 }
 0x789   :  { %v13168_v10 = vpop.permute.xlu0 %3094 }
 0x78a   :  { %v13170_v39 = vpop.permute.xlu1 %3379  ;;  %4049 = vrot.lane.b32.xlu0 %v4040_v18, %s9560_s16  ;;  %v4328_v18 = vmul.f32 %v4326_v11, %v12854_v4 }
 0x78c   :  { %4440 = vrot.lane.b32.xlu1 %v4420_v34, %s9557_s15  ;;  %v4487_v34 = vmul.f32 %v13184_v42, %v12987_v19 }
 0x78d   :  { %v13177_v0 = vpop.permute.xlu0 %3141 }
 0x78e   :  { %v13179_v2 = vpop.permute.xlu1 %3383  ;;  %4053 = vrot.lane.b32.xlu0 %v4042_v38, %s9560_s16  ;;  %v4489_v38 = vmul.f32 %v13184_v42, %v12999_v32 }
 0x790   :  { %4444 = vrot.lane.b32.xlu1 %v4422_v27, %s9557_s15 }
 0x791   :  { %v13191_v36 = vpop.permute.xlu0 %3145 }
 0x792   :  { %v13193_v44 = vpop.permute.xlu1 %3434  ;;  %4336 = vrot.lane.b32.xlu0 %v4328_v18, %s9556_s9  ;;  %v4538_v18 = vmul.f32 %v13203_v29, %v12987_v19 }
 0x794   :  { %4495 = vrot.lane.b32.xlu1 %v4487_v34, %s9561_s17 }
 0x795   :  { %v3201_v27 = vpop.permute.xlu0 %3200 }
 0x796   :  { %v13200_v35 = vpop.permute.xlu1 %3438  ;;  %4340 = vrot.lane.b32.xlu0 %v4330_v6, %s9556_s9  ;;  %v4540_v6 = vmul.f32 %v13203_v29, %v12999_v32 }
 0x798   :  { %4499 = vrot.lane.b32.xlu1 %v4489_v38, %s9561_s17 }
 0x799   :  { %v13210_v34 = vpop.permute.xlu0 %3204 }
 0x79a   :  { %v13212_v11 = vpop.permute.xlu1 %3711  ;;  %4387 = vrot.lane.b32.xlu0 %v4379_v31, %s9558_s7 }
 0x79c   :  { %4546 = vrot.lane.b32.xlu1 %v4538_v18, %s9562_s18 }
 0x79d   :  { %v3209_v38 = vpop.permute.xlu0 %3208 }
 0x79e   :  { %v13219_v37 = vpop.permute.xlu1 %3713  ;;  %4391 = vrot.lane.b32.xlu0 %v4381_v15, %s9558_s7  ;;  %v4419_v15 = vmul.f32 %v13141_v22, %v13058_v21 }
 0x79f   :  { %15656 = vst [vmem:[#allocation54_spill] sm:$0xff] %v13219_v37 }
 0x7a0   :  { %4550 = vrot.lane.b32.xlu1 %v4540_v6, %s9562_s18 }
 0x7a1   :  { %v13228_v31 = vpop.permute.xlu0 %3212 }
 0x7a2   :  { %v13230_v18 = vpop.permute.xlu1 %3717  ;;  %4434 = vrot.lane.b32.xlu0 %v4417_v13, %s9557_s15  ;;  %v4421_v13 = vmul.f32 %v13141_v22, %v12999_v32 }
 0x7a3   :  { %15657 = vst [vmem:[#allocation55_spill] sm:$0xff] %v13230_v18  ;;  %v3067_v18 = vmul.f32 %v12689_v40, %v3065_v9 }
 0x7a4   :  { %4609 = vrot.lane.b32.xlu1 %v4593_v16, %s9559_s5 }
 0x7a5   :  { %v13239_v61 = vpop.permute.xlu0 %3263  ;;  %v3100_v16 = vadd.f32 %v12968_v49, %v3067_v18 }
 0x7a6   :  { %v13241_v6 = vpop.permute.xlu1 %3744  ;;  %4438 = vrot.lane.b32.xlu0 %v4419_v15, %s9557_s15  ;;  %v3214_v15 = vsel %vm2637_vm5, %v13071_v14, %v3201_v27  ;;  %v3069_v14 = vmul.f32 %v12703_v48, %v3065_v9  ;;  %v4490_v48 = vmul.f32 %v13184_v42, %v13076_v1 }
 0x7a7   :  { %15658 = vst [vmem:[#allocation56_spill] sm:$0xff] %v13241_v6  ;;  %v3151_v40 = vadd.f32 %v13049_v41, %v3100_v16  ;;  %v13271_v6 = vstv %s12858_s3  ;;  %s9345_s3 = spop %9344 }
 0x7a8   :  { %4613 = vrot.lane.b32.xlu1 %v4595_v25, %s9559_s5  ;;  %v4423_v25 = vmul.f32 %v13141_v22, %v13076_v1  ;;  %v4664_v22 = vmul.f32 %v13271_v6, %v13090_v17  ;;  %v3102_v41 = vadd.f32 %v13024_v33, %v3069_v14  ;;  %v3068_v14 = vmul.f32 %v12696_v58, %v3065_v9  ;;  %s9347_s19 = spop %9346 }
 0x7a9   :  { %v13251_v43 = vpop.permute.xlu0 %3267  ;;  %v3222_v49 = vadd.f32 %v3214_v15, %v3151_v40  ;;  %v3216_v15 = vsel %vm2637_vm5, %v13092_v63, %v3209_v38  ;;  %v13298_v63 = vstv %s9339_s1  ;;  %s9349_s8 = spop %9348 }
 0x7aa   :  { %v13253_v37 = vpop.permute.xlu1 %3748  ;;  %4442 = vrot.lane.b32.xlu0 %v4421_v13, %s9557_s15  ;;  %s9351_s4 = spop %9350 }
 0x7ab   :  { %15659 = vst [vmem:[#allocation57_spill] sm:$0xff] %v13253_v37  ;;  %v4599_v37 = vmul.f32 %v13222_v46, %v13076_v1  ;;  %v3273_v27 = vadd.f32 %v13110_v51, %v3222_v49  ;;  %v4666_v51 = vmul.f32 %v13271_v6, %v13099_v12  ;;  %s13766_s29 = spop %9352 }
 0x7ac   :  { %4617 = vrot.lane.b32.xlu1 %v4597_v60, %s9559_s5  ;;  %v4488_v60 = vmul.f32 %v13184_v42, %v13058_v21  ;;  %v4539_v42 = vmul.f32 %v13203_v29, %v13058_v21 }
 0x7ad   :  { %v13264_v18 = vpop.permute.xlu0 %3314 }
 0x7ae   :  { %v13266_v26 = vpop.permute.xlu1 %3807  ;;  %4446 = vrot.lane.b32.xlu0 %v4423_v25, %s9557_s15  ;;  %v3324_v25 = vadd.f32 %v13127_v47, %v3273_v27  ;;  %v4954_v47 = vmul.f32 %v13298_v63, %v12856_v57 }
 0x7b0   :  { %4621 = vrot.lane.b32.xlu1 %v4599_v37, %s9559_s5  ;;  %v3153_v37 = vadd.f32 %v13061_v30, %v3102_v41 }
 0x7b1   :  { %v13282_v13 = vpop.permute.xlu0 %3318 }
 0x7b2   :  { %v13284_v16 = vpop.permute.xlu1 %3811  ;;  %4497 = vrot.lane.b32.xlu0 %v4488_v60, %s9561_s17  ;;  %v3224_v33 = vadd.f32 %v3216_v15, %v3153_v37  ;;  %v3215_v15 = vsel %vm2637_vm5, %v13081_v59, %v13210_v34  ;;  %v13329_v34 = vstv %s9341_s25  ;;  %s15695_s25 = smov 122  }
 0x7b4   :  { %4672 = vrot.lane.b32.xlu1 %v4664_v22, %s9560_s16  ;;  %v3275_v60 = vadd.f32 %v13119_v24, %v3224_v33  ;;  %v4541_v24 = vmul.f32 %v13203_v29, %v13076_v1 }
 0x7b5   :  { %v3374_v40 = vpop.permute.xlu0 %3373 }
 0x7b6   :  { %v13296_v49 = vpop.permute.xlu1 %3815  ;;  %v3387_v38 = vsel %vm2894_vm6, %v13149_v5, %v3374_v40  ;;  %4501 = vrot.lane.b32.xlu0 %v4490_v48, %s9561_s17  ;;  %v3101_v5 = vadd.f32 %v12994_v52, %v3068_v14  ;;  %v4956_v52 = vmul.f32 %v13298_v63, %v12861_v62 }
 0x7b7   :  { %v3395_v30 = vadd.f32 %v3387_v38, %v3324_v25 }
 0x7b8   :  { %4676 = vrot.lane.b32.xlu1 %v4666_v51, %s9560_s16  ;;  %v3152_v37 = vadd.f32 %v13177_v0, %v3101_v5  ;;  %v3326_v51 = vadd.f32 %v13138_v28, %v3275_v60  ;;  %v3217_v0 = vsel %vm2637_vm5, %v13102_v23, %v13228_v31  ;;  %v13364_v5 = vstv %s9343_s0 }
 0x7b9   :  { %v3446_v22 = vadd.f32 %v13193_v44, %v3395_v30  ;;  %v3378_v41 = vpop.permute.xlu0 %3377  ;;  %v3070_v44 = vmul.f32 %v12786_v55, %v3065_v9  ;;  %v4594_v55 = vmul.f32 %v13222_v46, %v13090_v17 }
 0x7ba   :  { %v13311_v27 = vpop.permute.xlu1 %3819  ;;  %4548 = vrot.lane.b32.xlu0 %v4539_v42, %s9562_s18  ;;  %v3223_v25 = vadd.f32 %v3215_v15, %v3152_v37  ;;  %v3388_v30 = vsel %vm2894_vm6, %v13161_v53, %v3378_v41 }
 0x7bb   :  { %v3479_v58 = vadd.f32 %v13132_v20, %v3446_v22  ;;  %v3103_v40 = vadd.f32 %v13168_v10, %v3070_v44 }
 0x7bc   :  { %4963 = vrot.lane.b32.xlu1 %v4954_v47, %s9556_s9  ;;  %v3274_v10 = vadd.f32 %v13239_v61, %v3223_v25  ;;  %v4596_v61 = vmul.f32 %v13222_v46, %v13130_v45 }
 0x7bd   :  { %v3382_v48 = vpop.permute.xlu0 %3381  ;;  %vm3483_vm8 = vcmp.ge.f32.partialorder %v3479_v58, 0.0  ;;  %v3487_v59 = vmul.f32 0.01, %v3479_v58  ;;  %v3154_v38 = vadd.f32 %v13191_v36, %v3103_v40 }
 0x7be   :  { %v13327_v33 = vpop.permute.xlu1 %3870  ;;  %v3389_v9 = vsel %vm2894_vm6, %v13170_v39, %v3382_v48  ;;  %4552 = vrot.lane.b32.xlu0 %v4541_v24, %s9562_s18  ;;  %v5005_v39 = vmul.f32 %v13329_v34, %v12856_v57  ;;  %v3325_v47 = vadd.f32 %v13264_v18, %v3274_v10 }
 0x7bf   :  { %v3397_v29 = vadd.f32 %v3389_v9, %v3326_v51  ;;  %v3491_v28 = vsel %vm3483_vm8, %v3479_v58, %v3487_v59  ;;  %v3225_v14 = vadd.f32 %v3217_v0, %v3154_v38  ;;  %v4600_v59 = vmul.f32 %v13222_v46, %v13154_v54 }
 0x7c0   :  { %4967 = vrot.lane.b32.xlu1 %v4956_v52, %s9556_s9  ;;  %8430 = vmatprep.mubr.msk.f32.mxu1 %vm2408_vm4, %v3491_v28  ;;  %v3396_v60 = vadd.f32 %v3388_v30, %v3325_v47  ;;  %v5060_v52 = vmul.f32 %v13364_v5, %v12987_v19  ;;  %v5062_v28 = vmul.f32 %v13364_v5, %v13058_v21  ;;  %v13415_v47 = vstv %s9345_s3 }
 0x7c1   :  { %v3448_v23 = vadd.f32 %v13200_v35, %v3397_v29  ;;  %v3386_v31 = vpop.permute.xlu0 %3385  ;;  %v3276_v36 = vadd.f32 %v13251_v43, %v3225_v14  ;;  %v5007_v35 = vmul.f32 %v13329_v34, %v12861_v62  ;;  %v4598_v43 = vmul.f32 %v13222_v46, %v13099_v12 }
 0x7c2   :  { %v13349_v42 = vpop.permute.xlu1 %3874  ;;  %4611 = vrot.lane.b32.xlu0 %v4594_v55, %s9559_s5  ;;  %v3390_v22 = vsel %vm2894_vm6, %v13179_v2, %v3386_v31  ;;  %v4665_v46 = vmul.f32 %v13271_v6, %v13130_v45  ;;  %v4667_v30 = vmul.f32 %v13271_v6, %v13154_v54  ;;  %v5066_v14 = vmul.f32 %v13364_v5, %v13076_v1 }
 0x7c3   :  { %v3481_v53 = vadd.f32 %v13132_v20, %v3448_v23  ;;  %v3327_v15 = vadd.f32 %v13282_v13, %v3276_v36  ;;  %v4953_v6 = vmul.f32 %v13298_v63, %v12854_v4 }
 0x7c4   :  { %5014 = vrot.lane.b32.xlu1 %v5005_v39, %s9558_s7  ;;  %v5064_v39 = vmul.f32 %v13364_v5, %v12999_v32 }
 0x7c5   :  { %v3437_v18 = vpop.permute.xlu0 %3436  ;;  %v3398_v24 = vadd.f32 %v3390_v22, %v3327_v15  ;;  %v3489_v48 = vmul.f32 0.01, %v3481_v53  ;;  %vm3485_vm10 = vcmp.ge.f32.partialorder %v3481_v53, 0.0  ;;  %v13438_v15 = vstv %s9347_s19  ;;  %s15708_s19 = smov 1  }
 0x7c6   :  { %v13362_v41 = vpop.permute.xlu1 %3921  ;;  %v3447_v58 = vadd.f32 %v3437_v18, %v3396_v60  ;;  %4615 = vrot.lane.b32.xlu0 %v4596_v61, %s9559_s5  ;;  %v5112_v61 = vmul.f32 %v13415_v47, %v12987_v19 }
 0x7c7   :  { %v3493_v0 = vsel %vm3485_vm10, %v3481_v53, %v3489_v48  ;;  %v5114_v53 = vmul.f32 %v13415_v47, %v12999_v32 }
 0x7c8   :  { %5018 = vrot.lane.b32.xlu1 %v5007_v35, %s9558_s7  ;;  %v3480_v44 = vadd.f32 %v13132_v20, %v3447_v58  ;;  %v4955_v35 = vmul.f32 %v13298_v63, %v12874_v50  ;;  %v5004_v58 = vmul.f32 %v13329_v34, %v12854_v4 }
 0x7c9   :  { %v3441_v37 = vpop.permute.xlu0 %3440 }
 0x7ca   :  { %v13372_v2 = vpop.permute.xlu1 %3925  ;;  %vm3484_vm9 = vcmp.ge.f32.partialorder %v3480_v44, 0.0  ;;  %v3488_v13 = vmul.f32 0.01, %v3480_v44  ;;  %v3449_v51 = vadd.f32 %v3441_v37, %v3398_v24  ;;  %4619 = vrot.lane.b32.xlu0 %v4598_v43, %s9559_s5  ;;  %v5163_v43 = vmul.f32 %v13438_v15, %v12987_v19 }
 0x7cb   :  { %v5165_v37 = vmul.f32 %v13438_v15, %v12999_v32 }
 0x7cc   :  { %5077 = vrot.lane.b32.xlu1 %v5060_v52, %s9557_s15  ;;  %v3492_v40 = vsel %vm3484_vm9, %v3480_v44, %v3488_v13  ;;  %v3482_v25 = vadd.f32 %v13132_v20, %v3449_v51  ;;  %v5006_v44 = vmul.f32 %v13329_v34, %v12874_v50  ;;  %v13458_v13 = vstv %s9349_s8  ;;  %s9578_s8 = smov 5  }
 0x7cd   :  { %v13381_v9 = vpop.permute.xlu0 %3715  ;;  %8431 = vmatmul.mubr.msk.f32.vlgmr.msra.gmra.mrb[64].mxu1 %vm2408_vm4, %v3492_v40  ;;  %v5059_v51 = vmul.f32 %v13364_v5, %v12854_v4  ;;  %v5218_v34 = vmul.f32 %v13458_v13, %v12987_v19 }
 0x7ce   :  { %v13384_v29 = vpop.permute.xlu1 %3984  ;;  %4623 = vrot.lane.b32.xlu0 %v4600_v59, %s9559_s5  ;;  %8433 = vmatprep.mubr.msk.f32.mxu1 %vm2408_vm4, %v3493_v0  ;;  %vm3486_vm11 = vcmp.ge.f32.partialorder %v3482_v25, 0.0  ;;  %v3490_v55 = vmul.f32 0.01, %v3482_v25  ;;  %v3723_v0 = vadd.f32 %v13212_v11, %v12865_v56 }
 0x7cf   :  { %9173 = vmatpush3.bf16.msra.mxu1 %v12978_v3 }
 0x7d0   :  { %5081 = vrot.lane.b32.xlu1 %v5062_v28, %s9557_s15  ;;  %v3494_v20 = vsel %vm3486_vm11, %v3482_v25, %v3490_v55  ;;  %9175 = vmatprep.subr.bf16.mxu1 %v13009_v8  ;;  %v5061_v25 = vmul.f32 %v13364_v5, %v12856_v57  ;;  %v5220_v55 = vmul.f32 %v13458_v13, %v13058_v21 }
 0x7d1   :  { %v13395_v38 = vpop.permute.xlu0 %3746  ;;  %8434 = vmatmul.mubr.msk.f32.gmra.mrb[66].mxu1 %vm2408_vm4, %v3494_v20  ;;  %v5063_v57 = vmul.f32 %v13364_v5, %v12874_v50 }
 0x7d2   :  { %v13398_v10 = vpop.permute.xlu1 %3988  ;;  %4674 = vrot.lane.b32.xlu0 %v4665_v46, %s9560_s16  ;;  %v15660_v46 = vld [vmem:[#allocation56_spill] sm:$0xff] }
 0x7d3   :  { %9177 = vmatpush3.bf16.msra.mxu1 %v13009_v8  ;;  %v3756_v20 = vadd.f32 %v15660_v46, %v3723_v0 }
 0x7d4   :  { %5085 = vrot.lane.b32.xlu1 %v5064_v39, %s9557_s15  ;;  %8444 = vmatprep.subr.msk.mxu1 %vm3507_vm7, %v13018_v7 }
 0x7d5   :  { %v13409_v23 = vpop.permute.xlu0 %3750 }
 0x7d6   :  { %v13411_v31 = vpop.permute.xlu1 %3992  ;;  %4678 = vrot.lane.b32.xlu0 %v4667_v30, %s9560_s16  ;;  %v5222_v30 = vmul.f32 %v13458_v13, %v12999_v32  ;;  %v5224_v32 = vmul.f32 %v13458_v13, %v13076_v1 }
 0x7d7   :  { %8445 = vmatpush3.msk.msra.mxu1 %vm3507_vm7, %v13018_v7 }
 0x7d8   :  { %5089 = vrot.lane.b32.xlu1 %v5066_v14, %s9557_s15  ;;  %9179 = vmatprep.subr.bf16.mxu1 %v12978_v3 }
 0x7d9   :  { %v3810_v36 = vpop.permute.xlu0 %3809 }
 0x7da   :  { %v13426_v60 = vpop.permute.xlu1 %3996  ;;  %4961 = vrot.lane.b32.xlu0 %v4953_v6, %s9556_s9  ;;  %v3823_v19 = vsel %vm2637_vm5, %v13266_v26, %v3810_v36  ;;  %v15661_v26 = vld [vmem:[#allocation41_spill] sm:$0xff]  ;;  %v5065_v6 = vmul.f32 %v13364_v5, %v12861_v62  ;;  %v5113_v62 = vmul.f32 %v13415_v47, %v13058_v21 }
 0x7db   :  { %v3831_v56 = vadd.f32 %v3823_v19, %v3756_v20  ;;  %v3725_v14 = vadd.f32 %v13381_v9, %v15661_v26  ;;  %v15662_v9 = vld [vmem:[#allocation57_spill] sm:$0xff]  ;;  %v15663_v19 = vld [vmem:[#allocation39_spill] sm:$0xff] }
 0x7dc   :  { %5120 = vrot.lane.b32.xlu1 %v5112_v61, %s9561_s17 }
 0x7dd   :  { %v13434_v22 = vpop.permute.xlu0 %3813  ;;  %v3882_v50 = vadd.f32 %v13327_v33, %v3831_v56 }
 0x7de   :  { %v13436_v18 = vpop.permute.xlu1 %4047  ;;  %4965 = vrot.lane.b32.xlu0 %v4955_v35, %s9556_s9  ;;  %v13508_v35 = vstv %s9351_s4  ;;  %v3824_v20 = vsel %vm2637_vm5, %v13284_v16, %v13434_v22  ;;  %v15666_v16 = vld [vmem:[#allocation11_spill] sm:$0xff]  ;;  %s9580_s4 = smov 6  }
 0x7df   :  { %v5289_v33 = vmul.f32 %v13508_v35, %v13090_v17 }
 0x7e0   :  { %5124 = vrot.lane.b32.xlu1 %v5114_v53, %s9561_s17 }
 0x7e1   :  { %v3818_v63 = vpop.permute.xlu0 %3817 }
 0x7e2   :  { %v13446_v24 = vpop.permute.xlu1 %4051  ;;  %5012 = vrot.lane.b32.xlu0 %v5004_v58, %s9558_s7  ;;  %v3825_v53 = vsel %vm2637_vm5, %v13296_v49, %v3818_v63  ;;  %v3758_v58 = vadd.f32 %v15662_v9, %v3725_v14  ;;  %v13551_v14 = vld [vmem:[%s15509_s11 + $0x4] sm:$0x1] }
 0x7e3   :  { %v13555_v22 = vmul.f32 %v13551_v14, %v15666_v16 }
 0x7e4   :  { %5171 = vrot.lane.b32.xlu1 %v5163_v43, %s9562_s18  ;;  %v3833_v5 = vadd.f32 %v3825_v53, %v3758_v58 }
 0x7e5   :  { %v13454_v52 = vpop.permute.xlu0 %3821 }
 0x7e6   :  { %v13456_v48 = vpop.permute.xlu1 %4338  ;;  %5016 = vrot.lane.b32.xlu0 %v5006_v44, %s9558_s7  ;;  %v3933_v44 = vadd.f32 %v13362_v41, %v3882_v50  ;;  %v15667_v50 = vld [vmem:[#allocation40_spill] sm:$0xff]  ;;  %v3826_v53 = vsel %vm2637_vm5, %v13311_v27, %v13454_v52 }
 0x7e8   :  { %5175 = vrot.lane.b32.xlu1 %v5165_v37, %s9562_s18 }
 0x7e9   :  { %v13464_v59 = vpop.permute.xlu0 %3872 }
 0x7ea   :  { %v13466_v40 = vpop.permute.xlu1 %4342  ;;  %5075 = vrot.lane.b32.xlu0 %v5059_v51, %s9557_s15  ;;  %v5115_v51 = vmul.f32 %v13415_v47, %v13076_v1  ;;  %v15665_v47 = vld [vmem:[#allocation51_spill] sm:$0xff] }
 0x7ec   :  { %5234 = vrot.lane.b32.xlu1 %v5218_v34, %s9559_s5  ;;  %v5291_v34 = vmul.f32 %v13508_v35, %v13099_v12 }
 0x7ed   :  { %v13476_v28 = vpop.permute.xlu0 %3876 }
 0x7ee   :  { %v13478_v4 = vpop.permute.xlu1 %4389  ;;  %5079 = vrot.lane.b32.xlu0 %v5061_v25, %s9557_s15  ;;  %v3884_v25 = vadd.f32 %v13349_v42, %v3833_v5  ;;  %v5164_v42 = vmul.f32 %v13438_v15, %v13058_v21  ;;  %v15668_v21 = vld [vmem:[#allocation55_spill] sm:$0xff] }
 0x7f0   :  { %5238 = vrot.lane.b32.xlu1 %v5220_v55, %s9559_s5 }
 0x7f1   :  { %v13489_v11 = vpop.permute.xlu0 %3923 }
 0x7f2   :  { %v13491_v39 = vpop.permute.xlu1 %4393  ;;  %5083 = vrot.lane.b32.xlu0 %v5063_v57, %s9557_s15 }
 0x7f4   :  { %5242 = vrot.lane.b32.xlu1 %v5222_v30, %s9559_s5  ;;  %v3935_v30 = vadd.f32 %v13372_v2, %v3884_v25 }
 0x7f5   :  { %v13502_v61 = vpop.permute.xlu0 %3927 }
 0x7f6   :  { %v13504_v36 = vpop.permute.xlu1 %4432  ;;  %5087 = vrot.lane.b32.xlu0 %v5065_v6, %s9557_s15 }
 0x7f8   :  { %5246 = vrot.lane.b32.xlu1 %v5224_v32, %s9559_s5  ;;  %v3726_v32 = vadd.f32 %v15668_v21, %v15667_v50 }
 0x7f9   :  { %v3987_v43 = vpop.permute.xlu0 %3986 }
 0x7fa   :  { %v13520_v37 = vpop.permute.xlu1 %4436  ;;  %v4000_v49 = vsel %vm2894_vm6, %v13384_v29, %v3987_v43  ;;  %5122 = vrot.lane.b32.xlu0 %v5113_v62, %s9561_s17  ;;  %v15664_v29 = vld [vmem:[#allocation54_spill] sm:$0xff]  ;;  %v5166_v62 = vmul.f32 %v13438_v15, %v13076_v1 }
 0x7fb   :  { %v4008_v63 = vadd.f32 %v4000_v49, %v3933_v44  ;;  %v3724_v46 = vadd.f32 %v15664_v29, %v15663_v19  ;;  %v15669_v44 = vld [vmem:[#allocation33_spill] sm:$0xff] }
 0x7fc   :  { %5297 = vrot.lane.b32.xlu1 %v5289_v33, %s9560_s16  ;;  %v3759_v33 = vadd.f32 %v13409_v23, %v3726_v32  ;;  %v13579_v49 = vmul.f32 %v13551_v14, %v15669_v44  ;;  %v13622_v32 = vld [vmem:[%s15509_s11 + $0x5] sm:$0x1] }
 0x7fd   :  { %v4059_v41 = vadd.f32 %v13436_v18, %v4008_v63  ;;  %v3991_v0 = vpop.permute.xlu0 %3990  ;;  %v3757_v18 = vadd.f32 %v13395_v38, %v3724_v46  ;;  %v15671_v46 = vld [vmem:[#allocation19_spill] sm:$0xff] }
 0x7fe   :  { %v13532_v55 = vpop.permute.xlu1 %4440  ;;  %5126 = vrot.lane.b32.xlu0 %v5115_v51, %s9561_s17  ;;  %v3834_v63 = vadd.f32 %v3826_v53, %v3759_v33 }
 0x7ff   :  { %v4092_v57 = vadd.f32 %v15665_v47, %v4059_v41  ;;  %v3832_v38 = vadd.f32 %v3824_v20, %v3757_v18  ;;  %v13608_v20 = vmul.f32 %v13551_v14, %v15671_v46  ;;  %v5223_v18 = vmul.f32 %v13458_v13, %v13099_v12 }
 0x800   :  { %5301 = vrot.lane.b32.xlu1 %v5291_v34, %s9560_s16  ;;  %v3885_v23 = vadd.f32 %v13476_v28, %v3834_v63 }
 0x801   :  { %v3995_v56 = vpop.permute.xlu0 %3994  ;;  %vm4096_vm12 = vcmp.ge.f32.partialorder %v4092_v57, 0.0  ;;  %v4100_v6 = vmul.f32 0.01, %v4092_v57  ;;  %v3883_v5 = vadd.f32 %v13464_v59, %v3832_v38  ;;  %v15673_v38 = vld [vmem:[#allocation14_spill] sm:$0xff] }
 0x802   :  { %v13546_v26 = vpop.permute.xlu1 %4444  ;;  %v4002_v2 = vsel %vm2894_vm6, %v13411_v31, %v3995_v56  ;;  %5173 = vrot.lane.b32.xlu0 %v5164_v42, %s9562_s18  ;;  %v4001_v31 = vsel %vm2894_vm6, %v13398_v10, %v3991_v0  ;;  %v5219_v10 = vmul.f32 %v13458_v13, %v13090_v17  ;;  %v3936_v41 = vadd.f32 %v13502_v61, %v3885_v23 }
 0x803   :  { %v4010_v9 = vadd.f32 %v4002_v2, %v3935_v30  ;;  %v4104_v58 = vsel %vm4096_vm12, %v4092_v57, %v4100_v6  ;;  %v3934_v1 = vadd.f32 %v13489_v11, %v3883_v5  ;;  %v15670_v11 = vld [vmem:[#allocation32_spill] sm:$0xff]  ;;  %v5221_v17 = vmul.f32 %v13458_v13, %v13130_v45 }
 0x804   :  { %5573 = vrot.lane.b32.xlu1 %v13555_v22, %s9567_s28  ;;  %8446 = vmatprep.mubr.msk.f32.mxu1 %vm2408_vm4, %v4104_v58  ;;  %v13595_v25 = vmul.f32 %v13551_v14, %v15670_v11  ;;  %v13626_v2 = vmul.f32 %v13622_v32, %v15673_v38  ;;  %v15677_v5 = vld [vmem:[#allocation4_spill] sm:$0xff]  ;;  %v5292_v23 = vmul.f32 %v13508_v35, %v13154_v54  ;;  %vm3596_vm12 = vcmask 146432  }
 0x805   :  { %v4061_v43 = vadd.f32 %v13446_v24, %v4010_v9  ;;  %v3999_v27 = vpop.permute.xlu0 %3998  ;;  %v4009_v15 = vadd.f32 %v4001_v31, %v3934_v1  ;;  %v15679_v1 = vld [vmem:[#allocation7_spill] sm:$0xff] }
 0x806   :  { %v13575_v52 = vpop.permute.xlu1 %4495  ;;  %5177 = vrot.lane.b32.xlu0 %v5166_v62, %s9562_s18  ;;  %v4003_v59 = vsel %vm2894_vm6, %v13426_v60, %v3999_v27  ;;  %v15675_v62 = vld [vmem:[#allocation30_spill] sm:$0xff] }
 0x807   :  { %v4094_v24 = vadd.f32 %v15665_v47, %v4061_v43  ;;  %v4011_v28 = vadd.f32 %v4003_v59, %v3936_v41  ;;  %v13639_v33 = vmul.f32 %v13622_v32, %v15675_v62  ;;  %v5290_v43 = vmul.f32 %v13508_v35, %v13130_v45 }
 0x808   :  { %5679 = vrot.lane.b32.xlu1 %v13579_v49, %s9560_s16 }
 0x809   :  { %v4050_v51 = vpop.permute.xlu0 %4049  ;;  %v4102_v61 = vmul.f32 0.01, %v4094_v24  ;;  %vm4098_vm14 = vcmp.ge.f32.partialorder %v4094_v24, 0.0 }
 0x80a   :  { %v13591_v34 = vpop.permute.xlu1 %4499  ;;  %v4060_v0 = vadd.f32 %v4050_v51, %v4009_v15  ;;  %5236 = vrot.lane.b32.xlu0 %v5219_v10, %s9559_s5 }
 0x80b   :  { %v4106_v50 = vsel %vm4098_vm14, %v4094_v24, %v4102_v61 }
 0x80c   :  { %5783 = vrot.lane.b32.xlu1 %v13595_v25, %s9571_s20  ;;  %v4093_v60 = vadd.f32 %v15665_v47, %v4060_v0 }
 0x80d   :  { %v4054_v19 = vpop.permute.xlu0 %4053 }
 0x80e   :  { %v13604_v29 = vpop.permute.xlu1 %4546  ;;  %vm4097_vm13 = vcmp.ge.f32.partialorder %v4093_v60, 0.0  ;;  %v4101_v57 = vmul.f32 0.01, %v4093_v60  ;;  %v4062_v42 = vadd.f32 %v4054_v19, %v4011_v28  ;;  %5240 = vrot.lane.b32.xlu0 %v5221_v17, %s9559_s5  ;;  %v15680_v19 = vld [vmem:[#allocation44_spill] sm:$0xff] }
 0x810   :  { %5909 = vrot.lane.b32.xlu1 %v13608_v20, %s15672_s23  ;;  %v4105_v56 = vsel %vm4097_vm13, %v4093_v60, %v4101_v57  ;;  %v4095_v30 = vadd.f32 %v15665_v47, %v4062_v42  ;;  %v5225_v47 = vmul.f32 %v13458_v13, %v13154_v54  ;;  %v15678_v13 = vld [vmem:[#allocation38_spill] sm:$0xff] }
 0x811   :  { %v4337_v6 = vpop.permute.xlu0 %4336  ;;  %8447 = vmatmul.mubr.msk.f32.vlgmr.msra.gmra.mrb[68].mxu1 %vm2408_vm4, %v4105_v56  ;;  %v5551_v31 = vmul.f32 %v15678_v13, %v15677_v5 }
 0x812   :  { %v13617_v21 = vpop.permute.xlu1 %4550  ;;  %5244 = vrot.lane.b32.xlu0 %v5223_v18, %s9559_s5  ;;  %8449 = vmatprep.mubr.msk.f32.mxu1 %vm2408_vm4, %v4106_v50  ;;  %vm4099_vm15 = vcmp.ge.f32.partialorder %v4095_v30, 0.0  ;;  %v4103_v12 = vmul.f32 0.01, %v4095_v30  ;;  %v4348_v61 = vadd.f32 %v4337_v6, %v15680_v19 }
 0x813   :  { %9181 = vmatpush3.bf16.msra.mxu1 %v12978_v3  ;;  %v5559_v10 = vrot.slane %v5551_v31, %v15679_v1 }
 0x814   :  { %6249 = vrot.lane.b32.xlu1 %v13626_v2, %s15674_s2  ;;  %v4107_v53 = vsel %vm4099_vm15, %v4095_v30, %v4103_v12  ;;  %9183 = vmatprep.subr.bf16.mxu1 %v13009_v8  ;;  %v15681_v12 = vld [vmem:[#allocation45_spill] sm:$0xff] }
 0x815   :  { %v4341_v9 = vpop.permute.xlu0 %4340  ;;  %8450 = vmatmul.mubr.msk.f32.gmra.mrb[70].mxu1 %vm2408_vm4, %v4107_v53  ;;  %v5566_v24 = vrot.slane %v5559_v10, %v15679_v1 }
 0x816   :  { %v4610_v58 = vpop.permute.xlu1 %4609  ;;  %5248 = vrot.lane.b32.xlu0 %v5225_v47, %s9559_s5  ;;  %v4350_v47 = vadd.f32 %v4341_v9, %v15681_v12 }
 0x817   :  { %9185 = vmatpush3.bf16.msra.mxu1 %v13009_v8 }
 0x818   :  { %6375 = vrot.lane.b32.xlu1 %v13639_v33, %s15676_s14  ;;  %8460 = vmatprep.subr.msk.mxu1 %vm3507_vm7, %v13018_v7 }
 0x819   :  { %v4388_v27 = vpop.permute.xlu0 %4387 }
 0x81a   :  { %v13651_v63 = vpop.permute.xlu1 %4613  ;;  %5299 = vrot.lane.b32.xlu0 %v5290_v43, %s9560_s16  ;;  %v4399_v56 = vadd.f32 %v4388_v27, %v4348_v61 }
 0x81b   :  { %8461 = vmatpush3.msk.msra.mxu1 %vm3507_vm7, %v13018_v7 }
 0x81c   :  { %9187 = vmatprep.subr.bf16.mxu1 %v12978_v3 }
 0x81d   :  { %v4392_v15 = vpop.permute.xlu0 %4391 }
 0x81e   :  { %v4618_v45 = vpop.permute.xlu1 %4617  ;;  %5303 = vrot.lane.b32.xlu0 %v5292_v23, %s9560_s16  ;;  %v4401_v43 = vadd.f32 %v4392_v15, %v4350_v47  ;;  %v15683_v15 = vld [vmem:[#allocation52_spill] sm:$0xff] }
 0x821   :  { %v4435_v59 = vpop.permute.xlu0 %4434 }
 0x822   :  { %v13662_v51 = vpop.permute.xlu1 %4621  ;;  %5567 = vrot.lane.b32.xlu0 %v5566_v24, %s9577_s27  ;;  %v4448_v18 = vsel %vm2637_vm5, %v13504_v36, %v4435_v59 }
 0x823   :  { %v4456_v30 = vadd.f32 %v4448_v18, %v4399_v56  ;;  %v15682_v18 = vld [vmem:[#allocation42_spill] sm:$0xff] }
 0x824   :  { %v4349_v56 = vadd.f32 %v13456_v48, %v15682_v18 }
 0x825   :  { %v4439_v7 = vpop.permute.xlu0 %4438  ;;  %v4507_v53 = vadd.f32 %v13575_v52, %v4456_v30 }
 0x826   :  { %v4673_v41 = vpop.permute.xlu1 %4672 }
 0x827   :  { %v4558_v36 = vadd.f32 %v13604_v29, %v4507_v53  ;;  %v4400_v29 = vadd.f32 %v13478_v4, %v4349_v56 }
 0x829   :  { %v4443_v0 = vpop.permute.xlu0 %4442 }
 0x82a   :  { %v4677_v17 = vpop.permute.xlu1 %4676  ;;  %v4450_v6 = vsel %vm2637_vm5, %v13532_v55, %v4443_v0  ;;  %v4449_v55 = vsel %vm2637_vm5, %v13520_v37, %v4439_v7 }
 0x82b   :  { %v4458_v10 = vadd.f32 %v4450_v6, %v4401_v43  ;;  %v4457_v53 = vadd.f32 %v4449_v55, %v4400_v29 }
 0x82d   :  { %v4447_v28 = vpop.permute.xlu0 %4446  ;;  %v4509_v9 = vadd.f32 %v13591_v34, %v4458_v10 }
 0x82e   :  { %v13665_v54 = vpop.permute.xlu1 %4963  ;;  %v4451_v37 = vsel %vm2637_vm5, %v13546_v26, %v4447_v28 }
 0x831   :  { %v4498_v35 = vpop.permute.xlu0 %4497 }
 0x832   :  { %v13667_v60 = vpop.permute.xlu1 %4967  ;;  %v4508_v43 = vadd.f32 %v4498_v35, %v4457_v53 }
 0x835   :  { %v4502_v57 = vpop.permute.xlu0 %4501 }
 0x836   :  { %v13670_v42 = vpop.permute.xlu1 %5014 }
 0x839   :  { %v4549_v50 = vpop.permute.xlu0 %4548 }
 0x83a   :  { %v13674_v38 = vpop.permute.xlu1 %5018 }
 0x83d   :  { %v4553_v13 = vpop.permute.xlu0 %4552 }
 0x83e   :  { %v13678_v31 = vpop.permute.xlu1 %5077 }
 0x841   :  { %v4612_v23 = vpop.permute.xlu0 %4611 }
 0x842   :  { %v13683_v27 = vpop.permute.xlu1 %5081  ;;  %v4625_v24 = vsel %vm2894_vm6, %v4610_v58, %v4612_v23  ;;  %v4560_v58 = vadd.f32 %v13617_v21, %v4509_v9 }
 0x843   :  { %v4633_v59 = vadd.f32 %v4625_v24, %v4558_v36  ;;  %v4559_v24 = vadd.f32 %v4549_v50, %v4508_v43 }
 0x845   :  { %v4684_v19 = vadd.f32 %v4673_v41, %v4633_v59  ;;  %v4616_v52 = vpop.permute.xlu0 %4615  ;;  %v15684_v41 = vld [vmem:[#allocation43_spill] sm:$0xff] }
 0x846   :  { %v13687_v61 = vpop.permute.xlu1 %5085  ;;  %v4351_v47 = vadd.f32 %v13466_v40, %v15684_v41  ;;  %v4626_v21 = vsel %vm2894_vm6, %v13651_v63, %v4616_v52 }
 0x847   :  { %v4717_v0 = vadd.f32 %v15683_v15, %v4684_v19 }
 0x848   :  { %v4402_v4 = vadd.f32 %v13491_v39, %v4351_v47 }
 0x849   :  { %v4620_v30 = vpop.permute.xlu0 %4619  ;;  %vm4721_vm0 = vcmp.ge.f32.partialorder %v4717_v0, 0.0  ;;  %v4725_v34 = vmul.f32 0.01, %v4717_v0 }
 0x84a   :  { %v13696_v12 = vpop.permute.xlu1 %5089  ;;  %v4627_v48 = vsel %vm2894_vm6, %v4618_v45, %v4620_v30  ;;  %v4459_v40 = vadd.f32 %v4451_v37, %v4402_v4  ;;  %v4634_v45 = vadd.f32 %v4626_v21, %v4559_v24 }
 0x84b   :  { %v4635_v7 = vadd.f32 %v4627_v48, %v4560_v58  ;;  %v4729_v6 = vsel %vm4721_vm0, %v4717_v0, %v4725_v34 }
 0x84c   :  { %8462 = vmatprep.mubr.msk.f32.mxu1 %vm2408_vm4, %v4729_v6  ;;  %v4510_v59 = vadd.f32 %v4502_v57, %v4459_v40 }
 0x84d   :  { %v4686_v10 = vadd.f32 %v4677_v17, %v4635_v7  ;;  %v4624_v23 = vpop.permute.xlu0 %4623 }
 0x84e   :  { %v5121_v36 = vpop.permute.xlu1 %5120  ;;  %v4628_v26 = vsel %vm2894_vm6, %v13662_v51, %v4624_v23  ;;  %v4561_v35 = vadd.f32 %v4553_v13, %v4510_v59  ;;  %v15685_v59 = vld [vmem:[#allocation48_spill] sm:$0xff] }
 0x84f   :  { %v4719_v9 = vadd.f32 %v15683_v15, %v4686_v10 }
 0x850   :  { %v4636_v18 = vadd.f32 %v4628_v26, %v4561_v35 }
 0x851   :  { %v4675_v28 = vpop.permute.xlu0 %4674  ;;  %v4727_v52 = vmul.f32 0.01, %v4719_v9  ;;  %vm4723_vm2 = vcmp.ge.f32.partialorder %v4719_v9, 0.0 }
 0x852   :  { %v5125_v39 = vpop.permute.xlu1 %5124  ;;  %v4685_v19 = vadd.f32 %v4675_v28, %v4634_v45 }
 0x853   :  { %v4731_v51 = vsel %vm4723_vm2, %v4719_v9, %v4727_v52 }
 0x854   :  { %v4718_v56 = vadd.f32 %v15683_v15, %v4685_v19 }
 0x855   :  { %v4679_v63 = vpop.permute.xlu0 %4678 }
 0x856   :  { %v5172_v17 = vpop.permute.xlu1 %5171  ;;  %vm4722_vm1 = vcmp.ge.f32.partialorder %v4718_v56, 0.0  ;;  %v4726_v55 = vmul.f32 0.01, %v4718_v56  ;;  %v4687_v50 = vadd.f32 %v4679_v63, %v4636_v18  ;;  %v15686_v18 = vld [vmem:[#allocation49_spill] sm:$0xff] }
 0x858   :  { %v4730_v57 = vsel %vm4722_vm1, %v4718_v56, %v4726_v55  ;;  %v4720_v0 = vadd.f32 %v15683_v15, %v4687_v50  ;;  %v13721_v15 = vld [vmem:[%s15511_s10 + $0x20] sm:$0x1f] }
 0x859   :  { %v4962_v29 = vpop.permute.xlu0 %4961  ;;  %8463 = vmatmul.mubr.msk.f32.vlgmr.msra.gmra.mrb[72].mxu1 %vm2408_vm4, %v4730_v57 }
 0x85a   :  { %v5176_v30 = vpop.permute.xlu1 %5175  ;;  %8465 = vmatprep.mubr.msk.f32.mxu1 %vm2408_vm4, %v4731_v51  ;;  %vm4724_vm3 = vcmp.ge.f32.partialorder %v4720_v0, 0.0  ;;  %v4728_v13 = vmul.f32 0.01, %v4720_v0  ;;  %9189 = vmatpush3.bf16.msra.mxu1 %v12978_v3  ;;  %v4973_v45 = vadd.f32 %v4962_v29, %v15685_v59 }
 0x85b   :  { %9191 = vmatprep.subr.bf16.mxu1 %v13009_v8 }
 0x85c   :  { %v4732_v58 = vsel %vm4724_vm3, %v4720_v0, %v4728_v13 }
 0x85d   :  { %v4966_v34 = vpop.permute.xlu0 %4965  ;;  %8466 = vmatmul.mubr.msk.f32.gmra.mrb[74].mxu1 %vm2408_vm4, %v4732_v58 }
 0x85e   :  { %v5235_v41 = vpop.permute.xlu1 %5234  ;;  %9193 = vmatpush3.bf16.msra.mxu1 %v13009_v8  ;;  %v4975_v56 = vadd.f32 %v4966_v34, %v15686_v18  ;;  %v15688_v34 = vld [vmem:[#allocation53_spill] sm:$0xff] }
 0x85f   :  { %8476 = vmatprep.subr.msk.mxu1 %vm3507_vm7, %v13721_v15 }
 0x861   :  { %v5013_v47 = vpop.permute.xlu0 %5012 }
 0x862   :  { %v5239_v53 = vpop.permute.xlu1 %5238  ;;  %8477 = vmatpush3.msk.msra.mxu1 %vm3507_vm7, %v13721_v15  ;;  %v5024_v28 = vadd.f32 %v5013_v47, %v4973_v45  ;;  %v15687_v47 = vld [vmem:[#allocation46_spill] sm:$0xff]  ;;  %v15689_v45 = vld [vmem:[#allocation47_spill] sm:$0xff] }
 0x863   :  { %9195 = vmatprep.subr.bf16.mxu1 %v12978_v3 }
 0x865   :  { %v5017_v48 = vpop.permute.xlu0 %5016 }
 0x866   :  { %v5243_v37 = vpop.permute.xlu1 %5242  ;;  %v5026_v50 = vadd.f32 %v5017_v48, %v4975_v56 }
 0x869   :  { %v5076_v7 = vpop.permute.xlu0 %5075 }
 0x86a   :  { %v5247_v6 = vpop.permute.xlu1 %5246  ;;  %v5091_v26 = vsel %vm2637_vm5, %v5076_v7, %v13678_v31  ;;  %v4974_v7 = vadd.f32 %v13665_v54, %v15687_v47  ;;  %v13773_v47 = vld [vmem:[#allocation2 + $0x18] sm:$0xff] }
 0x86b   :  { %v5099_v35 = vadd.f32 %v5091_v26, %v5024_v28 }
 0x86d   :  { %v5080_v4 = vpop.permute.xlu0 %5079  ;;  %v5132_v63 = vadd.f32 %v5121_v36, %v5099_v35 }
 0x86e   :  { %v5298_v43 = vpop.permute.xlu1 %5297  ;;  %v5092_v36 = vsel %vm2637_vm5, %v5080_v4, %v13683_v27 }
 0x86f   :  { %v5183_v51 = vadd.f32 %v5172_v17, %v5132_v63 }
 0x871   :  { %v5084_v21 = vpop.permute.xlu0 %5083 }
 0x872   :  { %v5302_v10 = vpop.permute.xlu1 %5301  ;;  %v5093_v55 = vsel %vm2637_vm5, %v5084_v21, %v13687_v61  ;;  %v5025_v61 = vadd.f32 %v13670_v42, %v4974_v7 }
 0x873   :  { %v5101_v57 = vadd.f32 %v5093_v55, %v5026_v50 }
 0x875   :  { %v5088_v23 = vpop.permute.xlu0 %5087  ;;  %v5134_v58 = vadd.f32 %v5125_v39, %v5101_v57  ;;  %v5100_v39 = vadd.f32 %v5092_v36, %v5025_v61 }
 0x876   :  { %v5574_v40 = vpop.permute.xlu1 %5573  ;;  %v5094_v54 = vsel %vm2637_vm5, %v5088_v23, %v13696_v12 }
 0x877   :  { %9354 = vpush %v5574_v40  ;;  %v5185_v21 = vadd.f32 %v5176_v30, %v5134_v58 }
 0x879   :  { %v5123_v24 = vpop.permute.xlu0 %5122 }
 0x87a   :  { %v5133_v4 = vadd.f32 %v5123_v24, %v5100_v39  ;;  %v15697_v39 = vld [vmem:[#allocation12_spill] sm:$0xff] }
 0x87d   :  { %v5127_v9 = vpop.permute.xlu0 %5126 }
 0x881   :  { %v5174_v19 = vpop.permute.xlu0 %5173 }
 0x882   :  { %v5184_v56 = vadd.f32 %v5174_v19, %v5133_v4  ;;  %v15702_v4 = vld [vmem:[#allocation28_spill] sm:$0xff] }
 0x885   :  { %v5178_v52 = vpop.permute.xlu0 %5177 }
 0x889   :  { %v5237_v0 = vpop.permute.xlu0 %5236 }
 0x88a   :  { %v5250_v29 = vsel %vm2894_vm6, %v5235_v41, %v5237_v0  ;;  %v4976_v41 = vadd.f32 %v13667_v60, %v15689_v45 }
 0x88b   :  { %v5258_v13 = vadd.f32 %v5250_v29, %v5183_v51 }
 0x88c   :  { %v5027_v27 = vadd.f32 %v13674_v38, %v4976_v41 }
 0x88d   :  { %v5309_v40 = vadd.f32 %v5298_v43, %v5258_v13  ;;  %v5241_v31 = vpop.permute.xlu0 %5240 }
 0x88e   :  { %v5251_v42 = vsel %vm2894_vm6, %v5239_v53, %v5241_v31  ;;  %v5102_v18 = vadd.f32 %v5094_v54, %v5027_v27  ;;  %v13771_v31 = vld [vmem:[#allocation2] sm:$0xff]  ;;  %v13836_v54 = vmul.f32 %v13622_v32, %v15670_v11  ;;  %v15701_v27 = vld [vmem:[#allocation22_spill] sm:$0xff] }
 0x88f   :  { %v5342_v59 = vadd.f32 %v15688_v34, %v5309_v40  ;;  %v5259_v63 = vadd.f32 %v5251_v42, %v5184_v56  ;;  %v5728_v42 = vmul.f32 %v13579_v49, %v15702_v4 }
 0x890   :  { %v5135_v60 = vadd.f32 %v5127_v9, %v5102_v18  ;;  %v15704_v18 = vld [vmem:[#allocation35_spill] sm:$0xff] }
 0x891   :  { %v5245_v48 = vpop.permute.xlu0 %5244  ;;  %vm5346_vm8 = vcmp.ge.f32.partialorder %v5342_v59, 0.0  ;;  %v5350_v17 = vmul.f32 0.01, %v5342_v59 }
 0x892   :  { %v5252_v43 = vsel %vm2894_vm6, %v5243_v37, %v5245_v48  ;;  %v5186_v23 = vadd.f32 %v5178_v52, %v5135_v60  ;;  %v15696_v48 = vld [vmem:[#allocation16_spill] sm:$0xff] }
 0x893   :  { %v5260_v26 = vadd.f32 %v5252_v43, %v5185_v21  ;;  %v5354_v28 = vsel %vm5346_vm8, %v5342_v59, %v5350_v17  ;;  %v15694_v59 = vld [vmem:[#allocation34_spill] sm:$0xff]  ;;  %v13794_v21 = vld [vmem:[%s15509_s11 + $0x6] sm:$0x1]  ;;  %v13802_v17 = vmul.f32 %v13551_v14, %v15675_v62  ;;  %s15706_s11 = smov 3  }
 0x894   :  { %8478 = vmatprep.mubr.msk.f32.mxu1 %vm2408_vm4, %v5354_v28  ;;  %v6457_v61 = vmul.f32 %v13622_v32, %v15694_v59  ;;  %v6923_v45 = vmul.f32 %v13794_v21, %v15669_v44  ;;  %v5832_v41 = vmul.f32 %v13551_v14, %v15694_v59  ;;  %v13824_v43 = vmul.f32 %v13794_v21, %v15671_v46  ;;  %v15699_v46 = vld [vmem:[#allocation8_spill] sm:$0xff]  ;;  %v15700_v28 = vld [vmem:[#allocation31_spill] sm:$0xff] }
 0x895   :  { %v5311_v30 = vadd.f32 %v5302_v10, %v5260_v26  ;;  %v5249_v35 = vpop.permute.xlu0 %5248  ;;  %v13828_v14 = vmul.f32 %v13622_v32, %v15669_v44  ;;  %v15698_v26 = vld [vmem:[#allocation17_spill] sm:$0xff]  ;;  %v5602_v44 = vmul.f32 %v13555_v22, %v15699_v46  ;;  %v6998_v60 = vmul.f32 %v13794_v21, %v15675_v62 }
 0x896   :  { %v5253_v55 = vsel %vm2894_vm6, %v5247_v6, %v5249_v35  ;;  %v15705_v22 = vld [vmem:[#allocation21_spill] sm:$0xff] }
 0x897   :  { %v5344_v37 = vadd.f32 %v15688_v34, %v5311_v30  ;;  %v5261_v57 = vadd.f32 %v5253_v55, %v5186_v23  ;;  %v15703_v30 = vld [vmem:[#allocation5_spill] sm:$0xff] }
 0x898   :  { %v13853_v35 = vmul.f32 %v13622_v32, %v15703_v30  ;;  %v15709_v62 = vld [vmem:[#allocation9_spill] sm:$0xff] }
 0x899   :  { %v5300_v12 = vpop.permute.xlu0 %5299  ;;  %v5352_v0 = vmul.f32 0.01, %v5344_v37  ;;  %vm5348_vm10 = vcmp.ge.f32.partialorder %v5344_v37, 0.0 }
 0x89a   :  { %v5310_v50 = vadd.f32 %v5300_v12, %v5259_v63  ;;  %v5736_v63 = vrot.slane %v5728_v42, %v15679_v1  ;;  %v6176_v49 = vmul.f32 %v13853_v35, %v15677_v5  ;;  %v6278_v12 = vmul.f32 %v13626_v2, %v15709_v62  ;;  %v15713_v2 = vld [vmem:[#allocation36_spill] sm:$0xff]  ;;  %v15720_v42 = vld [vmem:[#allocation23_spill] sm:$0xff] }
 0x89b   :  { %v5356_v6 = vsel %vm5348_vm10, %v5344_v37, %v5352_v0  ;;  %v13870_v37 = vmul.f32 %v13794_v21, %v15694_v59  ;;  %vm4906_vm10 = vcmask 441632  }
 0x89c   :  { %v5343_v38 = vadd.f32 %v15688_v34, %v5310_v50  ;;  %v5743_v32 = vrot.slane %v5736_v63, %v15679_v1  ;;  %v6184_v55 = vrot.slane %v6176_v49, %v15679_v1  ;;  %v15710_v50 = vld [vmem:[#allocation15_spill] sm:$0xff] }
 0x89d   :  { %v5304_v24 = vpop.permute.xlu0 %5303  ;;  %15707 = vst [vmem:[#allocation54_spill] sm:$0xff] %v13870_v37 }
 0x89e   :  { %vm5347_vm9 = vcmp.ge.f32.partialorder %v5343_v38, 0.0  ;;  %v5351_v53 = vmul.f32 0.01, %v5343_v38  ;;  %v5312_v10 = vadd.f32 %v5304_v24, %v5261_v57  ;;  %v6191_v23 = vrot.slane %v6184_v55, %v15679_v1  ;;  %v15712_v24 = vld [vmem:[#allocation26_spill] sm:$0xff] }
 0x89f   :  { %v6235_v57 = vrot.slane %v15710_v50, %v15679_v1  ;;  %v6404_v0 = vmul.f32 %v13639_v33, %v15712_v24  ;;  %v15716_v33 = vld [vmem:[#allocation20_spill] sm:$0xff] }
 0x8a0   :  { %v5355_v51 = vsel %vm5347_vm9, %v5343_v38, %v5351_v53  ;;  %v5345_v9 = vadd.f32 %v15688_v34, %v5312_v10  ;;  %v13753_v19 = vpop.f32.mrb[64].mxu1  ;;  %v15711_v38 = vld [vmem:[#allocation13_spill] sm:$0xff]  ;;  %v6286_v10 = vrot.slane %v6278_v12, %v15679_v1  ;;  %vm4281_vm9 = vcmask 294032  }
 0x8a1   :  { %15690 = vst [vmem:[#allocation56_spill] sm:$0xff] %v13753_v19  ;;  %v13755_v29 = vpop.f32.mrb[65].mxu1  ;;  %8479 = vmatmul.mubr.msk.f32.vlgmr.msra.gmra.mrb[76].mxu1 %vm2408_vm4, %v5355_v51  ;;  %v6242_v53 = vrot.slane %v6235_v57, %v15679_v1  ;;  %v15714_v51 = vld [vmem:[#allocation29_spill] sm:$0xff] }
 0x8a2   :  { %15691 = vst [vmem:[#allocation41_spill] sm:$0xff] %v13755_v29  ;;  %8481 = vmatprep.mubr.msk.f32.mxu1 %vm2408_vm4, %v5356_v6  ;;  %vm5349_vm11 = vcmp.ge.f32.partialorder %v5345_v9, 0.0  ;;  %v5353_v52 = vmul.f32 0.01, %v5345_v9  ;;  %9197 = vmatpush3.bf16.msra.mxu1 %v12978_v3  ;;  %v6293_v6 = vrot.slane %v6286_v10, %v15679_v1  ;;  %v6353_v10 = vmul.f32 %v13828_v14, %v15702_v4 }
 0x8a3   :  { %9199 = vmatprep.subr.bf16.mxu1 %v13009_v8 }
 0x8a4   :  { %v13761_v13 = vpop.f32.mrb[66].mxu1  ;;  %v5357_v58 = vsel %vm5349_vm11, %v5345_v9, %v5353_v52  ;;  %v6512_v9 = vmul.f32 %v6457_v61, %v15714_v51  ;;  %v6412_v52 = vrot.slane %v6404_v0, %v15679_v1  ;;  %vm5531_vm11 = vcmask 589232  }
 0x8a5   :  { %15692 = vst [vmem:[#allocation57_spill] sm:$0xff] %v13761_v13  ;;  %v13763_v40 = vpop.f32.mrb[67].mxu1  ;;  %8482 = vmatmul.mubr.msk.f32.gmra.mrb[78].mxu1 %vm2408_vm4, %v5357_v58  ;;  %v15715_v58 = vld [vmem:[#allocation37_spill] sm:$0xff] }
 0x8a6   :  { %15693 = vst [vmem:[#allocation39_spill] sm:$0xff] %v13763_v40  ;;  %9201 = vmatpush3.bf16.msra.mxu1 %v13009_v8 }
 0x8a7   :  { %8492 = vmatprep.subr.msk.mxu1 %vm3507_vm7, %v13721_v15 }
 0x8a8   :  { %s9355_s1 = spop %9354 }
 0x8a9   :  { %v13775_v7 = vstv %s9355_s1 }
 0x8aa   :  { %v5578_v36 = vmul.f32 %v13775_v7, %v13771_v31  ;;  %v5579_v34 = vmul.f32 %v13775_v7, %v13773_v47  ;;  %8493 = vmatpush3.msk.msra.mxu1 %vm3507_vm7, %v13721_v15  ;;  %v13798_v15 = vmul.f32 %v13794_v21, %v15666_v16  ;;  %v13816_v16 = vmul.f32 %v13794_v21, %v15670_v11 }
 0x8ab   :  { %9203 = vmatprep.subr.bf16.mxu1 %v12978_v3  ;;  %v5610_v11 = vrot.slane %v5602_v44, %v15679_v1 }
 0x8ac   :  { %5588 = vrot.lane.b32.xlu1 %v5579_v34, %s9556_s9  ;;  %5586 = vrot.lane.b32.xlu0 %v5578_v36, %s9556_s9  ;;  %v5661_v36 = vrot.slane %v15716_v33, %v15679_v1  ;;  %v15717_v34 = vld [vmem:[#allocation27_spill] sm:$0xff] }
 0x8ad   :  { %v5617_v56 = vrot.slane %v5610_v11, %v15679_v1  ;;  %v5812_v59 = vmul.f32 %v13595_v25, %v15717_v34  ;;  %v6571_v11 = vrot.slane %v15720_v42, %v15679_v1  ;;  %v5887_v25 = vmul.f32 %v5832_v41, %v15714_v51 }
 0x8af   :  { %v5820_v49 = vrot.slane %v5812_v59, %v15679_v1  ;;  %v6852_v59 = vmul.f32 %v13798_v15, %v15699_v46 }
 0x8b0   :  { %6463 = vrot.lane.b32.xlu1 %v6457_v61, %s15695_s25  ;;  %5624 = vrot.lane.b32.xlu0 %v15696_v48, %s15674_s2  ;;  %v6419_v48 = vrot.slane %v6412_v52, %v15679_v1  ;;  %v15718_v61 = vld [vmem:[#allocation25_spill] sm:$0xff] }
 0x8b1   :  { %v5827_v50 = vrot.slane %v5820_v49, %v15679_v1 }
 0x8b4   :  { %6823 = vrot.lane.b32.xlu1 %v13798_v15, %s9567_s28  ;;  %5750 = vrot.lane.b32.xlu0 %v13802_v17, %s15676_s14  ;;  %v7780_v15 = vmul.f32 %v15704_v18, %v15714_v51 }
 0x8b8   :  { %6929 = vrot.lane.b32.xlu1 %v6923_v45, %s9560_s16  ;;  %5838 = vrot.lane.b32.xlu0 %v5832_v41, %s15695_s25 }
 0x8bc   :  { %7051 = vrot.lane.b32.xlu1 %v13816_v16, %s9571_s20  ;;  %6198 = vrot.lane.b32.xlu0 %v15697_v39, %s9567_s28  ;;  %v6520_v39 = vrot.slane %v6512_v9, %v15679_v1 }
 0x8be   :  { %v6527_v63 = vrot.slane %v6520_v39, %v15679_v1  ;;  %v7654_v39 = vmul.f32 %v15700_v28, %v15712_v24 }
 0x8c0   :  { %7159 = vrot.lane.b32.xlu1 %v13824_v43, %s15672_s23  ;;  %6304 = vrot.lane.b32.xlu0 %v13828_v14, %s9560_s16 }
 0x8c4   :  { %7499 = vrot.lane.b32.xlu1 %v15698_v26, %s15674_s2  ;;  %6426 = vrot.lane.b32.xlu0 %v13836_v54, %s9571_s20 }
 0x8c8   :  { %7625 = vrot.lane.b32.xlu1 %v15700_v28, %s15676_s14  ;;  %6534 = vrot.lane.b32.xlu0 %v15701_v27, %s15672_s23  ;;  %v5668_v27 = vrot.slane %v5661_v36, %v15679_v1  ;;  %v6361_v36 = vrot.slane %v6353_v10, %v15679_v1  ;;  %v6860_v28 = vrot.slane %v6852_v59, %v15679_v1 }
 0x8ca   :  { %v6867_v49 = vrot.slane %v6860_v28, %v15679_v1 }
 0x8cc   :  { %7731 = vrot.lane.b32.xlu1 %v15704_v18, %s15695_s25  ;;  %6874 = vrot.lane.b32.xlu0 %v15705_v22, %s15674_s2  ;;  %v6978_v22 = vmul.f32 %v6923_v45, %v15702_v4  ;;  %v7029_v45 = vmul.f32 %v6998_v60, %v15712_v24  ;;  %v15727_v18 = vld [vmem:[#allocation24_spill] sm:$0xff] }
 0x8ce   :  { %v6986_v57 = vrot.slane %v6978_v22, %v15679_v1  ;;  %v7037_v52 = vrot.slane %v7029_v45, %v15679_v1  ;;  %v15726_v22 = vld [vmem:[#allocation6_spill] sm:$0xff] }
 0x8d0   :  { %5618 = vrot.lane.b32.xlu1 %v5617_v56, %s15706_s11  ;;  %7000 = vrot.lane.b32.xlu0 %v6998_v60, %s15676_s14  ;;  %v13937_v60 = vmul.f32 %v13794_v21, %v15703_v30  ;;  %v6993_v9 = vrot.slane %v6986_v57, %v15679_v1  ;;  %v7603_v30 = vmul.f32 %v15713_v2, %v15702_v4 }
 0x8d1   :  { %v7044_v14 = vrot.slane %v7037_v52, %v15679_v1 }
 0x8d2   :  { %v6801_v21 = vmul.f32 %v13937_v60, %v15677_v5 }
 0x8d4   :  { %5744 = vrot.lane.b32.xlu1 %v5743_v32, %s15708_s19  ;;  %7106 = vrot.lane.b32.xlu0 %v13870_v37, %s15695_s25  ;;  %v15723_v32 = vld [vmem:[#allocation10_spill] sm:$0xff] }
 0x8d5   :  { %v5938_v55 = vmul.f32 %v13608_v20, %v15723_v32  ;;  %v7080_v20 = vmul.f32 %v13816_v16, %v15717_v34 }
 0x8d7   :  { %v5946_v0 = vrot.slane %v5938_v55, %v15679_v1  ;;  %v7088_v33 = vrot.slane %v7080_v20, %v15679_v1  ;;  %v7788_v55 = vrot.slane %v7780_v15, %v15679_v1 }
 0x8d8   :  { %6192 = vrot.lane.b32.xlu1 %v6191_v23, %s9578_s8  ;;  %7448 = vrot.lane.b32.xlu0 %v15711_v38, %s9567_s28  ;;  %v6578_v23 = vrot.slane %v6571_v11, %v15679_v1  ;;  %v5895_v38 = vrot.slane %v5887_v25, %v15679_v1  ;;  %v7662_v11 = vrot.slane %v7654_v39, %v15679_v1 }
 0x8d9   :  { %v5953_v16 = vrot.slane %v5946_v0, %v15679_v1  ;;  %v7095_v4 = vrot.slane %v7088_v33, %v15679_v1  ;;  %v7426_v25 = vmul.f32 %v15726_v22, %v15677_v5  ;;  %v7795_v45 = vrot.slane %v7788_v55, %v15679_v1  ;;  %v5680_v5 = vpop.permute.xlu1 %5679  ;;  %v15728_v0 = vld [vmem:[#allocation18_spill] sm:$0xff] }
 0x8db   :  { %v7434_v57 = vrot.slane %v7426_v25, %v15679_v1 }
 0x8dc   :  { %6243 = vrot.lane.b32.xlu1 %v6242_v53, %s9577_s27  ;;  %7554 = vrot.lane.b32.xlu0 %v15713_v2, %s9560_s16  ;;  %v9579_v53 = vmov 4   ;;  %v6368_v2 = vrot.slane %v6361_v36, %v15679_v1  ;;  %v14006_v36 = vld [vmem:[#allocation2 + $0x30] sm:$0xff] }
 0x8dd   :  { %9455 = vset.pattern.permute.xlu0 %v9579_v53  ;;  %v7441_v20 = vrot.slane %v7434_v57, %v15679_v1  ;;  %v7485_v53 = vrot.slane %v15728_v0, %v15679_v1  ;;  %v5784_v10 = vpop.permute.xlu1 %5783  ;;  %v5580_v59 = vmul.f32 %v13775_v7, %v14006_v36 }
 0x8e0   :  { %6294 = vrot.lane.b32.xlu1 %v6293_v6, %s15706_s11  ;;  %7676 = vrot.lane.b32.xlu0 %v15715_v58, %s9571_s20  ;;  %s15722_s20 = smov 2   ;;  %v5902_v6 = vrot.slane %v5895_v38, %v15679_v1  ;;  %v7528_v38 = vmul.f32 %v15698_v26, %v15709_v62 }
 0x8e2   :  { %v7536_v52 = vrot.slane %v7528_v38, %v15679_v1 }
 0x8e4   :  { %6420 = vrot.lane.b32.xlu1 %v6419_v48, %s15708_s19  ;;  %7802 = vrot.lane.b32.xlu0 %v15718_v61, %s15672_s23  ;;  %v13906_v44 = vpop.f32.mrb[68].mxu1  ;;  %v6809_v48 = vrot.slane %v6801_v21, %v15679_v1  ;;  %v7543_v26 = vrot.slane %v7536_v52, %v15679_v1  ;;  %v5910_v21 = vpop.permute.xlu1 %5909 }
 0x8e5   :  { %15719 = vst [vmem:[#allocation51_spill] sm:$0xff] %v13906_v44  ;;  %v13913_v56 = vpop.f32.mrb[69].mxu1 }
 0x8e6   :  { %15721 = vst [vmem:[#allocation11_spill] sm:$0xff] %v13913_v56  ;;  %v6816_v42 = vrot.slane %v6809_v48, %v15679_v1 }
 0x8e8   :  { %6528 = vrot.lane.b32.xlu1 %v6527_v63, %s9567_s28  ;;  %5669 = vrot.lane.b32.xlu0 %v5668_v27, %s15722_s20  ;;  %v13921_v12 = vpop.f32.mrb[70].mxu1  ;;  %v7611_v27 = vrot.slane %v7603_v30, %v15679_v1  ;;  %v7669_v63 = vrot.slane %v7662_v11, %v15679_v1 }
 0x8e9   :  { %15724 = vst [vmem:[#allocation40_spill] sm:$0xff] %v13921_v12  ;;  %v13925_v41 = vpop.f32.mrb[71].mxu1 }
 0x8ea   :  { %15725 = vst [vmem:[#allocation55_spill] sm:$0xff] %v13925_v41  ;;  %v7618_v46 = vrot.slane %v7611_v27, %v15679_v1 }
 0x8ec   :  { %6579 = vrot.lane.b32.xlu1 %v6578_v23, %s15674_s2  ;;  %5828 = vrot.lane.b32.xlu0 %v5827_v50, %s9567_s28  ;;  %v6911_v23 = vrot.slane %v15727_v18, %v15679_v1 }
 0x8ee   :  { %v6918_v50 = vrot.slane %v6911_v23, %v15679_v1 }
 0x8f0   :  { %6994 = vrot.lane.b32.xlu1 %v6993_v9, %s15706_s11  ;;  %5903 = vrot.lane.b32.xlu0 %v5902_v6, %s15674_s2  ;;  %v7188_v9 = vmul.f32 %v13824_v43, %v15723_v32  ;;  %v7492_v6 = vrot.slane %v7485_v53, %v15679_v1  ;;  %v6250_v43 = vpop.permute.xlu1 %6249 }
 0x8f2   :  { %v7196_v62 = vrot.slane %v7188_v9, %v15679_v1  ;;  %v5536_v9 = vld [vmem:[%s15510_s12] sm:$0x1] }
 0x8f4   :  { %7045 = vrot.lane.b32.xlu1 %v7044_v14, %s15722_s20  ;;  %5954 = vrot.lane.b32.xlu0 %v5953_v16, %s9560_s16  ;;  %v7705_v16 = vmul.f32 %v15715_v58, %v15717_v34  ;;  %v7203_v30 = vrot.slane %v7196_v62, %v15679_v1  ;;  %v14008_v58 = vpop.permute.xlu0 %5567  ;;  %v6376_v48 = vpop.permute.xlu1 %6375 }
 0x8f5   :  { %v5570_v62 = vsub.f32 %v5536_v9, %v14008_v58 }
 0x8f6   :  { %v7713_v14 = vrot.slane %v7705_v16, %v15679_v1 }
 0x8f8   :  { %7096 = vrot.lane.b32.xlu1 %v7095_v4, %s15708_s19  ;;  %6369 = vrot.lane.b32.xlu0 %v6368_v2, %s15722_s20  ;;  %v7720_v33 = vrot.slane %v7713_v14, %v15679_v1  ;;  %v14042_v14 = vld [vmem:[#allocation2 + $0x8] sm:$0xff] }
 0x8fc   :  { %7619 = vrot.lane.b32.xlu1 %v7618_v46, %s9577_s27  ;;  %6817 = vrot.lane.b32.xlu0 %v6816_v42, %s9580_s4 }
 0x900   :  { %7670 = vrot.lane.b32.xlu1 %v7669_v63, %s15706_s11  ;;  %6868 = vrot.lane.b32.xlu0 %v6867_v49, %s9578_s8 }
 0x904   :  { %7796 = vrot.lane.b32.xlu1 %v7795_v45, %s15708_s19  ;;  %6919 = vrot.lane.b32.xlu0 %v6918_v50, %s9577_s27 }
 0x908   :  { %7442 = vrot.lane.b32.xlu0 %v7441_v20, %s9581_s21 }
 0x90c   :  { %7493 = vrot.lane.b32.xlu0 %v7492_v6, %s9580_s4 }
 0x910   :  { %7544 = vrot.lane.b32.xlu0 %v7543_v26, %s9578_s8 }
 0x914   :  { %7204 = vrot.lane.b32.xlu0 %v7203_v30, %s9567_s28 }
 0x918   :  { %7721 = vrot.lane.b32.xlu0 %v7720_v33, %s15722_s20 }
 0x91c   :  { %5590 = vrot.lane.b32.xlu0 %v5580_v59, %s9556_s9 }
 0x91e   :  { %v14013_v39 = vpop.permute.xlu0 %5586  ;;  %v14015_v4 = vpop.permute.xlu1 %5588 }
 0x922   :  { %v5625_v2 = vpop.permute.xlu0 %5624  ;;  %v6464_v1 = vpop.permute.xlu1 %6463 }
 0x923   :  { %9356 = vpush %v5625_v2  ;;  %v14053_v2 = vld [vmem:[#allocation2 + $0x20] sm:$0xff] }
 0x924   :  { %9358 = vpush %v5680_v5 }
 0x926   :  { %v5751_v27 = vpop.permute.xlu0 %5750  ;;  %v6824_v15 = vpop.permute.xlu1 %6823 }
 0x927   :  { %9360 = vpush %v5751_v27  ;;  %v5779_v27 = vmul.f32 %v13802_v17, %v15712_v24  ;;  %v14081_v24 = vld [vmem:[#allocation2 + $0x48] sm:$0xff] }
 0x928   :  { %9362 = vpush %v5784_v10 }
 0x92a   :  { %v5839_v42 = vpop.permute.xlu0 %5838  ;;  %v6930_v25 = vpop.permute.xlu1 %6929 }
 0x92b   :  { %9364 = vpush %v5839_v42 }
 0x92c   :  { %9366 = vpush %v5910_v21  ;;  %v14018_v46 = vpop.f32.mrb[72].mxu1 }
 0x92d   :  { %9368 = vpush %v13853_v35  ;;  %v14020_v11 = vpop.f32.mrb[73].mxu1 }
 0x92e   :  { %15729 = vst [vmem:[#allocation33_spill] sm:$0xff] %v14020_v11  ;;  %v6199_v28 = vpop.permute.xlu0 %6198  ;;  %v7052_v23 = vpop.permute.xlu1 %7051 }
 0x92f   :  { %9370 = vpush %v6199_v28  ;;  %v14060_v28 = vld [vmem:[#allocation2 + $0x40] sm:$0xff] }
 0x930   :  { %9372 = vpush %v6250_v43  ;;  %v14022_v63 = vpop.f32.mrb[74].mxu1  ;;  %15731 = vst [vmem:[#allocation19_spill] sm:$0xff] %v14060_v28 }
 0x931   :  { %v14024_v49 = vpop.f32.mrb[75].mxu1 }
 0x932   :  { %15730 = vst [vmem:[#allocation32_spill] sm:$0xff] %v14024_v49  ;;  %v6305_v55 = vpop.permute.xlu0 %6304  ;;  %v7160_v45 = vpop.permute.xlu1 %7159 }
 0x933   :  { %9374 = vpush %v6305_v55 }
 0x934   :  { %9376 = vpush %v6376_v48 }
 0x936   :  { %v6427_v18 = vpop.permute.xlu0 %6426  ;;  %v7500_v5 = vpop.permute.xlu1 %7499 }
 0x937   :  { %9378 = vpush %v6427_v18 }
 0x938   :  { %9380 = vpush %v6464_v1 }
 0x93a   :  { %v6535_v35 = vpop.permute.xlu0 %6534  ;;  %v7626_v20 = vpop.permute.xlu1 %7625 }
 0x93b   :  { %9382 = vpush %v6535_v35 }
 0x93c   :  { %9384 = vpush %v13937_v60 }
 0x93d   :  { %9386 = vpush %v6824_v15 }
 0x93e   :  { %v6875_v50 = vpop.permute.xlu0 %6874  ;;  %v7732_v60 = vpop.permute.xlu1 %7731 }
 0x93f   :  { %9388 = vpush %v6875_v50  ;;  %v5581_v50 = vmul.f32 %v13775_v7, %v14081_v24 }
 0x940   :  { %9390 = vpush %v6930_v25  ;;  %v14062_v25 = vld [vmem:[#allocation2 + $0x58] sm:$0xff] }
 0x941   :  { %15732 = vst [vmem:[#allocation14_spill] sm:$0xff] %v14062_v25 }
 0x942   :  { %v7001_v57 = vpop.permute.xlu0 %7000 }
 0x943   :  { %9392 = vpush %v7001_v57 }
 0x944   :  { %9394 = vpush %v7052_v23 }
 0x946   :  { %v7107_v38 = vpop.permute.xlu0 %7106 }
 0x947   :  { %9396 = vpush %v7107_v38 }
 0x948   :  { %9398 = vpush %v7160_v45 }
 0x949   :  { %9400 = vpush %v15726_v22  ;;  %v5619_v22 = vpop.permute.xlu1 %5618 }
 0x94a   :  { %v7449_v0 = vpop.permute.xlu0 %7448  ;;  %v5621_v30 = vsub.f32 %v5570_v62, %v5619_v22 }
 0x94b   :  { %9402 = vpush %v7449_v0  ;;  %v14096_v0 = vld [vmem:[#allocation2 + $0x38] sm:$0xff] }
 0x94c   :  { %9404 = vpush %v7500_v5 }
 0x94d   :  { %v5745_v48 = vpop.permute.xlu1 %5744 }
 0x94e   :  { %v7555_v53 = vpop.permute.xlu0 %7554 }
 0x94f   :  { %9406 = vpush %v7555_v53  ;;  %v14098_v53 = vld [vmem:[#allocation2 + $0x50] sm:$0xff] }
 0x950   :  { %9408 = vpush %v7626_v20 }
 0x952   :  { %v7677_v10 = vpop.permute.xlu0 %7676 }
 0x953   :  { %9410 = vpush %v7677_v10 }
 0x954   :  { %9412 = vpush %v7732_v60  ;;  %s9357_s23 = spop %9356 }
 0x955   :  { %v14031_v6 = vstv %s9357_s23  ;;  %s9359_s6 = spop %9358 }
 0x956   :  { %v5629_v52 = vmul.f32 %v14031_v6, %v13771_v31  ;;  %v5630_v16 = vmul.f32 %v14031_v6, %v13773_v47  ;;  %v7803_v26 = vpop.permute.xlu0 %7802  ;;  %v14038_v21 = vstv %s9359_s6 }
 0x957   :  { %9414 = vpush %v7803_v26  ;;  %v5685_v33 = vmul.f32 %v14038_v21, %v14042_v14  ;;  %v5684_v58 = vmul.f32 %v14038_v21, %v13771_v31  ;;  %v5687_v15 = vmul.f32 %v14038_v21, %v14053_v2  ;;  %v5686_v23 = vmul.f32 %v14038_v21, %v13773_v47 }
 0x958   :  { %5639 = vrot.lane.b32.xlu0 %v5630_v16, %s9558_s7  ;;  %5637 = vrot.lane.b32.xlu1 %v5629_v52, %s9558_s7  ;;  %s9361_s30 = spop %9360 }
 0x959   :  { %s14046_s14 = spop %9362  ;;  %v14068_v35 = vstv %s9361_s30 }
 0x95a   :  { %v5670_v43 = vpop.permute.xlu0 %5669  ;;  %v5755_v38 = vmul.f32 %v14068_v35, %v14042_v14  ;;  %v5756_v9 = vmul.f32 %v14068_v35, %v14053_v2 }
 0x95b   :  { %v5672_v59 = vsub.f32 %v5621_v30, %v5670_v43  ;;  %v15733_v30 = vld [vmem:[#allocation3_spill] sm:$0xff] }
 0x95c   :  { %5702 = vrot.lane.b32.xlu0 %v5685_v33, %s9557_s15  ;;  %s14051_s27 = spop %9364  ;;  %5700 = vrot.lane.b32.xlu1 %v5684_v58, %s9557_s15  ;;  %v5631_v33 = vmul.f32 %v14031_v6, %v14006_v36  ;;  %v5632_v58 = vmul.f32 %v14031_v6, %v14081_v24  ;;  %v5688_v6 = vmul.f32 %v14038_v21, %v14006_v36 }
 0x95d   :  { %v5747_v1 = vsub.f32 %v5672_v59, %v5745_v48  ;;  %s9367_s24 = spop %9366  ;;  %v14129_v59 = vstv %s14046_s14 }
 0x95e   :  { %v5829_v42 = vpop.permute.xlu0 %5828  ;;  %v14064_v55 = vstv %s9367_s24  ;;  %s14078_s26 = spop %9368  ;;  %v5788_v48 = vmul.f32 %v14129_v59, %v14042_v14 }
 0x95f   :  { %v5780_v18 = vsub.f32 %v5747_v1, %v5779_v27  ;;  %v14072_v45 = vmul.f32 %v14064_v55, %v14060_v28  ;;  %v14076_v17 = vmul.f32 %v14064_v55, %v14062_v25  ;;  %v5689_v1 = vmul.f32 %v14038_v21, %v14096_v0 }
 0x960   :  { %5706 = vrot.lane.b32.xlu0 %v5687_v15, %s9557_s15  ;;  %5704 = vrot.lane.b32.xlu1 %v5686_v23, %s9557_s15  ;;  %s14084_s1 = spop %9370  ;;  %v14149_v27 = vstv %s14051_s27 }
 0x961   :  { %v5831_v57 = vsub.f32 %v5780_v18, %v5829_v42  ;;  %s14090_s25 = spop %9372 }
 0x962   :  { %v5904_v5 = vpop.permute.xlu0 %5903 }
 0x963   :  { %v5906_v7 = vsub.f32 %v5831_v57, %v5904_v5  ;;  %v5789_v57 = vmul.f32 %v14129_v59, %v14053_v2 }
 0x964   :  { %5592 = vrot.lane.b32.xlu0 %v5581_v50, %s9556_s9  ;;  %s9375_s0 = spop %9374  ;;  %5763 = vrot.lane.b32.xlu1 %v5755_v38, %s9561_s17  ;;  %v5843_v50 = vmul.f32 %v14149_v27, %v14042_v14 }
 0x965   :  { %v14094_v20 = vstv %s9375_s0  ;;  %s9377_s3 = spop %9376 }
 0x966   :  { %v14100_v60 = vstv %s9377_s3  ;;  %v5955_v10 = vpop.permute.xlu0 %5954  ;;  %v14114_v26 = vmul.f32 %v14094_v20, %v14096_v0  ;;  %v14121_v62 = vmul.f32 %v14094_v20, %v14098_v53 }
 0x967   :  { %v14106_v22 = vmul.f32 %v14100_v60, %v14096_v0  ;;  %v14110_v52 = vmul.f32 %v14100_v60, %v14098_v53  ;;  %v5957_v16 = vsub.f32 %v5906_v7, %v5955_v10 }
 0x968   :  { %5765 = vrot.lane.b32.xlu1 %v5756_v9, %s9561_s17  ;;  %s14117_s11 = spop %9378  ;;  %v14186_v9 = vld [vmem:[#allocation2 + $0x28] sm:$0xff] }
 0x969   :  { %v5962_v43 = vrot.slane %v5957_v16, %v15733_v30  ;;  %s14126_s19 = spop %9380 }
 0x96b   :  { %5964 = vperm.xlu0 %9455, %v5962_v43  }
 0x96c   :  { %s14131_s8 = spop %9382  ;;  %5641 = vrot.lane.b32.xlu1 %v5631_v33, %s9558_s7  ;;  %v14193_v33 = vld [vmem:[#allocation2 + $0x10] sm:$0xff] }
 0x96d   :  { %s14136_s20 = spop %9384 }
 0x96e   :  { %s14140_s4 = spop %9386 }
 0x96f   :  { %5643 = vrot.lane.b32.xlu0 %v5632_v58, %s9558_s7 }
 0x970   :  { %5796 = vrot.lane.b32.xlu1 %v5788_v48, %s9562_s18  ;;  %s14144_s21 = spop %9388 }
 0x971   :  { %s14151_s28 = spop %9390 }
 0x973   :  { %5710 = vrot.lane.b32.xlu0 %v5689_v1, %s9557_s15 }
 0x974   :  { %s9393_s22 = spop %9392  ;;  %v14156_v42 = vpop.f32.mrb[76].mxu1  ;;  %5708 = vrot.lane.b32.xlu1 %v5688_v6, %s9557_s15  ;;  %v5690_v6 = vmul.f32 %v14038_v21, %v14081_v24 }
 0x975   :  { %v14159_v15 = vstv %s9393_s22  ;;  %s9395_s23 = spop %9394  ;;  %v14165_v23 = vpop.f32.mrb[77].mxu1 }
 0x976   :  { %15734 = vst [vmem:[#allocation30_spill] sm:$0xff] %v14159_v15  ;;  %v14163_v18 = vmul.f32 %v14159_v15, %v14096_v0  ;;  %v14173_v5 = vmul.f32 %v14159_v15, %v14098_v53  ;;  %v14175_v38 = vstv %s9395_s23 }
 0x977   :  { %15737 = vst [vmem:[#allocation7_spill] sm:$0xff] %v14175_v38  ;;  %v14179_v7 = vmul.f32 %v14175_v38, %v14096_v0  ;;  %v14183_v10 = vmul.f32 %v14175_v38, %v14098_v53  ;;  %5859 = vrot.lane.b32.xlu0 %v5843_v50, %s9559_s5  ;;  %v5844_v50 = vmul.f32 %v14149_v27, %v14193_v33 }
 0x978   :  { %15735 = vst [vmem:[#allocation4_spill] sm:$0xff] %v14163_v18  ;;  %15736 = vst [vmem:[#allocation38_spill] sm:$0xff] %v14173_v5  ;;  %s9397_s6 = spop %9396  ;;  %v14188_v16 = vpop.f32.mrb[78].mxu1  ;;  %5798 = vrot.lane.b32.xlu1 %v5789_v57, %s9562_s18  ;;  %v6201_v5 = vstv %s14084_s1  ;;  %v6381_v38 = vmul.f32 %v14100_v60, %v14053_v2 }
 0x979   :  { %15738 = vst [vmem:[#allocation44_spill] sm:$0xff] %v14179_v7  ;;  %15739 = vst [vmem:[#allocation45_spill] sm:$0xff] %v14183_v10  ;;  %v14191_v43 = vstv %s9397_s6  ;;  %s9399_s30 = spop %9398  ;;  %v14203_v1 = vpop.f32.mrb[79].mxu1 }
 0x97a   :  { %15740 = vst [vmem:[#allocation42_spill] sm:$0xff] %v14191_v43  ;;  %v14197_v58 = vmul.f32 %v14191_v43, %v14186_v9  ;;  %v14201_v48 = vmul.f32 %v14191_v43, %v14060_v28  ;;  %v14211_v57 = vmul.f32 %v14191_v43, %v14062_v25  ;;  %v7162_v10 = vstv %s9399_s30  ;;  %s14679_s0 = spop %9400  ;;  %s9585_s30 = smov 18  }
 0x97b   :  { %v14214_v61 = vmul.f32 %v7162_v10, %v14193_v33  ;;  %v14217_v32 = vmul.f32 %v7162_v10, %v14186_v9  ;;  %v14223_v7 = vmul.f32 %v7162_v10, %v14062_v25  ;;  %5712 = vrot.lane.b32.xlu0 %v5690_v6, %s9557_s15  ;;  %v5757_v6 = vmul.f32 %v14068_v35, %v14096_v0 }
 0x97c   :  { %15741 = vst [vmem:[#allocation52_spill] sm:$0xff] %v14197_v58  ;;  %15742 = vst [vmem:[#allocation43_spill] sm:$0xff] %v14201_v48  ;;  %v14220_v48 = vmul.f32 %v7162_v10, %v14060_v28  ;;  %5861 = vrot.lane.b32.xlu1 %v5844_v50, %s9559_s5  ;;  %v5846_v10 = vmul.f32 %v14149_v27, %v14186_v9  ;;  %v14245_v50 = vstv %s14090_s25  ;;  %s9403_s3 = spop %9402 }
 0x97d   :  { %15743 = vst [vmem:[#allocation48_spill] sm:$0xff] %v14211_v57  ;;  %15744 = vst [vmem:[#allocation49_spill] sm:$0xff] %v14214_v61  ;;  %v5845_v57 = vmul.f32 %v14149_v27, %v14053_v2  ;;  %v5691_v61 = vmul.f32 %v14038_v21, %v14098_v53  ;;  %v6204_v21 = vmul.f32 %v6201_v5, %v13773_v47 }
 0x97e   :  { %15745 = vst [vmem:[#allocation46_spill] sm:$0xff] %v14217_v32  ;;  %15746 = vst [vmem:[#allocation53_spill] sm:$0xff] %v14220_v48  ;;  %v6203_v48 = vmul.f32 %v6201_v5, %v13771_v31  ;;  %v5758_v32 = vmul.f32 %v14068_v35, %v14098_v53  ;;  %v5790_v35 = vmul.f32 %v14129_v59, %v14096_v0 }
 0x97f   :  { %15747 = vst [vmem:[#allocation47_spill] sm:$0xff] %v14223_v7  ;;  %5863 = vrot.lane.b32.xlu0 %v5845_v57, %s9559_s5  ;;  %v14237_v7 = vpop.permute.xlu1 %6192  ;;  %v6254_v57 = vmul.f32 %v14245_v50, %v13771_v31 }
 0x980   :  { %5714 = vrot.lane.b32.xlu1 %v5691_v61, %s9557_s15 }
 0x983   :  { %6211 = vrot.lane.b32.xlu0 %v6203_v48, %s9556_s9  ;;  %v14249_v61 = vpop.permute.xlu1 %6243  ;;  %v5914_v48 = vmul.f32 %v14064_v55, %v14193_v33 }
 0x984   :  { %5865 = vrot.lane.b32.xlu1 %v5846_v10, %s9559_s5  ;;  %v14259_v10 = vmul.f32 %v14191_v43, %v14096_v0 }
 0x986   :  { %15748 = vst [vmem:[#allocation34_spill] sm:$0xff] %v14259_v10  ;;  %v5847_v10 = vmul.f32 %v14149_v27, %v14096_v0 }
 0x987   :  { %5767 = vrot.lane.b32.xlu0 %v5757_v6, %s9561_s17  ;;  %v14263_v6 = vmul.f32 %v14191_v43, %v14098_v53  ;;  %v14269_v18 = vpop.permute.xlu1 %6294  ;;  %v6206_v43 = vmul.f32 %v6201_v5, %v14081_v24 }
 0x988   :  { %6213 = vrot.lane.b32.xlu1 %v6204_v21, %s9556_s9  ;;  %v5915_v21 = vmul.f32 %v14064_v55, %v14186_v9 }
 0x989   :  { %15749 = vst [vmem:[#allocation16_spill] sm:$0xff] %v14263_v6  ;;  %v14289_v6 = vpop.permute.xlu0 %6369 }
 0x98b   :  { %6262 = vrot.lane.b32.xlu0 %v6254_v57, %s9558_s7  ;;  %v6309_v57 = vmul.f32 %v14094_v20, %v13771_v31  ;;  %v14279_v55 = vpop.permute.xlu1 %6420 }
 0x98c   :  { %5922 = vrot.lane.b32.xlu1 %v5914_v48, %s9560_s16  ;;  %v6255_v48 = vmul.f32 %v14245_v50, %v13773_v47 }
 0x98d   :  { %v14302_v58 = vpop.permute.xlu0 %6817 }
 0x98f   :  { %5924 = vrot.lane.b32.xlu0 %v5915_v21, %s9560_s16  ;;  %v6310_v21 = vmul.f32 %v14094_v20, %v14042_v14 }
 0x990   :  { %5769 = vrot.lane.b32.xlu1 %v5758_v32, %s9561_s17  ;;  %v6312_v32 = vmul.f32 %v14094_v20, %v14053_v2 }
 0x993   :  { %6325 = vrot.lane.b32.xlu0 %v6309_v57, %s9557_s15  ;;  %v6311_v57 = vmul.f32 %v14094_v20, %v13773_v47 }
 0x994   :  { %6264 = vrot.lane.b32.xlu1 %v6255_v48, %s9558_s7  ;;  %v14293_v48 = vpop.permute.xlu1 %6528 }
 0x997   :  { %5800 = vrot.lane.b32.xlu0 %v5790_v35, %s9562_s18  ;;  %v9582_v35 = vmov 5  }
 0x998   :  { %6327 = vrot.lane.b32.xlu1 %v6310_v21, %s9557_s15  ;;  %9456 = vset.pattern.permute.xlu0 %v9582_v35  ;;  %v5791_v21 = vmul.f32 %v14129_v59, %v14098_v53  ;;  %v14305_v47 = vpop.permute.xlu1 %6579  ;;  %v6205_v59 = vmul.f32 %v6201_v5, %v14006_v36  ;;  %v14316_v35 = vpop.permute.xlu0 %6868 }
 0x99b   :  { %6331 = vrot.lane.b32.xlu0 %v6312_v32, %s9557_s15  ;;  %v5849_v32 = vmul.f32 %v14149_v27, %v14098_v53 }
 0x99c   :  { %6329 = vrot.lane.b32.xlu1 %v6311_v57, %s9557_s15  ;;  %v5848_v57 = vmul.f32 %v14149_v27, %v14060_v28 }
 0x99f   :  { %5867 = vrot.lane.b32.xlu0 %v5847_v10, %s9559_s5  ;;  %v5850_v10 = vmul.f32 %v14149_v27, %v14062_v25  ;;  %v4211_v25 = vsel %vm3596_vm12, %v13925_v41, 0.0 }
 0x9a0   :  { %5802 = vrot.lane.b32.xlu1 %v5791_v21, %s9562_s18  ;;  %v14318_v21 = vpop.permute.xlu1 %6994 }
 0x9a1   :  { %15750 = vst [vmem:[#allocation12_spill] sm:$0xff] %v14318_v21 }
 0x9a3   :  { %5871 = vrot.lane.b32.xlu0 %v5849_v32, %s9559_s5  ;;  %v6380_v32 = vmul.f32 %v14100_v60, %v14042_v14  ;;  %v3618_v60 = vmul.f32 %v13755_v29, %v13755_v29 }
 0x9a4   :  { %5869 = vrot.lane.b32.xlu1 %v5848_v57, %s9559_s5  ;;  %v14326_v57 = vpop.permute.xlu0 %6919  ;;  %v14329_v27 = vpop.permute.xlu1 %7045 }
 0x9a5   :  { %15751 = vst [vmem:[#allocation17_spill] sm:$0xff] %v14329_v27 }
 0x9a7   :  { %6215 = vrot.lane.b32.xlu0 %v6205_v59, %s9556_s9 }
 0x9a8   :  { %5873 = vrot.lane.b32.xlu1 %v5850_v10, %s9559_s5  ;;  %v14334_v59 = vpop.permute.xlu0 %7442  ;;  %v14336_v10 = vpop.permute.xlu1 %7096 }
 0x9a9   :  { %15752 = vst [vmem:[#allocation8_spill] sm:$0xff] %v14334_v59  ;;  %15753 = vst [vmem:[#allocation31_spill] sm:$0xff] %v14336_v10 }
 0x9ab   :  { %6217 = vrot.lane.b32.xlu0 %v6206_v43, %s9556_s9 }
 0x9ac   :  { %6388 = vrot.lane.b32.xlu1 %v6380_v32, %s9561_s17  ;;  %v14338_v5 = vpop.permute.xlu0 %7493  ;;  %v14340_v37 = vpop.permute.xlu1 %7619 }
 0x9ad   :  { %15754 = vst [vmem:[#allocation22_spill] sm:$0xff] %v14338_v5  ;;  %15755 = vst [vmem:[#allocation28_spill] sm:$0xff] %v14340_v37  ;;  %v3622_v37 = vsel %vm3596_vm12, %v3618_v60, 0.0  ;;  %v3597_v60 = vsel %vm3596_vm12, %v13755_v29, 0.0 }
 0x9b0   :  { %6390 = vrot.lane.b32.xlu1 %v6381_v38, %s9561_s17  ;;  %v14342_v43 = vpop.permute.xlu0 %7544  ;;  %v14344_v51 = vpop.permute.xlu1 %7670  ;;  %v3600_v38 = vsel %vm3596_vm12, %v13753_v19, 0.0 }
 0x9b1   :  { %15756 = vst [vmem:[#allocation5_spill] sm:$0xff] %v14342_v43  ;;  %15757 = vst [vmem:[#allocation35_spill] sm:$0xff] %v14344_v51 }
 0x9b4   :  { %v14346_v32 = vpop.permute.xlu0 %7204  ;;  %v14348_v15 = vpop.permute.xlu1 %7796 }
 0x9b5   :  { %15758 = vst [vmem:[#allocation21_spill] sm:$0xff] %v14346_v32  ;;  %15759 = vst [vmem:[#allocation9_spill] sm:$0xff] %v14348_v15  ;;  %v3620_v15 = vmul.f32 %v13763_v40, %v13763_v40  ;;  %v3603_v32 = vsel %vm3596_vm12, %v13763_v40, 0.0  ;;  %v4208_v40 = vsel %vm3596_vm12, %v13906_v44, 0.0 }
 0x9b8   :  { %v14356_v5 = vpop.permute.xlu0 %7721 }
 0x9b9   :  { %15760 = vst [vmem:[#allocation15_spill] sm:$0xff] %v14356_v5  ;;  %v3619_v5 = vmul.f32 %v13753_v19, %v13753_v19 }
 0x9bb   :  { %v3625_v27 = vsel %vm3596_vm12, %v3619_v5, 0.0 }
 0x9bc   :  { %v14361_v43 = vpop.permute.xlu0 %5590 }
 0x9bd   :  { %15761 = vst [vmem:[#allocation13_spill] sm:$0xff] %v14361_v43 }
 0x9ca   :  { %v14354_v59 = vpop.permute.xlu1 %5637  ;;  %3601 = vadd.xlane.f32.xlu0 %v3600_v38  ;;  %v3628_v38 = vsel %vm3596_vm12, %v3620_v15, 0.0  ;;  %v3606_v15 = vsel %vm3596_vm12, %v13761_v13, 0.0 }
 0x9ce   :  { %3623 = vadd.xlane.f32.xlu0 %v3622_v37  ;;  %v14359_v51 = vpop.permute.xlu1 %5700  ;;  %v14373_v37 = vpop.permute.xlu0 %5639 }
 0x9d2   :  { %3604 = vadd.xlane.f32.xlu0 %v3603_v32  ;;  %v14367_v10 = vpop.permute.xlu1 %5704  ;;  %v4226_v32 = vmul.f32 %v13913_v56, %v13913_v56  ;;  %v5703_v19 = vpop.permute.xlu0 %5702 }
 0x9d4   :  { %3598 = vadd.xlane.f32.xlu1 %v3597_v60  ;;  %v3621_v60 = vmul.f32 %v13761_v13, %v13761_v13  ;;  %v4230_v5 = vsel %vm3596_vm12, %v4226_v32, 0.0  ;;  %v4205_v32 = vsel %vm3596_vm12, %v13913_v56, 0.0  ;;  %v4853_v13 = vmul.f32 %v14024_v49, %v14024_v49 }
 0x9d6   :  { %3629 = vadd.xlane.f32.xlu0 %v3628_v38  ;;  %v14376_v43 = vpop.permute.xlu1 %5763  ;;  %v3631_v38 = vsel %vm3596_vm12, %v3621_v60, 0.0  ;;  %v14393_v28 = vpop.permute.xlu0 %5706 }
 0x9d8   :  { %3626 = vadd.xlane.f32.xlu1 %v3625_v27 }
 0x9da   :  { %4209 = vadd.xlane.f32.xlu0 %v4208_v40  ;;  %v14383_v29 = vpop.permute.xlu1 %5765  ;;  %v4228_v40 = vmul.f32 %v13925_v41, %v13925_v41  ;;  %v4833_v41 = vsel %vm3596_vm12, %v14018_v46, 0.0 }
 0x9dc   :  { %3607 = vadd.xlane.f32.xlu1 %v3606_v15  ;;  %v4227_v15 = vmul.f32 %v13906_v44, %v13906_v44  ;;  %v4236_v60 = vsel %vm3596_vm12, %v4228_v40, 0.0  ;;  %v4229_v40 = vmul.f32 %v13921_v12, %v13921_v12 }
 0x9de   :  { %4231 = vadd.xlane.f32.xlu0 %v4230_v5  ;;  %v14390_v27 = vpop.permute.xlu1 %5641  ;;  %v14404_v5 = vpop.permute.xlu0 %5592 }
 0x9df   :  { %15762 = vst [vmem:[#allocation26_spill] sm:$0xff] %v14390_v27  ;;  %15763 = vst [vmem:[#allocation36_spill] sm:$0xff] %v14404_v5  ;;  %v4233_v27 = vsel %vm3596_vm12, %v4227_v15, 0.0  ;;  %v14423_v15 = vstv %s13766_s29  ;;  %s9586_s29 = smov 36  }
 0x9e0   :  { %3632 = vadd.xlane.f32.xlu1 %v3631_v38 }
 0x9e2   :  { %4212 = vadd.xlane.f32.xlu0 %v4211_v25  ;;  %v5797_v21 = vpop.permute.xlu1 %5796  ;;  %v4851_v25 = vmul.f32 %v14020_v11, %v14020_v11 }
 0x9e4   :  { %4206 = vadd.xlane.f32.xlu1 %v4205_v32 }
 0x9e6   :  { %4237 = vadd.xlane.f32.xlu0 %v4236_v60  ;;  %v14406_v38 = vpop.permute.xlu1 %5708  ;;  %v4214_v60 = vsel %vm3596_vm12, %v13921_v12, 0.0 }
 0x9e7   :  { %15764 = vst [vmem:[#allocation37_spill] sm:$0xff] %v14406_v38  ;;  %v5547_v38 = vmul.f32 %v14423_v15, %v13771_v31  ;;  %v5716_v31 = vsel %vm2637_vm5, %v14359_v51, %v5703_v19  ;;  %v5458_v19 = vsel %vm3596_vm12, %v14156_v42, 0.0  ;;  %v9583_v51 = vmov 6  }
 0x9e8   :  { %4234 = vadd.xlane.f32.xlu1 %v4233_v27  ;;  %v4855_v27 = vsel %vm3596_vm12, %v4851_v25, 0.0 }
 0x9e9   :  { %9457 = vset.pattern.permute.xlu1 %v9583_v51  ;;  %v5478_v51 = vmul.f32 %v14203_v1, %v14203_v1 }
 0x9ea   :  { %4834 = vadd.xlane.f32.xlu0 %v4833_v41  ;;  %v14413_v56 = vpop.permute.xlu0 %5964  ;;  %v14415_v32 = vpop.permute.xlu1 %5798  ;;  %v4239_v41 = vsel %vm3596_vm12, %v4229_v40, 0.0  ;;  %v4852_v40 = vmul.f32 %v14018_v46, %v14018_v46 }
 0x9ec   :  { %4215 = vadd.xlane.f32.xlu1 %v4214_v60  ;;  %v4836_v60 = vsel %vm3596_vm12, %v14024_v49, 0.0 }
 0x9ee   :  { %4856 = vadd.xlane.f32.xlu0 %v4855_v27  ;;  %v14425_v44 = vpop.permute.xlu0 %5643  ;;  %v5862_v5 = vpop.permute.xlu1 %5861  ;;  %v5598_v27 = vadd.f32 %v14013_v39, %v5547_v38  ;;  %v4858_v39 = vsel %vm3596_vm12, %v4852_v40, 0.0  ;;  %v5476_v38 = vmul.f32 %v14165_v23, %v14165_v23 }
 0x9ef   :  { %15765 = vst [vmem:[#allocation20_spill] sm:$0xff] %v14425_v44 }
 0x9f0   :  { %4240 = vadd.xlane.f32.xlu1 %v4239_v41  ;;  %v4830_v41 = vsel %vm3596_vm12, %v14020_v11, 0.0  ;;  %v5649_v44 = vadd.f32 %v14354_v59, %v5598_v27 }
 0x9f2   :  { %4837 = vadd.xlane.f32.xlu0 %v4836_v60  ;;  %v14434_v25 = vpop.permute.xlu0 %5710  ;;  %v14436_v12 = vpop.permute.xlu1 %5714  ;;  %v4861_v60 = vsel %vm3596_vm12, %v4853_v13, 0.0 }
 0x9f3   :  { %15766 = vst [vmem:[#allocation27_spill] sm:$0xff] %v14434_v25  ;;  %15767 = vst [vmem:[#allocation23_spill] sm:$0xff] %v14436_v12  ;;  %v5724_v12 = vadd.f32 %v5716_v31, %v5649_v44  ;;  %v4854_v44 = vmul.f32 %v14022_v63, %v14022_v63 }
 0x9f4   :  { %4831 = vadd.xlane.f32.xlu1 %v4830_v41  ;;  %v4839_v41 = vsel %vm3596_vm12, %v14022_v63, 0.0 }
 0x9f5   :  { %v5775_v11 = vadd.f32 %v14376_v43, %v5724_v12  ;;  %v6161_v12 = vld [vmem:[%s15510_s12] sm:$0x1] }
 0x9f6   :  { %4862 = vadd.xlane.f32.xlu0 %v4861_v60  ;;  %v5860_v49 = vpop.permute.xlu0 %5859  ;;  %v5866_v25 = vpop.permute.xlu1 %5865 }
 0x9f7   :  { %v5875_v59 = vsel %vm2894_vm6, %v5860_v49, %v5862_v5  ;;  %v5808_v40 = vadd.f32 %v5797_v21, %v5775_v11  ;;  %v5480_v49 = vsel %vm3596_vm12, %v5476_v38, 0.0  ;;  %v6195_v21 = vsub.f32 %v6161_v12, %v14237_v7 }
 0x9f8   :  { %4859 = vadd.xlane.f32.xlu1 %v4858_v39  ;;  %v4864_v39 = vsel %vm3596_vm12, %v4854_v44, 0.0  ;;  %v5461_v38 = vsel %vm3596_vm12, %v14203_v1, 0.0  ;;  %v5455_v7 = vsel %vm3596_vm12, %v14165_v23, 0.0 }
 0x9f9   :  { %v5883_v43 = vadd.f32 %v5875_v59, %v5808_v40  ;;  %v6246_v44 = vsub.f32 %v6195_v21, %v14249_v61  ;;  %v5486_v61 = vsel %vm3596_vm12, %v5478_v51, 0.0 }
 0x9fa   :  { %5459 = vadd.xlane.f32.xlu0 %v5458_v19  ;;  %v14454_v13 = vpop.permute.xlu0 %5712  ;;  %v14456_v27 = vpop.permute.xlu1 %6213  ;;  %v14467_v19 = vld [vmem:[#allocation2 + $0x18] sm:$0xff] }
 0x9fb   :  { %v5548_v11 = vmul.f32 %v14467_v19, %v14423_v15 }
 0x9fc   :  { %4840 = vadd.xlane.f32.xlu1 %v4839_v41 }
 0x9fd   :  { %v5599_v40 = vadd.f32 %v14015_v4, %v5548_v11 }
 0x9fe   :  { %5481 = vadd.xlane.f32.xlu0 %v5480_v49  ;;  %v5864_v5 = vpop.permute.xlu0 %5863  ;;  %v5923_v31 = vpop.permute.xlu1 %5922  ;;  %v6297_v49 = vsub.f32 %v6246_v44, %v14269_v18 }
 0x9ff   :  { %v5934_v60 = vadd.f32 %v5923_v31, %v5883_v43  ;;  %v5477_v43 = vmul.f32 %v14156_v42, %v14156_v42  ;;  %v5717_v31 = vsel %vm2637_vm5, %v14367_v10, %v14393_v28  ;;  %v5650_v4 = vadd.f32 %v14373_v37, %v5599_v40 }
 0xa00   :  { %4865 = vadd.xlane.f32.xlu1 %v4864_v39  ;;  %v6372_v39 = vsub.f32 %v6297_v49, %v14289_v6  ;;  %v5876_v10 = vsel %vm2894_vm6, %v5864_v5, %v5866_v25  ;;  %v5479_v6 = vmul.f32 %v14188_v16, %v14188_v16  ;;  %v6455_v40 = vmul.f32 %v13836_v54, %v15717_v34 }
 0xa01   :  { %v5967_v59 = vadd.f32 %v14413_v56, %v5934_v60  ;;  %v5725_v21 = vadd.f32 %v5717_v31, %v5650_v4  ;;  %v5483_v18 = vsel %vm3596_vm12, %v5477_v43, 0.0  ;;  %v14517_v49 = vstv %s14117_s11  ;;  %s9405_s11 = spop %9404 }
 0xa02   :  { %5462 = vadd.xlane.f32.xlu0 %v5461_v38  ;;  %v14479_v41 = vpop.permute.xlu0 %6211  ;;  %v6423_v28 = vsub.f32 %v6372_v39, %v14279_v55  ;;  %v5489_v25 = vsel %vm3596_vm12, %v5479_v6, 0.0  ;;  %v6257_v31 = vmul.f32 %v14245_v50, %v14081_v24  ;;  %v6256_v4 = vmul.f32 %v14245_v50, %v14006_v36  ;;  %v14553_v50 = vpop.permute.xlu1 %5769 }
 0xa03   :  { %vm5971_vm13 = vcmp.ge.f32.partialorder %v5967_v59, 0.0  ;;  %v5975_v12 = vmul.f32 0.01, %v5967_v59  ;;  %v5776_v38 = vadd.f32 %v14383_v29, %v5725_v21  ;;  %v6315_v39 = vmul.f32 %v14094_v20, %v14081_v24 }
 0xa04   :  { %5456 = vadd.xlane.f32.xlu1 %v5455_v7  ;;  %v6456_v29 = vsub.f32 %v6423_v28, %v6455_v40  ;;  %v14589_v40 = vstv %s14144_s21 }
 0xa05   :  { %v5979_v60 = vsel %vm5971_vm13, %v5967_v59, %v5975_v12  ;;  %v5809_v51 = vadd.f32 %v14415_v32, %v5776_v38  ;;  %v5464_v59 = vsel %vm3596_vm12, %v14188_v16, 0.0  ;;  %v14569_v38 = vstv %s14140_s4 }
 0xa06   :  { %5487 = vadd.xlane.f32.xlu0 %v5486_v61  ;;  %v14492_v11 = vpop.permute.xlu0 %5767  ;;  %8494 = vmatprep.mubr.msk.f32.mxu1 %vm2408_vm4, %v5979_v60  ;;  %v6531_v7 = vsub.f32 %v6456_v29, %v14293_v48  ;;  %v14523_v48 = vld [vmem:[%s15511_s10 + $0x20] sm:$0x1f]  ;;  %v14542_v61 = vstv %s14126_s19  ;;  %v6313_v60 = vmul.f32 %v14094_v20, %v14006_v36  ;;  %v14571_v20 = vpop.permute.xlu1 %6264 }
 0xa07   :  { %v5884_v44 = vadd.f32 %v5876_v10, %v5809_v51  ;;  %15768 = vst [vmem:[#allocation6_spill] sm:$0xff] %v14523_v48  ;;  %v14577_v10 = vld [vmem:[#allocation2] sm:$0xff] }
 0xa08   :  { %5484 = vadd.xlane.f32.xlu1 %v5483_v18  ;;  %v6582_v54 = vsub.f32 %v6531_v7, %v14305_v47  ;;  %v6431_v47 = vmul.f32 %v14517_v49, %v14042_v14  ;;  %v6469_v18 = vmul.f32 %v14542_v61, %v14193_v33  ;;  %v6828_v6 = vmul.f32 %v14577_v10, %v14569_v38 }
 0xa09   :  { %v6879_v29 = vmul.f32 %v14577_v10, %v14589_v40  ;;  %v14614_v7 = vstv %s14151_s28 }
 0xa0a   :  { %v14499_v37 = vpop.permute.xlu0 %6262  ;;  %v6587_v34 = vrot.slane %v6582_v54, %v15733_v30  ;;  %v14582_v51 = vpop.permute.xlu1 %6327 }
 0xa0c   :  { %5465 = vadd.xlane.f32.xlu1 %v5464_v59  ;;  %v6471_v59 = vmul.f32 %v14542_v61, %v14186_v9 }
 0xa0e   :  { %v5925_v55 = vpop.permute.xlu0 %5924 }
 0xa0f   :  { %v5935_v43 = vadd.f32 %v5925_v55, %v5884_v44  ;;  %v14599_v55 = vstv %s14131_s8 }
 0xa10   :  { %5490 = vadd.xlane.f32.xlu1 %v5489_v25 }
 0xa11   :  { %v5968_v5 = vadd.f32 %v14413_v56, %v5935_v43  ;;  %v14603_v43 = vpop.permute.xlu1 %6329 }
 0xa12   :  { %v14560_v21 = vpop.permute.xlu0 %6325 }
 0xa13   :  { %vm5972_vm14 = vcmp.ge.f32.partialorder %v5968_v5, 0.0  ;;  %v5976_v32 = vmul.f32 0.01, %v5968_v5 }
 0xa15   :  { %v5980_v12 = vsel %vm5972_vm14, %v5968_v5, %v5976_v32  ;;  %v6539_v5 = vmul.f32 %v14599_v55, %v14193_v33  ;;  %v14617_v32 = vpop.permute.xlu1 %5802 }
 0xa16   :  { %8495 = vmatmul.mubr.msk.f32.vlgmr.msra.gmra.mrb[80].mxu1 %vm2408_vm4, %v5980_v12  ;;  %v14574_v28 = vpop.permute.xlu0 %5800  ;;  %v6934_v12 = vmul.f32 %v14577_v10, %v14614_v7 }
 0xa17   :  { %9205 = vmatpush3.bf16.msra.mxu1 %v12978_v3 }
 0xa18   :  { %9207 = vmatprep.subr.bf16.mxu1 %v13009_v8 }
 0xa1a   :  { %v14591_v44 = vpop.permute.xlu0 %6331 }
 0xa1b   :  { %9209 = vmatpush3.bf16.msra.mxu1 %v13009_v8 }
 0xa1c   :  { %6589 = vperm.xlu0 %9456, %v6587_v34   ;;  %8508 = vmatprep.subr.msk.mxu1 %vm3507_vm7, %v14523_v48  ;;  %v6880_v34 = vmul.f32 %v14467_v19, %v14589_v40 }
 0xa1e   :  { %v14606_v25 = vpop.permute.xlu0 %5867 }
 0xa1f   :  { %8509 = vmatpush3.msk.msra.mxu1 %vm3507_vm7, %v14523_v48 }
 0xa20   :  { %6439 = vrot.lane.b32.xlu0 %v6431_v47, %s9562_s18  ;;  %9211 = vmatprep.subr.bf16.mxu1 %v12978_v3  ;;  %v14631_v47 = vpop.permute.xlu1 %5869 }
 0xa21   :  { %5926 = vrot.lane.b32.xlu1 %v14072_v45, %s9560_s16  ;;  %v6468_v45 = vmul.f32 %v14542_v61, %v14042_v14 }
 0xa22   :  { %v14622_v54 = vpop.permute.xlu0 %5871 }
 0xa24   :  { %6268 = vrot.lane.b32.xlu0 %v6257_v31, %s9558_s7 }
 0xa25   :  { %6266 = vrot.lane.b32.xlu1 %v6256_v4, %s9558_s7  ;;  %v6786_v4 = vld [vmem:[%s15510_s12] sm:$0x1] }
 0xa26   :  { %v14634_v31 = vpop.permute.xlu0 %6215 }
 0xa27   :  { %15769 = vst [vmem:[#allocation24_spill] sm:$0xff] %v14634_v31 }
 0xa28   :  { %6335 = vrot.lane.b32.xlu0 %v14114_v26, %s9557_s15  ;;  %v6432_v26 = vmul.f32 %v14517_v49, %v14053_v2 }
 0xa29   :  { %5928 = vrot.lane.b32.xlu1 %v14076_v17, %s9560_s16  ;;  %v6470_v17 = vmul.f32 %v14542_v61, %v14053_v2 }
 0xa2c   :  { %6484 = vrot.lane.b32.xlu0 %v6468_v45, %s9559_s5  ;;  %v6935_v45 = vmul.f32 %v14614_v7, %v14042_v14 }
 0xa2d   :  { %6333 = vrot.lane.b32.xlu1 %v6313_v60, %s9557_s15  ;;  %v6820_v60 = vsub.f32 %v6786_v4, %v14302_v58  ;;  %v6830_v58 = vmul.f32 %v14569_v38, %v14006_v36  ;;  %v15774_v36 = vld [vmem:[#allocation17_spill] sm:$0xff] }
 0xa30   :  { %6337 = vrot.lane.b32.xlu0 %v6315_v39, %s9557_s15  ;;  %v14646_v39 = vpop.permute.xlu1 %5873 }
 0xa31   :  { %6441 = vrot.lane.b32.xlu1 %v6432_v26, %s9562_s18  ;;  %v6472_v26 = vmul.f32 %v14542_v61, %v14096_v0 }
 0xa34   :  { %6488 = vrot.lane.b32.xlu0 %v6470_v17, %s9559_s5  ;;  %v6871_v17 = vsub.f32 %v6820_v60, %v14316_v35 }
 0xa35   :  { %6486 = vrot.lane.b32.xlu1 %v6469_v18, %s9559_s5  ;;  %v14652_v18 = vpop.permute.xlu0 %6217 }
 0xa36   :  { %15770 = vst [vmem:[#allocation18_spill] sm:$0xff] %v14652_v18 }
 0xa38   :  { %6836 = vrot.lane.b32.xlu0 %v6828_v6, %s9556_s9  ;;  %v6936_v6 = vmul.f32 %v14467_v19, %v14614_v7 }
 0xa39   :  { %6339 = vrot.lane.b32.xlu1 %v14121_v62, %s9557_s15  ;;  %v6829_v62 = vmul.f32 %v14467_v19, %v14569_v38 }
 0xa3c   :  { %6392 = vrot.lane.b32.xlu0 %v14106_v22, %s9561_s17  ;;  %v6540_v22 = vmul.f32 %v14599_v55, %v14186_v9  ;;  %v6433_v9 = vmul.f32 %v14517_v49, %v14096_v0 }
 0xa3d   :  { %6490 = vrot.lane.b32.xlu1 %v6471_v59, %s9559_s5  ;;  %v6922_v59 = vsub.f32 %v6871_v17, %v14326_v57  ;;  %v6474_v17 = vmul.f32 %v14542_v61, %v14098_v53 }
 0xa40   :  { %6887 = vrot.lane.b32.xlu0 %v6879_v29, %s9558_s7  ;;  %v6434_v29 = vmul.f32 %v14517_v49, %v14098_v53 }
 0xa41   :  { %6838 = vrot.lane.b32.xlu1 %v6829_v62, %s9556_s9  ;;  %v14663_v62 = vpop.permute.xlu1 %6388 }
 0xa44   :  { %6549 = vrot.lane.b32.xlu0 %v6540_v22, %s9560_s16  ;;  %v15771_v22 = vld [vmem:[#allocation12_spill] sm:$0xff] }
 0xa45   :  { %6547 = vrot.lane.b32.xlu1 %v6539_v5, %s9560_s16  ;;  %v6997_v5 = vsub.f32 %v6922_v59, %v15771_v22  ;;  %v6831_v22 = vmul.f32 %v14569_v38, %v14081_v24 }
 0xa47   :  { %v7048_v49 = vsub.f32 %v6997_v5, %v15774_v36  ;;  %v14690_v5 = vstv %s9403_s3 }
 0xa48   :  { %6950 = vrot.lane.b32.xlu0 %v6934_v12, %s9557_s15  ;;  %v15772_v12 = vld [vmem:[#allocation14_spill] sm:$0xff] }
 0xa49   :  { %6394 = vrot.lane.b32.xlu1 %v14110_v52, %s9561_s17  ;;  %v6937_v52 = vmul.f32 %v14614_v7, %v14053_v2  ;;  %v6475_v57 = vmul.f32 %v14542_v61, %v15772_v12 }
 0xa4c   :  { %6443 = vrot.lane.b32.xlu0 %v6433_v9, %s9562_s18  ;;  %v15773_v9 = vld [vmem:[#allocation19_spill] sm:$0xff] }
 0xa4d   :  { %6889 = vrot.lane.b32.xlu1 %v6880_v34, %s9558_s7  ;;  %v6473_v34 = vmul.f32 %v14542_v61, %v15773_v9 }
 0xa50   :  { %6956 = vrot.lane.b32.xlu0 %v6937_v52, %s9557_s15  ;;  %v14674_v52 = vpop.permute.xlu1 %6390 }
 0xa51   :  { %6952 = vrot.lane.b32.xlu1 %v6935_v45, %s9557_s15  ;;  %v15775_v45 = vld [vmem:[#allocation30_spill] sm:$0xff] }
 0xa52   :  { %v7005_v60 = vmul.f32 %v15775_v45, %v14042_v14 }
 0xa54   :  { %6492 = vrot.lane.b32.xlu0 %v6472_v26, %s9559_s5 }
 0xa55   :  { %6954 = vrot.lane.b32.xlu1 %v6936_v6, %s9557_s15  ;;  %v15776_v6 = vld [vmem:[#allocation31_spill] sm:$0xff] }
 0xa56   :  { %v7099_v59 = vsub.f32 %v7048_v49, %v15776_v6  ;;  %v15779_v6 = vld [vmem:[#allocation21_spill] sm:$0xff] }
 0xa57   :  { %v3602_v35 = vpop.xlane.xlu0 %3601 }
 0xa58   :  { %6840 = vrot.lane.b32.xlu0 %v6830_v58, %s9556_s9 }
 0xa59   :  { %6445 = vrot.lane.b32.xlu1 %v6434_v29, %s9562_s18  ;;  %v7006_v29 = vmul.f32 %v15775_v45, %v14053_v2  ;;  %v14698_v45 = vld [vmem:[#allocation2 + $0x30] sm:$0xff] }
 0xa5a   :  { %v6881_v38 = vmul.f32 %v14698_v45, %v14589_v40 }
 0xa5b   :  { %v3624_v4 = vpop.xlane.xlu0 %3623 }
 0xa5c   :  { %6498 = vrot.lane.b32.xlu0 %v6475_v57, %s9559_s5  ;;  %v15777_v57 = vld [vmem:[#allocation29_spill] sm:$0xff] }
 0xa5d   :  { %6494 = vrot.lane.b32.xlu1 %v6473_v34, %s9559_s5  ;;  %v15778_v34 = vld [vmem:[#allocation54_spill] sm:$0xff] }
 0xa5e   :  { %v7155_v36 = vmul.f32 %v15778_v34, %v15777_v57 }
 0xa5f   :  { %v3605_v26 = vpop.xlane.xlu0 %3604 }
 0xa60   :  { %7013 = vrot.lane.b32.xlu0 %v7005_v60, %s9561_s17  ;;  %v7156_v60 = vsub.f32 %v7099_v59, %v7155_v36 }
 0xa61   :  { %6496 = vrot.lane.b32.xlu1 %v6474_v17, %s9559_s5  ;;  %v3599_v58 = vpop.xlane.xlu1 %3598  ;;  %v7453_v17 = vmul.f32 %v14577_v10, %v14690_v5 }
 0xa62   :  { %v3609_v18 = vadd.f32 %v3602_v35, %v3599_v58  ;;  %v7207_v31 = vsub.f32 %v7156_v60, %v15779_v6  ;;  %v6882_v58 = vmul.f32 %v14589_v40, %v14081_v24 }
 0xa63   :  { %v3630_v61 = vpop.xlane.xlu0 %3629 }
 0xa64   :  { %7015 = vrot.lane.b32.xlu0 %v7006_v29, %s9561_s17  ;;  %v3610_v35 = vadd.f32 %v3609_v18, %v3605_v26  ;;  %v6939_v18 = vmul.f32 %v14614_v7, %v14096_v0  ;;  %v6541_v26 = vmul.f32 %v14599_v55, %v15773_v9  ;;  %v6938_v0 = vmul.f32 %v14698_v45, %v14614_v7 }
 0xa65   :  { %6842 = vrot.lane.b32.xlu1 %v6831_v22, %s9556_s9  ;;  %v3627_v49 = vpop.xlane.xlu1 %3626  ;;  %v7212_v22 = vrot.slane %v7207_v31, %v15733_v30 }
 0xa66   :  { %v3634_v57 = vadd.f32 %v3627_v49, %v3624_v4 }
 0xa67   :  { %v4210_v48 = vpop.xlane.xlu0 %4209 }
 0xa68   :  { %7461 = vrot.lane.b32.xlu0 %v7453_v17, %s9556_s9  ;;  %v3635_v8 = vadd.f32 %v3634_v57, %v3630_v61  ;;  %v7454_v61 = vmul.f32 %v14467_v19, %v14690_v5 }
 0xa69   :  { %6891 = vrot.lane.b32.xlu1 %v6881_v38, %s9558_s7  ;;  %v3608_v59 = vpop.xlane.xlu1 %3607 }
 0xa6a   :  { %v3611_v29 = vadd.f32 %v3610_v35, %v3608_v59 }
 0xa6b   :  { %v4232_v34 = vpop.xlane.xlu0 %4231 }
 0xa6c   :  { %v3612_v36 = vrot.slane %v3611_v29, 4  ;;  %6893 = vrot.lane.b32.xlu0 %v6882_v58, %s9558_s7 }
 0xa6d   :  { %7214 = vperm.xlu1 %9457, %v7212_v22   ;;  %v3633_v60 = vpop.xlane.xlu1 %3632 }
 0xa6e   :  { %v3613_v4 = vadd.f32 %v3612_v36, %v3611_v29  ;;  %v3636_v49 = vadd.f32 %v3635_v8, %v3633_v60  ;;  %v6940_v36 = vmul.f32 %v14614_v7, %v14081_v24  ;;  %v15780_v60 = vld [vmem:[#allocation7_spill] sm:$0xff] }
 0xa6f   :  { %v4213_v17 = vpop.xlane.xlu0 %4212  ;;  %v7057_v24 = vmul.f32 %v15780_v60, %v14053_v2  ;;  %v15781_v2 = vld [vmem:[#allocation42_spill] sm:$0xff] }
 0xa70   :  { %v3614_v40 = vrot.slane %v3613_v4, 2  ;;  %v3637_v38 = vrot.slane %v3636_v49, 4  ;;  %6960 = vrot.lane.b32.xlu0 %v6939_v18, %s9557_s15  ;;  %v9584_v18 = vmov 7  }
 0xa71   :  { %6551 = vrot.lane.b32.xlu1 %v6541_v26, %s9560_s16  ;;  %v4207_v31 = vpop.xlane.xlu1 %4206  ;;  %9459 = vset.pattern.permute.xlu0 %v9584_v18 }
 0xa72   :  { %v3615_v6 = vadd.f32 %v3614_v40, %v3613_v4  ;;  %v3638_v57 = vadd.f32 %v3637_v38, %v3636_v49  ;;  %v4217_v9 = vadd.f32 %v4210_v48, %v4207_v31  ;;  %v7056_v4 = vmul.f32 %v15780_v60, %v14042_v14  ;;  %9458 = vset.pattern.permute.xlu1 %v9584_v18 }
 0xa73   :  { %v4238_v8 = vpop.xlane.xlu0 %4237  ;;  %v6542_v14 = vmul.f32 %v14599_v55, %v15772_v12  ;;  %v14739_v55 = vstv %s9405_s11 }
 0xa74   :  { %v3616_v35 = vrot.slane %v3615_v6, 1  ;;  %v3639_v59 = vrot.slane %v3638_v57, 2  ;;  %7463 = vrot.lane.b32.xlu0 %v7454_v61, %s9556_s9  ;;  %v4218_v38 = vadd.f32 %v4217_v9, %v4213_v17  ;;  %v7112_v9 = vmul.f32 %v15781_v2, %v14193_v33 }
 0xa75   :  { %6958 = vrot.lane.b32.xlu1 %v6938_v0, %s9557_s15  ;;  %v4235_v58 = vpop.xlane.xlu1 %4234  ;;  %v7504_v33 = vmul.f32 %v14577_v10, %v14739_v55 }
 0xa76   :  { %v3617_v29 = vadd.f32 %v3616_v35, %v3615_v6  ;;  %v3640_v22 = vadd.f32 %v3639_v59, %v3638_v57  ;;  %v4242_v40 = vadd.f32 %v4235_v58, %v4232_v34 }
 0xa77   :  { %v4835_v49 = vpop.xlane.xlu0 %4834 }
 0xa78   :  { %v14725_v26 = vmul.f32 0.0017361111, %v3617_v29  ;;  %v3641_v48 = vrot.slane %v3640_v22, 1  ;;  %6962 = vrot.lane.b32.xlu0 %v6940_v36, %s9557_s15  ;;  %v4243_v17 = vadd.f32 %v4242_v40, %v4238_v8  ;;  %v6941_v36 = vmul.f32 %v14614_v7, %v14098_v53 }
 0xa79   :  { %7064 = vrot.lane.b32.xlu1 %v7056_v4, %s9562_s18  ;;  %v4216_v31 = vpop.xlane.xlu1 %4215 }
 0xa7a   :  { %v3642_v61 = vadd.f32 %v3641_v48, %v3640_v22  ;;  %v4219_v6 = vadd.f32 %v4218_v38, %v4216_v31  ;;  %v3645_v0 = vmul.f32 %v14725_v26, %v14725_v26  ;;  %v14747_v31 = vld [vmem:[#allocation2 + $0x8] sm:$0xff] }
 0xa7b   :  { %v4857_v57 = vpop.xlane.xlu0 %4856  ;;  %v7111_v53 = vmul.f32 %v14747_v31, %v15781_v2 }
 0xa7c   :  { %v3644_v34 = vmul.f32 0.0017361111, %v3642_v61  ;;  %v4220_v35 = vrot.slane %v4219_v6, 4  ;;  %7066 = vrot.lane.b32.xlu0 %v7057_v24, %s9562_s18 }
 0xa7d   :  { %6553 = vrot.lane.b32.xlu1 %v6542_v14, %s9560_s16  ;;  %v4241_v59 = vpop.xlane.xlu1 %4240 }
 0xa7e   :  { %v3646_v58 = vsub.f32 %v3644_v34, %v3645_v0  ;;  %v4221_v29 = vadd.f32 %v4220_v35, %v4219_v6  ;;  %v4244_v22 = vadd.f32 %v4243_v17, %v4241_v59  ;;  %v7455_v34 = vmul.f32 %v14698_v45, %v14690_v5 }
 0xa7f   :  { %v4838_v12 = vpop.xlane.xlu0 %4837 }
 0xa80   :  { %v3651_v60 = vadd.f32 1e-05, %v3646_v58  ;;  %v4222_v4 = vrot.slane %v4221_v29, 2  ;;  %v4245_v18 = vrot.slane %v4244_v22, 4  ;;  %7129 = vrot.lane.b32.xlu0 %v7112_v9, %s9559_s5 }
 0xa81   :  { %6964 = vrot.lane.b32.xlu1 %v6941_v36, %s9557_s15  ;;  %v4832_v8 = vpop.xlane.xlu1 %4831  ;;  %v14758_v36 = vld [vmem:[#allocation2 + $0x20] sm:$0xff] }
 0xa82   :  { %9500 = vrsqrt.f32 %v3651_v60  ;;  %v4223_v48 = vadd.f32 %v4222_v4, %v4221_v29  ;;  %v4246_v40 = vadd.f32 %v4245_v18, %v4244_v22  ;;  %v4842_v61 = vadd.f32 %v4835_v49, %v4832_v8  ;;  %v15782_v18 = vld [vmem:[#allocation41_spill] sm:$0xff] }
 0xa83   :  { %v4863_v38 = vpop.xlane.xlu0 %4862  ;;  %v7113_v60 = vmul.f32 %v14758_v36, %v15781_v2  ;;  %v3647_v8 = vsub.f32 %v15782_v18, %v14725_v26 }
 0xa84   :  { %v4224_v7 = vrot.slane %v4223_v48, 1  ;;  %v4247_v24 = vrot.slane %v4246_v40, 2  ;;  %7512 = vrot.lane.b32.xlu0 %v7504_v33, %s9558_s7  ;;  %v4843_v58 = vadd.f32 %v4842_v61, %v4838_v12  ;;  %v15783_v33 = vld [vmem:[#allocation56_spill] sm:$0xff] }
 0xa85   :  { %7127 = vrot.lane.b32.xlu1 %v7111_v53, %s9559_s5  ;;  %v4860_v6 = vpop.xlane.xlu1 %4859 }
 0xa86   :  { %v4225_v14 = vadd.f32 %v4224_v7, %v4223_v48  ;;  %v4248_v0 = vadd.f32 %v4247_v24, %v4246_v40  ;;  %v4867_v9 = vadd.f32 %v4860_v6, %v4857_v57  ;;  %v3648_v48 = vsub.f32 %v15783_v33, %v14725_v26  ;;  %v15784_v57 = vld [vmem:[#allocation39_spill] sm:$0xff]  ;;  %v15785_v40 = vld [vmem:[#allocation57_spill] sm:$0xff] }
 0xa87   :  { %v5460_v35 = vpop.xlane.xlu0 %5459  ;;  %v3649_v12 = vsub.f32 %v15784_v57, %v14725_v26  ;;  %v3650_v53 = vsub.f32 %v15785_v40, %v14725_v26 }
 0xa88   :  { %v14755_v17 = vmul.f32 0.0017361111, %v4225_v14  ;;  %v4249_v59 = vrot.slane %v4248_v0, 1  ;;  %v4868_v2 = vadd.f32 %v4867_v9, %v4863_v38 }
 0xa89   :  { %7465 = vrot.lane.b32.xlu1 %v7455_v34, %s9556_s9  ;;  %v4841_v29 = vpop.xlane.xlu1 %4840 }
 0xa8a   :  { %v4250_v49 = vadd.f32 %v4249_v59, %v4248_v0  ;;  %v4844_v22 = vadd.f32 %v4843_v58, %v4841_v29  ;;  %v4253_v24 = vmul.f32 %v14755_v17, %v14755_v17 }
 0xa8b   :  { %v5482_v4 = vpop.xlane.xlu0 %5481 }
 0xa8c   :  { %v9501_v7 = vpop.eup %9500  ;;  %v4252_v61 = vmul.f32 0.0017361111, %v4250_v49  ;;  %v4845_v6 = vrot.slane %v4844_v22, 4 }
 0xa8d   :  { %7131 = vrot.lane.b32.xlu1 %v7113_v60, %s9559_s5  ;;  %v4866_v14 = vpop.xlane.xlu1 %4865  ;;  %v3653_v0 = vmul.f32 %v9501_v7, %v3647_v8  ;;  %v3654_v34 = vmul.f32 %v9501_v7, %v3648_v48  ;;  %v3655_v59 = vmul.f32 %v9501_v7, %v3649_v12  ;;  %v3656_v58 = vmul.f32 %v9501_v7, %v3650_v53  ;;  %v15786_v53 = vld [vmem:[#allocation13_spill] sm:$0xff] }
 0xa8e   :  { %v4254_v29 = vsub.f32 %v4252_v61, %v4253_v24  ;;  %v4846_v18 = vadd.f32 %v4845_v6, %v4844_v22  ;;  %v4869_v33 = vadd.f32 %v4868_v2, %v4866_v14  ;;  %v5549_v48 = vmul.f32 %v14698_v45, %v14423_v15  ;;  %v15787_v61 = vld [vmem:[#allocation27_spill] sm:$0xff]  ;;  %v15788_v6 = vld [vmem:[#allocation37_spill] sm:$0xff] }
 0xa8f   :  { %3657 = vst.msk [vmem:[%s15512_s13] sm:$0xff] %vm3596_vm12, %v3653_v0  ;;  %3658 = vst.msk [vmem:[%s15512_s13 + $0x10] sm:$0xff] %vm3596_vm12, %v3654_v34  ;;  %v5463_v49 = vpop.xlane.xlu0 %5462  ;;  %v5718_v2 = vsel %vm2637_vm5, %v15788_v6, %v15787_v61  ;;  %v15789_v34 = vld [vmem:[#allocation26_spill] sm:$0xff]  ;;  %v15790_v61 = vld [vmem:[#allocation36_spill] sm:$0xff] }
 0xa90   :  { %3659 = vst.msk [vmem:[%s15512_s13 + $0x20] sm:$0xff] %vm3596_vm12, %v3655_v59  ;;  %3660 = vst.msk [vmem:[%s15512_s13 + $0x30] sm:$0xff] %vm3596_vm12, %v3656_v58  ;;  %v4259_v26 = vadd.f32 1e-05, %v4254_v29  ;;  %v4847_v38 = vrot.slane %v4846_v18, 2  ;;  %v4870_v9 = vrot.slane %v4869_v33, 4  ;;  %v5600_v7 = vadd.f32 %v15786_v53, %v5549_v48 }
 0xa91   :  { %v5457_v22 = vpop.xlane.xlu1 %5456 }
 0xa92   :  { %9502 = vrsqrt.f32 %v4259_v26  ;;  %v4848_v60 = vadd.f32 %v4847_v38, %v4846_v18  ;;  %v4871_v8 = vadd.f32 %v4870_v9, %v4869_v33  ;;  %v5467_v40 = vadd.f32 %v5460_v35, %v5457_v22  ;;  %v14798_v38 = vld [vmem:[#allocation2 + $0x48] sm:$0xff] }
 0xa93   :  { %v5651_v59 = vadd.f32 %v15789_v34, %v5600_v7  ;;  %v5488_v58 = vpop.xlane.xlu0 %5487  ;;  %v5550_v35 = vmul.f32 %v14798_v38, %v14423_v15 }
 0xa94   :  { %v4849_v57 = vrot.slane %v4848_v60, 1  ;;  %v4872_v12 = vrot.slane %v4871_v8, 2  ;;  %v5468_v26 = vadd.f32 %v5467_v40, %v5463_v49 }
 0xa95   :  { %v5485_v24 = vpop.xlane.xlu1 %5484  ;;  %v5726_v9 = vadd.f32 %v5718_v2, %v5651_v59 }
 0xa96   :  { %v4850_v14 = vadd.f32 %v4849_v57, %v4848_v60  ;;  %v4873_v0 = vadd.f32 %v4872_v12, %v4871_v8  ;;  %v5492_v33 = vadd.f32 %v5485_v24, %v5482_v4  ;;  %v5601_v60 = vadd.f32 %v15790_v61, %v5550_v35  ;;  %v15791_v12 = vld [vmem:[#allocation51_spill] sm:$0xff]  ;;  %v15794_v61 = vld [vmem:[#allocation20_spill] sm:$0xff] }
 0xa97   :  { %v5777_v8 = vadd.f32 %v14492_v11, %v5726_v9  ;;  %v4256_v7 = vsub.f32 %v15791_v12, %v14755_v17  ;;  %v15792_v4 = vld [vmem:[#allocation11_spill] sm:$0xff]  ;;  %v5877_v11 = vsel %vm2894_vm6, %v14606_v25, %v14631_v47 }
 0xa98   :  { %v14796_v29 = vmul.f32 0.0017361111, %v4850_v14  ;;  %v4874_v18 = vrot.slane %v4873_v0, 1  ;;  %v4255_v49 = vsub.f32 %v15792_v4, %v14755_v17  ;;  %v5493_v2 = vadd.f32 %v5492_v33, %v5488_v58  ;;  %v15793_v14 = vld [vmem:[#allocation23_spill] sm:$0xff] }
 0xa99   :  { %v5466_v22 = vpop.xlane.xlu1 %5465 }
 0xa9a   :  { %v4875_v48 = vadd.f32 %v4874_v18, %v4873_v0  ;;  %v5469_v53 = vadd.f32 %v5468_v26, %v5466_v22  ;;  %v4878_v15 = vmul.f32 %v14796_v29, %v14796_v29  ;;  %v5719_v0 = vsel %vm2637_vm5, %v14454_v13, %v15793_v14  ;;  %v15795_v13 = vld [vmem:[#allocation55_spill] sm:$0xff] }
 0xa9b   :  { %v14804_v57 = vpop.permute.xlu0 %6589  ;;  %v5810_v26 = vadd.f32 %v14574_v28, %v5777_v8  ;;  %v4257_v58 = vsub.f32 %v15795_v13, %v14755_v17 }
 0xa9c   :  { %v9503_v40 = vpop.eup %9502  ;;  %v4877_v24 = vmul.f32 0.0017361111, %v4875_v48  ;;  %v5470_v6 = vrot.slane %v5469_v53, 4  ;;  %v5652_v48 = vadd.f32 %v15794_v61, %v5601_v60 }
 0xa9d   :  { %v5491_v34 = vpop.xlane.xlu1 %5490  ;;  %v4262_v59 = vmul.f32 %v9503_v40, %v4256_v7  ;;  %v4261_v18 = vmul.f32 %v9503_v40, %v4255_v49  ;;  %v5885_v33 = vadd.f32 %v5877_v11, %v5810_v26  ;;  %v4263_v28 = vmul.f32 %v9503_v40, %v4257_v58 }
 0xa9e   :  { %v4879_v35 = vsub.f32 %v4877_v24, %v4878_v15  ;;  %v5471_v9 = vadd.f32 %v5470_v6, %v5469_v53  ;;  %v5494_v22 = vadd.f32 %v5493_v2, %v5491_v34  ;;  %v5727_v4 = vadd.f32 %v5719_v0, %v5652_v48  ;;  %v15796_v24 = vld [vmem:[#allocation40_spill] sm:$0xff] }
 0xa9f   :  { %v14820_v12 = vpop.permute.xlu0 %6439  ;;  %4271 = vrot.lane.b32.xlu1 %v4262_v59, %s9585_s30  ;;  %4269 = vrot.lane.b32.xlu0 %v4261_v18, %s9585_s30  ;;  %v4258_v6 = vsub.f32 %v15796_v24, %v14755_v17  ;;  %v5878_v0 = vsel %vm2894_vm6, %v14622_v54, %v14646_v39 }
 0xaa0   :  { %v4884_v25 = vadd.f32 1e-05, %v4879_v35  ;;  %v5472_v47 = vrot.slane %v5471_v9, 2  ;;  %v5495_v7 = vrot.slane %v5494_v22, 4  ;;  %v5778_v2 = vadd.f32 %v14553_v50, %v5727_v4 }
 0xaa1   :  { %v5927_v49 = vpop.permute.xlu1 %5926  ;;  %v4264_v18 = vmul.f32 %v9503_v40, %v4258_v6  ;;  %v15797_v40 = vld [vmem:[#allocation33_spill] sm:$0xff] }
 0xaa2   :  { %9504 = vrsqrt.f32 %v4884_v25  ;;  %v5473_v53 = vadd.f32 %v5472_v47, %v5471_v9  ;;  %v5496_v8 = vadd.f32 %v5495_v7, %v5494_v22  ;;  %v5936_v15 = vadd.f32 %v5927_v49, %v5885_v33 }
 0xaa3   :  { %v14824_v60 = vpop.permute.xlu0 %6268  ;;  %4273 = vrot.lane.b32.xlu1 %v4263_v28, %s9585_s30  ;;  %v5811_v26 = vadd.f32 %v14617_v32, %v5778_v2  ;;  %v4881_v32 = vsub.f32 %v14018_v46, %v14796_v29  ;;  %v4880_v25 = vsub.f32 %v15797_v40, %v14796_v29  ;;  %v15798_v46 = vld [vmem:[#allocation32_spill] sm:$0xff] }
 0xaa4   :  { %v5474_v14 = vrot.slane %v5473_v53, 1  ;;  %v5497_v11 = vrot.slane %v5496_v8, 2  ;;  %v5969_v34 = vadd.f32 %v14413_v56, %v5936_v15  ;;  %v4882_v2 = vsub.f32 %v15798_v46, %v14796_v29  ;;  %v15799_v46 = vld [vmem:[#allocation52_spill] sm:$0xff] }
 0xaa5   :  { %v14833_v59 = vpop.permute.xlu1 %6266  ;;  %v5886_v17 = vadd.f32 %v5878_v0, %v5811_v26  ;;  %v14856_v0 = vstv %s14078_s26  ;;  %v4883_v26 = vsub.f32 %v14022_v63, %v14796_v29  ;;  %s9407_s26 = spop %9406 }
 0xaa6   :  { %v5475_v35 = vadd.f32 %v5474_v14, %v5473_v53  ;;  %v5498_v9 = vadd.f32 %v5497_v11, %v5496_v8  ;;  %vm5973_vm15 = vcmp.ge.f32.partialorder %v5969_v34, 0.0  ;;  %v5977_v50 = vmul.f32 0.01, %v5969_v34 }
 0xaa7   :  { %v14836_v22 = vpop.permute.xlu0 %6335  ;;  %4275 = vrot.lane.b32.xlu1 %v4264_v18, %s9585_s30 }
 0xaa8   :  { %v14838_v61 = vmul.f32 0.0017361111, %v5475_v35  ;;  %v5499_v48 = vrot.slane %v5498_v9, 1  ;;  %v5981_v13 = vsel %vm5973_vm15, %v5969_v34, %v5977_v50  ;;  %v6173_v50 = vmul.f32 %v14467_v19, %v14856_v0 }
 0xaa9   :  { %v5929_v58 = vpop.permute.xlu1 %5928  ;;  %8497 = vmatprep.mubr.msk.f32.mxu1 %vm2408_vm4, %v5981_v13  ;;  %v6172_v13 = vmul.f32 %v14577_v10, %v14856_v0 }
 0xaaa   :  { %v5500_v33 = vadd.f32 %v5499_v48, %v5498_v9  ;;  %v5937_v54 = vadd.f32 %v5929_v58, %v5886_v17  ;;  %v5503_v7 = vmul.f32 %v14838_v61, %v14838_v61  ;;  %v6224_v48 = vadd.f32 %v14456_v27, %v6173_v50 }
 0xaab   :  { %v6485_v39 = vpop.permute.xlu0 %6484  ;;  %v6342_v58 = vsel %vm2637_vm5, %v14603_v43, %v14591_v44  ;;  %v6223_v63 = vadd.f32 %v14479_v41, %v6172_v13  ;;  %v5506_v27 = vsub.f32 %v14156_v42, %v14838_v61  ;;  %v5505_v40 = vsub.f32 %v14165_v23, %v14838_v61 }
 0xaac   :  { %v9505_v47 = vpop.eup %9504  ;;  %v5502_v4 = vmul.f32 0.0017361111, %v5500_v33  ;;  %v5970_v49 = vadd.f32 %v14413_v56, %v5937_v54  ;;  %v6275_v29 = vadd.f32 %v14571_v20, %v6224_v48  ;;  %v6341_v54 = vsel %vm2637_vm5, %v14560_v21, %v14582_v51 }
 0xaad   :  { %v14848_v28 = vpop.permute.xlu1 %6333  ;;  %v4887_v53 = vmul.f32 %v9505_v47, %v4881_v32  ;;  %v4886_v8 = vmul.f32 %v9505_v47, %v4880_v25  ;;  %v4888_v34 = vmul.f32 %v9505_v47, %v4882_v2  ;;  %v4889_v9 = vmul.f32 %v9505_v47, %v4883_v26 }
 0xaae   :  { %v5504_v15 = vsub.f32 %v5502_v4, %v5503_v7  ;;  %vm5974_vm0 = vcmp.ge.f32.partialorder %v5970_v49, 0.0  ;;  %v5978_v24 = vmul.f32 0.01, %v5970_v49  ;;  %v6274_v44 = vadd.f32 %v14499_v37, %v6223_v63 }
 0xaaf   :  { %v14850_v6 = vpop.permute.xlu0 %6337  ;;  %4896 = vrot.lane.b32.xlu1 %v4887_v53, %s9586_s29  ;;  %4894 = vrot.lane.b32.xlu0 %v4886_v8, %s9586_s29  ;;  %v6350_v43 = vadd.f32 %v6342_v58, %v6275_v29  ;;  %v5507_v42 = vsub.f32 %v14203_v1, %v14838_v61  ;;  %v5508_v1 = vsub.f32 %v14188_v16, %v14838_v61 }
 0xab0   :  { %v5509_v14 = vadd.f32 1e-05, %v5504_v15  ;;  %v5982_v11 = vsel %vm5974_vm0, %v5970_v49, %v5978_v24  ;;  %v6349_v20 = vadd.f32 %v6341_v54, %v6274_v44  ;;  %v7456_v61 = vmul.f32 %v14798_v38, %v14690_v5 }
 0xab1   :  { %8498 = vmatmul.mubr.msk.f32.gmra.mrb[82].mxu1 %vm2408_vm4, %v5982_v11  ;;  %v6442_v56 = vpop.permute.xlu1 %6441  ;;  %v6401_v4 = vadd.f32 %v14674_v52, %v6350_v43  ;;  %v7506_v58 = vmul.f32 %v14698_v45, %v14739_v55 }
 0xab2   :  { %9506 = vrsqrt.f32 %v5509_v14  ;;  %v6400_v23 = vadd.f32 %v14663_v62, %v6349_v20  ;;  %v15803_v20 = vld [vmem:[#allocation49_spill] sm:$0xff] }
 0xab3   :  { %v6489_v18 = vpop.permute.xlu0 %6488  ;;  %4898 = vrot.lane.b32.xlu1 %v4888_v34, %s9586_s29  ;;  %v6452_v37 = vadd.f32 %v6442_v56, %v6401_v4  ;;  %v14904_v56 = vstv %s9407_s26  ;;  %v7411_v4 = vld [vmem:[%s15510_s12] sm:$0x1]  ;;  %s9409_s12 = spop %9408 }
 0xab4   :  { %v6451_v52 = vadd.f32 %v14820_v12, %v6400_v23  ;;  %v7559_v29 = vmul.f32 %v14577_v10, %v14904_v56  ;;  %v15801_v10 = vld [vmem:[#allocation4_spill] sm:$0xff] }
 0xab5   :  { %v6487_v35 = vpop.permute.xlu1 %6486 }
 0xab6   :  { %v6500_v49 = vsel %vm2894_vm6, %v6485_v39, %v6487_v35  ;;  %v7505_v39 = vmul.f32 %v14467_v19, %v14739_v55 }
 0xab7   :  { %v14862_v17 = vpop.permute.xlu0 %6836  ;;  %4900 = vrot.lane.b32.xlu1 %v4889_v9, %s9586_s29  ;;  %v6508_v62 = vadd.f32 %v6500_v49, %v6451_v52  ;;  %v7560_v9 = vmul.f32 %v14747_v31, %v14904_v56  ;;  %v15805_v49 = vld [vmem:[#allocation38_spill] sm:$0xff] }
 0xab8   :  { %v15806_v52 = vld [vmem:[#allocation22_spill] sm:$0xff] }
 0xab9   :  { %v14870_v33 = vpop.permute.xlu1 %6339 }
 0xabb   :  { %v14877_v32 = vpop.permute.xlu0 %6392 }
 0xabc   :  { %v9507_v25 = vpop.eup %9506 }
 0xabd   :  { %v6491_v47 = vpop.permute.xlu1 %6490  ;;  %v5512_v41 = vmul.f32 %v9507_v25, %v5506_v27  ;;  %v5511_v7 = vmul.f32 %v9507_v25, %v5505_v40  ;;  %v5513_v8 = vmul.f32 %v9507_v25, %v5507_v42  ;;  %v5514_v11 = vmul.f32 %v9507_v25, %v5508_v1  ;;  %v15800_v25 = vld [vmem:[#allocation50_spill] sm:$0xff]  ;;  %v15804_v42 = vld [vmem:[#allocation8_spill] sm:$0xff] }
 0xabe   :  { %v6501_v21 = vsel %vm2894_vm6, %v6489_v18, %v6491_v47  ;;  %v7562_v40 = vmul.f32 %v14758_v36, %v14904_v56  ;;  %v7561_v47 = vmul.f32 %v14467_v19, %v14904_v56  ;;  %v7563_v19 = vmul.f32 %v14698_v45, %v14904_v56 }
 0xabf   :  { %v14886_v51 = vpop.permute.xlu0 %6887  ;;  %5521 = vrot.lane.b32.xlu1 %v5512_v41, %s9558_s7  ;;  %5519 = vrot.lane.b32.xlu0 %v5511_v7, %s9558_s7  ;;  %v6509_v15 = vadd.f32 %v6501_v21, %v6452_v37  ;;  %v15802_v41 = vld [vmem:[#allocation6_spill] sm:$0xff]  ;;  %v7445_v23 = vsub.f32 %v7411_v4, %v15804_v42  ;;  %v15014_v42 = vld [vmem:[#allocation2 + $0x50] sm:$0xff] }
 0xac1   :  { %v14894_v53 = vpop.permute.xlu1 %6838 }
 0xac3   :  { %v6550_v24 = vpop.permute.xlu0 %6549  ;;  %5523 = vrot.lane.b32.xlu1 %v5513_v8, %s9558_s7  ;;  %7133 = vrot.lane.b32.xlu0 %v15799_v46, %s9559_s5  ;;  %v7507_v8 = vmul.f32 %v14798_v38, %v14739_v55  ;;  %v15807_v46 = vld [vmem:[#allocation5_spill] sm:$0xff] }
 0xac4   :  { %v6560_v2 = vadd.f32 %v6550_v24, %v6509_v15  ;;  %v7496_v15 = vsub.f32 %v7445_v23, %v15806_v52 }
 0xac5   :  { %v6548_v14 = vpop.permute.xlu1 %6547 }
 0xac6   :  { %v6593_v12 = vadd.f32 %v14804_v57, %v6560_v2  ;;  %v6559_v34 = vadd.f32 %v6548_v14, %v6508_v62  ;;  %v7547_v1 = vsub.f32 %v7496_v15, %v15807_v46  ;;  %v15808_v2 = vld [vmem:[#allocation44_spill] sm:$0xff]  ;;  %v14982_v14 = vld [vmem:[#allocation2 + $0x38] sm:$0xff]  ;;  %v15815_v15 = vld [vmem:[#allocation9_spill] sm:$0xff] }
 0xac7   :  { %v14907_v18 = vpop.permute.xlu0 %6950  ;;  %5525 = vrot.lane.b32.xlu1 %v5514_v11, %s9558_s7  ;;  %7514 = vrot.lane.b32.xlu0 %v7505_v39, %s9558_s7  ;;  %v7564_v55 = vmul.f32 %v14982_v14, %v14904_v56  ;;  %v7565_v11 = vmul.f32 %v14798_v38, %v14904_v56 }
 0xac8   :  { %v6592_v16 = vadd.f32 %v14804_v57, %v6559_v34  ;;  %v6601_v26 = vmul.f32 0.01, %v6593_v12  ;;  %vm6597_vm1 = vcmp.ge.f32.partialorder %v6593_v12, 0.0  ;;  %v15809_v34 = vld [vmem:[#allocation28_spill] sm:$0xff] }
 0xac9   :  { %v14914_v35 = vpop.permute.xlu1 %6394 }
 0xaca   :  { %vm6596_vm2 = vcmp.ge.f32.partialorder %v6592_v16, 0.0  ;;  %v6600_v50 = vmul.f32 0.01, %v6592_v16  ;;  %v6605_v5 = vsel %vm6597_vm1, %v6593_v12, %v6601_v26  ;;  %v7628_v12 = vstv %s9409_s12 }
 0xacb   :  { %v14918_v48 = vpop.permute.xlu0 %6443  ;;  %7467 = vrot.lane.b32.xlu1 %v7456_v61, %s9556_s9  ;;  %7577 = vrot.lane.b32.xlu0 %v7560_v9, %s9557_s15  ;;  %v6174_v26 = vmul.f32 %v14698_v45, %v14856_v0  ;;  %v7630_v9 = vmul.f32 %v14747_v31, %v7628_v12  ;;  %v7631_v52 = vmul.f32 %v14758_v36, %v7628_v12 }
 0xacc   :  { %v6604_v13 = vsel %vm6596_vm2, %v6592_v16, %v6600_v50  ;;  %v7622_v16 = vsub.f32 %v7547_v1, %v15809_v34  ;;  %vm7406_vm2 = vcmask 1032032  }
 0xacd   :  { %8510 = vmatprep.mubr.msk.f32.mxu1 %vm2408_vm4, %v6604_v13  ;;  %v14925_v63 = vpop.permute.xlu1 %6889  ;;  %v15810_v13 = vld [vmem:[#allocation24_spill] sm:$0xff] }
 0xace   :  { %8511 = vmatmul.mubr.msk.f32.vlgmr.msra.gmra.mrb[84].mxu1 %vm2408_vm4, %v6605_v5  ;;  %v15811_v5 = vld [vmem:[#allocation35_spill] sm:$0xff] }
 0xacf   :  { %v14930_v54 = vpop.permute.xlu0 %6956  ;;  %7575 = vrot.lane.b32.xlu1 %v7559_v29, %s9557_s15  ;;  %7516 = vrot.lane.b32.xlu0 %v7506_v58, %s9558_s7  ;;  %v6225_v58 = vadd.f32 %v15810_v13, %v6174_v26  ;;  %v7673_v29 = vsub.f32 %v7622_v16, %v15811_v5  ;;  %v15818_v26 = vld [vmem:[#allocation45_spill] sm:$0xff] }
 0xad0   :  { %9213 = vmatpush3.bf16.msra.mxu1 %v12978_v3 }
 0xad1   :  { %v14935_v27 = vpop.permute.xlu1 %6952  ;;  %9215 = vmatprep.subr.bf16.mxu1 %v15800_v25  ;;  %v6276_v45 = vadd.f32 %v14833_v59, %v6225_v58  ;;  %v15814_v59 = vld [vmem:[#allocation34_spill] sm:$0xff] }
 0xad3   :  { %v6493_v44 = vpop.permute.xlu0 %6492  ;;  %7017 = vrot.lane.b32.xlu1 %v15801_v10, %s9561_s17  ;;  %7581 = vrot.lane.b32.xlu0 %v7562_v40, %s9557_s15  ;;  %v6343_v40 = vsel %vm2637_vm5, %v14848_v28, %v14836_v22  ;;  %v7566_v22 = vmul.f32 %v15014_v42, %v14904_v56 }
 0xad4   :  { %9217 = vmatpush3.bf16.msra.mxu1 %v15800_v25  ;;  %v6351_v28 = vadd.f32 %v6343_v40, %v6276_v45  ;;  %v15821_v40 = vld [vmem:[#allocation16_spill] sm:$0xff]  ;;  %v7632_v45 = vmul.f32 %v14982_v14, %v7628_v12 }
 0xad5   :  { %v14944_v43 = vpop.permute.xlu1 %6954  ;;  %8524 = vmatprep.subr.msk.mxu1 %vm3507_vm7, %v15802_v41 }
 0xad7   :  { %v14950_v7 = vpop.permute.xlu0 %6840  ;;  %7579 = vrot.lane.b32.xlu1 %v7561_v47, %s9557_s15  ;;  %7172 = vrot.lane.b32.xlu0 %v15803_v20, %s9560_s16  ;;  %v15812_v47 = vld [vmem:[#allocation46_spill] sm:$0xff] }
 0xad8   :  { %8525 = vmatpush3.msk.msra.mxu1 %vm3507_vm7, %v15802_v41  ;;  %v15813_v41 = vld [vmem:[#allocation15_spill] sm:$0xff] }
 0xad9   :  { %v14960_v21 = vpop.permute.xlu1 %6445  ;;  %9226 = vmatprep.subr.bf16.mxu1 %v12978_v3  ;;  %v7724_v20 = vsub.f32 %v7673_v29, %v15813_v41  ;;  %v15820_v29 = vld [vmem:[#allocation43_spill] sm:$0xff] }
 0xadb   :  { %v14966_v37 = vpop.permute.xlu0 %6498  ;;  %7019 = vrot.lane.b32.xlu1 %v15805_v49, %s9561_s17  ;;  %7583 = vrot.lane.b32.xlu0 %v7563_v19, %s9557_s15  ;;  %v7799_v46 = vsub.f32 %v7724_v20, %v15815_v15 }
 0xadd   :  { %v6495_v24 = vpop.permute.xlu1 %6494 }
 0xade   :  { %v6502_v1 = vsel %vm2894_vm6, %v6493_v44, %v6495_v24  ;;  %v15819_v24 = vld [vmem:[#allocation18_spill] sm:$0xff] }
 0xadf   :  { %v14975_v62 = vpop.permute.xlu0 %7013  ;;  %7518 = vrot.lane.b32.xlu1 %v7507_v8, %s9558_s7  ;;  %7068 = vrot.lane.b32.xlu0 %v15808_v2, %s9562_s18  ;;  %v6402_v8 = vadd.f32 %v14877_v32, %v6351_v28  ;;  %v6175_v32 = vmul.f32 %v14798_v38, %v14856_v0 }
 0xae1   :  { %v14980_v39 = vpop.permute.xlu1 %6496  ;;  %v6453_v56 = vadd.f32 %v14918_v48, %v6402_v8  ;;  %v6226_v58 = vadd.f32 %v15819_v24, %v6175_v32  ;;  %v6344_v48 = vsel %vm2637_vm5, %v14850_v6, %v14870_v33 }
 0xae2   :  { %v6503_v8 = vsel %vm2894_vm6, %v14980_v39, %v14966_v37 }
 0xae3   :  { %v14989_v61 = vpop.permute.xlu0 %7015  ;;  %7585 = vrot.lane.b32.xlu1 %v7564_v55, %s9557_s15  ;;  %7587 = vrot.lane.b32.xlu0 %v7565_v11, %s9557_s15  ;;  %v15816_v55 = vld [vmem:[#allocation10_spill] sm:$0xff]  ;;  %v15817_v11 = vld [vmem:[#allocation25_spill] sm:$0xff] }
 0xae4   :  { %v7831_v34 = vmul.f32 %v15817_v11, %v15816_v55 }
 0xae5   :  { %v14996_v50 = vpop.permute.xlu1 %6842 }
 0xae6   :  { %v7832_v13 = vsub.f32 %v7799_v46, %v7831_v34 }
 0xae7   :  { %v15003_v10 = vpop.permute.xlu0 %7461  ;;  %7174 = vrot.lane.b32.xlu1 %v15812_v47, %s9560_s16  ;;  %7638 = vrot.lane.b32.xlu0 %v7630_v9, %s9561_s17  ;;  %v6510_v9 = vadd.f32 %v6502_v1, %v6453_v56  ;;  %v6277_v47 = vadd.f32 %v14824_v60, %v6226_v58 }
 0xae9   :  { %v15010_v4 = vpop.f32.mrb[80].mxu1  ;;  %v15012_v19 = vpop.permute.xlu1 %6891  ;;  %v6352_v6 = vadd.f32 %v6344_v48, %v6277_v47 }
 0xaea   :  { %v15018_v23 = vpop.f32.mrb[81].mxu1 }
 0xaeb   :  { %v15020_v49 = vpop.permute.xlu0 %6893  ;;  %7589 = vrot.lane.b32.xlu1 %v7566_v22, %s9557_s15  ;;  %7135 = vrot.lane.b32.xlu0 %v15814_v59, %s9559_s5  ;;  %s9411_s15 = spop %9410  ;;  %v7837_v22 = vrot.slane %v7832_v13, %v15733_v30  ;;  %v6403_v60 = vadd.f32 %v14914_v35, %v6352_v6  ;;  %v7633_v59 = vmul.f32 %v15014_v42, %v7628_v12  ;;  %v15822_v35 = vld [vmem:[#allocation48_spill] sm:$0xff]  ;;  %v9546_v13 = vld [vmem:[#allocation2 + $0x10] sm:$0xff] }
 0xaec   :  { %s9413_s7 = spop %9412  ;;  %v7679_v30 = vstv %s9411_s15 }
 0xaed   :  { %v15029_v2 = vpop.permute.xlu1 %7214  ;;  %v7734_v15 = vstv %s9413_s7  ;;  %v6454_v46 = vadd.f32 %v14960_v21, %v6403_v60  ;;  %v7681_v56 = vmul.f32 %v14747_v31, %v7679_v30  ;;  %v7682_v11 = vmul.f32 %v14758_v36, %v7679_v30  ;;  %s9415_s27 = spop %9414 }
 0xaee   :  { %v7736_v37 = vmul.f32 %v14747_v31, %v7734_v15  ;;  %v7742_v60 = vmul.f32 %v15014_v42, %v7734_v15 }
 0xaef   :  { %v15034_v16 = vpop.permute.xlu0 %6960  ;;  %7070 = vrot.lane.b32.xlu1 %v15818_v26, %s9562_s18  ;;  %7640 = vrot.lane.b32.xlu0 %v7631_v52, %s9561_s17  ;;  %v6511_v12 = vadd.f32 %v6503_v8, %v6454_v46 }
 0xaf1   :  { %v6552_v44 = vpop.permute.xlu1 %6551 }
 0xaf2   :  { %v6561_v5 = vadd.f32 %v6552_v44, %v6510_v9  ;;  %v15823_v9 = vld [vmem:[#allocation53_spill] sm:$0xff]  ;;  %v7737_v44 = vmul.f32 %v9546_v13, %v7734_v15 }
 0xaf3   :  { %7137 = vrot.lane.b32.xlu1 %v15820_v29, %s9559_s5  ;;  %7139 = vrot.lane.b32.xlu0 %v15821_v40, %s9559_s5  ;;  %v15052_v41 = vpop.permute.xlu0 %7463  ;;  %v15824_v29 = vld [vmem:[#allocation47_spill] sm:$0xff]  ;;  %v9547_v40 = vld [vmem:[#allocation2 + $0x28] sm:$0xff] }
 0xaf4   :  { %v6594_v0 = vadd.f32 %v14804_v57, %v6561_v5  ;;  %v7683_v5 = vmul.f32 %v14982_v14, %v7679_v30  ;;  %v7739_v47 = vmul.f32 %v9547_v40, %v7734_v15 }
 0xaf5   :  { %v15054_v20 = vpop.permute.xlu1 %6958 }
 0xaf6   :  { %vm6598_vm3 = vcmp.ge.f32.partialorder %v6594_v0, 0.0  ;;  %v6602_v33 = vmul.f32 0.01, %v6594_v0 }
 0xaf7   :  { %7839 = vperm.xlu1 %9458, %v7837_v22   ;;  %7642 = vrot.lane.b32.xlu0 %v7632_v45, %s9561_s17  ;;  %v15067_v1 = vpop.permute.xlu0 %6962  ;;  %v7740_v45 = vmul.f32 %v14982_v14, %v7734_v15  ;;  %v7684_v22 = vmul.f32 %v15014_v42, %v7679_v30  ;;  %v9548_v14 = vld [vmem:[#allocation2 + $0x40] sm:$0xff]  ;;  %v9549_v42 = vld [vmem:[#allocation2 + $0x58] sm:$0xff] }
 0xaf8   :  { %v6606_v28 = vsel %vm6598_vm3, %v6594_v0, %v6602_v33  ;;  %v7743_v46 = vmul.f32 %v9549_v42, %v7734_v15  ;;  %vm8031_vm3 = vcmask 1048560  }
 0xaf9   :  { %8513 = vmatprep.mubr.msk.f32.mxu1 %vm2408_vm4, %v6606_v28  ;;  %v15064_v52 = vpop.permute.xlu1 %7064  ;;  %v7805_v28 = vstv %s9415_s27  ;;  %s9588_s27 = smov 90  }
 0xafa   :  { %v7807_v8 = vmul.f32 %v9546_v13, %v7805_v28 }
 0xafb   :  { %7644 = vrot.lane.b32.xlu0 %v7633_v59, %s9561_s17  ;;  %7141 = vrot.lane.b32.xlu1 %v15822_v35, %s9559_s5  ;;  %v15078_v34 = vpop.permute.xlu0 %7066  ;;  %v7741_v59 = vmul.f32 %v9548_v14, %v7734_v15  ;;  %v7809_v35 = vmul.f32 %v9548_v14, %v7805_v28 }
 0xafd   :  { %v6554_v55 = vpop.permute.xlu1 %6553 }
 0xafe   :  { %v6562_v39 = vadd.f32 %v6554_v55, %v6511_v12  ;;  %v7810_v55 = vmul.f32 %v9549_v42, %v7805_v28 }
 0xaff   :  { %7752 = vrot.lane.b32.xlu0 %v7736_v37, %s9559_s5  ;;  %7689 = vrot.lane.b32.xlu1 %v7681_v56, %s9562_s18  ;;  %v15089_v58 = vpop.permute.xlu0 %7129  ;;  %v7808_v56 = vmul.f32 %v9547_v40, %v7805_v28 }
 0xb00   :  { %v6595_v21 = vadd.f32 %v14804_v57, %v6562_v39  ;;  %v7738_v57 = vmul.f32 %v14758_v36, %v7734_v15 }
 0xb01   :  { %v15080_v26 = vpop.permute.xlu1 %6964 }
 0xb02   :  { %vm6599_vm8 = vcmp.ge.f32.partialorder %v6595_v21, 0.0  ;;  %v6603_v32 = vmul.f32 0.01, %v6595_v21 }
 0xb03   :  { %7176 = vrot.lane.b32.xlu0 %v15823_v9, %s9560_s16  ;;  %7691 = vrot.lane.b32.xlu1 %v7682_v11, %s9562_s18  ;;  %v15099_v0 = vpop.permute.xlu0 %7512  ;;  %v7420_v9 = vstv %s14679_s0 }
 0xb04   :  { %v6607_v31 = vsel %vm6599_vm8, %v6595_v21, %v6603_v32  ;;  %vm8033_vm8 = vcmask 130048  }
 0xb05   :  { %8514 = vmatmul.mubr.msk.f32.gmra.mrb[86].mxu1 %vm2408_vm4, %v6607_v31  ;;  %v15086_v24 = vpop.permute.xlu1 %7127 }
 0xb07   :  { %7756 = vrot.lane.b32.xlu0 %v7738_v57, %s9559_s5  ;;  %7754 = vrot.lane.b32.xlu1 %v7737_v44, %s9559_s5  ;;  %v9550_v44 = vld [vmem:[#allocation2 + $0x18] sm:$0xff] }
 0xb08   :  { %v7423_v57 = vmul.f32 %v9550_v44, %v7420_v9 }
 0xb09   :  { %v15094_v48 = vpop.permute.xlu1 %7465 }
 0xb0b   :  { %7178 = vrot.lane.b32.xlu0 %v15824_v29, %s9560_s16  ;;  %7693 = vrot.lane.b32.xlu1 %v7683_v5, %s9562_s18  ;;  %v7474_v5 = vadd.f32 %v15052_v41, %v7423_v57  ;;  %v15161_v29 = vstv %s14136_s20 }
 0xb0d   :  { %v15101_v36 = vpop.permute.xlu1 %7131 }
 0xb0f   :  { %7760 = vrot.lane.b32.xlu0 %v7740_v45, %s9559_s5  ;;  %7758 = vrot.lane.b32.xlu1 %v7739_v47, %s9559_s5  ;;  %v6080_v45 = vsel %vm3596_vm12, %v15018_v23, 0.0 }
 0xb11   :  { %v4270_v6 = vpop.permute.xlu0 %4269  ;;  %v4272_v33 = vpop.permute.xlu1 %4271 }
 0xb12   :  { %4282 = vst.msk [vmem:[%s15512_s13] sm:$0xff] %vm4281_vm9, %v4270_v6  ;;  %4283 = vst.msk [vmem:[%s15512_s13 + $0x10] sm:$0xff] %vm4281_vm9, %v4272_v33  ;;  %v9551_v6 = vld [vmem:[#allocation2] sm:$0xff] }
 0xb13   :  { %7764 = vrot.lane.b32.xlu0 %v7742_v60, %s9559_s5  ;;  %7695 = vrot.lane.b32.xlu1 %v7684_v22, %s9562_s18  ;;  %v6797_v33 = vmul.f32 %v9551_v6, %v15161_v29  ;;  %v7425_v60 = vmul.f32 %v14798_v38, %v7420_v9  ;;  %v7422_v41 = vmul.f32 %v9551_v6, %v7420_v9 }
 0xb15   :  { %v4274_v30 = vpop.permute.xlu1 %4273 }
 0xb16   :  { %4284 = vst.msk [vmem:[%s15512_s13 + $0x20] sm:$0xff] %vm4281_vm9, %v4274_v30 }
 0xb17   :  { %7815 = vrot.lane.b32.xlu0 %v7807_v8, %s9560_s16  ;;  %7762 = vrot.lane.b32.xlu1 %v7741_v59, %s9559_s5  ;;  %v6848_v59 = vadd.f32 %v14862_v17, %v6797_v33  ;;  %v15172_v8 = vld [vmem:[#allocation2 + $0x30] sm:$0xff] }
 0xb18   :  { %v7424_v30 = vmul.f32 %v15172_v8, %v7420_v9 }
 0xb19   :  { %v4276_v12 = vpop.permute.xlu1 %4275 }
 0xb1a   :  { %4285 = vst.msk [vmem:[%s15512_s13 + $0x30] sm:$0xff] %vm4281_vm9, %v4276_v12  ;;  %v6899_v12 = vadd.f32 %v14886_v51, %v6848_v59 }
 0xb1b   :  { %7819 = vrot.lane.b32.xlu0 %v7809_v35, %s9560_s16  ;;  %7766 = vrot.lane.b32.xlu1 %v7743_v46, %s9559_s5  ;;  %v6966_v46 = vsel %vm2637_vm5, %v14907_v18, %v14935_v27  ;;  %v7473_v35 = vadd.f32 %v15003_v10, %v7422_v41  ;;  %v7143_v18 = vsel %vm2894_vm6, %v15086_v24, %v15089_v58 }
 0xb1c   :  { %v6974_v17 = vadd.f32 %v6966_v46, %v6899_v12  ;;  %v6101_v10 = vmul.f32 %v15018_v23, %v15018_v23 }
 0xb1e   :  { %v6105_v24 = vsel %vm3596_vm12, %v6101_v10, 0.0 }
 0xb1f   :  { %7817 = vrot.lane.b32.xlu1 %v7808_v56, %s9560_s16  ;;  %v7475_v56 = vadd.f32 %v15094_v48, %v7424_v30 }
 0xb21   :  { %v4895_v37 = vpop.permute.xlu0 %4894  ;;  %v4897_v39 = vpop.permute.xlu1 %4896 }
 0xb22   :  { %4907 = vst.msk [vmem:[%s15512_s13] sm:$0xff] %vm4906_vm10, %v4895_v37  ;;  %4908 = vst.msk [vmem:[%s15512_s13 + $0x10] sm:$0xff] %vm4906_vm10, %v4897_v39 }
 0xb23   :  { %7821 = vrot.lane.b32.xlu1 %v7810_v55, %s9560_s16  ;;  %v7524_v55 = vadd.f32 %v15099_v0, %v7473_v35  ;;  %v6083_v0 = vsel %vm3596_vm12, %v15010_v4, 0.0 }
 0xb25   :  { %v4899_v15 = vpop.permute.xlu1 %4898 }
 0xb26   :  { %4909 = vst.msk [vmem:[%s15512_s13 + $0x20] sm:$0xff] %vm4906_vm10, %v4899_v15 }
 0xb29   :  { %v4901_v21 = vpop.permute.xlu1 %4900 }
 0xb2a   :  { %4910 = vst.msk [vmem:[%s15512_s13 + $0x30] sm:$0xff] %vm4906_vm10, %v4901_v21 }
 0xb31   :  { %v5520_v11 = vpop.permute.xlu0 %5519  ;;  %v5522_v32 = vpop.permute.xlu1 %5521 }
 0xb32   :  { %5532 = vst.msk [vmem:[%s15512_s13] sm:$0xff] %vm5531_vm11, %v5520_v11  ;;  %5533 = vst.msk [vmem:[%s15512_s13 + $0x10] sm:$0xff] %vm5531_vm11, %v5522_v32  ;;  %v7025_v32 = vadd.f32 %v14975_v62, %v6974_v17 }
 0xb34   :  { %v7076_v48 = vadd.f32 %v15064_v52, %v7025_v32  ;;  %v9553_v32 = vld [vmem:[%s15511_s10 + $0x20] sm:$0x1f]  ;;  %s9587_s10 = smov 72  }
 0xb35   :  { %v15153_v31 = vpop.permute.xlu0 %7133  ;;  %v5524_v13 = vpop.permute.xlu1 %5523 }
 0xb36   :  { %5534 = vst.msk [vmem:[%s15512_s13 + $0x20] sm:$0xff] %vm5531_vm11, %v5524_v13  ;;  %v7151_v9 = vadd.f32 %v7143_v18, %v7076_v48  ;;  %v6799_v18 = vmul.f32 %v15172_v8, %v15161_v29 }
 0xb38   :  { %v6850_v48 = vadd.f32 %v14950_v7, %v6799_v18 }
 0xb39   :  { %v7515_v40 = vpop.permute.xlu0 %7514  ;;  %v5526_v47 = vpop.permute.xlu1 %5525 }
 0xb3a   :  { %v7525_v22 = vadd.f32 %v7515_v40, %v7474_v5  ;;  %5535 = vst.msk [vmem:[%s15512_s13 + $0x30] sm:$0xff] %vm5531_vm11, %v5526_v47  ;;  %6081 = vadd.xlane.f32.xlu0 %v6080_v45  ;;  %v6798_v40 = vmul.f32 %v9550_v44, %v15161_v29 }
 0xb3c   :  { %v6849_v6 = vadd.f32 %v14894_v53, %v6798_v40  ;;  %v7144_v53 = vsel %vm2894_vm6, %v15101_v36, %v15153_v31 }
 0xb3d   :  { %v7578_v28 = vpop.permute.xlu0 %7577  ;;  %v7468_v14 = vpop.permute.xlu1 %7467 }
 0xb3e   :  { %v7476_v42 = vadd.f32 %v7468_v14, %v7425_v60  ;;  %v6967_v60 = vsel %vm2637_vm5, %v14944_v43, %v14930_v54  ;;  %v6900_v41 = vadd.f32 %v14925_v63, %v6849_v6 }
 0xb40   :  { %v6975_v44 = vadd.f32 %v6967_v60, %v6900_v41 }
 0xb41   :  { %v7517_v37 = vpop.permute.xlu0 %7516  ;;  %v7576_v39 = vpop.permute.xlu1 %7575 }
 0xb42   :  { %v7526_v15 = vadd.f32 %v7517_v37, %v7475_v56  ;;  %v7591_v21 = vsel %vm2637_vm5, %v7576_v39, %v7578_v28  ;;  %v7026_v30 = vadd.f32 %v14989_v61, %v6975_v44 }
 0xb43   :  { %v15183_v11 = vadd.f32 %v7591_v21, %v7524_v55 }
 0xb44   :  { %v7077_v12 = vadd.f32 %v15078_v34, %v7026_v30 }
 0xb45   :  { %v7582_v27 = vpop.permute.xlu0 %7581  ;;  %v15189_v51 = vpop.permute.xlu1 %7017 }
 0xb46   :  { %v7152_v43 = vadd.f32 %v7144_v53, %v7077_v12 }
 0xb47   :  { %6084 = vadd.xlane.f32.xlu1 %v6083_v0 }
 0xb49   :  { %v7173_v13 = vpop.permute.xlu0 %7172  ;;  %v7580_v57 = vpop.permute.xlu1 %7579 }
 0xb4a   :  { %v7184_v62 = vadd.f32 %v7173_v13, %v7151_v9  ;;  %v7592_v5 = vsel %vm2637_vm5, %v7580_v57, %v7582_v27  ;;  %v6800_v57 = vmul.f32 %v14798_v38, %v15161_v29 }
 0xb4b   :  { %6106 = vadd.xlane.f32.xlu1 %v6105_v24  ;;  %v15198_v58 = vadd.f32 %v7592_v5, %v7525_v22 }
 0xb4c   :  { %v7217_v47 = vadd.f32 %v15029_v2, %v7184_v62  ;;  %v6851_v5 = vadd.f32 %v14996_v50, %v6800_v57 }
 0xb4d   :  { %v7584_v52 = vpop.permute.xlu0 %7583  ;;  %v7020_v45 = vpop.permute.xlu1 %7019 }
 0xb4e   :  { %v7225_v33 = vmul.f32 0.01, %v7217_v47  ;;  %vm7221_vm13 = vcmp.ge.f32.partialorder %v7217_v47, 0.0 }
 0xb50   :  { %v7229_v28 = vsel %vm7221_vm13, %v7217_v47, %v7225_v33 }
 0xb51   :  { %v7069_v14 = vpop.permute.xlu0 %7068  ;;  %8526 = vmatprep.mubr.msk.f32.mxu1 %vm2408_vm4, %v7229_v28  ;;  %v7519_v22 = vpop.permute.xlu1 %7518 }
 0xb52   :  { %v7527_v59 = vadd.f32 %v7519_v22, %v7476_v42 }
 0xb55   :  { %v7588_v46 = vpop.permute.xlu0 %7587  ;;  %v7586_v35 = vpop.permute.xlu1 %7585 }
 0xb56   :  { %v7593_v54 = vsel %vm2637_vm5, %v7584_v52, %v7586_v35 }
 0xb57   :  { %v15214_v63 = vadd.f32 %v7593_v54, %v7526_v15 }
 0xb59   :  { %v7639_v56 = vpop.permute.xlu0 %7638  ;;  %v7175_v55 = vpop.permute.xlu1 %7174 }
 0xb5a   :  { %v7185_v37 = vadd.f32 %v7175_v55, %v7152_v43  ;;  %v7650_v30 = vadd.f32 %v7639_v56, %v15183_v11 }
 0xb5c   :  { %v7218_v42 = vadd.f32 %v15029_v2, %v7185_v37 }
 0xb5d   :  { %v7136_v39 = vpop.permute.xlu0 %7135  ;;  %v7590_v61 = vpop.permute.xlu1 %7589 }
 0xb5e   :  { %vm7222_vm14 = vcmp.ge.f32.partialorder %v7218_v42, 0.0  ;;  %v7226_v17 = vmul.f32 0.01, %v7218_v42  ;;  %v7594_v36 = vsel %vm2637_vm5, %v7588_v46, %v7590_v61 }
 0xb5f   :  { %v15218_v31 = vadd.f32 %v7594_v36, %v7527_v59 }
 0xb60   :  { %v7230_v21 = vsel %vm7222_vm14, %v7218_v42, %v7226_v17 }
 0xb61   :  { %v15220_v34 = vpop.permute.xlu0 %7640  ;;  %8527 = vmatmul.mubr.msk.f32.vlgmr.msra.gmra.mrb[88].mxu1 %vm2408_vm4, %v7230_v21  ;;  %v7071_v27 = vpop.permute.xlu1 %7070 }
 0xb62   :  { %9229 = vmatpush3.bf16.msra.mxu1 %v12978_v3  ;;  %v6968_v3 = vsel %vm2637_vm5, %v15054_v20, %v15034_v16  ;;  %v6969_v16 = vsel %vm2637_vm5, %v15067_v1, %v15080_v26 }
 0xb63   :  { %9227 = vmatprep.subr.bf16.mxu1 %v15800_v25 }
 0xb65   :  { %v7140_v15 = vpop.permute.xlu0 %7139  ;;  %v7138_v13 = vpop.permute.xlu1 %7137 }
 0xb66   :  { %9230 = vmatpush3.bf16.msra.mxu1 %v15800_v25  ;;  %v6901_v25 = vadd.f32 %v15012_v19, %v6850_v48  ;;  %v7145_v62 = vsel %vm2894_vm6, %v7136_v39, %v7138_v13  ;;  %v6902_v19 = vadd.f32 %v15020_v49, %v6851_v5  ;;  %v7651_v48 = vadd.f32 %v15220_v34, %v15198_v58 }
 0xb67   :  { %9228 = vmatprep.subr.msk.mxu1 %vm3507_vm7, %v9553_v32 }
 0xb68   :  { %v6976_v9 = vadd.f32 %v6968_v3, %v6901_v25  ;;  %v6977_v47 = vadd.f32 %v6969_v16, %v6902_v19 }
 0xb69   :  { %v7643_v10 = vpop.permute.xlu0 %7642 }
 0xb6a   :  { %9231 = vmatpush3.msk.msra.mxu1 %vm3507_vm7, %v9553_v32  ;;  %v7027_v8 = vadd.f32 %v15189_v51, %v6976_v9  ;;  %v7028_v38 = vadd.f32 %v7020_v45, %v6977_v47  ;;  %v7652_v21 = vadd.f32 %v7643_v10, %v15214_v63 }
 0xb6c   :  { %v7078_v24 = vadd.f32 %v7069_v14, %v7027_v8  ;;  %v7079_v33 = vadd.f32 %v7071_v27, %v7028_v38 }
 0xb6d   :  { %v15238_v0 = vpop.permute.xlu0 %7644 }
 0xb6e   :  { %v7153_v20 = vadd.f32 %v7145_v62, %v7078_v24  ;;  %v7653_v62 = vadd.f32 %v15238_v0, %v15218_v31 }
 0xb71   :  { %v7753_v7 = vpop.permute.xlu0 %7752 }
 0xb75   :  { %v7177_v40 = vpop.permute.xlu0 %7176 }
 0xb76   :  { %v7186_v52 = vadd.f32 %v7177_v40, %v7153_v20  ;;  %v15249_v6 = vpop.permute.xlu1 %7839 }
 0xb78   :  { %v7219_v29 = vadd.f32 %v15029_v2, %v7186_v52 }
 0xb79   :  { %v7757_v51 = vpop.permute.xlu0 %7756 }
 0xb7a   :  { %v7227_v60 = vmul.f32 0.01, %v7219_v29  ;;  %v7142_v50 = vpop.permute.xlu1 %7141  ;;  %vm7223_vm7 = vcmp.ge.f32.partialorder %v7219_v29, 0.0 }
 0xb7b   :  { %v7146_v41 = vsel %vm2894_vm6, %v7140_v15, %v7142_v50  ;;  %v6102_v50 = vmul.f32 %v15010_v4, %v15010_v4 }
 0xb7c   :  { %v7154_v28 = vadd.f32 %v7146_v41, %v7079_v33  ;;  %v7231_v1 = vsel %vm7223_vm7, %v7219_v29, %v7227_v60 }
 0xb7d   :  { %v7179_v26 = vpop.permute.xlu0 %7178  ;;  %8529 = vmatprep.mubr.msk.f32.mxu1 %vm2408_vm4, %v7231_v1 }
 0xb7e   :  { %v7187_v49 = vadd.f32 %v7179_v26, %v7154_v28  ;;  %v7690_v14 = vpop.permute.xlu1 %7689 }
 0xb7f   :  { %v7701_v54 = vadd.f32 %v7690_v14, %v7650_v30 }
 0xb80   :  { %v7220_v22 = vadd.f32 %v15029_v2, %v7187_v49 }
 0xb81   :  { %v7761_v44 = vpop.permute.xlu0 %7760 }
 0xb82   :  { %v7228_v45 = vmul.f32 0.01, %v7220_v22  ;;  %v7692_v59 = vpop.permute.xlu1 %7691  ;;  %vm7224_vm5 = vcmp.ge.f32.partialorder %v7220_v22, 0.0 }
 0xb83   :  { %v7702_v57 = vadd.f32 %v7692_v59, %v7651_v48 }
 0xb84   :  { %v15256_v53 = vpop.f32.mrb[82].mxu1  ;;  %v7232_v46 = vsel %vm7224_vm5, %v7220_v22, %v7228_v45 }
 0xb85   :  { %v7765_v35 = vpop.permute.xlu0 %7764  ;;  %v15258_v12 = vpop.f32.mrb[83].mxu1  ;;  %8530 = vmatmul.mubr.msk.f32.gmra.mrb[90].mxu1 %vm2408_vm4, %v7232_v46 }
 0xb86   :  { %v7755_v43 = vpop.permute.xlu1 %7754  ;;  %v6086_v41 = vsel %vm3596_vm12, %v15258_v12, 0.0 }
 0xb87   :  { %v7768_v55 = vsel %vm2894_vm6, %v7753_v7, %v7755_v43 }
 0xb88   :  { %v7776_v37 = vadd.f32 %v7768_v55, %v7701_v54  ;;  %v6103_v55 = vmul.f32 %v15258_v12, %v15258_v12 }
 0xb89   :  { %v7816_v2 = vpop.permute.xlu0 %7815 }
 0xb8a   :  { %v7827_v42 = vadd.f32 %v7816_v2, %v7776_v37  ;;  %v7694_v39 = vpop.permute.xlu1 %7693 }
 0xb8b   :  { %v7703_v15 = vadd.f32 %v7694_v39, %v7652_v21 }
 0xb8c   :  { %v7842_v61 = vadd.f32 %v15249_v6, %v7827_v42 }
 0xb8d   :  { %v7820_v3 = vpop.permute.xlu0 %7819 }
 0xb8e   :  { %v7850_v17 = vmul.f32 0.01, %v7842_v61  ;;  %v7759_v11 = vpop.permute.xlu1 %7758  ;;  %vm7846_vm15 = vcmp.ge.f32.partialorder %v7842_v61, 0.0 }
 0xb8f   :  { %v7769_v25 = vsel %vm2894_vm6, %v7757_v51, %v7759_v11  ;;  %v6111_v11 = vsel %vm3596_vm12, %v6103_v55, 0.0 }
 0xb90   :  { %v7854_v56 = vsel %vm7846_vm15, %v7842_v61, %v7850_v17  ;;  %v7777_v63 = vadd.f32 %v7769_v25, %v7702_v57  ;;  %v6104_v57 = vmul.f32 %v15256_v53, %v15256_v53 }
 0xb91   :  { %8542 = vmatprep.mubr.msk.f32.mxu0 %vm2408_vm4, %v7854_v56  ;;  %v6089_v56 = vsel %vm3596_vm12, %v15256_v53, 0.0 }
 0xb92   :  { %v7696_v36 = vpop.permute.xlu1 %7695 }
 0xb93   :  { %v7704_v24 = vadd.f32 %v7696_v36, %v7653_v62 }
 0xb96   :  { %v7763_v32 = vpop.permute.xlu1 %7762 }
 0xb97   :  { %v7770_v18 = vsel %vm2894_vm6, %v7761_v44, %v7763_v32 }
 0xb98   :  { %v7778_v27 = vadd.f32 %v7770_v18, %v7703_v15 }
 0xb9a   :  { %v7829_v9 = vadd.f32 %v7820_v3, %v7778_v27  ;;  %v7767_v13 = vpop.permute.xlu1 %7766 }
 0xb9b   :  { %v7771_v10 = vsel %vm2894_vm6, %v7765_v35, %v7767_v13 }
 0xb9c   :  { %v7844_v8 = vadd.f32 %v15249_v6, %v7829_v9  ;;  %v7779_v20 = vadd.f32 %v7771_v10, %v7704_v24 }
 0xb9e   :  { %v7818_v7 = vpop.permute.xlu1 %7817  ;;  %vm7848_vm0 = vcmp.ge.f32.partialorder %v7844_v8, 0.0  ;;  %v7852_v5 = vmul.f32 0.01, %v7844_v8 }
 0xb9f   :  { %v7828_v16 = vadd.f32 %v7818_v7, %v7777_v63  ;;  %v6114_v7 = vsel %vm3596_vm12, %v6104_v57, 0.0 }
 0xba0   :  { %v7856_v58 = vsel %vm7848_vm0, %v7844_v8, %v7852_v5 }
 0xba1   :  { %v7843_v34 = vadd.f32 %v15249_v6, %v7828_v16  ;;  %v15274_v19 = vpop.f32.mrb[84].mxu1  ;;  %8545 = vmatprep.mubr.msk.f32.mxu1 %vm2408_vm4, %v7856_v58 }
 0xba2   :  { %v15277_v40 = vpop.f32.mrb[85].mxu1  ;;  %v7822_v47 = vpop.permute.xlu1 %7821  ;;  %v6708_v33 = vsel %vm3596_vm12, %v15274_v19, 0.0  ;;  %v6727_v59 = vmul.f32 %v15274_v19, %v15274_v19 }
 0xba3   :  { %vm7847_vm1 = vcmp.ge.f32.partialorder %v7843_v34, 0.0  ;;  %v7851_v31 = vmul.f32 0.01, %v7843_v34  ;;  %v7830_v0 = vadd.f32 %v7822_v47, %v7779_v20  ;;  %v6705_v52 = vsel %vm3596_vm12, %v15277_v40, 0.0 }
 0xba4   :  { %6706 = vadd.xlane.f32.xlu0 %v6705_v52  ;;  %v6726_v49 = vmul.f32 %v15277_v40, %v15277_v40  ;;  %v6733_v46 = vsel %vm3596_vm12, %v6727_v59, 0.0 }
 0xba5   :  { %v7855_v38 = vsel %vm7847_vm1, %v7843_v34, %v7851_v31  ;;  %v7845_v29 = vadd.f32 %v15249_v6, %v7830_v0  ;;  %v6108_v6 = vsel %vm3596_vm12, %v6102_v50, 0.0 }
 0xba6   :  { %8543 = vmatmul.mubr.msk.f32.vlgmr.msra.gmra.mrb[24].mxu0 %vm2408_vm4, %v7855_v38  ;;  %v6730_v45 = vsel %vm3596_vm12, %v6726_v49, 0.0 }
 0xba7   :  { %vm7849_vm6 = vcmp.ge.f32.partialorder %v7845_v29, 0.0  ;;  %v7853_v51 = vmul.f32 0.01, %v7845_v29 }
 0xba8   :  { %6709 = vadd.xlane.f32.xlu0 %v6708_v33 }
 0xba9   :  { %v7857_v60 = vsel %vm7849_vm6, %v7845_v29, %v7853_v51 }
 0xbaa   :  { %8546 = vmatmul.mubr.msk.f32.vlgmr.msra.gmra.mrb[92].mxu1 %vm2408_vm4, %v7857_v60  ;;  %vm6156_vm4 = vcmask 736832  }
 0xbac   :  { %6087 = vadd.xlane.f32.xlu0 %v6086_v41 }
 0xbb0   :  { %6109 = vadd.xlane.f32.xlu0 %v6108_v6 }
 0xbc7   :  { %v6082_v52 = vpop.xlane.xlu0 %6081 }
 0xbd4   :  { %v6085_v29 = vpop.xlane.xlu1 %6084 }
 0xbd8   :  { %v15291_v28 = vpop.f32.mrb[86].mxu1  ;;  %v6107_v33 = vpop.xlane.xlu1 %6106 }
 0xbd9   :  { %v15293_v1 = vpop.f32.mrb[87].mxu1  ;;  %v6714_v32 = vsel %vm3596_vm12, %v15291_v28, 0.0  ;;  %v6729_v62 = vmul.f32 %v15291_v28, %v15291_v28 }
 0xbda   :  { %v6711_v30 = vsel %vm3596_vm12, %v15293_v1, 0.0  ;;  %v6728_v18 = vmul.f32 %v15293_v1, %v15293_v1 }
 0xbdb   :  { %v6739_v24 = vsel %vm3596_vm12, %v6729_v62, 0.0 }
 0xbdc   :  { %v6736_v9 = vsel %vm3596_vm12, %v6728_v18, 0.0 }
 0xc31   :  { %v6707_v38 = vpop.xlane.xlu0 %6706 }
 0xc34   :  { %v15295_v26 = vpop.f32.mrb[88].mxu1 }
 0xc35   :  { %v15299_v14 = vpop.f32.mrb[89].mxu1  ;;  %v7333_v22 = vsel %vm3596_vm12, %v15295_v26, 0.0  ;;  %v7352_v21 = vmul.f32 %v15295_v26, %v15295_v26  ;;  %v6710_v51 = vpop.xlane.xlu0 %6709 }
 0xc36   :  { %7334 = vadd.xlane.f32.xlu0 %v7333_v22  ;;  %v7330_v44 = vsel %vm3596_vm12, %v15299_v14, 0.0  ;;  %v7351_v61 = vmul.f32 %v15299_v14, %v15299_v14 }
 0xc37   :  { %7331 = vadd.xlane.f32.xlu1 %v7330_v44  ;;  %v7358_v27 = vsel %vm3596_vm12, %v7352_v21, 0.0 }
 0xc38   :  { %v7355_v36 = vsel %vm3596_vm12, %v7351_v61, 0.0 }
 0xc39   :  { %v6088_v60 = vpop.xlane.xlu0 %6087 }
 0xc3a   :  { %6731 = vadd.xlane.f32.xlu0 %v6730_v45 }
 0xc3b   :  { %6712 = vadd.xlane.f32.xlu1 %v6711_v30  ;;  %v6092_v30 = vadd.f32 %v6085_v29, %v6082_v52 }
 0xc3d   :  { %v6110_v41 = vpop.xlane.xlu0 %6109  ;;  %v6093_v55 = vadd.f32 %v6092_v30, %v6088_v60 }
 0xc3f   :  { %6734 = vadd.xlane.f32.xlu1 %v6733_v46 }
 0xc58   :  { %v15311_v35 = vpop.f32.mrb[90].mxu1 }
 0xc59   :  { %v15313_v54 = vpop.f32.mrb[91].mxu1  ;;  %v7339_v63 = vsel %vm3596_vm12, %v15311_v35, 0.0  ;;  %v7354_v20 = vmul.f32 %v15311_v35, %v15311_v35 }
 0xc5a   :  { %v7336_v15 = vsel %vm3596_vm12, %v15313_v54, 0.0  ;;  %v7353_v10 = vmul.f32 %v15313_v54, %v15313_v54 }
 0xc5b   :  { %v7364_v0 = vsel %vm3596_vm12, %v7354_v20, 0.0 }
 0xc5c   :  { %v7361_v16 = vsel %vm3596_vm12, %v7353_v10, 0.0 }
 0xc79   :  { %v15315_v43 = vpop.f32.mrb[24].mxu0 }
 0xc7a   :  { %v15319_v37 = vpop.f32.mrb[25].mxu0  ;;  %v7958_v2 = vsel %vm3596_vm12, %v15315_v43, 0.0  ;;  %v7977_v48 = vmul.f32 %v15315_v43, %v15315_v43 }
 0xc7b   :  { %7959 = vadd.xlane.f32.xlu1 %v7958_v2  ;;  %v7955_v42 = vsel %vm3596_vm12, %v15319_v37, 0.0  ;;  %v7976_v25 = vmul.f32 %v15319_v37, %v15319_v37 }
 0xc7c   :  { %7956 = vadd.xlane.f32.xlu0 %v7955_v42  ;;  %v7983_v13 = vsel %vm3596_vm12, %v7977_v48, 0.0 }
 0xc7d   :  { %v15325_v39 = vpop.f32.mrb[92].mxu1  ;;  %v7980_v8 = vsel %vm3596_vm12, %v7976_v25, 0.0 }
 0xc7e   :  { %v15329_v17 = vpop.f32.mrb[93].mxu1  ;;  %v7979_v58 = vmul.f32 %v15325_v39, %v15325_v39  ;;  %v7964_v47 = vsel %vm3596_vm12, %v15325_v39, 0.0 }
 0xc7f   :  { %6112 = vadd.xlane.f32.xlu1 %v6111_v11  ;;  %v7961_v3 = vsel %vm3596_vm12, %v15329_v17, 0.0  ;;  %v7978_v5 = vmul.f32 %v15329_v17, %v15329_v17  ;;  %v6717_v11 = vadd.f32 %v6710_v51, %v6707_v38 }
 0xc80   :  { %6090 = vadd.xlane.f32.xlu0 %v6089_v56  ;;  %v7989_v31 = vsel %vm3596_vm12, %v7979_v58, 0.0 }
 0xc81   :  { %v7986_v34 = vsel %vm3596_vm12, %v7978_v5, 0.0  ;;  %vm6781_vm12 = vcmask 884432  }
 0xc83   :  { %7356 = vadd.xlane.f32.xlu1 %v7355_v36 }
 0xc84   :  { %7337 = vadd.xlane.f32.xlu0 %v7336_v15 }
 0xc87   :  { %6715 = vadd.xlane.f32.xlu1 %v6714_v32 }
 0xc88   :  { %7359 = vadd.xlane.f32.xlu0 %v7358_v27 }
 0xc8b   :  { %7962 = vadd.xlane.f32.xlu1 %v7961_v3 }
 0xc8c   :  { %6737 = vadd.xlane.f32.xlu0 %v6736_v9 }
 0xc8f   :  { %7984 = vadd.xlane.f32.xlu1 %v7983_v13 }
 0xc90   :  { %7981 = vadd.xlane.f32.xlu0 %v7980_v8 }
 0xc93   :  { %7340 = vadd.xlane.f32.xlu1 %v7339_v63  ;;  %v6117_v63 = vadd.f32 %v6110_v41, %v6107_v33 }
 0xc94   :  { %6115 = vadd.xlane.f32.xlu0 %v6114_v7 }
 0xc97   :  { %6740 = vadd.xlane.f32.xlu1 %v6739_v24 }
 0xc98   :  { %7362 = vadd.xlane.f32.xlu0 %v7361_v16 }
 0xc9b   :  { %7987 = vadd.xlane.f32.xlu1 %v7986_v34 }
 0xc9c   :  { %7965 = vadd.xlane.f32.xlu0 %v7964_v47 }
 0xc9f   :  { %7990 = vadd.xlane.f32.xlu1 %v7989_v31 }
 0xca0   :  { %7365 = vadd.xlane.f32.xlu0 %v7364_v0 }
 0xcc3   :  { %v7335_v49 = vpop.xlane.xlu0 %7334 }
 0xcc4   :  { %v7332_v50 = vpop.xlane.xlu1 %7331 }
 0xcc5   :  { %v7342_v8 = vadd.f32 %v7335_v49, %v7332_v50 }
 0xcc7   :  { %v6732_v44 = vpop.xlane.xlu0 %6731 }
 0xcc8   :  { %v6713_v6 = vpop.xlane.xlu1 %6712 }
 0xcc9   :  { %v6718_v36 = vadd.f32 %v6717_v11, %v6713_v6 }
 0xccc   :  { %v6735_v22 = vpop.xlane.xlu1 %6734 }
 0xccd   :  { %v6742_v58 = vadd.f32 %v6735_v22, %v6732_v44 }
 0xd08   :  { %v7960_v45 = vpop.xlane.xlu1 %7959 }
 0xd09   :  { %v7957_v59 = vpop.xlane.xlu0 %7956 }
 0xd0a   :  { %v7967_v49 = vadd.f32 %v7960_v45, %v7957_v59 }
 0xd0c   :  { %v6113_v46 = vpop.xlane.xlu1 %6112 }
 0xd0d   :  { %v6091_v2 = vpop.xlane.xlu0 %6090  ;;  %v6118_v24 = vadd.f32 %v6117_v63, %v6113_v46 }
 0xd0e   :  { %v6094_v42 = vadd.f32 %v6093_v55, %v6091_v2 }
 0xd10   :  { %v7357_v61 = vpop.xlane.xlu1 %7356  ;;  %v6095_v21 = vrot.slane %v6094_v42, 4 }
 0xd11   :  { %v7338_v56 = vpop.xlane.xlu0 %7337 }
 0xd12   :  { %v6096_v27 = vadd.f32 %v6095_v21, %v6094_v42  ;;  %v7343_v7 = vadd.f32 %v7342_v8, %v7338_v56 }
 0xd14   :  { %v6716_v15 = vpop.xlane.xlu1 %6715  ;;  %v6097_v9 = vrot.slane %v6096_v27, 2 }
 0xd15   :  { %v6719_v32 = vadd.f32 %v6718_v36, %v6716_v15  ;;  %v7360_v18 = vpop.xlane.xlu0 %7359 }
 0xd16   :  { %v6098_v10 = vadd.f32 %v6097_v9, %v6096_v27  ;;  %v7367_v36 = vadd.f32 %v7360_v18, %v7357_v61 }
 0xd17   :  { %v6720_v48 = vrot.slane %v6719_v32, 4 }
 0xd18   :  { %v7963_v3 = vpop.xlane.xlu1 %7962  ;;  %v6099_v31 = vrot.slane %v6098_v10, 1 }
 0xd19   :  { %v6738_v25 = vpop.xlane.xlu0 %6737  ;;  %v6721_v13 = vadd.f32 %v6720_v48, %v6719_v32  ;;  %v7968_v46 = vadd.f32 %v7967_v49, %v7963_v3 }
 0xd1a   :  { %v6743_v52 = vadd.f32 %v6742_v58, %v6738_v25  ;;  %v6100_v41 = vadd.f32 %v6099_v31, %v6098_v10 }
 0xd1b   :  { %v6722_v5 = vrot.slane %v6721_v13, 2 }
 0xd1c   :  { %v7985_v57 = vpop.xlane.xlu1 %7984  ;;  %v15375_v32 = vmul.f32 0.0017361111, %v6100_v41 }
 0xd1d   :  { %v7982_v62 = vpop.xlane.xlu0 %7981  ;;  %v6723_v0 = vadd.f32 %v6722_v5, %v6721_v13 }
 0xd1e   :  { %v7992_v42 = vadd.f32 %v7985_v57, %v7982_v62  ;;  %v6128_v61 = vmul.f32 %v15375_v32, %v15375_v32 }
 0xd1f   :  { %v6724_v30 = vrot.slane %v6723_v0, 1 }
 0xd20   :  { %v7341_v16 = vpop.xlane.xlu1 %7340 }
 0xd21   :  { %v7344_v34 = vadd.f32 %v7343_v7, %v7341_v16  ;;  %v6116_v20 = vpop.xlane.xlu0 %6115  ;;  %v6725_v27 = vadd.f32 %v6724_v30, %v6723_v0 }
 0xd22   :  { %v6119_v47 = vadd.f32 %v6118_v24, %v6116_v20 }
 0xd23   :  { %v7345_v38 = vrot.slane %v7344_v34, 4  ;;  %v15377_v5 = vmul.f32 0.0017361111, %v6725_v27 }
 0xd24   :  { %v6120_v29 = vrot.slane %v6119_v47, 4  ;;  %v6741_v51 = vpop.xlane.xlu1 %6740 }
 0xd25   :  { %v7346_v60 = vadd.f32 %v7345_v38, %v7344_v34  ;;  %v6744_v6 = vadd.f32 %v6743_v52, %v6741_v51  ;;  %v7363_v50 = vpop.xlane.xlu0 %7362 }
 0xd26   :  { %v6121_v33 = vadd.f32 %v6120_v29, %v6119_v47  ;;  %v7368_v9 = vadd.f32 %v7367_v36, %v7363_v50  ;;  %v6753_v29 = vmul.f32 %v15377_v5, %v15377_v5 }
 0xd27   :  { %v6745_v55 = vrot.slane %v6744_v6, 4  ;;  %v7347_v2 = vrot.slane %v7346_v60, 2 }
 0xd28   :  { %v6122_v22 = vrot.slane %v6121_v33, 2  ;;  %v7988_v44 = vpop.xlane.xlu1 %7987 }
 0xd29   :  { %v6746_v11 = vadd.f32 %v6745_v55, %v6744_v6  ;;  %v7966_v56 = vpop.xlane.xlu0 %7965  ;;  %v7993_v25 = vadd.f32 %v7992_v42, %v7988_v44  ;;  %v7348_v45 = vadd.f32 %v7347_v2, %v7346_v60 }
 0xd2a   :  { %v6123_v21 = vadd.f32 %v6122_v22, %v6121_v33  ;;  %v7969_v15 = vadd.f32 %v7968_v46, %v7966_v56 }
 0xd2b   :  { %v6747_v48 = vrot.slane %v6746_v11, 2  ;;  %v7349_v16 = vrot.slane %v7348_v45, 1 }
 0xd2c   :  { %v6124_v59 = vrot.slane %v6123_v21, 1  ;;  %v7970_v13 = vrot.slane %v7969_v15, 4  ;;  %v7991_v8 = vpop.xlane.xlu1 %7990 }
 0xd2d   :  { %v6748_v3 = vadd.f32 %v6747_v48, %v6746_v11  ;;  %v7994_v63 = vadd.f32 %v7993_v25, %v7991_v8  ;;  %v7366_v10 = vpop.xlane.xlu0 %7365  ;;  %v7350_v6 = vadd.f32 %v7349_v16, %v7348_v45  ;;  %v6131_v45 = vsub.f32 %v15010_v4, %v15375_v32 }
 0xd2e   :  { %v6125_v7 = vadd.f32 %v6124_v59, %v6123_v21  ;;  %v7971_v57 = vadd.f32 %v7970_v13, %v7969_v15  ;;  %v7369_v62 = vadd.f32 %v7368_v9, %v7366_v10  ;;  %v6130_v59 = vsub.f32 %v15018_v23, %v15375_v32 }
 0xd2f   :  { %v6749_v18 = vrot.slane %v6748_v3, 1  ;;  %v7995_v24 = vrot.slane %v7994_v63, 4  ;;  %v7376_v44 = vmul.f32 0.0017361111, %v7350_v6  ;;  %v6755_v10 = vsub.f32 %v15277_v40, %v15377_v5 }
 0xd30   :  { %v6127_v58 = vmul.f32 0.0017361111, %v6125_v7  ;;  %v7972_v34 = vrot.slane %v7971_v57, 2  ;;  %v7370_v20 = vrot.slane %v7369_v62, 4  ;;  %v6133_v23 = vsub.f32 %v15256_v53, %v15375_v32 }
 0xd31   :  { %v6750_v47 = vadd.f32 %v6749_v18, %v6748_v3  ;;  %v7996_v31 = vadd.f32 %v7995_v24, %v7994_v63  ;;  %v7378_v48 = vmul.f32 %v7376_v44, %v7376_v44  ;;  %v6757_v18 = vsub.f32 %v15293_v1, %v15377_v5 }
 0xd32   :  { %v6129_v0 = vsub.f32 %v6127_v58, %v6128_v61  ;;  %v7973_v52 = vadd.f32 %v7972_v34, %v7971_v57  ;;  %v7371_v38 = vadd.f32 %v7370_v20, %v7369_v62  ;;  %v6132_v57 = vsub.f32 %v15258_v12, %v15375_v32 }
 0xd33   :  { %v6752_v51 = vmul.f32 0.0017361111, %v6750_v47  ;;  %v7997_v60 = vrot.slane %v7996_v31, 2  ;;  %v6756_v12 = vsub.f32 %v15274_v19, %v15377_v5  ;;  %v7380_v16 = vsub.f32 %v15299_v14, %v7376_v44 }
 0xd34   :  { %v6134_v50 = vadd.f32 1e-05, %v6129_v0  ;;  %v7974_v49 = vrot.slane %v7973_v52, 1  ;;  %v7372_v33 = vrot.slane %v7371_v38, 2  ;;  %v6758_v53 = vsub.f32 %v15291_v28, %v15377_v5 }
 0xd35   :  { %v6754_v41 = vsub.f32 %v6752_v51, %v6753_v29  ;;  %v7998_v30 = vadd.f32 %v7997_v60, %v7996_v31  ;;  %v7382_v1 = vsub.f32 %v15313_v54, %v7376_v44  ;;  %v7381_v19 = vsub.f32 %v15295_v26, %v7376_v44 }
 0xd36   :  { %9508 = vrsqrt.f32 %v6134_v50  ;;  %v7975_v55 = vadd.f32 %v7974_v49, %v7973_v52  ;;  %v7373_v46 = vadd.f32 %v7372_v33, %v7371_v38  ;;  %v7383_v28 = vsub.f32 %v15311_v35, %v7376_v44 }
 0xd37   :  { %v6759_v2 = vadd.f32 1e-05, %v6754_v41  ;;  %v7999_v22 = vrot.slane %v7998_v30, 1 }
 0xd38   :  { %v15383_v42 = vmul.f32 0.0017361111, %v7975_v55  ;;  %v7374_v11 = vrot.slane %v7373_v46, 1 }
 0xd39   :  { %9510 = vrsqrt.f32 %v6759_v2  ;;  %v8000_v56 = vadd.f32 %v7999_v22, %v7998_v30 }
 0xd3a   :  { %v7375_v36 = vadd.f32 %v7374_v11, %v7373_v46  ;;  %v8003_v21 = vmul.f32 %v15383_v42, %v15383_v42  ;;  %v8005_v14 = vsub.f32 %v15319_v37, %v15383_v42  ;;  %v8007_v54 = vsub.f32 %v15329_v17, %v15383_v42 }
 0xd3b   :  { %v8002_v15 = vmul.f32 0.0017361111, %v8000_v56  ;;  %v8006_v26 = vsub.f32 %v15315_v43, %v15383_v42  ;;  %v8008_v29 = vsub.f32 %v15325_v39, %v15383_v42 }
 0xd3c   :  { %v7377_v27 = vmul.f32 0.0017361111, %v7375_v36 }
 0xd3d   :  { %v8004_v13 = vsub.f32 %v8002_v15, %v8003_v21 }
 0xd3e   :  { %v7379_v25 = vsub.f32 %v7377_v27, %v7378_v48 }
 0xd3f   :  { %v8009_v4 = vadd.f32 1e-05, %v8004_v13 }
 0xd40   :  { %v9509_v9 = vpop.eup %9508  ;;  %v7384_v8 = vadd.f32 1e-05, %v7379_v25 }
 0xd41   :  { %v6137_v3 = vmul.f32 %v9509_v9, %v6131_v45  ;;  %v6136_v63 = vmul.f32 %v9509_v9, %v6130_v59  ;;  %v6138_v61 = vmul.f32 %v9509_v9, %v6132_v57  ;;  %v6139_v40 = vmul.f32 %v9509_v9, %v6133_v23 }
 0xd42   :  { %9512 = vrsqrt.f32 %v7384_v8 }
 0xd43   :  { %v9511_v7 = vpop.eup %9510  ;;  %6146 = vrot.lane.b32.xlu1 %v6137_v3, %s9587_s10  ;;  %6144 = vrot.lane.b32.xlu0 %v6136_v63, %s9587_s10  ;;  %9514 = vrsqrt.f32 %v8009_v4 }
 0xd44   :  { %v6761_v62 = vmul.f32 %v9511_v7, %v6755_v10  ;;  %v6763_v24 = vmul.f32 %v9511_v7, %v6757_v18  ;;  %v6762_v34 = vmul.f32 %v9511_v7, %v6756_v12  ;;  %v6764_v32 = vmul.f32 %v9511_v7, %v6758_v53 }
 0xd47   :  { %6148 = vrot.lane.b32.xlu1 %v6138_v61, %s9587_s10  ;;  %6769 = vrot.lane.b32.xlu0 %v6761_v62, %s9588_s27 }
 0xd4b   :  { %6150 = vrot.lane.b32.xlu1 %v6139_v40, %s9587_s10  ;;  %6773 = vrot.lane.b32.xlu0 %v6763_v24, %s9588_s27 }
 0xd4c   :  { %v9513_v58 = vpop.eup %9512 }
 0xd4d   :  { %v7386_v20 = vmul.f32 %v9513_v58, %v7380_v16  ;;  %v7388_v47 = vmul.f32 %v9513_v58, %v7382_v1  ;;  %v9515_v31 = vpop.eup %9514  ;;  %v7387_v0 = vmul.f32 %v9513_v58, %v7381_v19  ;;  %v7389_v5 = vmul.f32 %v9513_v58, %v7383_v28 }
 0xd4e   :  { %v8011_v52 = vmul.f32 %v9515_v31, %v8005_v14  ;;  %v8013_v38 = vmul.f32 %v9515_v31, %v8007_v54  ;;  %v8012_v37 = vmul.f32 %v9515_v31, %v8006_v26  ;;  %v8014_v51 = vmul.f32 %v9515_v31, %v8008_v29 }
 0xd4f   :  { %6771 = vrot.lane.b32.xlu1 %v6762_v34, %s9588_s27  ;;  %7394 = vrot.lane.b32.xlu0 %v7386_v20, %s9561_s17 }
 0xd53   :  { %6775 = vrot.lane.b32.xlu1 %v6764_v32, %s9588_s27  ;;  %7398 = vrot.lane.b32.xlu0 %v7388_v47, %s9561_s17 }
 0xd57   :  { %7396 = vrot.lane.b32.xlu1 %v7387_v0, %s9561_s17  ;;  %8019 = vrot.lane.b32.xlu0 %v8011_v52, %s15674_s2 }
 0xd5b   :  { %7400 = vrot.lane.b32.xlu1 %v7389_v5, %s9561_s17  ;;  %8023 = vrot.lane.b32.xlu0 %v8013_v38, %s15674_s2 }
 0xd5f   :  { %8021 = vrot.lane.b32.xlu1 %v8012_v37, %s15674_s2 }
 0xd63   :  { %8025 = vrot.lane.b32.xlu1 %v8014_v51, %s15674_s2 }
 0xdb5   :  { %v6145_v35 = vpop.permute.xlu0 %6144  ;;  %v6147_v17 = vpop.permute.xlu1 %6146 }
 0xdb6   :  { %6157 = vst.msk [vmem:[%s15512_s13] sm:$0xff] %vm6156_vm4, %v6145_v35  ;;  %6158 = vst.msk [vmem:[%s15512_s13 + $0x10] sm:$0xff] %vm6156_vm4, %v6147_v17 }
 0xdb9   :  { %v6770_v43 = vpop.permute.xlu0 %6769  ;;  %v6149_v60 = vpop.permute.xlu1 %6148 }
 0xdba   :  { %6782 = vst.msk [vmem:[%s15512_s13] sm:$0xff] %vm6781_vm12, %v6770_v43 }
 0xdbb   :  { %6159 = vst.msk [vmem:[%s15512_s13 + $0x20] sm:$0xff] %vm6156_vm4, %v6149_v60 }
 0xdbd   :  { %v6774_v39 = vpop.permute.xlu0 %6773  ;;  %v6151_v6 = vpop.permute.xlu1 %6150 }
 0xdbe   :  { %6784 = vst.msk [vmem:[%s15512_s13 + $0x20] sm:$0xff] %vm6781_vm12, %v6774_v39 }
 0xdbf   :  { %6160 = vst.msk [vmem:[%s15512_s13 + $0x30] sm:$0xff] %vm6156_vm4, %v6151_v6 }
 0xdc1   :  { %v7395_v50 = vpop.permute.xlu0 %7394  ;;  %v6772_v49 = vpop.permute.xlu1 %6771 }
 0xdc2   :  { %7407 = vst.msk [vmem:[%s15512_s13] sm:$0xff] %vm7406_vm2, %v7395_v50 }
 0xdc3   :  { %6783 = vst.msk [vmem:[%s15512_s13 + $0x10] sm:$0xff] %vm6781_vm12, %v6772_v49 }
 0xdc5   :  { %v7399_v33 = vpop.permute.xlu0 %7398  ;;  %v6776_v41 = vpop.permute.xlu1 %6775 }
 0xdc6   :  { %7409 = vst.msk [vmem:[%s15512_s13 + $0x20] sm:$0xff] %vm7406_vm2, %v7399_v33 }
 0xdc7   :  { %6785 = vst.msk [vmem:[%s15512_s13 + $0x30] sm:$0xff] %vm6781_vm12, %v6776_v41 }
 0xdc9   :  { %v8020_v30 = vpop.permute.xlu0 %8019  ;;  %v7397_v55 = vpop.permute.xlu1 %7396 }
 0xdca   :  { %8032 = vst.msk [vmem:[%s15512_s13] sm:$0xff] %vm8031_vm3, %v8020_v30 }
 0xdcb   :  { %8034 = vst.msk [vmem:[%s15512_s13 + $0x8] sm:$0xff] %vm8033_vm8, %v8020_v30 }
 0xdcc   :  { %7408 = vst.msk [vmem:[%s15512_s13 + $0x10] sm:$0xff] %vm7406_vm2, %v7397_v55 }
 0xdcd   :  { %v8024_v46 = vpop.permute.xlu0 %8023  ;;  %v7401_v2 = vpop.permute.xlu1 %7400 }
 0xdce   :  { %8037 = vst.msk [vmem:[%s15512_s13 + $0x20] sm:$0xff] %vm8031_vm3, %v8024_v46 }
 0xdcf   :  { %8038 = vst.msk [vmem:[%s15512_s13 + $0x28] sm:$0xff] %vm8033_vm8, %v8024_v46 }
 0xdd0   :  { %7410 = vst.msk [vmem:[%s15512_s13 + $0x30] sm:$0xff] %vm7406_vm2, %v7401_v2 }
 0xdd1   :  { %v8022_v22 = vpop.permute.xlu1 %8021 }
 0xdd2   :  { %8035 = vst.msk [vmem:[%s15512_s13 + $0x10] sm:$0xff] %vm8031_vm3, %v8022_v22 }
 0xdd3   :  { %8036 = vst.msk [vmem:[%s15512_s13 + $0x18] sm:$0xff] %vm8033_vm8, %v8022_v22 }
 0xdd5   :  { %v8026_v44 = vpop.permute.xlu1 %8025 }
 0xdd6   :  { %8039 = vst.msk [vmem:[%s15512_s13 + $0x30] sm:$0xff] %vm8031_vm3, %v8026_v44 }
 0xdd7   :  { %8040 = vst.msk [vmem:[%s15512_s13 + $0x38] sm:$0xff] %vm8033_vm8, %v8026_v44 }

</bundles_post_ra>
